<compile_context>
chip_gen: v5e
topology: v5e:2x2
jax: 0.10.0
libtpu: 0.0.40
codegen_flags: <defaults>
</compile_context>

<pallas_src>
import functools
import math

import jax
import jax.numpy as jnp
import numpy as np
from jax.experimental import pallas as pl
from jax.experimental.pallas import tpu as pltpu


def _layernorm(x, gamma, beta, eps=1e-5):
    mu = jnp.mean(x, axis=-1, keepdims=True)
    var = jnp.mean(jnp.square(x - mu), axis=-1, keepdims=True)
    return (x - mu) * jax.lax.rsqrt(var + eps) * gamma + beta


def _pick_l_chunk(L):
    # bf16 inputs: second-minor block dim must be a multiple of 16, or == L.
    for c in (128, 64, 32, 16):
        if L % c == 0 and L // c >= 2:
            return c
    return L


# ----------------------------- fused kernel ---------------------------------
def fused_utter_encoder_kernel(
        conv_h_ref, emo_h_ref, adj_ref, perm_ref,
        wmap_ref, bmap_ref, wemo_ref, bemo_ref,
        wem_ref, bem_ref, wo_ref,
        g1_ref, be1_ref, w1_ref, b1_ref, w2_ref, b2_ref,
        g2_ref, be2_ref,
        out_ref,
        cmax_ref, emax_ref,
        *, nhead):
    l = pl.program_id(0)
    n_l = pl.num_programs(0)
    f32 = jnp.float32

    # ---- 1) streamed token max-pool (every grid step, overlapped with DMA) ----
    cmax = jnp.max(conv_h_ref[...], axis=1)            # (B*S, T) bf16
    emax = jnp.max(emo_h_ref[...], axis=1)             # (B*S, T) bf16

    @pl.when(l == 0)
    def _init():
        cmax_ref[...] = cmax
        emax_ref[...] = emax

    @pl.when(l > 0)
    def _accumulate():
        cmax_ref[...] = jnp.maximum(cmax_ref[...], cmax)
        emax_ref[...] = jnp.maximum(emax_ref[...], emax)

    # ---- 2) mapping + attention + epilogue, only once pooling is complete ----
    @pl.when(l == n_l - 1)
    def _epilogue():
        B, S, _ = adj_ref.shape
        U = wo_ref.shape[0]
        hd = U // nhead
        scaling = float(hd) ** (-0.5)

        # mapping / emotion_lin (bf16 inputs & weights, f32 accumulation)
        mapped = jnp.dot(cmax_ref[...], wmap_ref[...],
                         preferred_element_type=f32) + bmap_ref[...]    # (B*S, U)
        emo = jnp.dot(emax_ref[...], wemo_ref[...],
                      preferred_element_type=f32) + bemo_ref[...]       # (B*S, E)
        # emotion_mapping(cat(mapped, emo)) as a single K=U+E matmul
        utter = jnp.dot(jnp.concatenate([mapped, emo], axis=-1), wem_ref[...],
                        preferred_element_type=f32) + bem_ref[...]      # (B*S, U)

        # masked multi-head self-attention, heads batched per conversation
        attn_rows = []
        for b in range(B):
            xb = utter[b * S:(b + 1) * S, :]                            # (S, U)
            xh = jnp.stack([xb[:, h * hd:(h + 1) * hd]
                            for h in range(nhead)], axis=0)             # (H, S, hd)
            scores = jnp.einsum('hsd,htd->hst', xh, xh,
                                preferred_element_type=f32) * scaling   # (H, S, S)
            scores = scores - (1.0 - adj_ref[b][None, :, :]) * 1e30     # mask_logic
            m = jnp.max(scores, axis=-1, keepdims=True)
            e = jnp.exp(scores - m)
            p = e * pl.reciprocal(jnp.sum(e, axis=-1, keepdims=True),
                                  approx=True)                          # softmax(dim=2)
            pv = jnp.einsum('hst,htd->hsd', p, xh,
                            preferred_element_type=f32)                 # (H, S, hd)
            attn_rows.append(jnp.concatenate([pv[h] for h in range(nhead)],
                                             axis=-1))                  # (S, U)
        attn_nat = jnp.concatenate(attn_rows, axis=0)                   # (B*S, U), row=b*S+s

        # torch's transpose(0,1).view(bsz, slen, -1) row scramble as a tiny
        # permutation matmul (no scatter stores, no VMEM scratch round-trip)
        attn_scr = jnp.dot(perm_ref[...], attn_nat, preferred_element_type=f32)

        # o_proj + residual + LayerNorm + MLP(+residual) + LayerNorm
        x2 = jnp.dot(attn_scr, wo_ref[...], preferred_element_type=f32)
        ss = _layernorm(utter + x2, g1_ref[...], be1_ref[...])          # self.norm
        hmid = jnp.maximum(jnp.dot(ss, w1_ref[...], preferred_element_type=f32)
                           + b1_ref[...], 0.0)                          # relu(linear1)
        lo = jnp.dot(hmid, w2_ref[...], preferred_element_type=f32) + b2_ref[...]
        out_ref[...] = _layernorm(lo + ss, g2_ref[...], be2_ref[...])   # mlp.norm


# ----------------------------- wrapper ---------------------------------------
def utter_encoder_forward(conv_hidden, emo_hidden, adj, params, nhead, l_chunk=None):
    B, S, L, T = conv_hidden.shape
    U = params["w_map_t"].shape[1]
    E = params["w_emo_t"].shape[1]
    FF = params["w1_t"].shape[1]
    BS = B * S
    hd = U // nhead
    bf16, f32 = jnp.bfloat16, jnp.float32

    if l_chunk is None:
        l_chunk = _pick_l_chunk(L)
    assert L % l_chunk == 0

    conv_flat = conv_hidden.reshape(BS, L, T).astype(bf16)
    emo_flat = emo_hidden.reshape(BS, L, T).astype(bf16)
    adj_f = adj.astype(f32)

    # permutation matrix reproducing the torch row scramble: scrambled row r
    # holds the head-merged attention output of (batch r % B, seq r // B).
    r = np.arange(BS)
    perm_np = np.zeros((BS, BS), np.float32)
    perm_np[r, (r % B) * S + (r // B)] = 1.0
    perm = jnp.asarray(perm_np)

    # emotion_mapping weight pre-stacked to (U+E, U) for one K=U+E matmul
    w_em = jnp.concatenate([params["w_em_u_t"], params["w_em_e_t"]], axis=0).astype(f32)

    def full_spec(shape):
        nd = len(shape)
        return pl.BlockSpec(shape, lambda l, _nd=nd: (0,) * _nd)

    # ---- VMEM budget / cost estimate ----
    chunk_bytes = BS * l_chunk * T * 2
    weight_bytes = (T * (U + E)) * 2 + ((U + E) * U + U * U + 2 * U * FF + BS * BS) * 4
    est_vmem = (2 * 2 * chunk_bytes      # conv+emo chunks, double-buffered
                + 2 * BS * T * 2         # running-max scratches
                + 2 * weight_bytes       # params (conservatively doubled)
                + 2 * BS * U * 4         # resident output block
                + (1 << 20))             # slack
    vmem_limit = int(min(64 * 2 ** 20, max(32 * 2 ** 20, 2 * est_vmem)))

    flops = (2 * BS * T * (U + E) + 2 * BS * (U + E) * U
             + 4 * B * nhead * S * S * hd + 2 * BS * BS * U
             + 2 * BS * U * U + 4 * BS * U * FF)
    transcendentals = B * nhead * S * S + 2 * BS
    bytes_accessed = (2 * BS * L * T * 2 + weight_bytes
                      + B * S * S * 4 + BS * U * 4 + (8 * U + E + FF) * 4)

    out_flat = pl.pallas_call(
        functools.partial(fused_utter_encoder_kernel, nhead=nhead),
        out_shape=jax.ShapeDtypeStruct((BS, U), f32),
        grid=(L // l_chunk,),
        in_specs=[
            pl.BlockSpec((BS, l_chunk, T), lambda l: (0, l, 0)),   # conv hidden (bf16)
            pl.BlockSpec((BS, l_chunk, T), lambda l: (0, l, 0)),   # emo hidden (bf16)
            full_spec((B, S, S)),                                  # adj
            full_spec((BS, BS)),                                   # permutation matrix
            full_spec((T, U)), full_spec((1, U)),                  # mapping
            full_spec((T, E)), full_spec((1, E)),                  # emotion_lin
            full_spec((U + E, U)), full_spec((1, U)),              # emotion_mapping
            full_spec((U, U)),                                     # o_proj
            full_spec((1, U)), full_spec((1, U)),                  # norm
            full_spec((U, FF)), full_spec((1, FF)),                # mlp.linear1
            full_spec((FF, U)), full_spec((1, U)),                 # mlp.linear2
            full_spec((1, U)), full_spec((1, U)),                  # mlp.norm
        ],
        out_specs=pl.BlockSpec((BS, U), lambda l: (0, 0)),
        scratch_shapes=[pltpu.VMEM((BS, T), bf16),                 # running max (conv)
                        pltpu.VMEM((BS, T), bf16)],                # running max (emo)
        compiler_params=pltpu.CompilerParams(
            dimension_semantics=("arbitrary",),
            vmem_limit_bytes=vmem_limit),
        cost_estimate=pl.CostEstimate(flops=int(flops),
                                      transcendentals=int(transcendentals),
                                      bytes_accessed=int(bytes_accessed)),
    )(conv_flat, emo_flat, adj_f, perm,
      params["w_map_t"].astype(bf16), params["b_map"],
      params["w_emo_t"].astype(bf16), params["b_emo"],
      w_em, params["b_em"],
      params["w_o_t"],
      params["norm_g"], params["norm_b"],
      params["w1_t"], params["b1"],
      params["w2_t"], params["b2"],
      params["mlp_norm_g"], params["mlp_norm_b"])

    return out_flat.reshape(B, S, U)


# ----------------------------- reference (pure JAX) --------------------------
def reference_forward(conv_hidden, emo_hidden, adj, p, nhead):
    B, S, L, T = conv_hidden.shape
    U = p["w_map_t"].shape[1]
    hd = U // nhead
    pooled = conv_hidden.max(axis=2)
    emo_pooled = emo_hidden.max(axis=2)
    mapped = pooled @ p["w_map_t"] + p["b_map"]
    emo = emo_pooled @ p["w_emo_t"] + p["b_emo"]
    utter = mapped @ p["w_em_u_t"] + emo @ p["w_em_e_t"] + p["b_em"]
    xh = utter.reshape(B, S, nhead, hd).transpose(0, 2, 1, 3).reshape(B * nhead, S, hd)
    adjh = jnp.repeat(adj, nhead, axis=0)
    scores = jnp.einsum("nsd,ntd->nst", xh, xh) * (float(hd) ** -0.5)
    scores = scores - (1.0 - adjh) * 1e30
    pw = jax.nn.softmax(scores, axis=-1)
    attn = jnp.einsum("nst,ntd->nsd", pw, xh)
    attn = jnp.transpose(attn, (1, 0, 2)).reshape(B, S, U)
    x2 = attn @ p["w_o_t"]

    def ln(x, g, b, eps=1e-5):
        mu = x.mean(-1, keepdims=True)
        var = ((x - mu) ** 2).mean(-1, keepdims=True)
        return (x - mu) * jax.lax.rsqrt(var + eps) * g + b

    ss = ln(utter + x2, p["norm_g"], p["norm_b"])
    h = jax.nn.relu(ss @ p["w1_t"] + p["b1"])
    lo = h @ p["w2_t"] + p["b2"]
    return ln(lo + ss, p["mlp_norm_g"], p["mlp_norm_b"])


# ----------------------------- param init ------------------------------------
def init_params(key, token_dim, utter_dim, emotion_dim, ff_dim):
    ks = jax.random.split(key, 16)
    f32 = jnp.float32

    def lin(k, fan_in, shape):
        bound = 1.0 / math.sqrt(fan_in)
        return jax.random.uniform(k, shape, f32, -bound, bound)

    def xavier(k, shape):
        bound = math.sqrt(6.0 / (shape[0] + shape[1]))
        return jax.random.uniform(k, shape, f32, -bound, bound)

    U, E, T, FF = utter_dim, emotion_dim, token_dim, ff_dim
    # weights stored already transposed to (in, out) for the kernel
    return {
        "w_map_t": lin(ks[0], T, (T, U)), "b_map": lin(ks[1], T, (1, U)),
        "w_emo_t": lin(ks[2], T, (T, E)), "b_emo": lin(ks[3], T, (1, E)),
        "w_em_u_t": lin(ks[4], U + E, (U, U)),
        "w_em_e_t": lin(ks[5], U + E, (E, U)),
        "b_em": lin(ks[6], U + E, (1, U)),
        # q/k/v proj weights exist in the module but are unused in forward
        "w_o_t": xavier(ks[7], (U, U)),
        "norm_g": jnp.ones((1, U), f32), "norm_b": jnp.zeros((1, U), f32),
        "w1_t": lin(ks[8], U, (U, FF)), "b1": lin(ks[9], U, (1, FF)),
        "w2_t": lin(ks[10], FF, (FF, U)), "b2": lin(ks[11], FF, (1, U)),
        "mlp_norm_g": jnp.ones((1, U), f32), "mlp_norm_b": jnp.zeros((1, U), f32),
    }


# ----------------------------- main -------------------------------------------
if __name__ == "__main__":
    B, S, L = 2, 8, 32           # conversations, max utterances, tokens per utterance
    TOKEN_DIM = 768              # roberta-base hidden size (hardcoded in the module)
    UTTER_DIM, EMOTION_DIM, FF_DIM, NHEAD = 128, 64, 256, 4

    key = jax.random.PRNGKey(0)
    k_c, k_e, k_a, k_p = jax.random.split(key, 4)

    conv_hidden = jax.random.normal(k_c, (B, S, L, TOKEN_DIM), jnp.float32)
    emo_hidden = jax.random.normal(k_e, (B, S, L, TOKEN_DIM), jnp.float32)
    adj = (jax.random.uniform(k_a, (B, S, S)) < 0.5).astype(jnp.float32)
    adj = jnp.maximum(adj, jnp.eye(S, dtype=jnp.float32)[None])   # diagonal always attended

    params = init_params(k_p, TOKEN_DIM, UTTER_DIM, EMOTION_DIM, FF_DIM)

    # pre-round the tensors the kernel streams in bf16 so the f32 reference sees
    # identical values (the kernel-side bf16 casts are then lossless)
    conv_hidden = conv_hidden.astype(jnp.bfloat16).astype(jnp.float32)
    emo_hidden = emo_hidden.astype(jnp.bfloat16).astype(jnp.float32)
    params["w_map_t"] = params["w_map_t"].astype(jnp.bfloat16).astype(jnp.float32)
    params["w_emo_t"] = params["w_emo_t"].astype(jnp.bfloat16).astype(jnp.float32)

    out = utter_encoder_forward(conv_hidden, emo_hidden, adj, params, NHEAD)
    out = jax.block_until_ready(out)

    ref = reference_forward(conv_hidden, emo_hidden, adj, params, NHEAD)
    np.testing.assert_allclose(np.asarray(out), np.asarray(ref), rtol=1e-2, atol=1e-2)

    print("KERNEL_OK")
</pallas_src>

<mosaic_0001>
module attributes {stable_mosaic.version = 11 : i64} {
  func.func @fused_utter_encoder_kernel(%arg0: i32, %arg1: memref<16x16x768xbf16, #tpu.memory_space<vmem>>, %arg2: memref<16x16x768xbf16, #tpu.memory_space<vmem>>, %arg3: memref<2x8x8xf32, #tpu.memory_space<vmem>>, %arg4: memref<16x16xf32, #tpu.memory_space<vmem>>, %arg5: memref<768x128xbf16, #tpu.memory_space<vmem>>, %arg6: memref<1x128xf32, #tpu.memory_space<vmem>>, %arg7: memref<768x64xbf16, #tpu.memory_space<vmem>>, %arg8: memref<1x64xf32, #tpu.memory_space<vmem>>, %arg9: memref<192x128xf32, #tpu.memory_space<vmem>>, %arg10: memref<1x128xf32, #tpu.memory_space<vmem>>, %arg11: memref<128x128xf32, #tpu.memory_space<vmem>>, %arg12: memref<1x128xf32, #tpu.memory_space<vmem>>, %arg13: memref<1x128xf32, #tpu.memory_space<vmem>>, %arg14: memref<128x256xf32, #tpu.memory_space<vmem>>, %arg15: memref<1x256xf32, #tpu.memory_space<vmem>>, %arg16: memref<256x128xf32, #tpu.memory_space<vmem>>, %arg17: memref<1x128xf32, #tpu.memory_space<vmem>>, %arg18: memref<1x128xf32, #tpu.memory_space<vmem>>, %arg19: memref<1x128xf32, #tpu.memory_space<vmem>>, %arg20: memref<16x128xf32, #tpu.memory_space<vmem>>, %arg21: memref<16x768xbf16, #tpu.memory_space<vmem>>, %arg22: memref<16x768xbf16, #tpu.memory_space<vmem>>) attributes {dimension_semantics = [#tpu.dimension_semantics<arbitrary>], iteration_bounds = array<i64: 2>, scalar_prefetch = 0 : i64, scratch_operands = 2 : i64, tpu.core_type = #tpu.core_type<tc>, window_params = [{transform_indices = @transform_0, window_bounds = array<i64: 16, 16, 768>}, {transform_indices = @transform_1, window_bounds = array<i64: 16, 16, 768>}, {pipeline_mode = #tpu.pipeline_mode<synchronous>, transform_indices = @transform_2, window_bounds = array<i64: 2, 8, 8>}, {pipeline_mode = #tpu.pipeline_mode<synchronous>, transform_indices = @transform_3, window_bounds = array<i64: 16, 16>}, {pipeline_mode = #tpu.pipeline_mode<synchronous>, transform_indices = @transform_4, window_bounds = array<i64: 768, 128>}, {pipeline_mode = #tpu.pipeline_mode<synchronous>, transform_indices = @transform_5, window_bounds = array<i64: 1, 128>}, {pipeline_mode = #tpu.pipeline_mode<synchronous>, transform_indices = @transform_6, window_bounds = array<i64: 768, 64>}, {pipeline_mode = #tpu.pipeline_mode<synchronous>, transform_indices = @transform_7, window_bounds = array<i64: 1, 64>}, {pipeline_mode = #tpu.pipeline_mode<synchronous>, transform_indices = @transform_8, window_bounds = array<i64: 192, 128>}, {pipeline_mode = #tpu.pipeline_mode<synchronous>, transform_indices = @transform_9, window_bounds = array<i64: 1, 128>}, {pipeline_mode = #tpu.pipeline_mode<synchronous>, transform_indices = @transform_10, window_bounds = array<i64: 128, 128>}, {pipeline_mode = #tpu.pipeline_mode<synchronous>, transform_indices = @transform_11, window_bounds = array<i64: 1, 128>}, {pipeline_mode = #tpu.pipeline_mode<synchronous>, transform_indices = @transform_12, window_bounds = array<i64: 1, 128>}, {pipeline_mode = #tpu.pipeline_mode<synchronous>, transform_indices = @transform_13, window_bounds = array<i64: 128, 256>}, {pipeline_mode = #tpu.pipeline_mode<synchronous>, transform_indices = @transform_14, window_bounds = array<i64: 1, 256>}, {pipeline_mode = #tpu.pipeline_mode<synchronous>, transform_indices = @transform_15, window_bounds = array<i64: 256, 128>}, {pipeline_mode = #tpu.pipeline_mode<synchronous>, transform_indices = @transform_16, window_bounds = array<i64: 1, 128>}, {pipeline_mode = #tpu.pipeline_mode<synchronous>, transform_indices = @transform_17, window_bounds = array<i64: 1, 128>}, {pipeline_mode = #tpu.pipeline_mode<synchronous>, transform_indices = @transform_18, window_bounds = array<i64: 1, 128>}, {pipeline_mode = #tpu.pipeline_mode<synchronous>, transform_indices = @transform_19, window_bounds = array<i64: 16, 128>}]} {
    %c0 = arith.constant 0 : index
    %c0_0 = arith.constant 0 : index
    %c0_1 = arith.constant 0 : index
    %0 = vector.load %arg1[%c0, %c0_0, %c0_1] : memref<16x16x768xbf16, #tpu.memory_space<vmem>>, vector<16x16x768xbf16>
    %cst = arith.constant dense<0xFF80> : vector<16x768xbf16>
    %1 = vector.multi_reduction <maximumf>, %0, %cst [1] : vector<16x16x768xbf16> to vector<16x768xbf16>
    %c0_2 = arith.constant 0 : index
    %c0_3 = arith.constant 0 : index
    %c0_4 = arith.constant 0 : index
    %2 = vector.load %arg2[%c0_2, %c0_3, %c0_4] : memref<16x16x768xbf16, #tpu.memory_space<vmem>>, vector<16x16x768xbf16>
    %cst_5 = arith.constant dense<0xFF80> : vector<16x768xbf16>
    %3 = vector.multi_reduction <maximumf>, %2, %cst_5 [1] : vector<16x16x768xbf16> to vector<16x768xbf16>
    %c0_i32 = arith.constant 0 : i32
    %4 = arith.cmpi eq, %arg0, %c0_i32 : i32
    %5 = arith.extui %4 : i1 to i32
    %c0_i32_6 = arith.constant 0 : i32
    %6 = arith.cmpi ne, %5, %c0_i32_6 : i32
    scf.if %6 {
      %c0_10 = arith.constant 0 : index
      %c0_11 = arith.constant 0 : index
      %13 = vector.load %arg21[%c0_10, %c0_11] : memref<16x768xbf16, #tpu.memory_space<vmem>>, vector<16x768xbf16>
      tpu.vector_store %arg21[%c0_10, %c0_11], %1 {strides = array<i32>} : memref<16x768xbf16, #tpu.memory_space<vmem>>, vector<16x768xbf16>,
      %c0_12 = arith.constant 0 : index
      %c0_13 = arith.constant 0 : index
      %14 = vector.load %arg22[%c0_12, %c0_13] : memref<16x768xbf16, #tpu.memory_space<vmem>>, vector<16x768xbf16>
      tpu.vector_store %arg22[%c0_12, %c0_13], %3 {strides = array<i32>} : memref<16x768xbf16, #tpu.memory_space<vmem>>, vector<16x768xbf16>,
    } else {
    }
    %c0_i32_7 = arith.constant 0 : i32
    %7 = arith.cmpi sgt, %arg0, %c0_i32_7 : i32
    %8 = arith.extui %7 : i1 to i32
    %c0_i32_8 = arith.constant 0 : i32
    %9 = arith.cmpi ne, %8, %c0_i32_8 : i32
    scf.if %9 {
      %c0_10 = arith.constant 0 : index
      %c0_11 = arith.constant 0 : index
      %13 = vector.load %arg21[%c0_10, %c0_11] : memref<16x768xbf16, #tpu.memory_space<vmem>>, vector<16x768xbf16>
      %14 = arith.maximumf %13, %1 : vector<16x768xbf16>
      %c0_12 = arith.constant 0 : index
      %c0_13 = arith.constant 0 : index
      %15 = vector.load %arg21[%c0_12, %c0_13] : memref<16x768xbf16, #tpu.memory_space<vmem>>, vector<16x768xbf16>
      tpu.vector_store %arg21[%c0_12, %c0_13], %14 {strides = array<i32>} : memref<16x768xbf16, #tpu.memory_space<vmem>>, vector<16x768xbf16>,
      %c0_14 = arith.constant 0 : index
      %c0_15 = arith.constant 0 : index
      %16 = vector.load %arg22[%c0_14, %c0_15] : memref<16x768xbf16, #tpu.memory_space<vmem>>, vector<16x768xbf16>
      %17 = arith.maximumf %16, %3 : vector<16x768xbf16>
      %c0_16 = arith.constant 0 : index
      %c0_17 = arith.constant 0 : index
      %18 = vector.load %arg22[%c0_16, %c0_17] : memref<16x768xbf16, #tpu.memory_space<vmem>>, vector<16x768xbf16>
      tpu.vector_store %arg22[%c0_16, %c0_17], %17 {strides = array<i32>} : memref<16x768xbf16, #tpu.memory_space<vmem>>, vector<16x768xbf16>,
    } else {
    }
    %c1_i32 = arith.constant 1 : i32
    %10 = arith.cmpi eq, %arg0, %c1_i32 : i32
    %11 = arith.extui %10 : i1 to i32
    %c0_i32_9 = arith.constant 0 : i32
    %12 = arith.cmpi ne, %11, %c0_i32_9 : i32
    scf.if %12 {
      %c0_10 = arith.constant 0 : index
      %c0_11 = arith.constant 0 : index
      %13 = vector.load %arg21[%c0_10, %c0_11] : memref<16x768xbf16, #tpu.memory_space<vmem>>, vector<16x768xbf16>
      %c0_12 = arith.constant 0 : index
      %c0_13 = arith.constant 0 : index
      %14 = vector.load %arg5[%c0_12, %c0_13] : memref<768x128xbf16, #tpu.memory_space<vmem>>, vector<768x128xbf16>
      %cst_14 = arith.constant dense<0.000000e+00> : vector<16x128xf32>
      %15 = tpu.matmul %13, %14, %cst_14 {dimension_numbers = #tpu.dot_dimension_numbers<[1], [0], [0], [1], [0, 0, 1, 1], [], []>} : vector<16x768xbf16>, vector<768x128xbf16>, vector<16x128xf32> -> vector<16x128xf32>
      %c0_15 = arith.constant 0 : index
      %c0_16 = arith.constant 0 : index
      %16 = vector.load %arg6[%c0_15, %c0_16] : memref<1x128xf32, #tpu.memory_space<vmem>>, vector<1x128xf32>
      %17 = vector.broadcast %16 : vector<1x128xf32> to vector<16x128xf32>
      %18 = arith.addf %15, %17 : vector<16x128xf32>
      %c0_17 = arith.constant 0 : index
      %c0_18 = arith.constant 0 : index
      %19 = vector.load %arg22[%c0_17, %c0_18] : memref<16x768xbf16, #tpu.memory_space<vmem>>, vector<16x768xbf16>
      %c0_19 = arith.constant 0 : index
      %c0_20 = arith.constant 0 : index
      %20 = vector.load %arg7[%c0_19, %c0_20] : memref<768x64xbf16, #tpu.memory_space<vmem>>, vector<768x64xbf16>
      %cst_21 = arith.constant dense<0.000000e+00> : vector<16x64xf32>
      %21 = tpu.matmul %19, %20, %cst_21 {dimension_numbers = #tpu.dot_dimension_numbers<[1], [0], [0], [1], [0, 0, 1, 1], [], []>} : vector<16x768xbf16>, vector<768x64xbf16>, vector<16x64xf32> -> vector<16x64xf32>
      %c0_22 = arith.constant 0 : index
      %c0_23 = arith.constant 0 : index
      %22 = vector.load %arg8[%c0_22, %c0_23] : memref<1x64xf32, #tpu.memory_space<vmem>>, vector<1x64xf32>
      %23 = vector.broadcast %22 : vector<1x64xf32> to vector<16x64xf32>
      %24 = arith.addf %21, %23 : vector<16x64xf32>
      %25 = tpu.concatenate %18, %24 in 1 : vector<16x128xf32>, vector<16x64xf32> -> vector<16x192xf32>
      %c0_24 = arith.constant 0 : index
      %c0_25 = arith.constant 0 : index
      %26 = vector.load %arg9[%c0_24, %c0_25] : memref<192x128xf32, #tpu.memory_space<vmem>>, vector<192x128xf32>
      %cst_26 = arith.constant dense<0.000000e+00> : vector<16x128xf32>
      %27 = tpu.matmul %25, %26, %cst_26 {dimension_numbers = #tpu.dot_dimension_numbers<[1], [0], [0], [1], [0, 0, 1, 1], [], []>} : vector<16x192xf32>, vector<192x128xf32>, vector<16x128xf32> -> vector<16x128xf32>
      %c0_27 = arith.constant 0 : index
      %c0_28 = arith.constant 0 : index
      %28 = vector.load %arg10[%c0_27, %c0_28] : memref<1x128xf32, #tpu.memory_space<vmem>>, vector<1x128xf32>
      %29 = vector.broadcast %28 : vector<1x128xf32> to vector<16x128xf32>
      %30 = arith.addf %27, %29 : vector<16x128xf32>
      %31 = vector.extract_strided_slice %30 {offsets = [0, 0], sizes = [8, 128], strides = [1, 1]} : vector<16x128xf32> to vector<8x128xf32>
      %32 = vector.extract_strided_slice %31 {offsets = [0, 0], sizes = [8, 32], strides = [1, 1]} : vector<8x128xf32> to vector<8x32xf32>
      %33 = vector.extract_strided_slice %31 {offsets = [0, 32], sizes = [8, 32], strides = [1, 1]} : vector<8x128xf32> to vector<8x32xf32>
      %34 = vector.extract_strided_slice %31 {offsets = [0, 64], sizes = [8, 32], strides = [1, 1]} : vector<8x128xf32> to vector<8x32xf32>
      %35 = vector.extract_strided_slice %31 {offsets = [0, 96], sizes = [8, 32], strides = [1, 1]} : vector<8x128xf32> to vector<8x32xf32>
      %36 = vector.shape_cast %32 : vector<8x32xf32> to vector<1x8x32xf32>
      %37 = vector.shape_cast %33 : vector<8x32xf32> to vector<1x8x32xf32>
      %38 = vector.shape_cast %34 : vector<8x32xf32> to vector<1x8x32xf32>
      %39 = vector.shape_cast %35 : vector<8x32xf32> to vector<1x8x32xf32>
      %40 = tpu.concatenate %36, %37, %38, %39 in 0 : vector<1x8x32xf32>, vector<1x8x32xf32>, vector<1x8x32xf32>, vector<1x8x32xf32> -> vector<4x8x32xf32>
      "tpu.trace_start"() <{level = 10 : i32, message = "hsd,htd->hst"}> : () -> ()
      %cst_29 = arith.constant dense<0.000000e+00> : vector<4x8x8xf32>
      %41 = tpu.matmul %40, %40, %cst_29 {dimension_numbers = #tpu.dot_dimension_numbers<[2], [2], [1], [1], [0, 0, 0, 1, 1, 1], [0], [0]>} : vector<4x8x32xf32>, vector<4x8x32xf32>, vector<4x8x8xf32> -> vector<4x8x8xf32>
      "tpu.trace_stop"() : () -> ()
      %cst_30 = arith.constant 0.176776692 : f32
      %42 = vector.broadcast %cst_30 : f32 to vector<4x8x8xf32>
      %43 = arith.mulf %41, %42 : vector<4x8x8xf32>
      %c0_31 = arith.constant 0 : index
      %c0_32 = arith.constant 0 : index
      %c0_33 = arith.constant 0 : index
      %44 = vector.load %arg3[%c0_31, %c0_32, %c0_33] : memref<2x8x8xf32, #tpu.memory_space<vmem>>, vector<1x8x8xf32>
      %45 = vector.shape_cast %44 : vector<1x8x8xf32> to vector<8x8xf32>
      %46 = vector.shape_cast %45 : vector<8x8xf32> to vector<1x8x8xf32>
      %cst_34 = arith.constant 1.000000e+00 : f32
      %47 = vector.broadcast %cst_34 : f32 to vector<1x8x8xf32>
      %48 = arith.subf %47, %46 : vector<1x8x8xf32>
      %cst_35 = arith.constant 1.000000e+30 : f32
      %49 = vector.broadcast %cst_35 : f32 to vector<1x8x8xf32>
      %50 = arith.mulf %48, %49 : vector<1x8x8xf32>
      %51 = vector.broadcast %50 : vector<1x8x8xf32> to vector<4x8x8xf32>
      %52 = arith.subf %43, %51 : vector<4x8x8xf32>
      %cst_36 = arith.constant dense<0xFF800000> : vector<4x8xf32>
      %53 = vector.multi_reduction <maximumf>, %52, %cst_36 [2] : vector<4x8x8xf32> to vector<4x8xf32>
      %54 = vector.shape_cast %53 : vector<4x8xf32> to vector<4x8x1xf32>
      %55 = vector.broadcast %54 : vector<4x8x1xf32> to vector<4x8x8xf32>
      %56 = arith.subf %52, %55 : vector<4x8x8xf32>
      %57 = math.exp %56 : vector<4x8x8xf32>
      %cst_37 = arith.constant dense<0.000000e+00> : vector<4x8xf32>
      %58 = vector.multi_reduction <add>, %57, %cst_37 [2] : vector<4x8x8xf32> to vector<4x8xf32>
      %59 = vector.shape_cast %58 : vector<4x8xf32> to vector<4x8x1xf32>
      %60 = tpu.reciprocal %59 {approx = true} : vector<4x8x1xf32> -> vector<4x8x1xf32>
      %61 = vector.broadcast %60 : vector<4x8x1xf32> to vector<4x8x8xf32>
      %62 = arith.mulf %57, %61 : vector<4x8x8xf32>
      "tpu.trace_start"() <{level = 10 : i32, message = "hst,htd->hsd"}> : () -> ()
      %cst_38 = arith.constant dense<0.000000e+00> : vector<4x8x32xf32>
      %63 = tpu.matmul %62, %40, %cst_38 {dimension_numbers = #tpu.dot_dimension_numbers<[2], [1], [1], [2], [0, 0, 0, 1, 1, 2], [0], [0]>} : vector<4x8x8xf32>, vector<4x8x32xf32>, vector<4x8x32xf32> -> vector<4x8x32xf32>
      "tpu.trace_stop"() : () -> ()
      %64 = vector.extract_strided_slice %63 {offsets = [0, 0, 0], sizes = [1, 8, 32], strides = [1, 1, 1]} : vector<4x8x32xf32> to vector<1x8x32xf32>
      %65 = vector.shape_cast %64 : vector<1x8x32xf32> to vector<8x32xf32>
      %66 = vector.extract_strided_slice %63 {offsets = [1, 0, 0], sizes = [1, 8, 32], strides = [1, 1, 1]} : vector<4x8x32xf32> to vector<1x8x32xf32>
      %67 = vector.shape_cast %66 : vector<1x8x32xf32> to vector<8x32xf32>
      %68 = vector.extract_strided_slice %63 {offsets = [2, 0, 0], sizes = [1, 8, 32], strides = [1, 1, 1]} : vector<4x8x32xf32> to vector<1x8x32xf32>
      %69 = vector.shape_cast %68 : vector<1x8x32xf32> to vector<8x32xf32>
      %70 = vector.extract_strided_slice %63 {offsets = [3, 0, 0], sizes = [1, 8, 32], strides = [1, 1, 1]} : vector<4x8x32xf32> to vector<1x8x32xf32>
      %71 = vector.shape_cast %70 : vector<1x8x32xf32> to vector<8x32xf32>
      %72 = tpu.concatenate %65, %67, %69, %71 in 1 : vector<8x32xf32>, vector<8x32xf32>, vector<8x32xf32>, vector<8x32xf32> -> vector<8x128xf32>
      %73 = vector.extract_strided_slice %30 {offsets = [8, 0], sizes = [8, 128], strides = [1, 1]} : vector<16x128xf32> to vector<8x128xf32>
      %74 = vector.extract_strided_slice %73 {offsets = [0, 0], sizes = [8, 32], strides = [1, 1]} : vector<8x128xf32> to vector<8x32xf32>
      %75 = vector.extract_strided_slice %73 {offsets = [0, 32], sizes = [8, 32], strides = [1, 1]} : vector<8x128xf32> to vector<8x32xf32>
      %76 = vector.extract_strided_slice %73 {offsets = [0, 64], sizes = [8, 32], strides = [1, 1]} : vector<8x128xf32> to vector<8x32xf32>
      %77 = vector.extract_strided_slice %73 {offsets = [0, 96], sizes = [8, 32], strides = [1, 1]} : vector<8x128xf32> to vector<8x32xf32>
      %78 = vector.shape_cast %74 : vector<8x32xf32> to vector<1x8x32xf32>
      %79 = vector.shape_cast %75 : vector<8x32xf32> to vector<1x8x32xf32>
      %80 = vector.shape_cast %76 : vector<8x32xf32> to vector<1x8x32xf32>
      %81 = vector.shape_cast %77 : vector<8x32xf32> to vector<1x8x32xf32>
      %82 = tpu.concatenate %78, %79, %80, %81 in 0 : vector<1x8x32xf32>, vector<1x8x32xf32>, vector<1x8x32xf32>, vector<1x8x32xf32> -> vector<4x8x32xf32>
      "tpu.trace_start"() <{level = 10 : i32, message = "hsd,htd->hst"}> : () -> ()
      %cst_39 = arith.constant dense<0.000000e+00> : vector<4x8x8xf32>
      %83 = tpu.matmul %82, %82, %cst_39 {dimension_numbers = #tpu.dot_dimension_numbers<[2], [2], [1], [1], [0, 0, 0, 1, 1, 1], [0], [0]>} : vector<4x8x32xf32>, vector<4x8x32xf32>, vector<4x8x8xf32> -> vector<4x8x8xf32>
      "tpu.trace_stop"() : () -> ()
      %cst_40 = arith.constant 0.176776692 : f32
      %84 = vector.broadcast %cst_40 : f32 to vector<4x8x8xf32>
      %85 = arith.mulf %83, %84 : vector<4x8x8xf32>
      %c1 = arith.constant 1 : index
      %c0_41 = arith.constant 0 : index
      %c0_42 = arith.constant 0 : index
      %86 = vector.load %arg3[%c1, %c0_41, %c0_42] : memref<2x8x8xf32, #tpu.memory_space<vmem>>, vector<1x8x8xf32>
      %87 = vector.shape_cast %86 : vector<1x8x8xf32> to vector<8x8xf32>
      %88 = vector.shape_cast %87 : vector<8x8xf32> to vector<1x8x8xf32>
      %cst_43 = arith.constant 1.000000e+00 : f32
      %89 = vector.broadcast %cst_43 : f32 to vector<1x8x8xf32>
      %90 = arith.subf %89, %88 : vector<1x8x8xf32>
      %cst_44 = arith.constant 1.000000e+30 : f32
      %91 = vector.broadcast %cst_44 : f32 to vector<1x8x8xf32>
      %92 = arith.mulf %90, %91 : vector<1x8x8xf32>
      %93 = vector.broadcast %92 : vector<1x8x8xf32> to vector<4x8x8xf32>
      %94 = arith.subf %85, %93 : vector<4x8x8xf32>
      %cst_45 = arith.constant dense<0xFF800000> : vector<4x8xf32>
      %95 = vector.multi_reduction <maximumf>, %94, %cst_45 [2] : vector<4x8x8xf32> to vector<4x8xf32>
      %96 = vector.shape_cast %95 : vector<4x8xf32> to vector<4x8x1xf32>
      %97 = vector.broadcast %96 : vector<4x8x1xf32> to vector<4x8x8xf32>
      %98 = arith.subf %94, %97 : vector<4x8x8xf32>
      %99 = math.exp %98 : vector<4x8x8xf32>
      %cst_46 = arith.constant dense<0.000000e+00> : vector<4x8xf32>
      %100 = vector.multi_reduction <add>, %99, %cst_46 [2] : vector<4x8x8xf32> to vector<4x8xf32>
      %101 = vector.shape_cast %100 : vector<4x8xf32> to vector<4x8x1xf32>
      %102 = tpu.reciprocal %101 {approx = true} : vector<4x8x1xf32> -> vector<4x8x1xf32>
      %103 = vector.broadcast %102 : vector<4x8x1xf32> to vector<4x8x8xf32>
      %104 = arith.mulf %99, %103 : vector<4x8x8xf32>
      "tpu.trace_start"() <{level = 10 : i32, message = "hst,htd->hsd"}> : () -> ()
      %cst_47 = arith.constant dense<0.000000e+00> : vector<4x8x32xf32>
      %105 = tpu.matmul %104, %82, %cst_47 {dimension_numbers = #tpu.dot_dimension_numbers<[2], [1], [1], [2], [0, 0, 0, 1, 1, 2], [0], [0]>} : vector<4x8x8xf32>, vector<4x8x32xf32>, vector<4x8x32xf32> -> vector<4x8x32xf32>
      "tpu.trace_stop"() : () -> ()
      %106 = vector.extract_strided_slice %105 {offsets = [0, 0, 0], sizes = [1, 8, 32], strides = [1, 1, 1]} : vector<4x8x32xf32> to vector<1x8x32xf32>
      %107 = vector.shape_cast %106 : vector<1x8x32xf32> to vector<8x32xf32>
      %108 = vector.extract_strided_slice %105 {offsets = [1, 0, 0], sizes = [1, 8, 32], strides = [1, 1, 1]} : vector<4x8x32xf32> to vector<1x8x32xf32>
      %109 = vector.shape_cast %108 : vector<1x8x32xf32> to vector<8x32xf32>
      %110 = vector.extract_strided_slice %105 {offsets = [2, 0, 0], sizes = [1, 8, 32], strides = [1, 1, 1]} : vector<4x8x32xf32> to vector<1x8x32xf32>
      %111 = vector.shape_cast %110 : vector<1x8x32xf32> to vector<8x32xf32>
      %112 = vector.extract_strided_slice %105 {offsets = [3, 0, 0], sizes = [1, 8, 32], strides = [1, 1, 1]} : vector<4x8x32xf32> to vector<1x8x32xf32>
      %113 = vector.shape_cast %112 : vector<1x8x32xf32> to vector<8x32xf32>
      %114 = tpu.concatenate %107, %109, %111, %113 in 1 : vector<8x32xf32>, vector<8x32xf32>, vector<8x32xf32>, vector<8x32xf32> -> vector<8x128xf32>
      %115 = tpu.concatenate %72, %114 in 0 : vector<8x128xf32>, vector<8x128xf32> -> vector<16x128xf32>
      %c0_48 = arith.constant 0 : index
      %c0_49 = arith.constant 0 : index
      %116 = vector.load %arg4[%c0_48, %c0_49] : memref<16x16xf32, #tpu.memory_space<vmem>>, vector<16x16xf32>
      %cst_50 = arith.constant dense<0.000000e+00> : vector<16x128xf32>
      %117 = tpu.matmul %116, %115, %cst_50 {dimension_numbers = #tpu.dot_dimension_numbers<[1], [0], [0], [1], [0, 0, 1, 1], [], []>} : vector<16x16xf32>, vector<16x128xf32>, vector<16x128xf32> -> vector<16x128xf32>
      %c0_51 = arith.constant 0 : index
      %c0_52 = arith.constant 0 : index
      %118 = vector.load %arg11[%c0_51, %c0_52] : memref<128x128xf32, #tpu.memory_space<vmem>>, vector<128x128xf32>
      %cst_53 = arith.constant dense<0.000000e+00> : vector<16x128xf32>
      %119 = tpu.matmul %117, %118, %cst_53 {dimension_numbers = #tpu.dot_dimension_numbers<[1], [0], [0], [1], [0, 0, 1, 1], [], []>} : vector<16x128xf32>, vector<128x128xf32>, vector<16x128xf32> -> vector<16x128xf32>
      %120 = arith.addf %30, %119 : vector<16x128xf32>
      %c0_54 = arith.constant 0 : index
      %c0_55 = arith.constant 0 : index
      %121 = vector.load %arg12[%c0_54, %c0_55] : memref<1x128xf32, #tpu.memory_space<vmem>>, vector<1x128xf32>
      %c0_56 = arith.constant 0 : index
      %c0_57 = arith.constant 0 : index
      %122 = vector.load %arg13[%c0_56, %c0_57] : memref<1x128xf32, #tpu.memory_space<vmem>>, vector<1x128xf32>
      %cst_58 = arith.constant dense<0.000000e+00> : vector<16xf32>
      %123 = vector.multi_reduction <add>, %120, %cst_58 [1] : vector<16x128xf32> to vector<16xf32>
      %124 = vector.shape_cast %123 : vector<16xf32> to vector<16x1xf32>
      %cst_59 = arith.constant 1.280000e+02 : f32
      %125 = vector.broadcast %cst_59 : f32 to vector<16x1xf32>
      %126 = arith.divf %124, %125 : vector<16x1xf32>
      %127 = vector.broadcast %126 : vector<16x1xf32> to vector<16x128xf32>
      %128 = arith.subf %120, %127 : vector<16x128xf32>
      %129 = arith.mulf %128, %128 : vector<16x128xf32>
      %cst_60 = arith.constant dense<0.000000e+00> : vector<16xf32>
      %130 = vector.multi_reduction <add>, %129, %cst_60 [1] : vector<16x128xf32> to vector<16xf32>
      %131 = vector.shape_cast %130 : vector<16xf32> to vector<16x1xf32>
      %cst_61 = arith.constant 1.280000e+02 : f32
      %132 = vector.broadcast %cst_61 : f32 to vector<16x1xf32>
      %133 = arith.divf %131, %132 : vector<16x1xf32>
      %134 = vector.broadcast %126 : vector<16x1xf32> to vector<16x128xf32>
      %135 = arith.subf %120, %134 : vector<16x128xf32>
      %cst_62 = arith.constant 9.99999974E-6 : f32
      %136 = vector.broadcast %cst_62 : f32 to vector<16x1xf32>
      %137 = arith.addf %133, %136 : vector<16x1xf32>
      %138 = math.rsqrt %137 : vector<16x1xf32>
      %139 = vector.broadcast %138 : vector<16x1xf32> to vector<16x128xf32>
      %140 = arith.mulf %135, %139 : vector<16x128xf32>
      %141 = vector.broadcast %121 : vector<1x128xf32> to vector<16x128xf32>
      %142 = arith.mulf %140, %141 : vector<16x128xf32>
      %143 = vector.broadcast %122 : vector<1x128xf32> to vector<16x128xf32>
      %144 = arith.addf %142, %143 : vector<16x128xf32>
      %c0_63 = arith.constant 0 : index
      %c0_64 = arith.constant 0 : index
      %145 = vector.load %arg14[%c0_63, %c0_64] : memref<128x256xf32, #tpu.memory_space<vmem>>, vector<128x256xf32>
      %cst_65 = arith.constant dense<0.000000e+00> : vector<16x256xf32>
      %146 = tpu.matmul %144, %145, %cst_65 {dimension_numbers = #tpu.dot_dimension_numbers<[1], [0], [0], [1], [0, 0, 1, 1], [], []>} : vector<16x128xf32>, vector<128x256xf32>, vector<16x256xf32> -> vector<16x256xf32>
      %c0_66 = arith.constant 0 : index
      %c0_67 = arith.constant 0 : index
      %147 = vector.load %arg15[%c0_66, %c0_67] : memref<1x256xf32, #tpu.memory_space<vmem>>, vector<1x256xf32>
      %148 = vector.broadcast %147 : vector<1x256xf32> to vector<16x256xf32>
      %149 = arith.addf %146, %148 : vector<16x256xf32>
      %cst_68 = arith.constant 0.000000e+00 : f32
      %150 = vector.broadcast %cst_68 : f32 to vector<16x256xf32>
      %151 = arith.maximumf %149, %150 : vector<16x256xf32>
      %c0_69 = arith.constant 0 : index
      %c0_70 = arith.constant 0 : index
      %152 = vector.load %arg16[%c0_69, %c0_70] : memref<256x128xf32, #tpu.memory_space<vmem>>, vector<256x128xf32>
      %cst_71 = arith.constant dense<0.000000e+00> : vector<16x128xf32>
      %153 = tpu.matmul %151, %152, %cst_71 {dimension_numbers = #tpu.dot_dimension_numbers<[1], [0], [0], [1], [0, 0, 1, 1], [], []>} : vector<16x256xf32>, vector<256x128xf32>, vector<16x128xf32> -> vector<16x128xf32>
      %c0_72 = arith.constant 0 : index
      %c0_73 = arith.constant 0 : index
      %154 = vector.load %arg17[%c0_72, %c0_73] : memref<1x128xf32, #tpu.memory_space<vmem>>, vector<1x128xf32>
      %155 = vector.broadcast %154 : vector<1x128xf32> to vector<16x128xf32>
      %156 = arith.addf %153, %155 : vector<16x128xf32>
      %157 = arith.addf %156, %144 : vector<16x128xf32>
      %c0_74 = arith.constant 0 : index
      %c0_75 = arith.constant 0 : index
      %158 = vector.load %arg18[%c0_74, %c0_75] : memref<1x128xf32, #tpu.memory_space<vmem>>, vector<1x128xf32>
      %c0_76 = arith.constant 0 : index
      %c0_77 = arith.constant 0 : index
      %159 = vector.load %arg19[%c0_76, %c0_77] : memref<1x128xf32, #tpu.memory_space<vmem>>, vector<1x128xf32>
      %cst_78 = arith.constant dense<0.000000e+00> : vector<16xf32>
      %160 = vector.multi_reduction <add>, %157, %cst_78 [1] : vector<16x128xf32> to vector<16xf32>
      %161 = vector.shape_cast %160 : vector<16xf32> to vector<16x1xf32>
      %cst_79 = arith.constant 1.280000e+02 : f32
      %162 = vector.broadcast %cst_79 : f32 to vector<16x1xf32>
      %163 = arith.divf %161, %162 : vector<16x1xf32>
      %164 = vector.broadcast %163 : vector<16x1xf32> to vector<16x128xf32>
      %165 = arith.subf %157, %164 : vector<16x128xf32>
      %166 = arith.mulf %165, %165 : vector<16x128xf32>
      %cst_80 = arith.constant dense<0.000000e+00> : vector<16xf32>
      %167 = vector.multi_reduction <add>, %166, %cst_80 [1] : vector<16x128xf32> to vector<16xf32>
      %168 = vector.shape_cast %167 : vector<16xf32> to vector<16x1xf32>
      %cst_81 = arith.constant 1.280000e+02 : f32
      %169 = vector.broadcast %cst_81 : f32 to vector<16x1xf32>
      %170 = arith.divf %168, %169 : vector<16x1xf32>
      %171 = vector.broadcast %163 : vector<16x1xf32> to vector<16x128xf32>
      %172 = arith.subf %157, %171 : vector<16x128xf32>
      %cst_82 = arith.constant 9.99999974E-6 : f32
      %173 = vector.broadcast %cst_82 : f32 to vector<16x1xf32>
      %174 = arith.addf %170, %173 : vector<16x1xf32>
      %175 = math.rsqrt %174 : vector<16x1xf32>
      %176 = vector.broadcast %175 : vector<16x1xf32> to vector<16x128xf32>
      %177 = arith.mulf %172, %176 : vector<16x128xf32>
      %178 = vector.broadcast %158 : vector<1x128xf32> to vector<16x128xf32>
      %179 = arith.mulf %177, %178 : vector<16x128xf32>
      %180 = vector.broadcast %159 : vector<1x128xf32> to vector<16x128xf32>
      %181 = arith.addf %179, %180 : vector<16x128xf32>
      %c0_83 = arith.constant 0 : index
      %c0_84 = arith.constant 0 : index
      %182 = vector.load %arg20[%c0_83, %c0_84] : memref<16x128xf32, #tpu.memory_space<vmem>>, vector<16x128xf32>
      tpu.vector_store %arg20[%c0_83, %c0_84], %181 {strides = array<i32>} : memref<16x128xf32, #tpu.memory_space<vmem>>, vector<16x128xf32>,
    } else {
    }
    return
  }
  func.func @transform_0(%arg0: i32) -> (i32, i32, i32) {
    %c0_i32 = arith.constant 0 : i32
    %c0_i32_0 = arith.constant 0 : i32
    %c0_i32_1 = arith.constant 0 : i32
    return %c0_i32, %arg0, %c0_i32_0 : i32, i32, i32
  }
  func.func @transform_1(%arg0: i32) -> (i32, i32, i32) {
    %c0_i32 = arith.constant 0 : i32
    %c0_i32_0 = arith.constant 0 : i32
    %c0_i32_1 = arith.constant 0 : i32
    return %c0_i32, %arg0, %c0_i32_0 : i32, i32, i32
  }
  func.func @transform_2(%arg0: i32) -> (i32, i32, i32) {
    %c0_i32 = arith.constant 0 : i32
    %c0_i32_0 = arith.constant 0 : i32
    %c0_i32_1 = arith.constant 0 : i32
    %c0_i32_2 = arith.constant 0 : i32
    return %c0_i32, %c0_i32_0, %c0_i32_1 : i32, i32, i32
  }
  func.func @transform_3(%arg0: i32) -> (i32, i32) {
    %c0_i32 = arith.constant 0 : i32
    %c0_i32_0 = arith.constant 0 : i32
    %c0_i32_1 = arith.constant 0 : i32
    return %c0_i32, %c0_i32_0 : i32, i32
  }
  func.func @transform_4(%arg0: i32) -> (i32, i32) {
    %c0_i32 = arith.constant 0 : i32
    %c0_i32_0 = arith.constant 0 : i32
    %c0_i32_1 = arith.constant 0 : i32
    return %c0_i32, %c0_i32_0 : i32, i32
  }
  func.func @transform_5(%arg0: i32) -> (i32, i32) {
    %c0_i32 = arith.constant 0 : i32
    %c0_i32_0 = arith.constant 0 : i32
    %c0_i32_1 = arith.constant 0 : i32
    return %c0_i32, %c0_i32_0 : i32, i32
  }
  func.func @transform_6(%arg0: i32) -> (i32, i32) {
    %c0_i32 = arith.constant 0 : i32
    %c0_i32_0 = arith.constant 0 : i32
    %c0_i32_1 = arith.constant 0 : i32
    return %c0_i32, %c0_i32_0 : i32, i32
  }
  func.func @transform_7(%arg0: i32) -> (i32, i32) {
    %c0_i32 = arith.constant 0 : i32
    %c0_i32_0 = arith.constant 0 : i32
    %c0_i32_1 = arith.constant 0 : i32
    return %c0_i32, %c0_i32_0 : i32, i32
  }
  func.func @transform_8(%arg0: i32) -> (i32, i32) {
    %c0_i32 = arith.constant 0 : i32
    %c0_i32_0 = arith.constant 0 : i32
    %c0_i32_1 = arith.constant 0 : i32
    return %c0_i32, %c0_i32_0 : i32, i32
  }
  func.func @transform_9(%arg0: i32) -> (i32, i32) {
    %c0_i32 = arith.constant 0 : i32
    %c0_i32_0 = arith.constant 0 : i32
    %c0_i32_1 = arith.constant 0 : i32
    return %c0_i32, %c0_i32_0 : i32, i32
  }
  func.func @transform_10(%arg0: i32) -> (i32, i32) {
    %c0_i32 = arith.constant 0 : i32
    %c0_i32_0 = arith.constant 0 : i32
    %c0_i32_1 = arith.constant 0 : i32
    return %c0_i32, %c0_i32_0 : i32, i32
  }
  func.func @transform_11(%arg0: i32) -> (i32, i32) {
    %c0_i32 = arith.constant 0 : i32
    %c0_i32_0 = arith.constant 0 : i32
    %c0_i32_1 = arith.constant 0 : i32
    return %c0_i32, %c0_i32_0 : i32, i32
  }
  func.func @transform_12(%arg0: i32) -> (i32, i32) {
    %c0_i32 = arith.constant 0 : i32
    %c0_i32_0 = arith.constant 0 : i32
    %c0_i32_1 = arith.constant 0 : i32
    return %c0_i32, %c0_i32_0 : i32, i32
  }
  func.func @transform_13(%arg0: i32) -> (i32, i32) {
    %c0_i32 = arith.constant 0 : i32
    %c0_i32_0 = arith.constant 0 : i32
    %c0_i32_1 = arith.constant 0 : i32
    return %c0_i32, %c0_i32_0 : i32, i32
  }
  func.func @transform_14(%arg0: i32) -> (i32, i32) {
    %c0_i32 = arith.constant 0 : i32
    %c0_i32_0 = arith.constant 0 : i32
    %c0_i32_1 = arith.constant 0 : i32
    return %c0_i32, %c0_i32_0 : i32, i32
  }
  func.func @transform_15(%arg0: i32) -> (i32, i32) {
    %c0_i32 = arith.constant 0 : i32
    %c0_i32_0 = arith.constant 0 : i32
    %c0_i32_1 = arith.constant 0 : i32
    return %c0_i32, %c0_i32_0 : i32, i32
  }
  func.func @transform_16(%arg0: i32) -> (i32, i32) {
    %c0_i32 = arith.constant 0 : i32
    %c0_i32_0 = arith.constant 0 : i32
    %c0_i32_1 = arith.constant 0 : i32
    return %c0_i32, %c0_i32_0 : i32, i32
  }
  func.func @transform_17(%arg0: i32) -> (i32, i32) {
    %c0_i32 = arith.constant 0 : i32
    %c0_i32_0 = arith.constant 0 : i32
    %c0_i32_1 = arith.constant 0 : i32
    return %c0_i32, %c0_i32_0 : i32, i32
  }
  func.func @transform_18(%arg0: i32) -> (i32, i32) {
    %c0_i32 = arith.constant 0 : i32
    %c0_i32_0 = arith.constant 0 : i32
    %c0_i32_1 = arith.constant 0 : i32
    return %c0_i32, %c0_i32_0 : i32, i32
  }
  func.func @transform_19(%arg0: i32) -> (i32, i32) {
    %c0_i32 = arith.constant 0 : i32
    %c0_i32_0 = arith.constant 0 : i32
    %c0_i32_1 = arith.constant 0 : i32
    return %c0_i32, %c0_i32_0 : i32, i32
  }
}

</mosaic_0001>

<bundles_post_ra>
// kernel: tpu_custom_call.1
= control target key start
LH: loop header
LB: loop body
LE: loop exit
PB: predicated region body
PF: predicated region fallthrough
CT: control target
= control target key end

     0   :  { %s11260_s0 = inlined_call_operand.hbm [shape: bf16[16,32,768], index: 0, kind: input, shape index: {}]   ;;  %s11261_s1 = inlined_call_operand.hbm [shape: bf16[16,32,768], index: 1, kind: input, shape index: {}]   ;;  %s11262_s2 = inlined_call_operand.hbm [shape: f32[2,8,8], index: 2, kind: input, shape index: {}]   ;;  %s11263_s3 = inlined_call_operand.hbm [shape: f32[16,16], index: 3, kind: input, shape index: {}]   ;;  %s11264_s4 = inlined_call_operand.vmem [shape: bf16[768,128], index: 4, kind: input, shape index: {}]   ;;  %s11265_s5 = inlined_call_operand.vmem [shape: f32[1,128], index: 5, kind: input, shape index: {}]   ;;  %s11266_s6 = inlined_call_operand.vmem [shape: bf16[768,64], index: 6, kind: input, shape index: {}]   ;;  %s11267_s7 = inlined_call_operand.vmem [shape: f32[1,64], index: 7, kind: input, shape index: {}]   ;;  %s11268_s8 = inlined_call_operand.vmem [shape: f32[192,128], index: 8, kind: input, shape index: {}]   ;;  %s11269_s9 = inlined_call_operand.vmem [shape: f32[1,128], index: 9, kind: input, shape index: {}]   ;;  %s11270_s10 = inlined_call_operand.hbm [shape: f32[128,128], index: 10, kind: input, shape index: {}]   ;;  %s11271_s11 = inlined_call_operand.vmem [shape: f32[1,128], index: 11, kind: input, shape index: {}]   ;;  %s11272_s12 = inlined_call_operand.hbm [shape: f32[1,128], index: 12, kind: input, shape index: {}]   ;;  %s11273_s13 = inlined_call_operand.hbm [shape: f32[128,256], index: 13, kind: input, shape index: {}]   ;;  %s11274_s14 = inlined_call_operand.vmem [shape: f32[1,256], index: 14, kind: input, shape index: {}]   ;;  %s11275_s15 = inlined_call_operand.hbm [shape: f32[256,128], index: 15, kind: input, shape index: {}]   ;;  %s11276_s16 = inlined_call_operand.vmem [shape: f32[1,128], index: 16, kind: input, shape index: {}]   ;;  %s11277_s17 = inlined_call_operand.vmem [shape: f32[1,128], index: 17, kind: input, shape index: {}]   ;;  %s11278_s18 = inlined_call_operand.vmem [shape: f32[1,128], index: 18, kind: input, shape index: {}]   ;;  %s11279_s19 = inlined_call_operand.hbm [shape: f32[16,128], index: 19, kind: output, shape index: {}]  }
   0x1   :  { %11640 = sst [smem:[#allocation174_spill]] %s11260_s0 }
   0x2   :  { %11641 = sst [smem:[#allocation175_spill]] %s11261_s1 }
   0x3   :  { %11642 = sst [smem:[#allocation176_spill]] %s11262_s2 }
   0x4   :  { %11643 = sst [smem:[#allocation177_spill]] %s11263_s3 }
   0x5   :  { %11644 = sst [smem:[#allocation178_spill]] %s11267_s7 }
   0x6   :  { %11645 = sst [smem:[#allocation179_spill]] %s11269_s9 }
   0x7   :  { %11646 = sst [smem:[#allocation180_spill]] %s11271_s11 }
   0x8   :  { %11647 = sst [smem:[#allocation181_spill]] %s11272_s12 }
   0x9   :  { %11648 = sst [smem:[#allocation182_spill]] %s11274_s14 }
   0xa   :  { %11649 = sst [smem:[#allocation183_spill]] %s11276_s16 }
   0xb   :  { %11650 = sst [smem:[#allocation184_spill]] %s11277_s17 }
   0xc   :  { %11651 = sst [smem:[#allocation185_spill]] %s11278_s18 }
   0xd   :  { %11652 = sst [smem:[#allocation186_spill]] %s11279_s19 }
   0xe   :  { %24 = vsyncpa [#allocation5], 0 }
   0xf   :  { %26 = vsyncpa [#allocation5 + $0x1], 0 }
  0x10   :  { %27 = vsyncpa [#allocation8], 0 }
  0x11   :  { %29 = vsyncpa [#allocation8 + $0x1], 0 }
  0x12   :  { %30 = vsyncpa [#allocation11], 0 }
  0x13   :  { %31 = vsyncpa [#allocation14], 0 }
  0x14   :  { %32 = vsyncpa [#allocation17], 0 }
  0x15   :  { %33 = vsyncpa [#allocation6], 0  ;;  %s7326_s0 = smov 0   ;;  %s7328_s30 = smov 0  }
  0x16   :  { %s7330_s20 = smov 0   ;;  %s7332_s21 = smov 0  }
  0x17 LB: > { %s7345_s1 = sadd.s32 4294967295, %s7195_s21   ;;  %s7348_s22 = sadd.s32 1, %s7195_s21   ;;  %s7195_s21 = sphi %s7332_s21, %s12761_s21   ;;  %s7191_s20 = sphi %s7330_s20, %s12765_s20   ;;  %s7187_s30 = sphi %s7328_s30, %s12764_s30   ;;  %s7183_s0 = sphi %s7326_s0, %s12763_s0  }
  0x18   : > { %11653 = sst [smem:[#allocation32_spill]] %s7348_s22  ;;  %s43_s2 = ssub.s32 %s7195_s21, %s7348_s22 }
  0x19   : > { %s46_s23 = sadd.s32 1, %s7191_s20  ;;  %p44_p0 = scmp.eq.s32.totalorder %s43_s2, 0 }
  0x1a   : > { %p53_p1 = scmp.ne.s32.totalorder %s7191_s20, %s7187_s30  ;;  %p54_p2 = scmp.eq.s32.totalorder %s7195_s21, 0 }
  0x1b   : > { %p59_p3 = scmp.ne.s32.totalorder %s7187_s30, %s7183_s0  ;;  %p60_p5 = scmp.eq.s32.totalorder %s7345_s1, 0 }
  0x1c   : > { %s7358_s24 = scalar_select %p44_p0, %s7191_s20, %s46_s23  }
  0x1d   : > { %p7360_p4 = por %p54_p2, %p53_p1  ;;  %p6119_p6 = scmp.ge.s32.totalorder %s7195_s21, 1 }
  0x1e   : > { %11654 = sst [smem:[#allocation33_spill]] %s7358_s24  ;;  %p474_p7 = scmp.lt.s32.totalorder %s7195_s21, 3 }
  0x1f   : > { %p7369_p8 = por %p60_p5, %p59_p3  ;;  %p6120_p9 = scmp.ne.s32.totalorder %s7345_s1, 0 }
  0x20   : > { %p7374_p10 = pnand %p6119_p6, %p474_p7  ;;  %s11658_s29 = sld [smem:[#allocation177_spill]] }
  0x21   : > { %s11659_s12 = sld [smem:[#allocation181_spill]]  ;;  %s7197_s19 = smov [#allocation10]  }
  0x22   : > { %p6770_p11 = pneg %p7374_p10  ;;  %s501_s18 = sshll.u32 %s7197_s19, 4  ;;  %s502_s18 = int_to_ptr.vmem [resolvable:$true] %s501_s18 }
  0x23   : > { %s7198_s27 = smov 128   ;;  %s7199_s28 = smov 8  }
  0x24   : > { %p7388_p12 = pnand %p6770_p11, %p60_p5  ;;  %s11661_s17 = sld [smem:[#allocation176_spill]] }
  0x25   : > { %s531_s11 = sshll.u32 %s11270_s10, 4  ;;  %s7201_s9 = smov [#allocation9]   ;;  %s532_s11 = int_to_ptr.hbm [resolvable:$true] %s531_s11 }
  0x26   : > { %s499_s0 = sshll.u32 %s11658_s29, 4  ;;  %s7200_s29 = smov [#allocation13]   ;;  %s500_s0 = int_to_ptr.hbm [resolvable:$true] %s499_s0 }
  0x27   : > { %s549_s24 = sshll.u32 %s11659_s12, 4  ;;  %s551_s2 = sshll.u32 %s7200_s29, 4  ;;  %s550_s24 = int_to_ptr.hbm [resolvable:$true] %s549_s24  ;;  %s552_s2 = int_to_ptr.vmem [resolvable:$true] %s551_s2 }
  0x28   : > { %6776 = dma.hbm_to_vmem [thread:$0]  (!%p7388_p12), %s500_s0, 256, %s502_s18, [#allocation11], %s7198_s27, %s7198_s27, %s7199_s28  }
  0x29   : > { %6782 = dma.hbm_to_vmem [thread:$0]  (!%p7388_p12), %s550_s24, 16, %s552_s2, [#allocation14]  }
  0x2a   : > { %s485_s16 = sshll.u32 %s11661_s17, 4  ;;  %s487_s7 = sshll.u32 %s7201_s9, 4  ;;  %s486_s16 = int_to_ptr.hbm [resolvable:$true] %s485_s16  ;;  %s488_s7 = int_to_ptr.vmem [resolvable:$true] %s487_s7 }
  0x2b   : > { %6773 = dma.hbm_to_vmem [thread:$0]  (!%p7388_p12), %s486_s16, 256, %s488_s7, [#allocation8], %s7198_s27, %s7198_s27, %s7199_s28  }
  0x2c   : > { %s7202_s12 = smov [#allocation12]   ;;  %s560_s24 = sshll.u32 %s11273_s13, 4  ;;  %s561_s24 = int_to_ptr.hbm [resolvable:$true] %s560_s24 }
  0x2d   : > { %s533_s17 = sshll.u32 %s7202_s12, 4  ;;  %s7203_s9 = smov [#allocation15]   ;;  %s534_s17 = int_to_ptr.vmem [resolvable:$true] %s533_s17 }
  0x2e   : > { %6779 = dma.hbm_to_vmem [thread:$0]  (!%p7388_p12), %s532_s11, 2048, %s534_s17, [#allocation11], %s7198_s27, %s7198_s27, %s7199_s28  }
  0x2f   : > { %s562_s14 = sshll.u32 %s7203_s9, 4  ;;  %s577_s7 = sshll.u32 %s11275_s15, 4  ;;  %s563_s14 = int_to_ptr.vmem [resolvable:$true] %s562_s14  ;;  %s578_s7 = int_to_ptr.hbm [resolvable:$true] %s577_s7 }
  0x30   : > { %s7204_s16 = smov 256   ;;  %s7205_s23 = smov 16  }
  0x31   : > { %6785 = dma.hbm_to_vmem [thread:$0]  (!%p7388_p12), %s561_s24, 4096, %s563_s14, [#allocation14], %s7204_s16, %s7204_s16, %s7205_s23  }
  0x32   : > { %s7206_s19 = smov [#allocation16]   ;;  %p6126_p13 = scmp.ge.s32.totalorder %s7195_s21, 2 }
  0x33   : > { %s579_s12 = sshll.u32 %s7206_s19, 4  ;;  %s580_s12 = int_to_ptr.vmem [resolvable:$true] %s579_s12 }
  0x34   : > { %6788 = dma.hbm_to_vmem [thread:$0]  (!%p7388_p12), %s578_s7, 4096, %s580_s12, [#allocation17], %s7198_s27, %s7198_s27, %s7199_s28  }
  0x35   : > { %598 = sbr.rel (%p6126_p13) target bundleno = 85 (0x55), region = 84 }
  0x3a   : > { %s602_s11 = sand.u32 1, %s7191_s20   ;;  %s6720_s17 = smul.u32 48, %s7195_s21 }
  0x3b   : > { %s7431_s18 = smul.u32 768, %s602_s11  ;;  %s11662_s24 = sld [smem:[#allocation174_spill]] }
  0x3c   : > { %s6736_s9 = scalar_select %p7360_p4, [#allocation0], [#allocation23] }
  0x3d   : > { %s606_s14 = scalar_lea.vmem [#allocation4], %s7431_s18  ;;  %s7207_s7 = smov 1536  }
  0x3e   : > { %s627_s29 = sshll.u32 %s606_s14, 4  ;;  %s617_s2 = sld [smem:[%s6736_s9]]   ;;  %s628_s29 = int_to_ptr.vmem [resolvable:$true] %s627_s29 }
  0x3f   : > { %6737 = sst [smem:[#allocation20]] (%p7360_p4), %s7207_s7  ;;  %s7208_s16 = smov 768  }
  0x40   : > { %6738 = sst [smem:[#allocation20 + $0x1]] (%p7360_p4), %s7208_s16  ;;  %s7209_s23 = smov 2  }
  0x41   : > { %s612_s27 = scalar_lea.hbm %s11662_s24, %s6720_s17  ;;  %6739 = sst [smem:[#allocation20 + $0x2]] (%p7360_p4), %s7209_s23 }
  0x42   : > { %s625_s28 = sshll.u32 %s612_s27, 4  ;;  %s7210_s19 = smov 384   ;;  %s626_s28 = int_to_ptr.hbm [resolvable:$true] %s625_s28 }
  0x43   : > { %6740 = sst [smem:[#allocation20 + $0x3]] (%p7360_p4), %s7210_s19  ;;  %s7211_s22 = smov 24  }
  0x44   : > { %6741 = sst [smem:[#allocation20 + $0x4]] (%p7360_p4), %s7210_s19  ;;  %s6130_s12 = sshll.u32 %s617_s2, 26 }
  0x45   : > { %6742 = sst [smem:[#allocation20 + $0x5]] (%p7360_p4), %s7211_s22  ;;  %s6131_s0 = sadd.s32 134217728, %s6130_s12 }
  0x46   : > { %s603_s24 = scalar_lea.sflag [#allocation5], %s602_s11  ;;  %s7212_s27 = smov [#allocation19]  }
  0x47   : > { %6743 = dma.general (%p7360_p4), %s626_s28, 12288, %s628_s29, %s603_s24, %s7212_s27, [#allocation20], %s6131_s0, 0  }
  0x48   : > { %s650_s9 = sand.u32 1, %s7195_s21   ;;  %s11663_s2 = sld [smem:[#allocation175_spill]] }
  0x49   : > { %s6744_s23 = scalar_select %p7360_p4, [#allocation0], [#allocation24] }
  0x4a   : > { %s654_s19 = scalar_lea.vmem [#allocation7], %s7431_s18  ;;  %s7213_s12 = smov 1536  }
  0x4b   : > { %s675_s28 = sshll.u32 %s654_s19, 4  ;;  %s665_s29 = sld [smem:[%s6744_s23]]   ;;  %s676_s28 = int_to_ptr.vmem [resolvable:$true] %s675_s28 }
  0x4c   : > { %6745 = sst [smem:[#allocation22]] (%p7360_p4), %s7213_s12  ;;  %s7214_s21 = smov 768  }
  0x4d   : > { %6746 = sst [smem:[#allocation22 + $0x1]] (%p7360_p4), %s7214_s21  ;;  %s7215_s22 = smov 2  }
  0x4e   : > { %s660_s16 = scalar_lea.hbm %s11663_s2, %s6720_s17  ;;  %6747 = sst [smem:[#allocation22 + $0x2]] (%p7360_p4), %s7215_s22 }
  0x4f   : > { %s673_s11 = sshll.u32 %s660_s16, 4  ;;  %s7216_s17 = smov 384   ;;  %s674_s11 = int_to_ptr.hbm [resolvable:$true] %s673_s11 }
  0x50   : > { %6748 = sst [smem:[#allocation22 + $0x3]] (%p7360_p4), %s7216_s17  ;;  %s7217_s24 = smov 24  }
  0x51   : > { %s6135_s0 = sshll.u32 %s665_s29, 26  ;;  %6749 = sst [smem:[#allocation22 + $0x4]] (%p7360_p4), %s7216_s17 }
  0x52   : > { %s6136_s18 = sadd.s32 134217728, %s6135_s0  ;;  %6750 = sst [smem:[#allocation22 + $0x5]] (%p7360_p4), %s7217_s24 }
  0x53   : > { %s651_s27 = scalar_lea.sflag [#allocation8], %s650_s9  ;;  %s7218_s14 = smov [#allocation21]  }
  0x54   : > { %6751 = dma.general (%p7360_p4), %s674_s11, 12288, %s676_s28, %s651_s27, %s7218_s14, [#allocation22], %s6136_s18, 0  }
  0x55 PF: > { %700 = sbr.rel (%p7374_p10) target bundleno = 3570 (0xdf2), region = 96 }
  0x5a   : > { %s702_s7 = sand.u32 1, %s7187_s30  }
  0x5b   : > { %s6723_s2 = smul.u32 768, %s702_s7  ;;  %s703_s16 = scalar_lea.sflag [#allocation5], %s702_s7 }
  0x5d   : > { %s7481_s23 = scalar_lea.vmem [#allocation4], %s6723_s2 }
  0x5e   : > { %7154 = dma.done.wait (%p7369_p8), %s703_s16, 12288  }
  0x5f   : > { %7156 = vsyncadd (%p7369_p8), %s703_s16, 4294955008  ;;  %s712_s25 = sand.u32 1, %s7345_s1   ;;  %s7488_s11 = scalar_lea.vmem [#allocation7], %s6723_s2 }
  0x60   : > { %s713_s9 = scalar_lea.sflag [#allocation8], %s712_s25 }
  0x61   : > { %7158 = dma.done.wait (%p7369_p8), %s713_s9, 12288  }
  0x62   : > { %7160 = vsyncadd (%p7369_p8), %s713_s9, 4294955008 }
  0x63   : > { %7162 = dma.done.wait (%p60_p5), [#allocation8], 256  }
  0x64   : > { %7164 = vsyncadd (%p60_p5), [#allocation8], 4294967040 }
  0x65   : > { %7166 = dma.done.wait (%p60_p5), [#allocation11], 2304  }
  0x66   : > { %7168 = vsyncadd (%p60_p5), [#allocation11], 4294964992 }
  0x67   : > { %7170 = dma.done.wait (%p60_p5), [#allocation14], 4112  }
  0x68   : > { %7172 = vsyncadd (%p60_p5), [#allocation14], 4294963184 }
  0x69   : > { %7174 = dma.done.wait (%p60_p5), [#allocation17], 4096  }
  0x6a   : > { %7176 = vsyncadd (%p60_p5), [#allocation17], 4294963200  ;;  %v7511_v0 = vld [vmem:[%s7481_s23] sm:$0xff]  ;;  %v7514_v1 = vld [vmem:[%s7481_s23 + $0x8] sm:$0xff] }
  0x6b   : > { %v7517_v2 = vld [vmem:[%s7481_s23 + $0x10] sm:$0xff]  ;;  %v7520_v3 = vld [vmem:[%s7481_s23 + $0x18] sm:$0xff]  ;;  %v7523_v4 = vld [vmem:[%s7481_s23 + $0x20] sm:$0xff] }
  0x6c   : > { %v7526_v5 = vld [vmem:[%s7481_s23 + $0x28] sm:$0xff]  ;;  %v7533_v10 = vld [vmem:[%s7481_s23 + $0x30] sm:$0xff]  ;;  %v7536_v11 = vld [vmem:[%s7481_s23 + $0x38] sm:$0xff] }
  0x6d   : > { %v7539_v12 = vld [vmem:[%s7481_s23 + $0x40] sm:$0xff]  ;;  %v7546_v17 = vld [vmem:[%s7481_s23 + $0x48] sm:$0xff]  ;;  %v7549_v18 = vld [vmem:[%s7481_s23 + $0x50] sm:$0xff] }
  0x6e   : > { %v7552_v19 = vld [vmem:[%s7481_s23 + $0x58] sm:$0xff]  ;;  %v7559_v24 = vld [vmem:[%s7481_s23 + $0x60] sm:$0xff]  ;;  %v7562_v25 = vld [vmem:[%s7481_s23 + $0x68] sm:$0xff] }
  0x6f   : > { %v7569_v30 = vld [vmem:[%s7481_s23 + $0x70] sm:$0xff]  ;;  %v7572_v31 = vld [vmem:[%s7481_s23 + $0x78] sm:$0xff]  ;;  %v7579_v36 = vld [vmem:[%s7481_s23 + $0x80] sm:$0xff] }
  0x70   : > { %v7582_v37 = vld [vmem:[%s7481_s23 + $0x88] sm:$0xff]  ;;  %v7589_v42 = vld [vmem:[%s7481_s23 + $0x90] sm:$0xff]  ;;  %v7592_v43 = vld [vmem:[%s7481_s23 + $0x98] sm:$0xff] }
  0x71   : > { %v7599_v48 = vld [vmem:[%s7481_s23 + $0xa0] sm:$0xff]  ;;  %v7602_v49 = vld [vmem:[%s7481_s23 + $0xa8] sm:$0xff]  ;;  %v7609_v54 = vld [vmem:[%s7481_s23 + $0xb0] sm:$0xff] }
  0x72   : > { %v7612_v55 = vld [vmem:[%s7481_s23 + $0xb8] sm:$0xff]  ;;  %v7619_v60 = vld [vmem:[%s7481_s23 + $0xc0] sm:$0xff]  ;;  %v7622_v61 = vld [vmem:[%s7481_s23 + $0xc8] sm:$0xff] }
  0x73   : > { %v7629_v47 = vld [vmem:[%s7481_s23 + $0xd0] sm:$0xff]  ;;  %v7632_v57 = vld [vmem:[%s7481_s23 + $0xd8] sm:$0xff]  ;;  %v7639_v63 = vld [vmem:[%s7481_s23 + $0xe0] sm:$0xff] }
  0x74   : > { %v7642_v56 = vld [vmem:[%s7481_s23 + $0xe8] sm:$0xff]  ;;  %v7649_v58 = vld [vmem:[%s7481_s23 + $0xf0] sm:$0xff]  ;;  %v7652_v53 = vld [vmem:[%s7481_s23 + $0xf8] sm:$0xff] }
  0x75   : > { %v7659_v51 = vld [vmem:[%s7481_s23 + $0x100] sm:$0xff]  ;;  %v7662_v52 = vld [vmem:[%s7481_s23 + $0x108] sm:$0xff]  ;;  %v7669_v62 = vld [vmem:[%s7481_s23 + $0x110] sm:$0xff] }
  0x76   : > { %v7672_v41 = vld [vmem:[%s7481_s23 + $0x118] sm:$0xff]  ;;  %v7679_v59 = vld [vmem:[%s7481_s23 + $0x120] sm:$0xff]  ;;  %v7682_v40 = vld [vmem:[%s7481_s23 + $0x128] sm:$0xff] }
  0x77   : > { %11664 = vst [vmem:[#allocation34_spill] sm:$0xff] %v7679_v59  ;;  %v7689_v50 = vld [vmem:[%s7481_s23 + $0x130] sm:$0xff]  ;;  %v7692_v39 = vld [vmem:[%s7481_s23 + $0x138] sm:$0xff]  ;;  %v7699_v46 = vld [vmem:[%s7481_s23 + $0x140] sm:$0xff] }
  0x78   : > { %11665 = vst [vmem:[#allocation35_spill] sm:$0xff] %v7682_v40  ;;  %v7702_v38 = vld [vmem:[%s7481_s23 + $0x148] sm:$0xff]  ;;  %v7709_v45 = vld [vmem:[%s7481_s23 + $0x150] sm:$0xff]  ;;  %v7712_v35 = vld [vmem:[%s7481_s23 + $0x158] sm:$0xff] }
  0x79   : > { %11666 = vst [vmem:[#allocation36_spill] sm:$0xff] %v7689_v50  ;;  %v7719_v44 = vld [vmem:[%s7481_s23 + $0x160] sm:$0xff]  ;;  %v7722_v34 = vld [vmem:[%s7481_s23 + $0x168] sm:$0xff]  ;;  %v7729_v33 = vld [vmem:[%s7481_s23 + $0x170] sm:$0xff] }
  0x7a   : > { %11667 = vst [vmem:[#allocation37_spill] sm:$0xff] %v7692_v39  ;;  %v7732_v23 = vld [vmem:[%s7481_s23 + $0x178] sm:$0xff]  ;;  %v7739_v32 = vld [vmem:[%s7481_s23 + $0x180] sm:$0xff]  ;;  %v7742_v22 = vld [vmem:[%s7481_s23 + $0x188] sm:$0xff] }
  0x7b   : > { %11668 = vst [vmem:[#allocation38_spill] sm:$0xff] %v7699_v46  ;;  %v7749_v29 = vld [vmem:[%s7481_s23 + $0x190] sm:$0xff]  ;;  %v7752_v21 = vld [vmem:[%s7481_s23 + $0x198] sm:$0xff]  ;;  %v7759_v28 = vld [vmem:[%s7481_s23 + $0x1a0] sm:$0xff] }
  0x7c   : > { %11669 = vst [vmem:[#allocation39_spill] sm:$0xff] %v7702_v38  ;;  %v7762_v20 = vld [vmem:[%s7481_s23 + $0x1a8] sm:$0xff]  ;;  %v7769_v27 = vld [vmem:[%s7481_s23 + $0x1b0] sm:$0xff]  ;;  %v7772_v16 = vld [vmem:[%s7481_s23 + $0x1b8] sm:$0xff] }
  0x7d   : > { %11670 = vst [vmem:[#allocation40_spill] sm:$0xff] %v7709_v45  ;;  %v7779_v26 = vld [vmem:[%s7481_s23 + $0x1c0] sm:$0xff]  ;;  %v7782_v15 = vld [vmem:[%s7481_s23 + $0x1c8] sm:$0xff]  ;;  %v7789_v14 = vld [vmem:[%s7481_s23 + $0x1d0] sm:$0xff] }
  0x7e   : > { %11671 = vst [vmem:[#allocation41_spill] sm:$0xff] %v7712_v35  ;;  %v7799_v13 = vld [vmem:[%s7481_s23 + $0x1e0] sm:$0xff]  ;;  %v7809_v9 = vld [vmem:[%s7481_s23 + $0x1f0] sm:$0xff] }
  0x7f   : > { %11672 = vst [vmem:[#allocation42_spill] sm:$0xff] %v7719_v44  ;;  %v7819_v8 = vld [vmem:[%s7481_s23 + $0x200] sm:$0xff]  ;;  %v7829_v7 = vld [vmem:[%s7481_s23 + $0x210] sm:$0xff] }
  0x80   : > { %11673 = vst [vmem:[#allocation43_spill] sm:$0xff] %v7722_v34  ;;  %v7839_v6 = vld [vmem:[%s7481_s23 + $0x220] sm:$0xff]  ;;  %v7849_v44 = vld [vmem:[%s7481_s23 + $0x230] sm:$0xff] }
  0x81   : > { %11674 = vst [vmem:[#allocation44_spill] sm:$0xff] %v7729_v33  ;;  %v7969_v35 = vld [vmem:[%s7481_s23 + $0x2f0] sm:$0xff] }
  0x82   : > { %11675 = vst [vmem:[#allocation45_spill] sm:$0xff] %v7732_v23  ;;  %v7959_v23 = vld [vmem:[%s7481_s23 + $0x2e0] sm:$0xff] }
  0x83   : > { %11676 = vst [vmem:[#allocation46_spill] sm:$0xff] %v7739_v32  ;;  %v7792_v32 = vld [vmem:[%s7481_s23 + $0x1d8] sm:$0xff] }
  0x84   : > { %11677 = vst [vmem:[#allocation47_spill] sm:$0xff] %v7742_v22  ;;  %v7859_v22 = vld [vmem:[%s7481_s23 + $0x240] sm:$0xff] }
  0x85   : > { %11678 = vst [vmem:[#allocation48_spill] sm:$0xff] %v7749_v29  ;;  %v7802_v29 = vld [vmem:[%s7481_s23 + $0x1e8] sm:$0xff] }
  0x86   : > { %11679 = vst [vmem:[#allocation49_spill] sm:$0xff] %v7752_v21  ;;  %v7869_v21 = vld [vmem:[%s7481_s23 + $0x250] sm:$0xff] }
  0x87   : > { %11680 = vst [vmem:[#allocation50_spill] sm:$0xff] %v7759_v28  ;;  %v7812_v28 = vld [vmem:[%s7481_s23 + $0x1f8] sm:$0xff] }
  0x88   : > { %11681 = vst [vmem:[#allocation51_spill] sm:$0xff] %v7762_v20  ;;  %v7879_v20 = vld [vmem:[%s7481_s23 + $0x260] sm:$0xff] }
  0x89   : > { %11682 = vst [vmem:[#allocation52_spill] sm:$0xff] %v7769_v27  ;;  %v7822_v27 = vld [vmem:[%s7481_s23 + $0x208] sm:$0xff] }
  0x8a   : > { %11683 = vst [vmem:[#allocation53_spill] sm:$0xff] %v7772_v16  ;;  %v7889_v16 = vld [vmem:[%s7481_s23 + $0x270] sm:$0xff] }
  0x8b   : > { %11684 = vst [vmem:[#allocation54_spill] sm:$0xff] %v7779_v26  ;;  %v7832_v26 = vld [vmem:[%s7481_s23 + $0x218] sm:$0xff] }
  0x8c   : > { %11685 = vst [vmem:[#allocation55_spill] sm:$0xff] %v7782_v15  ;;  %v7899_v15 = vld [vmem:[%s7481_s23 + $0x280] sm:$0xff] }
  0x8d   : > { %11686 = vst [vmem:[#allocation56_spill] sm:$0xff] %v7789_v14  ;;  %v7842_v14 = vld [vmem:[%s7481_s23 + $0x228] sm:$0xff] }
  0x8e   : > { %11687 = vst [vmem:[#allocation57_spill] sm:$0xff] %v7792_v32  ;;  %v7909_v32 = vld [vmem:[%s7481_s23 + $0x290] sm:$0xff] }
  0x8f   : > { %11688 = vst [vmem:[#allocation58_spill] sm:$0xff] %v7799_v13  ;;  %v7852_v13 = vld [vmem:[%s7481_s23 + $0x238] sm:$0xff] }
  0x90   : > { %11689 = vst [vmem:[#allocation59_spill] sm:$0xff] %v7802_v29  ;;  %v7919_v29 = vld [vmem:[%s7481_s23 + $0x2a0] sm:$0xff] }
  0x91   : > { %11690 = vst [vmem:[#allocation60_spill] sm:$0xff] %v7809_v9  ;;  %v7862_v9 = vld [vmem:[%s7481_s23 + $0x248] sm:$0xff] }
  0x92   : > { %11691 = vst [vmem:[#allocation61_spill] sm:$0xff] %v7812_v28  ;;  %v7929_v28 = vld [vmem:[%s7481_s23 + $0x2b0] sm:$0xff] }
  0x93   : > { %11692 = vst [vmem:[#allocation62_spill] sm:$0xff] %v7819_v8  ;;  %v7872_v8 = vld [vmem:[%s7481_s23 + $0x258] sm:$0xff] }
  0x94   : > { %11693 = vst [vmem:[#allocation63_spill] sm:$0xff] %v7822_v27  ;;  %v7939_v27 = vld [vmem:[%s7481_s23 + $0x2c0] sm:$0xff] }
  0x95   : > { %11694 = vst [vmem:[#allocation64_spill] sm:$0xff] %v7829_v7  ;;  %v7882_v7 = vld [vmem:[%s7481_s23 + $0x268] sm:$0xff] }
  0x96   : > { %11695 = vst [vmem:[#allocation65_spill] sm:$0xff] %v7832_v26  ;;  %v7949_v26 = vld [vmem:[%s7481_s23 + $0x2d0] sm:$0xff] }
  0x97   : > { %11696 = vst [vmem:[#allocation66_spill] sm:$0xff] %v7839_v6  ;;  %v7892_v6 = vld [vmem:[%s7481_s23 + $0x278] sm:$0xff] }
  0x98   : > { %11697 = vst [vmem:[#allocation67_spill] sm:$0xff] %v7842_v14  ;;  %v7962_v14 = vld [vmem:[%s7481_s23 + $0x2e8] sm:$0xff] }
  0x99   : > { %11698 = vst [vmem:[#allocation68_spill] sm:$0xff] %v7849_v44  ;;  %v7902_v44 = vld [vmem:[%s7481_s23 + $0x288] sm:$0xff] }
  0x9a   : > { %11699 = vst [vmem:[#allocation69_spill] sm:$0xff] %v7852_v13  ;;  %v11729_v13 = vunpack.c.l.bf16 %v7514_v1 }
  0x9b   : > { %11700 = vst [vmem:[#allocation70_spill] sm:$0xff] %v7859_v22  ;;  %v7912_v22 = vld [vmem:[%s7481_s23 + $0x298] sm:$0xff] }
  0x9c   : > { %11701 = vst [vmem:[#allocation71_spill] sm:$0xff] %v7862_v9  ;;  %v11731_v9 = vunpack.c.h.bf16 %v7514_v1  ;;  %v11739_v1 = vunpack.c.h.bf16 %v7533_v10 }
  0x9d   : > { %11702 = vst [vmem:[#allocation72_spill] sm:$0xff] %v7869_v21  ;;  %v7922_v21 = vld [vmem:[%s7481_s23 + $0x2a8] sm:$0xff] }
  0x9e   : > { %11703 = vst [vmem:[#allocation73_spill] sm:$0xff] %v7872_v8  ;;  %v11728_v8 = vunpack.c.l.bf16 %v7523_v4 }
  0x9f   : > { %11704 = vst [vmem:[#allocation74_spill] sm:$0xff] %v7879_v20  ;;  %v7932_v20 = vld [vmem:[%s7481_s23 + $0x2b8] sm:$0xff] }
  0xa0   : > { %11705 = vst [vmem:[#allocation75_spill] sm:$0xff] %v7882_v7  ;;  %v7972_v7 = vld [vmem:[%s7481_s23 + $0x2f8] sm:$0xff] }
  0xa1   : > { %11706 = vst [vmem:[#allocation76_spill] sm:$0xff] %v7889_v16  ;;  %v7942_v16 = vld [vmem:[%s7481_s23 + $0x2c8] sm:$0xff] }
  0xa2   : > { %11707 = vst [vmem:[#allocation77_spill] sm:$0xff] %v7892_v6 }
  0xa3   : > { %11708 = vst [vmem:[#allocation78_spill] sm:$0xff] %v7899_v15  ;;  %v7952_v15 = vld [vmem:[%s7481_s23 + $0x2d8] sm:$0xff] }
  0xa4   : > { %11709 = vst [vmem:[#allocation79_spill] sm:$0xff] %v7902_v44 }
  0xa5   : > { %11710 = vst [vmem:[#allocation80_spill] sm:$0xff] %v7909_v32  ;;  %v11725_v32 = vunpack.c.l.bf16 %v7511_v0 }
  0xa6   : > { %11711 = vst [vmem:[#allocation81_spill] sm:$0xff] %v7912_v22  ;;  %v11724_v22 = vunpack.c.l.bf16 %v7520_v3 }
  0xa7   : > { %11712 = vst [vmem:[#allocation82_spill] sm:$0xff] %v7919_v29  ;;  %v11727_v29 = vunpack.c.h.bf16 %v7511_v0  ;;  %v11735_v0 = vunpack.c.h.bf16 %v7517_v2 }
  0xa8   : > { %11713 = vst [vmem:[#allocation83_spill] sm:$0xff] %v7922_v21  ;;  %v11730_v21 = vunpack.c.h.bf16 %v7523_v4  ;;  %v11738_v4 = vunpack.c.h.bf16 %v7546_v17 }
  0xa9   : > { %11714 = vst [vmem:[#allocation84_spill] sm:$0xff] %v7929_v28  ;;  %v11726_v28 = vunpack.c.h.bf16 %v7520_v3  ;;  %v11734_v3 = vunpack.c.h.bf16 %v7526_v5 }
  0xaa   : > { %11715 = vst [vmem:[#allocation85_spill] sm:$0xff] %v7932_v20  ;;  %v1113_v6 = vmax.f32 %v11731_v9, %v11730_v21  ;;  %v1141_v9 = vmax.f32 %v11739_v1, %v11738_v4 }
  0xab   : > { %11716 = vst [vmem:[#allocation86_spill] sm:$0xff] %v7939_v27  ;;  %v1099_v44 = vmax.f32 %v11727_v29, %v11726_v28  ;;  %v1127_v28 = vmax.f32 %v11735_v0, %v11734_v3  ;;  %v11736_v29 = vunpack.c.l.bf16 %v7546_v17 }
  0xac   : > { %11717 = vst [vmem:[#allocation87_spill] sm:$0xff] %v7942_v16  ;;  %v1142_v16 = vrot.slane %v1141_v9, 4 }
  0xad   : > { %11718 = vst [vmem:[#allocation88_spill] sm:$0xff] %v7949_v26  ;;  %v1100_v21 = vrot.slane %v1099_v44, 4 }
  0xae   : > { %11719 = vst [vmem:[#allocation89_spill] sm:$0xff] %v7952_v15  ;;  %v1092_v15 = vmax.f32 %v11725_v32, %v11724_v22  ;;  %v11737_v32 = vunpack.c.l.bf16 %v7533_v10 }
  0xaf   : > { %11720 = vst [vmem:[#allocation90_spill] sm:$0xff] %v7959_v23  ;;  %v1106_v23 = vmax.f32 %v11729_v13, %v11728_v8  ;;  %v1101_v3 = vmax.f32 %v1099_v44, %v1100_v21 }
  0xb0   : > { %11721 = vst [vmem:[#allocation91_spill] sm:$0xff] %v7962_v14  ;;  %v1134_v8 = vmax.f32 %v11737_v32, %v11736_v29  ;;  %v1093_v13 = vrot.slane %v1092_v15, 4  ;;  %v1114_v14 = vrot.slane %v1113_v6, 4  ;;  %v1143_v32 = vmax.f32 %v1141_v9, %v1142_v16 }
  0xb1   : > { %11722 = vst [vmem:[#allocation92_spill] sm:$0xff] %v7969_v35  ;;  %v11733_v35 = vunpack.c.l.bf16 %v7517_v2  ;;  %v1107_v26 = vrot.slane %v1106_v23, 4  ;;  %v1102_v45 = vrot.slane %v1101_v3, 2 }
  0xb2   : > { %11723 = vst [vmem:[#allocation93_spill] sm:$0xff] %v7972_v7  ;;  %v11732_v7 = vunpack.c.l.bf16 %v7526_v5  ;;  %v1135_v5 = vrot.slane %v1134_v8, 4  ;;  %v1094_v2 = vmax.f32 %v1092_v15, %v1093_v13  ;;  %v1115_v27 = vmax.f32 %v1113_v6, %v1114_v14 }
  0xb3   : > { %v1108_v0 = vmax.f32 %v1106_v23, %v1107_v26  ;;  %v1144_v38 = vrot.slane %v1143_v32, 2  ;;  %v1103_v46 = vmax.f32 %v1101_v3, %v1102_v45 }
  0xb4   : > { %v1120_v22 = vmax.f32 %v11733_v35, %v11732_v7  ;;  %v1128_v35 = vrot.slane %v1127_v28, 4  ;;  %v1136_v29 = vmax.f32 %v1134_v8, %v1135_v5  ;;  %v1095_v17 = vrot.slane %v1094_v2, 2 }
  0xb5   : > { %v1109_v10 = vrot.slane %v1108_v0, 2  ;;  %v1116_v4 = vrot.slane %v1115_v27, 2  ;;  %v1145_v6 = vmax.f32 %v1143_v32, %v1144_v38  ;;  %v1104_v26 = vrot.slane %v1103_v46, 1 }
  0xb6   : > { %v1121_v7 = vrot.slane %v1120_v22, 4  ;;  %v1129_v33 = vmax.f32 %v1127_v28, %v1128_v35  ;;  %v1137_v50 = vrot.slane %v1136_v29, 2  ;;  %v1096_v40 = vmax.f32 %v1094_v2, %v1095_v17 }
  0xb7   : > { %v1110_v59 = vmax.f32 %v1108_v0, %v1109_v10  ;;  %v1117_v39 = vmax.f32 %v1115_v27, %v1116_v4  ;;  %v1146_v13 = vrot.slane %v1145_v6, 1  ;;  %v11740_v38 = vunpack.c.l.bf16 %v7549_v18 }
  0xb8   : > { %v1122_v20 = vmax.f32 %v1120_v22, %v1121_v7  ;;  %v1130_v34 = vrot.slane %v1129_v33, 2  ;;  %v1138_v23 = vmax.f32 %v1136_v29, %v1137_v50  ;;  %v1097_v14 = vrot.slane %v1096_v40, 1 }
  0xb9   : > { %v1111_v22 = vrot.slane %v1110_v59, 1  ;;  %v1118_v16 = vrot.slane %v1117_v39, 1  ;;  %v8024_v7 = vmax.f32 %v1103_v46, %v1104_v26  ;;  %v11741_v50 = vunpack.c.l.bf16 %v7536_v11 }
  0xba   : > { %v1123_v1 = vrot.slane %v1122_v20, 2  ;;  %v1131_v44 = vmax.f32 %v1129_v33, %v1130_v34  ;;  %v1139_v9 = vrot.slane %v1138_v23, 1  ;;  %v8022_v21 = vmax.f32 %v1096_v40, %v1097_v14 }
  0xbb   : > { %v8026_v35 = vmax.f32 %v1110_v59, %v1111_v22  ;;  %v8028_v45 = vmax.f32 %v1117_v39, %v1118_v16  ;;  %v8036_v34 = vmax.f32 %v1145_v6, %v1146_v13  ;;  %v1148_v40 = vmax.f32 %v11741_v50, %v11740_v38 }
  0xbc   : > { %v1124_v15 = vmax.f32 %v1122_v20, %v1123_v1  ;;  %v1132_v8 = vrot.slane %v1131_v44, 1  ;;  %v8034_v33 = vmax.f32 %v1138_v23, %v1139_v9  ;;  %v11742_v46 = vunpack.c.h.bf16 %v7549_v18 }
  0xbd   : > { %v11743_v59 = vunpack.c.h.bf16 %v7536_v11  ;;  %v11744_v39 = vunpack.c.l.bf16 %v7552_v19  ;;  %v11745_v2 = vunpack.c.l.bf16 %v7539_v12  ;;  %v11746_v0 = vunpack.c.h.bf16 %v7552_v19 }
  0xbe   : > { %v1125_v28 = vrot.slane %v1124_v15, 1  ;;  %v8032_v27 = vmax.f32 %v1131_v44, %v1132_v8  ;;  %v11747_v29 = vunpack.c.h.bf16 %v7539_v12  ;;  %v11748_v17 = vunpack.c.l.bf16 %v7572_v31 }
  0xbf   : > { %v1155_v5 = vmax.f32 %v11743_v59, %v11742_v46  ;;  %v1162_v3 = vmax.f32 %v11745_v2, %v11744_v39  ;;  %v11749_v10 = vunpack.c.l.bf16 %v7559_v24  ;;  %v11750_v18 = vunpack.c.h.bf16 %v7572_v31 }
  0xc0   : > { %v8030_v20 = vmax.f32 %v1124_v15, %v1125_v28  ;;  %v1169_v32 = vmax.f32 %v11747_v29, %v11746_v0  ;;  %v11751_v11 = vunpack.c.h.bf16 %v7559_v24  ;;  %v11752_v15 = vunpack.c.l.bf16 %v7579_v36 }
  0xc1   : > { %v1176_v4 = vmax.f32 %v11749_v10, %v11748_v17  ;;  %v11753_v44 = vunpack.c.l.bf16 %v7562_v25  ;;  %v11754_v19 = vunpack.c.h.bf16 %v7579_v36  ;;  %v11755_v12 = vunpack.c.h.bf16 %v7562_v25 }
  0xc2   : > { %v1183_v1 = vmax.f32 %v11751_v11, %v11750_v18  ;;  %v1149_v14 = vrot.slane %v1148_v40, 4  ;;  %v1156_v26 = vrot.slane %v1155_v5, 4  ;;  %v1163_v22 = vrot.slane %v1162_v3, 4 }
  0xc3   : > { %v1190_v23 = vmax.f32 %v11753_v44, %v11752_v15  ;;  %v1197_v6 = vmax.f32 %v11755_v12, %v11754_v19  ;;  %v1170_v16 = vrot.slane %v1169_v32, 4  ;;  %v1177_v28 = vrot.slane %v1176_v4, 4 }
  0xc4   : > { %v1184_v8 = vrot.slane %v1183_v1, 4  ;;  %v1150_v24 = vmax.f32 %v1148_v40, %v1149_v14  ;;  %v1157_v13 = vmax.f32 %v1155_v5, %v1156_v26  ;;  %v1164_v38 = vmax.f32 %v1162_v3, %v1163_v22 }
  0xc5   : > { %v1191_v31 = vrot.slane %v1190_v23, 4  ;;  %v1198_v9 = vrot.slane %v1197_v6, 4  ;;  %v1171_v50 = vmax.f32 %v1169_v32, %v1170_v16  ;;  %v1178_v46 = vmax.f32 %v1176_v4, %v1177_v28 }
  0xc6   : > { %v1185_v59 = vmax.f32 %v1183_v1, %v1184_v8  ;;  %v1151_v36 = vrot.slane %v1150_v24, 2  ;;  %v1158_v0 = vrot.slane %v1157_v13, 2  ;;  %v1165_v25 = vrot.slane %v1164_v38, 2 }
  0xc7   : > { %v1192_v39 = vmax.f32 %v1190_v23, %v1191_v31  ;;  %v1199_v2 = vmax.f32 %v1197_v6, %v1198_v9  ;;  %v1172_v29 = vrot.slane %v1171_v50, 2  ;;  %v1179_v17 = vrot.slane %v1178_v46, 2 }
  0xc8   : > { %v1186_v10 = vrot.slane %v1185_v59, 2  ;;  %v1152_v15 = vmax.f32 %v1150_v24, %v1151_v36  ;;  %v1159_v44 = vmax.f32 %v1157_v13, %v1158_v0  ;;  %v1166_v19 = vmax.f32 %v1164_v38, %v1165_v25 }
  0xc9   : > { %v1193_v18 = vrot.slane %v1192_v39, 2  ;;  %v1200_v11 = vrot.slane %v1199_v2, 2  ;;  %v1173_v12 = vmax.f32 %v1171_v50, %v1172_v29  ;;  %v1180_v40 = vmax.f32 %v1178_v46, %v1179_v17 }
  0xca   : > { %v1187_v5 = vmax.f32 %v1185_v59, %v1186_v10  ;;  %v1153_v4 = vrot.slane %v1152_v15, 1  ;;  %v1160_v1 = vrot.slane %v1159_v44, 1  ;;  %v1167_v23 = vrot.slane %v1166_v19, 1 }
  0xcb   : > { %v1194_v3 = vmax.f32 %v1192_v39, %v1193_v18  ;;  %v1201_v32 = vmax.f32 %v1199_v2, %v1200_v11  ;;  %v1174_v6 = vrot.slane %v1173_v12, 1  ;;  %v1181_v14 = vrot.slane %v1180_v40, 1 }
  0xcc   : > { %v1188_v26 = vrot.slane %v1187_v5, 1  ;;  %v8070_v28 = vmax.f32 %v1152_v15, %v1153_v4  ;;  %v8072_v8 = vmax.f32 %v1159_v44, %v1160_v1  ;;  %v8074_v31 = vmax.f32 %v1166_v19, %v1167_v23 }
  0xcd   : > { %v1195_v22 = vrot.slane %v1194_v3, 1  ;;  %v1202_v16 = vrot.slane %v1201_v32, 1  ;;  %v8076_v9 = vmax.f32 %v1173_v12, %v1174_v6  ;;  %v8078_v24 = vmax.f32 %v1180_v40, %v1181_v14 }
  0xce   : > { %v8080_v13 = vmax.f32 %v1187_v5, %v1188_v26  ;;  %v11756_v46 = vunpack.c.l.bf16 %v7582_v37  ;;  %v11757_v59 = vunpack.c.l.bf16 %v7569_v30  ;;  %v11758_v2 = vunpack.c.h.bf16 %v7582_v37 }
  0xcf   : > { %v8082_v38 = vmax.f32 %v1194_v3, %v1195_v22  ;;  %v8084_v50 = vmax.f32 %v1201_v32, %v1202_v16  ;;  %v11759_v36 = vunpack.c.h.bf16 %v7569_v30  ;;  %v11760_v25 = vunpack.c.l.bf16 %v7602_v49 }
  0xd0   : > { %v1204_v39 = vmax.f32 %v11757_v59, %v11756_v46  ;;  %v11761_v29 = vunpack.c.l.bf16 %v7589_v42  ;;  %v11762_v10 = vunpack.c.h.bf16 %v7602_v49  ;;  %v11763_v18 = vunpack.c.h.bf16 %v7589_v42 }
  0xd1   : > { %v1211_v0 = vmax.f32 %v11759_v36, %v11758_v2  ;;  %v11764_v15 = vunpack.c.l.bf16 %v7609_v54  ;;  %v11765_v44 = vunpack.c.l.bf16 %v7592_v43  ;;  %v11766_v37 = vunpack.c.h.bf16 %v7609_v54 }
  0xd2   : > { %v1218_v17 = vmax.f32 %v11761_v29, %v11760_v25  ;;  %v1225_v11 = vmax.f32 %v11763_v18, %v11762_v10  ;;  %v11767_v30 = vunpack.c.h.bf16 %v7592_v43  ;;  %v11768_v40 = vunpack.c.l.bf16 %v7612_v55 }
  0xd3   : > { %v1232_v19 = vmax.f32 %v11765_v44, %v11764_v15  ;;  %v11769_v5 = vunpack.c.l.bf16 %v7599_v48  ;;  %v11770_v49 = vunpack.c.h.bf16 %v7612_v55  ;;  %v11771_v42 = vunpack.c.h.bf16 %v7599_v48 }
  0xd4   : > { %v1239_v12 = vmax.f32 %v11767_v30, %v11766_v37  ;;  %v1205_v4 = vrot.slane %v1204_v39, 4  ;;  %v1212_v1 = vrot.slane %v1211_v0, 4  ;;  %v1219_v23 = vrot.slane %v1218_v17, 4 }
  0xd5   : > { %v1246_v3 = vmax.f32 %v11769_v5, %v11768_v40  ;;  %v1253_v32 = vmax.f32 %v11771_v42, %v11770_v49  ;;  %v1226_v6 = vrot.slane %v1225_v11, 4  ;;  %v1233_v14 = vrot.slane %v1232_v19, 4 }
  0xd6   : > { %v1240_v26 = vrot.slane %v1239_v12, 4  ;;  %v1206_v43 = vmax.f32 %v1204_v39, %v1205_v4  ;;  %v1213_v16 = vmax.f32 %v1211_v0, %v1212_v1  ;;  %v1220_v46 = vmax.f32 %v1218_v17, %v1219_v23 }
  0xd7   : > { %v1247_v54 = vrot.slane %v1246_v3, 4  ;;  %v1254_v22 = vrot.slane %v1253_v32, 4  ;;  %v1227_v59 = vmax.f32 %v1225_v11, %v1226_v6  ;;  %v1234_v2 = vmax.f32 %v1232_v19, %v1233_v14 }
  0xd8   : > { %v1241_v36 = vmax.f32 %v1239_v12, %v1240_v26  ;;  %v1207_v55 = vrot.slane %v1206_v43, 2  ;;  %v1214_v10 = vrot.slane %v1213_v16, 2  ;;  %v1221_v48 = vrot.slane %v1220_v46, 2 }
  0xd9   : > { %v1248_v25 = vmax.f32 %v1246_v3, %v1247_v54  ;;  %v1255_v29 = vmax.f32 %v1253_v32, %v1254_v22  ;;  %v1228_v18 = vrot.slane %v1227_v59, 2  ;;  %v1235_v15 = vrot.slane %v1234_v2, 2 }
  0xda   : > { %v1242_v44 = vrot.slane %v1241_v36, 2  ;;  %v1208_v40 = vmax.f32 %v1206_v43, %v1207_v55  ;;  %v1215_v5 = vmax.f32 %v1213_v16, %v1214_v10  ;;  %v1222_v49 = vmax.f32 %v1220_v46, %v1221_v48 }
  0xdb   : > { %v1249_v37 = vrot.slane %v1248_v25, 2  ;;  %v1256_v30 = vrot.slane %v1255_v29, 2  ;;  %v1229_v42 = vmax.f32 %v1227_v59, %v1228_v18  ;;  %v1236_v39 = vmax.f32 %v1234_v2, %v1235_v15 }
  0xdc   : > { %v1243_v0 = vmax.f32 %v1241_v36, %v1242_v44  ;;  %v1209_v19 = vrot.slane %v1208_v40, 1  ;;  %v1216_v12 = vrot.slane %v1215_v5, 1  ;;  %v1223_v3 = vrot.slane %v1222_v49, 1 }
  0xdd   : > { %v1250_v17 = vmax.f32 %v1248_v25, %v1249_v37  ;;  %v1257_v11 = vmax.f32 %v1255_v29, %v1256_v30  ;;  %v1230_v32 = vrot.slane %v1229_v42, 1  ;;  %v1237_v4 = vrot.slane %v1236_v39, 1 }
  0xde   : > { %v1244_v1 = vrot.slane %v1243_v0, 1  ;;  %v8118_v14 = vmax.f32 %v1208_v40, %v1209_v19  ;;  %v8120_v26 = vmax.f32 %v1215_v5, %v1216_v12  ;;  %v8122_v54 = vmax.f32 %v1222_v49, %v1223_v3 }
  0xdf   : > { %v1251_v23 = vrot.slane %v1250_v17, 1  ;;  %v1258_v6 = vrot.slane %v1257_v11, 1  ;;  %v8124_v22 = vmax.f32 %v1229_v42, %v1230_v32  ;;  %v8126_v43 = vmax.f32 %v1236_v39, %v1237_v4 }
  0xe0   : > { %v8128_v16 = vmax.f32 %v1243_v0, %v1244_v1  ;;  %v11772_v2 = vunpack.c.l.bf16 %v7632_v57  ;;  %v11773_v36 = vunpack.c.l.bf16 %v7619_v60  ;;  %v11774_v29 = vunpack.c.h.bf16 %v7632_v57 }
  0xe1   : > { %v8130_v46 = vmax.f32 %v1250_v17, %v1251_v23  ;;  %v8132_v59 = vmax.f32 %v1257_v11, %v1258_v6  ;;  %v11775_v55 = vunpack.c.h.bf16 %v7619_v60  ;;  %v11776_v48 = vunpack.c.l.bf16 %v7639_v63 }
  0xe2   : > { %v1260_v25 = vmax.f32 %v11773_v36, %v11772_v2  ;;  %v11777_v18 = vunpack.c.l.bf16 %v7622_v61  ;;  %v11778_v44 = vunpack.c.h.bf16 %v7639_v63  ;;  %v11779_v37 = vunpack.c.h.bf16 %v7622_v61 }
  0xe3   : > { %v1267_v10 = vmax.f32 %v11775_v55, %v11774_v29  ;;  %v11780_v40 = vunpack.c.l.bf16 %v7642_v56  ;;  %v11781_v5 = vunpack.c.l.bf16 %v7629_v47  ;;  %v11782_v57 = vunpack.c.h.bf16 %v7642_v56 }
  0xe4   : > { %v1274_v15 = vmax.f32 %v11777_v18, %v11776_v48  ;;  %v1281_v30 = vmax.f32 %v11779_v37, %v11778_v44  ;;  %v11783_v60 = vunpack.c.h.bf16 %v7629_v47  ;;  %v11784_v39 = vunpack.c.l.bf16 %v7662_v52 }
  0xe5   : > { %v1288_v49 = vmax.f32 %v11781_v5, %v11780_v40  ;;  %v11785_v0 = vunpack.c.l.bf16 %v7649_v58  ;;  %v11786_v63 = vunpack.c.h.bf16 %v7662_v52  ;;  %v11787_v61 = vunpack.c.h.bf16 %v7649_v58 }
  0xe6   : > { %v1295_v42 = vmax.f32 %v11783_v60, %v11782_v57  ;;  %v1261_v19 = vrot.slane %v1260_v25, 4  ;;  %v1268_v12 = vrot.slane %v1267_v10, 4  ;;  %v1275_v3 = vrot.slane %v1274_v15, 4 }
  0xe7   : > { %v1302_v17 = vmax.f32 %v11785_v0, %v11784_v39  ;;  %v1309_v11 = vmax.f32 %v11787_v61, %v11786_v63  ;;  %v1282_v32 = vrot.slane %v1281_v30, 4  ;;  %v1289_v4 = vrot.slane %v1288_v49, 4 }
  0xe8   : > { %v1296_v1 = vrot.slane %v1295_v42, 4  ;;  %v1262_v47 = vmax.f32 %v1260_v25, %v1261_v19  ;;  %v1269_v6 = vmax.f32 %v1267_v10, %v1268_v12  ;;  %v1276_v2 = vmax.f32 %v1274_v15, %v1275_v3 }
  0xe9   : > { %v1303_v56 = vrot.slane %v1302_v17, 4  ;;  %v1310_v23 = vrot.slane %v1309_v11, 4  ;;  %v1283_v36 = vmax.f32 %v1281_v30, %v1282_v32  ;;  %v1290_v29 = vmax.f32 %v1288_v49, %v1289_v4 }
  0xea   : > { %v1297_v55 = vmax.f32 %v1295_v42, %v1296_v1  ;;  %v1263_v52 = vrot.slane %v1262_v47, 2  ;;  %v1270_v44 = vrot.slane %v1269_v6, 2  ;;  %v1277_v58 = vrot.slane %v1276_v2, 2 }
  0xeb   : > { %v1304_v48 = vmax.f32 %v1302_v17, %v1303_v56  ;;  %v1311_v18 = vmax.f32 %v1309_v11, %v1310_v23  ;;  %v1284_v37 = vrot.slane %v1283_v36, 2  ;;  %v1291_v40 = vrot.slane %v1290_v29, 2 }
  0xec   : > { %v1298_v5 = vrot.slane %v1297_v55, 2  ;;  %v1264_v39 = vmax.f32 %v1262_v47, %v1263_v52  ;;  %v1271_v0 = vmax.f32 %v1269_v6, %v1270_v44  ;;  %v1278_v63 = vmax.f32 %v1276_v2, %v1277_v58 }
  0xed   : > { %v1305_v57 = vrot.slane %v1304_v48, 2  ;;  %v1312_v60 = vrot.slane %v1311_v18, 2  ;;  %v1285_v61 = vmax.f32 %v1283_v36, %v1284_v37  ;;  %v1292_v25 = vmax.f32 %v1290_v29, %v1291_v40 }
  0xee   : > { %v1299_v10 = vmax.f32 %v1297_v55, %v1298_v5  ;;  %v1265_v49 = vrot.slane %v1264_v39, 1  ;;  %v1272_v42 = vrot.slane %v1271_v0, 1  ;;  %v1279_v17 = vrot.slane %v1278_v63, 1 }
  0xef   : > { %v1306_v15 = vmax.f32 %v1304_v48, %v1305_v57  ;;  %v1313_v30 = vmax.f32 %v1311_v18, %v1312_v60  ;;  %v1286_v11 = vrot.slane %v1285_v61, 1  ;;  %v1293_v19 = vrot.slane %v1292_v25, 1 }
  0xf0   : > { %v1300_v12 = vrot.slane %v1299_v10, 1  ;;  %v8166_v4 = vmax.f32 %v1264_v39, %v1265_v49  ;;  %v8168_v1 = vmax.f32 %v1271_v0, %v1272_v42  ;;  %v8170_v56 = vmax.f32 %v1278_v63, %v1279_v17  ;;  %v11800_v39 = vld [vmem:[#allocation37_spill] sm:$0xff]  ;;  %v11802_v63 = vld [vmem:[#allocation34_spill] sm:$0xff]  ;;  %v11808_v49 = vld [vmem:[#allocation35_spill] sm:$0xff] }
  0xf1   : > { %v1307_v3 = vrot.slane %v1306_v15, 1  ;;  %v1314_v32 = vrot.slane %v1313_v30, 1  ;;  %v8172_v23 = vmax.f32 %v1285_v61, %v1286_v11  ;;  %v8174_v47 = vmax.f32 %v1292_v25, %v1293_v19 }
  0xf2   : > { %v8176_v6 = vmax.f32 %v1299_v10, %v1300_v12  ;;  %v11792_v29 = vunpack.c.l.bf16 %v7669_v62  ;;  %v11793_v55 = vunpack.c.l.bf16 %v7652_v53  ;;  %v11794_v18 = vunpack.c.h.bf16 %v7669_v62 }
  0xf3   : > { %11788 = vst [vmem:[#allocation94_spill] sm:$0xff] %v8174_v47  ;;  %v8178_v2 = vmax.f32 %v1306_v15, %v1307_v3  ;;  %v8180_v36 = vmax.f32 %v1313_v30, %v1314_v32  ;;  %v11795_v52 = vunpack.c.h.bf16 %v7652_v53  ;;  %v11796_v58 = vunpack.c.l.bf16 %v7672_v41  ;;  %v11806_v15 = vld [vmem:[#allocation38_spill] sm:$0xff] }
  0xf4   : > { %11789 = vst [vmem:[#allocation95_spill] sm:$0xff] %v8176_v6  ;;  %v1316_v48 = vmax.f32 %v11793_v55, %v11792_v29  ;;  %v11797_v37 = vunpack.c.l.bf16 %v7659_v51  ;;  %v11798_v5 = vunpack.c.h.bf16 %v7672_v41  ;;  %v11799_v57 = vunpack.c.h.bf16 %v7659_v51 }
  0xf5   : > { %11790 = vst [vmem:[#allocation96_spill] sm:$0xff] %v8178_v2  ;;  %v1323_v44 = vmax.f32 %v11795_v52, %v11794_v18  ;;  %v11801_v0 = vunpack.c.l.bf16 %v11800_v39  ;;  %v11803_v61 = vunpack.c.l.bf16 %v11802_v63  ;;  %v11804_v62 = vunpack.c.h.bf16 %v11800_v39 }
  0xf6   : > { %11791 = vst [vmem:[#allocation97_spill] sm:$0xff] %v8180_v36  ;;  %v1330_v40 = vmax.f32 %v11797_v37, %v11796_v58  ;;  %v1337_v60 = vmax.f32 %v11799_v57, %v11798_v5  ;;  %v11805_v53 = vunpack.c.h.bf16 %v11802_v63  ;;  %v11807_v30 = vunpack.c.l.bf16 %v11806_v15 }
  0xf7   : > { %v1344_v25 = vmax.f32 %v11803_v61, %v11801_v0  ;;  %v11809_v42 = vunpack.c.l.bf16 %v11808_v49  ;;  %v11810_v41 = vunpack.c.h.bf16 %v11806_v15  ;;  %v11811_v51 = vunpack.c.h.bf16 %v11808_v49 }
  0xf8   : > { %v1351_v10 = vmax.f32 %v11805_v53, %v11804_v62  ;;  %v1317_v19 = vrot.slane %v1316_v48, 4  ;;  %v1324_v12 = vrot.slane %v1323_v44, 4  ;;  %v1331_v3 = vrot.slane %v1330_v40, 4 }
  0xf9   : > { %v1358_v17 = vmax.f32 %v11809_v42, %v11807_v30  ;;  %v1365_v11 = vmax.f32 %v11811_v51, %v11810_v41  ;;  %v1338_v32 = vrot.slane %v1337_v60, 4  ;;  %v1345_v29 = vrot.slane %v1344_v25, 4 }
  0xfa   : > { %v1352_v55 = vrot.slane %v1351_v10, 4  ;;  %v1318_v58 = vmax.f32 %v1316_v48, %v1317_v19  ;;  %v1325_v37 = vmax.f32 %v1323_v44, %v1324_v12  ;;  %v1332_v5 = vmax.f32 %v1330_v40, %v1331_v3 }
  0xfb   : > { %v1359_v18 = vrot.slane %v1358_v17, 4  ;;  %v1366_v52 = vrot.slane %v1365_v11, 4  ;;  %v1339_v57 = vmax.f32 %v1337_v60, %v1338_v32  ;;  %v1346_v39 = vmax.f32 %v1344_v25, %v1345_v29 }
  0xfc   : > { %v1353_v0 = vmax.f32 %v1351_v10, %v1352_v55  ;;  %v1319_v62 = vrot.slane %v1318_v58, 2  ;;  %v1326_v53 = vrot.slane %v1325_v37, 2  ;;  %v1333_v15 = vrot.slane %v1332_v5, 2 }
  0xfd   : > { %v1360_v63 = vmax.f32 %v1358_v17, %v1359_v18  ;;  %v1367_v61 = vmax.f32 %v1365_v11, %v1366_v52  ;;  %v1340_v30 = vrot.slane %v1339_v57, 2  ;;  %v1347_v49 = vrot.slane %v1346_v39, 2 }
  0xfe   : > { %v1354_v42 = vrot.slane %v1353_v0, 2  ;;  %v1320_v36 = vmax.f32 %v1318_v58, %v1319_v62  ;;  %v1327_v2 = vmax.f32 %v1325_v37, %v1326_v53  ;;  %v1334_v6 = vmax.f32 %v1332_v5, %v1333_v15  ;;  %v11828_v15 = vld [vmem:[#allocation40_spill] sm:$0xff] }
  0xff   : > { %v1361_v41 = vrot.slane %v1360_v63, 2  ;;  %v1368_v51 = vrot.slane %v1367_v61, 2  ;;  %v1341_v47 = vmax.f32 %v1339_v57, %v1340_v30  ;;  %v1348_v48 = vmax.f32 %v1346_v39, %v1347_v49  ;;  %v11820_v39 = vld [vmem:[#allocation39_spill] sm:$0xff] }
 0x100   : > { %v1355_v44 = vmax.f32 %v1353_v0, %v1354_v42  ;;  %v1321_v25 = vrot.slane %v1320_v36, 1  ;;  %v1328_v10 = vrot.slane %v1327_v2, 1  ;;  %v1335_v17 = vrot.slane %v1334_v6, 1 }
 0x101   : > { %v1362_v40 = vmax.f32 %v1360_v63, %v1361_v41  ;;  %v1369_v60 = vmax.f32 %v1367_v61, %v1368_v51  ;;  %v1342_v11 = vrot.slane %v1341_v47, 1  ;;  %v1349_v19 = vrot.slane %v1348_v48, 1  ;;  %v11822_v63 = vld [vmem:[#allocation36_spill] sm:$0xff] }
 0x102   : > { %v1356_v12 = vrot.slane %v1355_v44, 1  ;;  %v8214_v29 = vmax.f32 %v1320_v36, %v1321_v25  ;;  %v8216_v55 = vmax.f32 %v1327_v2, %v1328_v10  ;;  %v8218_v18 = vmax.f32 %v1334_v6, %v1335_v17 }
 0x103   : > { %v1363_v3 = vrot.slane %v1362_v40, 1  ;;  %v1370_v32 = vrot.slane %v1369_v60, 1  ;;  %v8220_v52 = vmax.f32 %v1341_v47, %v1342_v11  ;;  %v8222_v58 = vmax.f32 %v1348_v48, %v1349_v19  ;;  %v11826_v47 = vld [vmem:[#allocation43_spill] sm:$0xff]  ;;  %v11832_v48 = vld [vmem:[#allocation44_spill] sm:$0xff]  ;;  %v11838_v19 = vld [vmem:[#allocation45_spill] sm:$0xff] }
 0x104   : > { %11812 = vst [vmem:[#allocation37_spill] sm:$0xff] %v8214_v29  ;;  %v8224_v37 = vmax.f32 %v1355_v44, %v1356_v12  ;;  %v11821_v0 = vunpack.c.l.bf16 %v11820_v39  ;;  %v11823_v61 = vunpack.c.l.bf16 %v11822_v63  ;;  %v11824_v2 = vunpack.c.h.bf16 %v11820_v39 }
 0x105   : > { %11813 = vst [vmem:[#allocation34_spill] sm:$0xff] %v8216_v55  ;;  %v8226_v5 = vmax.f32 %v1362_v40, %v1363_v3  ;;  %v8228_v57 = vmax.f32 %v1369_v60, %v1370_v32  ;;  %v11825_v6 = vunpack.c.h.bf16 %v11822_v63  ;;  %v11827_v53 = vunpack.c.l.bf16 %v11826_v47  ;;  %v11834_v40 = vld [vmem:[#allocation41_spill] sm:$0xff]  ;;  %v11840_v3 = vld [vmem:[#allocation42_spill] sm:$0xff] }
 0x106   : > { %11814 = vst [vmem:[#allocation38_spill] sm:$0xff] %v8218_v18  ;;  %v1372_v36 = vmax.f32 %v11823_v61, %v11821_v0  ;;  %v11829_v30 = vunpack.c.l.bf16 %v11828_v15  ;;  %v11830_v42 = vunpack.c.h.bf16 %v11826_v47  ;;  %v11831_v41 = vunpack.c.h.bf16 %v11828_v15 }
 0x107   : > { %11815 = vst [vmem:[#allocation35_spill] sm:$0xff] %v8220_v52  ;;  %v1379_v62 = vmax.f32 %v11825_v6, %v11824_v2  ;;  %v11833_v44 = vunpack.c.l.bf16 %v11832_v48  ;;  %v11835_v60 = vunpack.c.l.bf16 %v11834_v40  ;;  %v11836_v10 = vunpack.c.h.bf16 %v11832_v48 }
 0x108   : > { %11816 = vst [vmem:[#allocation98_spill] sm:$0xff] %v8222_v58  ;;  %v1386_v49 = vmax.f32 %v11829_v30, %v11827_v53  ;;  %v1393_v51 = vmax.f32 %v11831_v41, %v11830_v42  ;;  %v11837_v17 = vunpack.c.h.bf16 %v11834_v40  ;;  %v11839_v12 = vunpack.c.l.bf16 %v11838_v19 }
 0x109   : > { %11817 = vst [vmem:[#allocation99_spill] sm:$0xff] %v8224_v37  ;;  %v1400_v25 = vmax.f32 %v11835_v60, %v11833_v44  ;;  %v11841_v32 = vunpack.c.l.bf16 %v11840_v3  ;;  %v11842_v0 = vunpack.c.h.bf16 %v11838_v19  ;;  %v11843_v63 = vunpack.c.h.bf16 %v11840_v3 }
 0x10a   : > { %11818 = vst [vmem:[#allocation100_spill] sm:$0xff] %v8226_v5  ;;  %v1407_v11 = vmax.f32 %v11837_v17, %v11836_v10  ;;  %v1373_v2 = vrot.slane %v1372_v36, 4  ;;  %v1380_v6 = vrot.slane %v1379_v62, 4  ;;  %v1387_v47 = vrot.slane %v1386_v49, 4 }
 0x10b   : > { %11819 = vst [vmem:[#allocation101_spill] sm:$0xff] %v8228_v57  ;;  %v1414_v39 = vmax.f32 %v11841_v32, %v11839_v12  ;;  %v1421_v61 = vmax.f32 %v11843_v63, %v11842_v0  ;;  %v1394_v53 = vrot.slane %v1393_v51, 4  ;;  %v1401_v15 = vrot.slane %v1400_v25, 4 }
 0x10c   : > { %v1408_v30 = vrot.slane %v1407_v11, 4  ;;  %v1374_v48 = vmax.f32 %v1372_v36, %v1373_v2  ;;  %v1381_v44 = vmax.f32 %v1379_v62, %v1380_v6  ;;  %v1388_v40 = vmax.f32 %v1386_v49, %v1387_v47 }
 0x10d   : > { %v1415_v42 = vrot.slane %v1414_v39, 4  ;;  %v1422_v41 = vrot.slane %v1421_v61, 4  ;;  %v1395_v60 = vmax.f32 %v1393_v51, %v1394_v53  ;;  %v1402_v10 = vmax.f32 %v1400_v25, %v1401_v15 }
 0x10e   : > { %v1409_v17 = vmax.f32 %v1407_v11, %v1408_v30  ;;  %v1375_v19 = vrot.slane %v1374_v48, 2  ;;  %v1382_v57 = vrot.slane %v1381_v44, 2  ;;  %v1389_v3 = vrot.slane %v1388_v40, 2 }
 0x10f   : > { %v1416_v12 = vmax.f32 %v1414_v39, %v1415_v42  ;;  %v1423_v32 = vmax.f32 %v1421_v61, %v1422_v41  ;;  %v1396_v0 = vrot.slane %v1395_v60, 2  ;;  %v1403_v63 = vrot.slane %v1402_v10, 2 }
 0x110   : > { %v1410_v5 = vrot.slane %v1409_v17, 2  ;;  %v1376_v52 = vmax.f32 %v1374_v48, %v1375_v19  ;;  %v1383_v18 = vmax.f32 %v1381_v44, %v1382_v57  ;;  %v1390_v55 = vmax.f32 %v1388_v40, %v1389_v3  ;;  %v11852_v48 = vld [vmem:[#allocation49_spill] sm:$0xff]  ;;  %v11854_v40 = vld [vmem:[#allocation46_spill] sm:$0xff] }
 0x111   : > { %v1417_v37 = vrot.slane %v1416_v12, 2  ;;  %v1424_v58 = vrot.slane %v1423_v32, 2  ;;  %v1397_v29 = vmax.f32 %v1395_v60, %v1396_v0  ;;  %v1404_v36 = vmax.f32 %v1402_v10, %v1403_v63 }
 0x112   : > { %v1411_v62 = vmax.f32 %v1409_v17, %v1410_v5  ;;  %v1377_v25 = vrot.slane %v1376_v52, 1  ;;  %v1384_v11 = vrot.slane %v1383_v18, 1  ;;  %v1391_v39 = vrot.slane %v1390_v55, 1 }
 0x113   : > { %v1418_v49 = vmax.f32 %v1416_v12, %v1417_v37  ;;  %v1425_v51 = vmax.f32 %v1423_v32, %v1424_v58  ;;  %v1398_v61 = vrot.slane %v1397_v29, 1  ;;  %v1405_v2 = vrot.slane %v1404_v36, 1  ;;  %v11860_v12 = vld [vmem:[#allocation47_spill] sm:$0xff] }
 0x114   : > { %v1412_v6 = vrot.slane %v1411_v62, 1  ;;  %v8262_v15 = vmax.f32 %v1376_v52, %v1377_v25  ;;  %v8264_v30 = vmax.f32 %v1383_v18, %v1384_v11  ;;  %v8266_v42 = vmax.f32 %v1390_v55, %v1391_v39 }
 0x115   : > { %v1419_v47 = vrot.slane %v1418_v49, 1  ;;  %v1426_v53 = vrot.slane %v1425_v51, 1  ;;  %v8268_v57 = vmax.f32 %v1397_v29, %v1398_v61  ;;  %v8270_v41 = vmax.f32 %v1404_v36, %v1405_v2  ;;  %v11858_v29 = vld [vmem:[#allocation50_spill] sm:$0xff]  ;;  %v11864_v36 = vld [vmem:[#allocation51_spill] sm:$0xff] }
 0x116   : > { %11844 = vst [vmem:[#allocation39_spill] sm:$0xff] %v8262_v15  ;;  %v8272_v37 = vmax.f32 %v1411_v62, %v1412_v6  ;;  %v11853_v44 = vunpack.c.l.bf16 %v11852_v48  ;;  %v11855_v60 = vunpack.c.l.bf16 %v11854_v40  ;;  %v11856_v18 = vunpack.c.h.bf16 %v11852_v48  ;;  %v11870_v2 = vld [vmem:[#allocation55_spill] sm:$0xff] }
 0x117   : > { %11845 = vst [vmem:[#allocation36_spill] sm:$0xff] %v8264_v30  ;;  %v8274_v58 = vmax.f32 %v1418_v49, %v1419_v47  ;;  %v8276_v5 = vmax.f32 %v1425_v51, %v1426_v53  ;;  %v11857_v55 = vunpack.c.h.bf16 %v11854_v40  ;;  %v11859_v17 = vunpack.c.l.bf16 %v11858_v29  ;;  %v11866_v49 = vld [vmem:[#allocation48_spill] sm:$0xff] }
 0x118   : > { %11846 = vst [vmem:[#allocation43_spill] sm:$0xff] %v8266_v42  ;;  %v1428_v52 = vmax.f32 %v11855_v60, %v11853_v44  ;;  %v11861_v32 = vunpack.c.l.bf16 %v11860_v12  ;;  %v11862_v3 = vunpack.c.h.bf16 %v11858_v29  ;;  %v11863_v0 = vunpack.c.h.bf16 %v11860_v12  ;;  %v11872_v47 = vld [vmem:[#allocation52_spill] sm:$0xff] }
 0x119   : > { %11847 = vst [vmem:[#allocation40_spill] sm:$0xff] %v8268_v57  ;;  %v1435_v10 = vmax.f32 %v11857_v55, %v11856_v18  ;;  %v11865_v62 = vunpack.c.l.bf16 %v11864_v36  ;;  %v11867_v51 = vunpack.c.l.bf16 %v11866_v49  ;;  %v11868_v11 = vunpack.c.h.bf16 %v11864_v36 }
 0x11a   : > { %11848 = vst [vmem:[#allocation44_spill] sm:$0xff] %v8270_v41  ;;  %v1442_v19 = vmax.f32 %v11861_v32, %v11859_v17  ;;  %v1449_v63 = vmax.f32 %v11863_v0, %v11862_v3  ;;  %v11869_v39 = vunpack.c.h.bf16 %v11866_v49  ;;  %v11871_v6 = vunpack.c.l.bf16 %v11870_v2 }
 0x11b   : > { %11849 = vst [vmem:[#allocation41_spill] sm:$0xff] %v8272_v37  ;;  %v1456_v25 = vmax.f32 %v11867_v51, %v11865_v62  ;;  %v11873_v53 = vunpack.c.l.bf16 %v11872_v47  ;;  %v11874_v44 = vunpack.c.h.bf16 %v11870_v2  ;;  %v11875_v40 = vunpack.c.h.bf16 %v11872_v47 }
 0x11c   : > { %11850 = vst [vmem:[#allocation45_spill] sm:$0xff] %v8274_v58  ;;  %v1463_v61 = vmax.f32 %v11869_v39, %v11868_v11  ;;  %v1429_v18 = vrot.slane %v1428_v52, 4  ;;  %v1436_v55 = vrot.slane %v1435_v10, 4  ;;  %v1443_v29 = vrot.slane %v1442_v19, 4 }
 0x11d   : > { %11851 = vst [vmem:[#allocation42_spill] sm:$0xff] %v8276_v5  ;;  %v1470_v48 = vmax.f32 %v11873_v53, %v11871_v6  ;;  %v1477_v60 = vmax.f32 %v11875_v40, %v11874_v44  ;;  %v1450_v17 = vrot.slane %v1449_v63, 4  ;;  %v1457_v12 = vrot.slane %v1456_v25, 4 }
 0x11e   : > { %v1464_v32 = vrot.slane %v1463_v61, 4  ;;  %v1430_v36 = vmax.f32 %v1428_v52, %v1429_v18  ;;  %v1437_v62 = vmax.f32 %v1435_v10, %v1436_v55  ;;  %v1444_v49 = vmax.f32 %v1442_v19, %v1443_v29 }
 0x11f   : > { %v1471_v3 = vrot.slane %v1470_v48, 4  ;;  %v1478_v0 = vrot.slane %v1477_v60, 4  ;;  %v1451_v51 = vmax.f32 %v1449_v63, %v1450_v17  ;;  %v1458_v11 = vmax.f32 %v1456_v25, %v1457_v12 }
 0x120   : > { %v1465_v39 = vmax.f32 %v1463_v61, %v1464_v32  ;;  %v1431_v2 = vrot.slane %v1430_v36, 2  ;;  %v1438_v5 = vrot.slane %v1437_v62, 2  ;;  %v1445_v47 = vrot.slane %v1444_v49, 2 }
 0x121   : > { %v1472_v6 = vmax.f32 %v1470_v48, %v1471_v3  ;;  %v1479_v53 = vmax.f32 %v1477_v60, %v1478_v0  ;;  %v1452_v44 = vrot.slane %v1451_v51, 2  ;;  %v1459_v40 = vrot.slane %v1458_v11, 2 }
 0x122   : > { %v1466_v58 = vrot.slane %v1465_v39, 2  ;;  %v1432_v57 = vmax.f32 %v1430_v36, %v1431_v2  ;;  %v1439_v42 = vmax.f32 %v1437_v62, %v1438_v5  ;;  %v1446_v30 = vmax.f32 %v1444_v49, %v1445_v47  ;;  %v11884_v36 = vld [vmem:[#allocation56_spill] sm:$0xff]  ;;  %v11886_v49 = vld [vmem:[#allocation53_spill] sm:$0xff] }
 0x123   : > { %v1473_v37 = vrot.slane %v1472_v6, 2  ;;  %v1480_v41 = vrot.slane %v1479_v53, 2  ;;  %v1453_v15 = vmax.f32 %v1451_v51, %v1452_v44  ;;  %v1460_v52 = vmax.f32 %v1458_v11, %v1459_v40 }
 0x124   : > { %v1467_v10 = vmax.f32 %v1465_v39, %v1466_v58  ;;  %v1433_v25 = vrot.slane %v1432_v57, 1  ;;  %v1440_v61 = vrot.slane %v1439_v42, 1  ;;  %v1447_v48 = vrot.slane %v1446_v30, 1 }
 0x125   : > { %v1474_v19 = vmax.f32 %v1472_v6, %v1473_v37  ;;  %v1481_v63 = vmax.f32 %v1479_v53, %v1480_v41  ;;  %v1454_v60 = vrot.slane %v1453_v15, 1  ;;  %v1461_v18 = vrot.slane %v1460_v52, 1  ;;  %v11892_v6 = vld [vmem:[#allocation54_spill] sm:$0xff] }
 0x126   : > { %v1468_v55 = vrot.slane %v1467_v10, 1  ;;  %v8310_v12 = vmax.f32 %v1432_v57, %v1433_v25  ;;  %v8312_v32 = vmax.f32 %v1439_v42, %v1440_v61  ;;  %v8314_v3 = vmax.f32 %v1446_v30, %v1447_v48 }
 0x127   : > { %v1475_v29 = vrot.slane %v1474_v19, 1  ;;  %v1482_v17 = vrot.slane %v1481_v63, 1  ;;  %v8316_v5 = vmax.f32 %v1453_v15, %v1454_v60  ;;  %v8318_v0 = vmax.f32 %v1460_v52, %v1461_v18  ;;  %v11890_v15 = vld [vmem:[#allocation57_spill] sm:$0xff]  ;;  %v11902_v18 = vld [vmem:[#allocation62_spill] sm:$0xff] }
 0x128   : > { %11876 = vst [vmem:[#allocation49_spill] sm:$0xff] %v8310_v12  ;;  %v8320_v37 = vmax.f32 %v1467_v10, %v1468_v55  ;;  %v11885_v62 = vunpack.c.l.bf16 %v11884_v36  ;;  %v11887_v51 = vunpack.c.l.bf16 %v11886_v49  ;;  %v11888_v42 = vunpack.c.h.bf16 %v11884_v36  ;;  %v11896_v52 = vld [vmem:[#allocation61_spill] sm:$0xff] }
 0x129   : > { %11877 = vst [vmem:[#allocation46_spill] sm:$0xff] %v8312_v32  ;;  %v8322_v41 = vmax.f32 %v1474_v19, %v1475_v29  ;;  %v8324_v58 = vmax.f32 %v1481_v63, %v1482_v17  ;;  %v11889_v30 = vunpack.c.h.bf16 %v11886_v49  ;;  %v11891_v39 = vunpack.c.l.bf16 %v11890_v15  ;;  %v11898_v19 = vld [vmem:[#allocation58_spill] sm:$0xff]  ;;  %v11904_v29 = vld [vmem:[#allocation59_spill] sm:$0xff] }
 0x12a   : > { %11878 = vst [vmem:[#allocation50_spill] sm:$0xff] %v8314_v3  ;;  %v1484_v57 = vmax.f32 %v11887_v51, %v11885_v62  ;;  %v11893_v53 = vunpack.c.l.bf16 %v11892_v6  ;;  %v11894_v47 = vunpack.c.h.bf16 %v11890_v15  ;;  %v11895_v44 = vunpack.c.h.bf16 %v11892_v6 }
 0x12b   : > { %11879 = vst [vmem:[#allocation47_spill] sm:$0xff] %v8316_v5  ;;  %v1491_v11 = vmax.f32 %v11889_v30, %v11888_v42  ;;  %v11897_v10 = vunpack.c.l.bf16 %v11896_v52  ;;  %v11899_v63 = vunpack.c.l.bf16 %v11898_v19  ;;  %v11900_v61 = vunpack.c.h.bf16 %v11896_v52 }
 0x12c   : > { %11880 = vst [vmem:[#allocation51_spill] sm:$0xff] %v8318_v0  ;;  %v1498_v2 = vmax.f32 %v11893_v53, %v11891_v39  ;;  %v1505_v40 = vmax.f32 %v11895_v44, %v11894_v47  ;;  %v11901_v48 = vunpack.c.h.bf16 %v11898_v19  ;;  %v11903_v55 = vunpack.c.l.bf16 %v11902_v18 }
 0x12d   : > { %11881 = vst [vmem:[#allocation48_spill] sm:$0xff] %v8320_v37  ;;  %v1512_v25 = vmax.f32 %v11899_v63, %v11897_v10  ;;  %v11905_v17 = vunpack.c.l.bf16 %v11904_v29  ;;  %v11906_v62 = vunpack.c.h.bf16 %v11902_v18  ;;  %v11907_v49 = vunpack.c.h.bf16 %v11904_v29 }
 0x12e   : > { %11882 = vst [vmem:[#allocation55_spill] sm:$0xff] %v8322_v41  ;;  %v1519_v60 = vmax.f32 %v11901_v48, %v11900_v61  ;;  %v1485_v42 = vrot.slane %v1484_v57, 4  ;;  %v1492_v30 = vrot.slane %v1491_v11, 4  ;;  %v1499_v15 = vrot.slane %v1498_v2, 4 }
 0x12f   : > { %11883 = vst [vmem:[#allocation52_spill] sm:$0xff] %v8324_v58  ;;  %v1526_v36 = vmax.f32 %v11905_v17, %v11903_v55  ;;  %v1533_v51 = vmax.f32 %v11907_v49, %v11906_v62  ;;  %v1506_v39 = vrot.slane %v1505_v40, 4  ;;  %v1513_v6 = vrot.slane %v1512_v25, 4 }
 0x130   : > { %v1520_v53 = vrot.slane %v1519_v60, 4  ;;  %v1486_v52 = vmax.f32 %v1484_v57, %v1485_v42  ;;  %v1493_v10 = vmax.f32 %v1491_v11, %v1492_v30  ;;  %v1500_v19 = vmax.f32 %v1498_v2, %v1499_v15 }
 0x131   : > { %v1527_v47 = vrot.slane %v1526_v36, 4  ;;  %v1534_v44 = vrot.slane %v1533_v51, 4  ;;  %v1507_v63 = vmax.f32 %v1505_v40, %v1506_v39  ;;  %v1514_v61 = vmax.f32 %v1512_v25, %v1513_v6 }
 0x132   : > { %v1521_v48 = vmax.f32 %v1519_v60, %v1520_v53  ;;  %v1487_v18 = vrot.slane %v1486_v52, 2  ;;  %v1494_v58 = vrot.slane %v1493_v10, 2  ;;  %v1501_v29 = vrot.slane %v1500_v19, 2 }
 0x133   : > { %v1528_v55 = vmax.f32 %v1526_v36, %v1527_v47  ;;  %v1535_v17 = vmax.f32 %v1533_v51, %v1534_v44  ;;  %v1508_v62 = vrot.slane %v1507_v63, 2  ;;  %v1515_v49 = vrot.slane %v1514_v61, 2 }
 0x134   : > { %v1522_v41 = vrot.slane %v1521_v48, 2  ;;  %v1488_v5 = vmax.f32 %v1486_v52, %v1487_v18  ;;  %v1495_v3 = vmax.f32 %v1493_v10, %v1494_v58  ;;  %v1502_v32 = vmax.f32 %v1500_v19, %v1501_v29  ;;  %v11916_v52 = vld [vmem:[#allocation63_spill] sm:$0xff]  ;;  %v11918_v19 = vld [vmem:[#allocation60_spill] sm:$0xff] }
 0x135   : > { %v1529_v37 = vrot.slane %v1528_v55, 2  ;;  %v1536_v0 = vrot.slane %v1535_v17, 2  ;;  %v1509_v12 = vmax.f32 %v1507_v63, %v1508_v62  ;;  %v1516_v57 = vmax.f32 %v1514_v61, %v1515_v49 }
 0x136   : > { %v1523_v11 = vmax.f32 %v1521_v48, %v1522_v41  ;;  %v1489_v25 = vrot.slane %v1488_v5, 1  ;;  %v1496_v60 = vrot.slane %v1495_v3, 1  ;;  %v1503_v36 = vrot.slane %v1502_v32, 1 }
 0x137   : > { %v1530_v2 = vmax.f32 %v1528_v55, %v1529_v37  ;;  %v1537_v40 = vmax.f32 %v1535_v17, %v1536_v0  ;;  %v1510_v51 = vrot.slane %v1509_v12, 1  ;;  %v1517_v42 = vrot.slane %v1516_v57, 1  ;;  %v11924_v55 = vld [vmem:[#allocation64_spill] sm:$0xff] }
 0x138   : > { %v1524_v30 = vrot.slane %v1523_v11, 1  ;;  %v8358_v6 = vmax.f32 %v1488_v5, %v1489_v25  ;;  %v8360_v53 = vmax.f32 %v1495_v3, %v1496_v60  ;;  %v8362_v47 = vmax.f32 %v1502_v32, %v1503_v36 }
 0x139   : > { %v1531_v15 = vrot.slane %v1530_v2, 1  ;;  %v1538_v39 = vrot.slane %v1537_v40, 1  ;;  %v8364_v58 = vmax.f32 %v1509_v12, %v1510_v51  ;;  %v8366_v44 = vmax.f32 %v1516_v57, %v1517_v42  ;;  %v11922_v12 = vld [vmem:[#allocation67_spill] sm:$0xff]  ;;  %v11928_v57 = vld [vmem:[#allocation68_spill] sm:$0xff]  ;;  %v11934_v42 = vld [vmem:[#allocation69_spill] sm:$0xff] }
 0x13a   : > { %11908 = vst [vmem:[#allocation56_spill] sm:$0xff] %v8358_v6  ;;  %v8368_v37 = vmax.f32 %v1523_v11, %v1524_v30  ;;  %v11917_v10 = vunpack.c.l.bf16 %v11916_v52  ;;  %v11919_v63 = vunpack.c.l.bf16 %v11918_v19  ;;  %v11920_v3 = vunpack.c.h.bf16 %v11916_v52 }
 0x13b   : > { %11909 = vst [vmem:[#allocation53_spill] sm:$0xff] %v8360_v53  ;;  %v8370_v0 = vmax.f32 %v1530_v2, %v1531_v15  ;;  %v8372_v41 = vmax.f32 %v1537_v40, %v1538_v39  ;;  %v11921_v32 = vunpack.c.h.bf16 %v11918_v19  ;;  %v11923_v48 = vunpack.c.l.bf16 %v11922_v12  ;;  %v11930_v2 = vld [vmem:[#allocation65_spill] sm:$0xff]  ;;  %v11936_v15 = vld [vmem:[#allocation66_spill] sm:$0xff] }
 0x13c   : > { %11910 = vst [vmem:[#allocation57_spill] sm:$0xff] %v8362_v47  ;;  %v1540_v5 = vmax.f32 %v11919_v63, %v11917_v10  ;;  %v11925_v17 = vunpack.c.l.bf16 %v11924_v55  ;;  %v11926_v29 = vunpack.c.h.bf16 %v11922_v12  ;;  %v11927_v62 = vunpack.c.h.bf16 %v11924_v55 }
 0x13d   : > { %11911 = vst [vmem:[#allocation54_spill] sm:$0xff] %v8364_v58  ;;  %v1547_v61 = vmax.f32 %v11921_v32, %v11920_v3  ;;  %v11929_v11 = vunpack.c.l.bf16 %v11928_v57  ;;  %v11931_v40 = vunpack.c.l.bf16 %v11930_v2  ;;  %v11932_v60 = vunpack.c.h.bf16 %v11928_v57 }
 0x13e   : > { %11912 = vst [vmem:[#allocation61_spill] sm:$0xff] %v8366_v44  ;;  %v1554_v18 = vmax.f32 %v11925_v17, %v11923_v48  ;;  %v1561_v49 = vmax.f32 %v11927_v62, %v11926_v29  ;;  %v11933_v36 = vunpack.c.h.bf16 %v11930_v2  ;;  %v11935_v30 = vunpack.c.l.bf16 %v11934_v42 }
 0x13f   : > { %11913 = vst [vmem:[#allocation58_spill] sm:$0xff] %v8368_v37  ;;  %v1568_v25 = vmax.f32 %v11931_v40, %v11929_v11  ;;  %v11937_v39 = vunpack.c.l.bf16 %v11936_v15  ;;  %v11938_v10 = vunpack.c.h.bf16 %v11934_v42  ;;  %v11939_v19 = vunpack.c.h.bf16 %v11936_v15 }
 0x140   : > { %11914 = vst [vmem:[#allocation62_spill] sm:$0xff] %v8370_v0  ;;  %v1575_v51 = vmax.f32 %v11933_v36, %v11932_v60  ;;  %v1541_v3 = vrot.slane %v1540_v5, 4  ;;  %v1548_v32 = vrot.slane %v1547_v61, 4  ;;  %v1555_v12 = vrot.slane %v1554_v18, 4 }
 0x141   : > { %11915 = vst [vmem:[#allocation59_spill] sm:$0xff] %v8372_v41  ;;  %v1582_v52 = vmax.f32 %v11937_v39, %v11935_v30  ;;  %v1589_v63 = vmax.f32 %v11939_v19, %v11938_v10  ;;  %v1562_v48 = vrot.slane %v1561_v49, 4  ;;  %v1569_v55 = vrot.slane %v1568_v25, 4 }
 0x142   : > { %v1576_v17 = vrot.slane %v1575_v51, 4  ;;  %v1542_v57 = vmax.f32 %v1540_v5, %v1541_v3  ;;  %v1549_v11 = vmax.f32 %v1547_v61, %v1548_v32  ;;  %v1556_v2 = vmax.f32 %v1554_v18, %v1555_v12 }
 0x143   : > { %v1583_v29 = vrot.slane %v1582_v52, 4  ;;  %v1590_v62 = vrot.slane %v1589_v63, 4  ;;  %v1563_v40 = vmax.f32 %v1561_v49, %v1562_v48  ;;  %v1570_v60 = vmax.f32 %v1568_v25, %v1569_v55 }
 0x144   : > { %v1577_v36 = vmax.f32 %v1575_v51, %v1576_v17  ;;  %v1543_v42 = vrot.slane %v1542_v57, 2  ;;  %v1550_v41 = vrot.slane %v1549_v11, 2  ;;  %v1557_v15 = vrot.slane %v1556_v2, 2 }
 0x145   : > { %v1584_v30 = vmax.f32 %v1582_v52, %v1583_v29  ;;  %v1591_v39 = vmax.f32 %v1589_v63, %v1590_v62  ;;  %v1564_v10 = vrot.slane %v1563_v40, 2  ;;  %v1571_v19 = vrot.slane %v1570_v60, 2 }
 0x146   : > { %v1578_v0 = vrot.slane %v1577_v36, 2  ;;  %v1544_v58 = vmax.f32 %v1542_v57, %v1543_v42  ;;  %v1551_v47 = vmax.f32 %v1549_v11, %v1550_v41  ;;  %v1558_v53 = vmax.f32 %v1556_v2, %v1557_v15  ;;  %v11948_v57 = vld [vmem:[#allocation73_spill] sm:$0xff]  ;;  %v11950_v2 = vld [vmem:[#allocation70_spill] sm:$0xff] }
 0x147   : > { %v1585_v37 = vrot.slane %v1584_v30, 2  ;;  %v1592_v44 = vrot.slane %v1591_v39, 2  ;;  %v1565_v6 = vmax.f32 %v1563_v40, %v1564_v10  ;;  %v1572_v5 = vmax.f32 %v1570_v60, %v1571_v19 }
 0x148   : > { %v1579_v61 = vmax.f32 %v1577_v36, %v1578_v0  ;;  %v1545_v25 = vrot.slane %v1544_v58, 1  ;;  %v1552_v51 = vrot.slane %v1551_v47, 1  ;;  %v1559_v52 = vrot.slane %v1558_v53, 1 }
 0x149   : > { %v1586_v18 = vmax.f32 %v1584_v30, %v1585_v37  ;;  %v1593_v49 = vmax.f32 %v1591_v39, %v1592_v44  ;;  %v1566_v63 = vrot.slane %v1565_v6, 1  ;;  %v1573_v3 = vrot.slane %v1572_v5, 1  ;;  %v11956_v30 = vld [vmem:[#allocation71_spill] sm:$0xff] }
 0x14a   : > { %v1580_v32 = vrot.slane %v1579_v61, 1  ;;  %v8406_v55 = vmax.f32 %v1544_v58, %v1545_v25  ;;  %v8408_v17 = vmax.f32 %v1551_v47, %v1552_v51  ;;  %v8410_v29 = vmax.f32 %v1558_v53, %v1559_v52 }
 0x14b   : > { %v1587_v12 = vrot.slane %v1586_v18, 1  ;;  %v1594_v48 = vrot.slane %v1593_v49, 1  ;;  %v8412_v41 = vmax.f32 %v1565_v6, %v1566_v63  ;;  %v8414_v62 = vmax.f32 %v1572_v5, %v1573_v3  ;;  %v11954_v6 = vld [vmem:[#allocation74_spill] sm:$0xff]  ;;  %v11960_v5 = vld [vmem:[#allocation75_spill] sm:$0xff] }
 0x14c   : > { %11940 = vst [vmem:[#allocation63_spill] sm:$0xff] %v8406_v55  ;;  %v8416_v37 = vmax.f32 %v1579_v61, %v1580_v32  ;;  %v11949_v11 = vunpack.c.l.bf16 %v11948_v57  ;;  %v11951_v40 = vunpack.c.l.bf16 %v11950_v2  ;;  %v11952_v47 = vunpack.c.h.bf16 %v11948_v57  ;;  %v11966_v3 = vld [vmem:[#allocation79_spill] sm:$0xff] }
 0x14d   : > { %11941 = vst [vmem:[#allocation60_spill] sm:$0xff] %v8408_v17  ;;  %v8418_v44 = vmax.f32 %v1586_v18, %v1587_v12  ;;  %v8420_v0 = vmax.f32 %v1593_v49, %v1594_v48  ;;  %v11953_v53 = vunpack.c.h.bf16 %v11950_v2  ;;  %v11955_v36 = vunpack.c.l.bf16 %v11954_v6  ;;  %v11962_v18 = vld [vmem:[#allocation72_spill] sm:$0xff] }
 0x14e   : > { %11942 = vst [vmem:[#allocation67_spill] sm:$0xff] %v8410_v29  ;;  %v1596_v58 = vmax.f32 %v11951_v40, %v11949_v11  ;;  %v11957_v39 = vunpack.c.l.bf16 %v11956_v30  ;;  %v11958_v15 = vunpack.c.h.bf16 %v11954_v6  ;;  %v11959_v10 = vunpack.c.h.bf16 %v11956_v30  ;;  %v11968_v12 = vld [vmem:[#allocation76_spill] sm:$0xff] }
 0x14f   : > { %11943 = vst [vmem:[#allocation64_spill] sm:$0xff] %v8412_v41  ;;  %v1603_v60 = vmax.f32 %v11953_v53, %v11952_v47  ;;  %v11961_v61 = vunpack.c.l.bf16 %v11960_v5  ;;  %v11963_v49 = vunpack.c.l.bf16 %v11962_v18  ;;  %v11964_v51 = vunpack.c.h.bf16 %v11960_v5 }
 0x150   : > { %11944 = vst [vmem:[#allocation68_spill] sm:$0xff] %v8414_v62  ;;  %v1610_v42 = vmax.f32 %v11957_v39, %v11955_v36  ;;  %v1617_v19 = vmax.f32 %v11959_v10, %v11958_v15  ;;  %v11965_v52 = vunpack.c.h.bf16 %v11962_v18  ;;  %v11967_v32 = vunpack.c.l.bf16 %v11966_v3 }
 0x151   : > { %11945 = vst [vmem:[#allocation65_spill] sm:$0xff] %v8416_v37  ;;  %v1624_v25 = vmax.f32 %v11963_v49, %v11961_v61  ;;  %v11969_v48 = vunpack.c.l.bf16 %v11968_v12  ;;  %v11970_v11 = vunpack.c.h.bf16 %v11966_v3  ;;  %v11971_v2 = vunpack.c.h.bf16 %v11968_v12 }
 0x152   : > { %11946 = vst [vmem:[#allocation69_spill] sm:$0xff] %v8418_v44  ;;  %v1631_v63 = vmax.f32 %v11965_v52, %v11964_v51  ;;  %v1597_v47 = vrot.slane %v1596_v58, 4  ;;  %v1604_v53 = vrot.slane %v1603_v60, 4  ;;  %v1611_v6 = vrot.slane %v1610_v42, 4 }
 0x153   : > { %11947 = vst [vmem:[#allocation66_spill] sm:$0xff] %v8420_v0  ;;  %v1638_v57 = vmax.f32 %v11969_v48, %v11967_v32  ;;  %v1645_v40 = vmax.f32 %v11971_v2, %v11970_v11  ;;  %v1618_v36 = vrot.slane %v1617_v19, 4  ;;  %v1625_v30 = vrot.slane %v1624_v25, 4 }
 0x154   : > { %v1632_v39 = vrot.slane %v1631_v63, 4  ;;  %v1598_v5 = vmax.f32 %v1596_v58, %v1597_v47  ;;  %v1605_v61 = vmax.f32 %v1603_v60, %v1604_v53  ;;  %v1612_v18 = vmax.f32 %v1610_v42, %v1611_v6 }
 0x155   : > { %v1639_v15 = vrot.slane %v1638_v57, 4  ;;  %v1646_v10 = vrot.slane %v1645_v40, 4  ;;  %v1619_v49 = vmax.f32 %v1617_v19, %v1618_v36  ;;  %v1626_v51 = vmax.f32 %v1624_v25, %v1625_v30 }
 0x156   : > { %v1633_v52 = vmax.f32 %v1631_v63, %v1632_v39  ;;  %v1599_v3 = vrot.slane %v1598_v5, 2  ;;  %v1606_v0 = vrot.slane %v1605_v61, 2  ;;  %v1613_v12 = vrot.slane %v1612_v18, 2 }
 0x157   : > { %v1640_v32 = vmax.f32 %v1638_v57, %v1639_v15  ;;  %v1647_v48 = vmax.f32 %v1645_v40, %v1646_v10  ;;  %v1620_v11 = vrot.slane %v1619_v49, 2  ;;  %v1627_v2 = vrot.slane %v1626_v51, 2 }
 0x158   : > { %v1634_v44 = vrot.slane %v1633_v52, 2  ;;  %v1600_v41 = vmax.f32 %v1598_v5, %v1599_v3  ;;  %v1607_v29 = vmax.f32 %v1605_v61, %v1606_v0  ;;  %v1614_v17 = vmax.f32 %v1612_v18, %v1613_v12  ;;  %v11980_v5 = vld [vmem:[#allocation80_spill] sm:$0xff]  ;;  %v11982_v18 = vld [vmem:[#allocation77_spill] sm:$0xff] }
 0x159   : > { %v1641_v37 = vrot.slane %v1640_v32, 2  ;;  %v1648_v62 = vrot.slane %v1647_v48, 2  ;;  %v1621_v55 = vmax.f32 %v1619_v49, %v1620_v11  ;;  %v1628_v58 = vmax.f32 %v1626_v51, %v1627_v2 }
 0x15a   : > { %v1635_v60 = vmax.f32 %v1633_v52, %v1634_v44  ;;  %v1601_v25 = vrot.slane %v1600_v41, 1  ;;  %v1608_v63 = vrot.slane %v1607_v29, 1  ;;  %v1615_v57 = vrot.slane %v1614_v17, 1 }
 0x15b   : > { %v1642_v42 = vmax.f32 %v1640_v32, %v1641_v37  ;;  %v1649_v19 = vmax.f32 %v1647_v48, %v1648_v62  ;;  %v1622_v40 = vrot.slane %v1621_v55, 1  ;;  %v1629_v47 = vrot.slane %v1628_v58, 1  ;;  %v11988_v32 = vld [vmem:[#allocation78_spill] sm:$0xff] }
 0x15c   : > { %v1636_v53 = vrot.slane %v1635_v60, 1  ;;  %v8454_v30 = vmax.f32 %v1600_v41, %v1601_v25  ;;  %v8456_v39 = vmax.f32 %v1607_v29, %v1608_v63  ;;  %v8458_v15 = vmax.f32 %v1614_v17, %v1615_v57 }
 0x15d   : > { %v1643_v6 = vrot.slane %v1642_v42, 1  ;;  %v1650_v36 = vrot.slane %v1649_v19, 1  ;;  %v8460_v0 = vmax.f32 %v1621_v55, %v1622_v40  ;;  %v8462_v10 = vmax.f32 %v1628_v58, %v1629_v47  ;;  %v11986_v55 = vld [vmem:[#allocation81_spill] sm:$0xff]  ;;  %v11998_v47 = vld [vmem:[#allocation86_spill] sm:$0xff] }
 0x15e   : > { %11972 = vst [vmem:[#allocation73_spill] sm:$0xff] %v8454_v30  ;;  %v8464_v37 = vmax.f32 %v1635_v60, %v1636_v53  ;;  %v11981_v61 = vunpack.c.l.bf16 %v11980_v5  ;;  %v11983_v49 = vunpack.c.l.bf16 %v11982_v18  ;;  %v11984_v29 = vunpack.c.h.bf16 %v11980_v5  ;;  %v11992_v58 = vld [vmem:[#allocation85_spill] sm:$0xff] }
 0x15f   : > { %11973 = vst [vmem:[#allocation70_spill] sm:$0xff] %v8456_v39  ;;  %v8466_v62 = vmax.f32 %v1642_v42, %v1643_v6  ;;  %v8468_v44 = vmax.f32 %v1649_v19, %v1650_v36  ;;  %v11985_v17 = vunpack.c.h.bf16 %v11982_v18  ;;  %v11987_v52 = vunpack.c.l.bf16 %v11986_v55  ;;  %v11994_v42 = vld [vmem:[#allocation82_spill] sm:$0xff]  ;;  %v12000_v6 = vld [vmem:[#allocation83_spill] sm:$0xff] }
 0x160   : > { %11974 = vst [vmem:[#allocation74_spill] sm:$0xff] %v8458_v15  ;;  %v1652_v41 = vmax.f32 %v11983_v49, %v11981_v61  ;;  %v11989_v48 = vunpack.c.l.bf16 %v11988_v32  ;;  %v11990_v12 = vunpack.c.h.bf16 %v11986_v55  ;;  %v11991_v11 = vunpack.c.h.bf16 %v11988_v32 }
 0x161   : > { %11975 = vst [vmem:[#allocation71_spill] sm:$0xff] %v8460_v0  ;;  %v1659_v51 = vmax.f32 %v11985_v17, %v11984_v29  ;;  %v11993_v60 = vunpack.c.l.bf16 %v11992_v58  ;;  %v11995_v19 = vunpack.c.l.bf16 %v11994_v42  ;;  %v11996_v63 = vunpack.c.h.bf16 %v11992_v58 }
 0x162   : > { %11976 = vst [vmem:[#allocation75_spill] sm:$0xff] %v8462_v10  ;;  %v1666_v3 = vmax.f32 %v11989_v48, %v11987_v52  ;;  %v1673_v2 = vmax.f32 %v11991_v11, %v11990_v12  ;;  %v11997_v57 = vunpack.c.h.bf16 %v11994_v42  ;;  %v11999_v53 = vunpack.c.l.bf16 %v11998_v47 }
 0x163   : > { %11977 = vst [vmem:[#allocation72_spill] sm:$0xff] %v8464_v37  ;;  %v1680_v25 = vmax.f32 %v11995_v19, %v11993_v60  ;;  %v12001_v36 = vunpack.c.l.bf16 %v12000_v6  ;;  %v12002_v61 = vunpack.c.h.bf16 %v11998_v47  ;;  %v12003_v18 = vunpack.c.h.bf16 %v12000_v6 }
 0x164   : > { %11978 = vst [vmem:[#allocation79_spill] sm:$0xff] %v8466_v62  ;;  %v1687_v40 = vmax.f32 %v11997_v57, %v11996_v63  ;;  %v1653_v29 = vrot.slane %v1652_v41, 4  ;;  %v1660_v17 = vrot.slane %v1659_v51, 4  ;;  %v1667_v55 = vrot.slane %v1666_v3, 4 }
 0x165   : > { %11979 = vst [vmem:[#allocation76_spill] sm:$0xff] %v8468_v44  ;;  %v1694_v5 = vmax.f32 %v12001_v36, %v11999_v53  ;;  %v1701_v49 = vmax.f32 %v12003_v18, %v12002_v61  ;;  %v1674_v52 = vrot.slane %v1673_v2, 4  ;;  %v1681_v32 = vrot.slane %v1680_v25, 4 }
 0x166   : > { %v1688_v48 = vrot.slane %v1687_v40, 4  ;;  %v1654_v58 = vmax.f32 %v1652_v41, %v1653_v29  ;;  %v1661_v60 = vmax.f32 %v1659_v51, %v1660_v17  ;;  %v1668_v42 = vmax.f32 %v1666_v3, %v1667_v55 }
 0x167   : > { %v1695_v12 = vrot.slane %v1694_v5, 4  ;;  %v1702_v11 = vrot.slane %v1701_v49, 4  ;;  %v1675_v19 = vmax.f32 %v1673_v2, %v1674_v52  ;;  %v1682_v63 = vmax.f32 %v1680_v25, %v1681_v32 }
 0x168   : > { %v1689_v57 = vmax.f32 %v1687_v40, %v1688_v48  ;;  %v1655_v47 = vrot.slane %v1654_v58, 2  ;;  %v1662_v44 = vrot.slane %v1661_v60, 2  ;;  %v1669_v6 = vrot.slane %v1668_v42, 2 }
 0x169   : > { %v1696_v53 = vmax.f32 %v1694_v5, %v1695_v12  ;;  %v1703_v36 = vmax.f32 %v1701_v49, %v1702_v11  ;;  %v1676_v61 = vrot.slane %v1675_v19, 2  ;;  %v1683_v18 = vrot.slane %v1682_v63, 2 }
 0x16a   : > { %v1690_v62 = vrot.slane %v1689_v57, 2  ;;  %v1656_v0 = vmax.f32 %v1654_v58, %v1655_v47  ;;  %v1663_v15 = vmax.f32 %v1661_v60, %v1662_v44  ;;  %v1670_v39 = vmax.f32 %v1668_v42, %v1669_v6  ;;  %v12012_v58 = vld [vmem:[#allocation87_spill] sm:$0xff]  ;;  %v12014_v42 = vld [vmem:[#allocation84_spill] sm:$0xff] }
 0x16b   : > { %v1697_v37 = vrot.slane %v1696_v53, 2  ;;  %v1704_v10 = vrot.slane %v1703_v36, 2  ;;  %v1677_v30 = vmax.f32 %v1675_v19, %v1676_v61  ;;  %v1684_v41 = vmax.f32 %v1682_v63, %v1683_v18 }
 0x16c   : > { %v1691_v51 = vmax.f32 %v1689_v57, %v1690_v62  ;;  %v1657_v25 = vrot.slane %v1656_v0, 1  ;;  %v1664_v40 = vrot.slane %v1663_v15, 1  ;;  %v1671_v5 = vrot.slane %v1670_v39, 1 }
 0x16d   : > { %v1698_v3 = vmax.f32 %v1696_v53, %v1697_v37  ;;  %v1705_v2 = vmax.f32 %v1703_v36, %v1704_v10  ;;  %v1678_v49 = vrot.slane %v1677_v30, 1  ;;  %v1685_v29 = vrot.slane %v1684_v41, 1  ;;  %v12020_v53 = vld [vmem:[#allocation88_spill] sm:$0xff] }
 0x16e   : > { %v1692_v17 = vrot.slane %v1691_v51, 1  ;;  %v8502_v32 = vmax.f32 %v1656_v0, %v1657_v25  ;;  %v8504_v48 = vmax.f32 %v1663_v15, %v1664_v40  ;;  %v8506_v12 = vmax.f32 %v1670_v39, %v1671_v5 }
 0x16f   : > { %v1699_v55 = vrot.slane %v1698_v3, 1  ;;  %v1706_v52 = vrot.slane %v1705_v2, 1  ;;  %v8508_v44 = vmax.f32 %v1677_v30, %v1678_v49  ;;  %v8510_v11 = vmax.f32 %v1684_v41, %v1685_v29  ;;  %v12018_v30 = vld [vmem:[#allocation91_spill] sm:$0xff]  ;;  %v12024_v41 = vld [vmem:[#allocation92_spill] sm:$0xff]  ;;  %v12030_v29 = vld [vmem:[#allocation93_spill] sm:$0xff] }
 0x170   : > { %12004 = vst [vmem:[#allocation80_spill] sm:$0xff] %v8502_v32  ;;  %v8512_v37 = vmax.f32 %v1691_v51, %v1692_v17  ;;  %v12013_v60 = vunpack.c.l.bf16 %v12012_v58  ;;  %v12015_v19 = vunpack.c.l.bf16 %v12014_v42  ;;  %v12016_v15 = vunpack.c.h.bf16 %v12012_v58 }
 0x171   : > { %12005 = vst [vmem:[#allocation77_spill] sm:$0xff] %v8504_v48  ;;  %v8514_v10 = vmax.f32 %v1698_v3, %v1699_v55  ;;  %v8516_v62 = vmax.f32 %v1705_v2, %v1706_v52  ;;  %v12017_v39 = vunpack.c.h.bf16 %v12014_v42  ;;  %v12019_v57 = vunpack.c.l.bf16 %v12018_v30  ;;  %v12026_v3 = vld [vmem:[#allocation89_spill] sm:$0xff]  ;;  %v12032_v55 = vld [vmem:[#allocation90_spill] sm:$0xff] }
 0x172   : > { %12006 = vst [vmem:[#allocation81_spill] sm:$0xff] %v8506_v12  ;;  %v1708_v0 = vmax.f32 %v12015_v19, %v12013_v60  ;;  %v12021_v36 = vunpack.c.l.bf16 %v12020_v53  ;;  %v12022_v6 = vunpack.c.h.bf16 %v12018_v30  ;;  %v12023_v61 = vunpack.c.h.bf16 %v12020_v53 }
 0x173   : > { %12007 = vst [vmem:[#allocation78_spill] sm:$0xff] %v8508_v44  ;;  %v1715_v63 = vmax.f32 %v12017_v39, %v12016_v15  ;;  %v12025_v51 = vunpack.c.l.bf16 %v12024_v41  ;;  %v12027_v2 = vunpack.c.l.bf16 %v12026_v3  ;;  %v12028_v40 = vunpack.c.h.bf16 %v12024_v41 }
 0x174   : > { %12008 = vst [vmem:[#allocation85_spill] sm:$0xff] %v8510_v11  ;;  %v1722_v47 = vmax.f32 %v12021_v36, %v12019_v57  ;;  %v1729_v18 = vmax.f32 %v12023_v61, %v12022_v6  ;;  %v12029_v5 = vunpack.c.h.bf16 %v12026_v3  ;;  %v12031_v17 = vunpack.c.l.bf16 %v12030_v29 }
 0x175   : > { %12009 = vst [vmem:[#allocation82_spill] sm:$0xff] %v8512_v37  ;;  %v1736_v25 = vmax.f32 %v12027_v2, %v12025_v51  ;;  %v12033_v52 = vunpack.c.l.bf16 %v12032_v55  ;;  %v12034_v60 = vunpack.c.h.bf16 %v12030_v29  ;;  %v12035_v42 = vunpack.c.h.bf16 %v12032_v55 }
 0x176   : > { %12010 = vst [vmem:[#allocation86_spill] sm:$0xff] %v8514_v10  ;;  %v1743_v49 = vmax.f32 %v12029_v5, %v12028_v40  ;;  %v1709_v15 = vrot.slane %v1708_v0, 4  ;;  %v1716_v39 = vrot.slane %v1715_v63, 4  ;;  %v1723_v30 = vrot.slane %v1722_v47, 4 }
 0x177   : > { %12011 = vst [vmem:[#allocation83_spill] sm:$0xff] %v8516_v62  ;;  %v1750_v58 = vmax.f32 %v12033_v52, %v12031_v17  ;;  %v1757_v19 = vmax.f32 %v12035_v42, %v12034_v60  ;;  %v1730_v57 = vrot.slane %v1729_v18, 4  ;;  %v1737_v53 = vrot.slane %v1736_v25, 4 }
 0x178   : > { %v1744_v36 = vrot.slane %v1743_v49, 4  ;;  %v1710_v41 = vmax.f32 %v1708_v0, %v1709_v15  ;;  %v1717_v51 = vmax.f32 %v1715_v63, %v1716_v39  ;;  %v1724_v3 = vmax.f32 %v1722_v47, %v1723_v30 }
 0x179   : > { %v1751_v6 = vrot.slane %v1750_v58, 4  ;;  %v1758_v61 = vrot.slane %v1757_v19, 4  ;;  %v1731_v2 = vmax.f32 %v1729_v18, %v1730_v57  ;;  %v1738_v40 = vmax.f32 %v1736_v25, %v1737_v53 }
 0x17a   : > { %v1745_v5 = vmax.f32 %v1743_v49, %v1744_v36  ;;  %v1711_v29 = vrot.slane %v1710_v41, 2  ;;  %v1718_v62 = vrot.slane %v1717_v51, 2  ;;  %v1725_v55 = vrot.slane %v1724_v3, 2 }
 0x17b   : > { %v1752_v17 = vmax.f32 %v1750_v58, %v1751_v6  ;;  %v1759_v52 = vmax.f32 %v1757_v19, %v1758_v61  ;;  %v1732_v60 = vrot.slane %v1731_v2, 2  ;;  %v1739_v42 = vrot.slane %v1738_v40, 2 }
 0x17c   : > { %v1746_v10 = vrot.slane %v1745_v5, 2  ;;  %v1712_v44 = vmax.f32 %v1710_v41, %v1711_v29  ;;  %v1719_v12 = vmax.f32 %v1717_v51, %v1718_v62  ;;  %v1726_v48 = vmax.f32 %v1724_v3, %v1725_v55  ;;  %v12077_v51 = vld [vmem:[#allocation36_spill] sm:$0xff]  ;;  %v12085_v55 = vld [vmem:[#allocation45_spill] sm:$0xff] }
 0x17d   : > { %v1753_v37 = vrot.slane %v1752_v17, 2  ;;  %v1760_v11 = vrot.slane %v1759_v52, 2  ;;  %v1733_v32 = vmax.f32 %v1731_v2, %v1732_v60  ;;  %v1740_v0 = vmax.f32 %v1738_v40, %v1739_v42  ;;  %v12079_v2 = vld [vmem:[#allocation43_spill] sm:$0xff]  ;;  %v12080_v40 = vld [vmem:[#allocation40_spill] sm:$0xff]  ;;  %v12086_v60 = vld [vmem:[#allocation42_spill] sm:$0xff] }
 0x17e   : > { %v1747_v63 = vmax.f32 %v1745_v5, %v1746_v10  ;;  %v1713_v25 = vrot.slane %v1712_v44, 1  ;;  %v1720_v49 = vrot.slane %v1719_v12, 1  ;;  %v1727_v58 = vrot.slane %v1726_v48, 1 }
 0x17f   : > { %v1754_v47 = vmax.f32 %v1752_v17, %v1753_v37  ;;  %v1761_v18 = vmax.f32 %v1759_v52, %v1760_v11  ;;  %v1734_v19 = vrot.slane %v1733_v32, 1  ;;  %v1741_v15 = vrot.slane %v1740_v0, 1  ;;  %v12082_v17 = vld [vmem:[#allocation44_spill] sm:$0xff]  ;;  %v12083_v52 = vld [vmem:[#allocation41_spill] sm:$0xff] }
 0x180   : > { %v1748_v39 = vrot.slane %v1747_v63, 1  ;;  %v8550_v53 = vmax.f32 %v1712_v44, %v1713_v25  ;;  %v8552_v36 = vmax.f32 %v1719_v12, %v1720_v49  ;;  %v8554_v6 = vmax.f32 %v1726_v48, %v1727_v58  ;;  %v12092_v25 = vld [vmem:[#allocation47_spill] sm:$0xff] }
 0x181   : > { %v1755_v30 = vrot.slane %v1754_v47, 1  ;;  %v1762_v57 = vrot.slane %v1761_v18, 1  ;;  %v8556_v62 = vmax.f32 %v1733_v32, %v1734_v19  ;;  %v8558_v61 = vmax.f32 %v1740_v0, %v1741_v15  ;;  %v12088_v0 = vld [vmem:[#allocation49_spill] sm:$0xff]  ;;  %v12094_v58 = vld [vmem:[#allocation51_spill] sm:$0xff]  ;;  %v12095_v19 = vld [vmem:[#allocation48_spill] sm:$0xff] }
 0x182   : > { %12036 = vst [vmem:[#allocation87_spill] sm:$0xff] %v8550_v53  ;;  %v8560_v37 = vmax.f32 %v1747_v63, %v1748_v39  ;;  %v8568_v41 = vpack.c.bf16 %v8024_v7, %v8022_v21  ;;  %v8572_v12 = vpack.c.bf16 %v8028_v45, %v8026_v35  ;;  %v8576_v32 = vpack.c.bf16 %v8032_v27, %v8030_v20  ;;  %v12089_v63 = vld [vmem:[#allocation46_spill] sm:$0xff]  ;;  %v12097_v39 = vld [vmem:[#allocation55_spill] sm:$0xff] }
 0x183   : > { %12037 = vst [vmem:[#allocation84_spill] sm:$0xff] %v8552_v36  ;;  %v8562_v11 = vmax.f32 %v1754_v47, %v1755_v30  ;;  %v8564_v10 = vmax.f32 %v1761_v18, %v1762_v57  ;;  %v8580_v48 = vpack.c.bf16 %v8036_v34, %v8034_v33  ;;  %v8584_v44 = vpack.c.bf16 %v8072_v8, %v8070_v28  ;;  %v12058_v8 = vld [vmem:[#allocation94_spill] sm:$0xff]  ;;  %v12098_v30 = vld [vmem:[#allocation52_spill] sm:$0xff] }
 0x184   : > { %12038 = vst [vmem:[#allocation91_spill] sm:$0xff] %v8554_v6  ;;  %v8588_v21 = vpack.c.bf16 %v8076_v9, %v8074_v31  ;;  %v8592_v7 = vpack.c.bf16 %v8080_v13, %v8078_v24  ;;  %v8596_v35 = vpack.c.bf16 %v8084_v50, %v8082_v38  ;;  %v8600_v45 = vpack.c.bf16 %v8120_v26, %v8118_v14  ;;  %v12059_v31 = vld [vmem:[#allocation95_spill] sm:$0xff]  ;;  %v12061_v24 = vld [vmem:[#allocation96_spill] sm:$0xff]  ;;  %v12062_v13 = vld [vmem:[#allocation97_spill] sm:$0xff] }
 0x185   : > { %12039 = vst [vmem:[#allocation88_spill] sm:$0xff] %v8556_v62  ;;  %v8604_v20 = vpack.c.bf16 %v8124_v22, %v8122_v54  ;;  %v8608_v27 = vpack.c.bf16 %v8128_v16, %v8126_v43  ;;  %v8612_v33 = vpack.c.bf16 %v8132_v59, %v8130_v46  ;;  %v8616_v34 = vpack.c.bf16 %v8168_v1, %v8166_v4  ;;  %v12064_v50 = vld [vmem:[#allocation37_spill] sm:$0xff]  ;;  %v12065_v14 = vld [vmem:[#allocation34_spill] sm:$0xff]  ;;  %v12068_v22 = vld [vmem:[#allocation35_spill] sm:$0xff] }
 0x186   : > { %12040 = vst [vmem:[#allocation92_spill] sm:$0xff] %v8558_v61  ;;  %v8620_v28 = vpack.c.bf16 %v8172_v23, %v8170_v56  ;;  %v8624_v9 = vpack.c.bf16 %v12059_v31, %v12058_v8  ;;  %v8628_v38 = vpack.c.bf16 %v12062_v13, %v12061_v24  ;;  %v8632_v26 = vpack.c.bf16 %v12065_v14, %v12064_v50  ;;  %v12067_v54 = vld [vmem:[#allocation38_spill] sm:$0xff]  ;;  %v12071_v46 = vld [vmem:[#allocation99_spill] sm:$0xff]  ;;  %v12073_v4 = vld [vmem:[#allocation100_spill] sm:$0xff] }
 0x187   : > { %12041 = vst [vmem:[#allocation89_spill] sm:$0xff] %v8560_v37  ;;  %v8636_v43 = vpack.c.bf16 %v12068_v22, %v12067_v54  ;;  %v12070_v16 = vld [vmem:[#allocation98_spill] sm:$0xff]  ;;  %v12074_v1 = vld [vmem:[#allocation101_spill] sm:$0xff]  ;;  %v12076_v23 = vld [vmem:[#allocation39_spill] sm:$0xff]  ;;  %v8652_v5 = vpack.c.bf16 %v12080_v40, %v12079_v2  ;;  %v8656_v29 = vpack.c.bf16 %v12083_v52, %v12082_v17  ;;  %v8660_v42 = vpack.c.bf16 %v12086_v60, %v12085_v55 }
 0x188   : > { %12042 = vst [vmem:[#allocation93_spill] sm:$0xff] %v8562_v11  ;;  %v8640_v59 = vpack.c.bf16 %v12071_v46, %v12070_v16  ;;  %v8644_v56 = vpack.c.bf16 %v12074_v1, %v12073_v4  ;;  %v8648_v3 = vpack.c.bf16 %v12077_v51, %v12076_v23  ;;  %v8664_v47 = vpack.c.bf16 %v12089_v63, %v12088_v0  ;;  %v12091_v18 = vld [vmem:[#allocation50_spill] sm:$0xff]  ;;  %v12100_v8 = vld [vmem:[#allocation56_spill] sm:$0xff]  ;;  %v12101_v31 = vld [vmem:[#allocation53_spill] sm:$0xff] }
 0x189   : > { %12043 = vst [vmem:[#allocation90_spill] sm:$0xff] %v8564_v10  ;;  %v8668_v49 = vpack.c.bf16 %v12092_v25, %v12091_v18  ;;  %v8672_v15 = vpack.c.bf16 %v12095_v19, %v12094_v58  ;;  %v8676_v57 = vpack.c.bf16 %v12098_v30, %v12097_v39  ;;  %v8680_v24 = vpack.c.bf16 %v12101_v31, %v12100_v8  ;;  %v12103_v13 = vld [vmem:[#allocation57_spill] sm:$0xff]  ;;  %v12104_v50 = vld [vmem:[#allocation54_spill] sm:$0xff]  ;;  %v12110_v4 = vld [vmem:[#allocation59_spill] sm:$0xff] }
 0x18a   : > { %12044 = vst [vmem:[#allocation102_spill] sm:$0xff] %v8568_v41  ;;  %v8684_v14 = vpack.c.bf16 %v12104_v50, %v12103_v13  ;;  %v12106_v54 = vld [vmem:[#allocation61_spill] sm:$0xff]  ;;  %v12107_v22 = vld [vmem:[#allocation58_spill] sm:$0xff]  ;;  %v12112_v23 = vld [vmem:[#allocation63_spill] sm:$0xff] }
 0x18b   : > { %12045 = vst [vmem:[#allocation103_spill] sm:$0xff] %v8572_v12  ;;  %v8688_v16 = vpack.c.bf16 %v12107_v22, %v12106_v54  ;;  %v12109_v46 = vld [vmem:[#allocation62_spill] sm:$0xff]  ;;  %v12113_v51 = vld [vmem:[#allocation60_spill] sm:$0xff]  ;;  %v12115_v40 = vld [vmem:[#allocation67_spill] sm:$0xff] }
 0x18c   : > { %12046 = vst [vmem:[#allocation104_spill] sm:$0xff] %v8576_v32  ;;  %v8692_v1 = vpack.c.bf16 %v12110_v4, %v12109_v46  ;;  %v8696_v2 = vpack.c.bf16 %v12113_v51, %v12112_v23  ;;  %v12116_v17 = vld [vmem:[#allocation64_spill] sm:$0xff]  ;;  %v12119_v60 = vld [vmem:[#allocation65_spill] sm:$0xff]  ;;  %v12122_v18 = vld [vmem:[#allocation66_spill] sm:$0xff] }
 0x18d   : > { %12047 = vst [vmem:[#allocation105_spill] sm:$0xff] %v8580_v48  ;;  %v8700_v52 = vpack.c.bf16 %v12116_v17, %v12115_v40  ;;  %v12118_v55 = vld [vmem:[#allocation68_spill] sm:$0xff]  ;;  %v12121_v63 = vld [vmem:[#allocation69_spill] sm:$0xff]  ;;  %v12125_v19 = vld [vmem:[#allocation70_spill] sm:$0xff] }
 0x18e   : > { %12048 = vst [vmem:[#allocation106_spill] sm:$0xff] %v8584_v44  ;;  %v8704_v0 = vpack.c.bf16 %v12119_v60, %v12118_v55  ;;  %v8708_v25 = vpack.c.bf16 %v12122_v18, %v12121_v63  ;;  %v12124_v58 = vld [vmem:[#allocation73_spill] sm:$0xff]  ;;  %v12127_v30 = vld [vmem:[#allocation74_spill] sm:$0xff]  ;;  %v12128_v8 = vld [vmem:[#allocation71_spill] sm:$0xff] }
 0x18f   : > { %12049 = vst [vmem:[#allocation107_spill] sm:$0xff] %v8588_v21  ;;  %v8712_v39 = vpack.c.bf16 %v12125_v19, %v12124_v58  ;;  %v8716_v31 = vpack.c.bf16 %v12128_v8, %v12127_v30  ;;  %v12130_v13 = vld [vmem:[#allocation75_spill] sm:$0xff]  ;;  %v12131_v50 = vld [vmem:[#allocation72_spill] sm:$0xff]  ;;  %v12137_v17 = vld [vmem:[#allocation77_spill] sm:$0xff] }
 0x190   : > { %12050 = vst [vmem:[#allocation108_spill] sm:$0xff] %v8592_v7  ;;  %v8720_v54 = vpack.c.bf16 %v12131_v50, %v12130_v13  ;;  %v12133_v22 = vld [vmem:[#allocation79_spill] sm:$0xff]  ;;  %v12134_v46 = vld [vmem:[#allocation76_spill] sm:$0xff]  ;;  %v12139_v60 = vld [vmem:[#allocation81_spill] sm:$0xff] }
 0x191   : > { %12051 = vst [vmem:[#allocation109_spill] sm:$0xff] %v8596_v35  ;;  %v8724_v4 = vpack.c.bf16 %v12134_v46, %v12133_v22  ;;  %v8727_v23 = vld [vmem:[%s7488_s11] sm:$0xff]  ;;  %v8730_v51 = vld [vmem:[%s7488_s11 + $0x8] sm:$0xff]  ;;  %v12140_v63 = vld [vmem:[#allocation78_spill] sm:$0xff] }
 0x192   : > { %12052 = vst [vmem:[#allocation110_spill] sm:$0xff] %v8600_v45  ;;  %v12136_v40 = vld [vmem:[#allocation80_spill] sm:$0xff]  ;;  %v8738_v18 = vpack.c.bf16 %v12140_v63, %v12139_v60  ;;  %v12142_v58 = vld [vmem:[#allocation85_spill] sm:$0xff]  ;;  %v12143_v19 = vld [vmem:[#allocation82_spill] sm:$0xff]  ;;  %v8764_v60 = vpack.c.bf16 %v8560_v37, %v8558_v61  ;;  %v8768_v63 = vpack.c.bf16 %v8564_v10, %v8562_v11 }
 0x193   : > { %12053 = vst [vmem:[#allocation111_spill] sm:$0xff] %v8604_v20  ;;  %v8734_v55 = vpack.c.bf16 %v12137_v17, %v12136_v40  ;;  %v8742_v30 = vpack.c.bf16 %v12143_v19, %v12142_v58  ;;  %v12145_v8 = vld [vmem:[#allocation86_spill] sm:$0xff]  ;;  %v12146_v13 = vld [vmem:[#allocation83_spill] sm:$0xff]  ;;  %v8756_v40 = vpack.c.bf16 %v8552_v36, %v8550_v53  ;;  %v8760_v17 = vpack.c.bf16 %v8556_v62, %v8554_v6  ;;  %v8774_v19 = vld [vmem:[%s7488_s11 + $0x28] sm:$0xff] }
 0x194   : > { %12054 = vst [vmem:[#allocation112_spill] sm:$0xff] %v8608_v27  ;;  %v8746_v50 = vpack.c.bf16 %v12146_v13, %v12145_v8  ;;  %v8749_v22 = vld [vmem:[%s7488_s11 + $0x10] sm:$0xff]  ;;  %v8752_v46 = vld [vmem:[%s7488_s11 + $0x18] sm:$0xff]  ;;  %v8771_v58 = vld [vmem:[%s7488_s11 + $0x20] sm:$0xff] }
 0x195   : > { %12055 = vst [vmem:[#allocation113_spill] sm:$0xff] %v8612_v33  ;;  %v8777_v8 = vld [vmem:[%s7488_s11 + $0x30] sm:$0xff]  ;;  %v8780_v13 = vld [vmem:[%s7488_s11 + $0x38] sm:$0xff]  ;;  %v8787_v11 = vld [vmem:[%s7488_s11 + $0x40] sm:$0xff] }
 0x196   : > { %12056 = vst [vmem:[#allocation114_spill] sm:$0xff] %v8616_v34  ;;  %v8790_v61 = vld [vmem:[%s7488_s11 + $0x48] sm:$0xff]  ;;  %v8797_v53 = vld [vmem:[%s7488_s11 + $0x50] sm:$0xff]  ;;  %v8807_v6 = vld [vmem:[%s7488_s11 + $0x60] sm:$0xff] }
 0x197   : > { %12057 = vst [vmem:[#allocation115_spill] sm:$0xff] %v8620_v28  ;;  %v8817_v37 = vld [vmem:[%s7488_s11 + $0x70] sm:$0xff]  ;;  %v8827_v36 = vld [vmem:[%s7488_s11 + $0x80] sm:$0xff]  ;;  %v8940_v45 = vld [vmem:[%s7488_s11 + $0x138] sm:$0xff] }
 0x198   : > { %12060 = vst [vmem:[#allocation94_spill] sm:$0xff] %v8624_v9  ;;  %v8837_v62 = vld [vmem:[%s7488_s11 + $0x90] sm:$0xff]  ;;  %v8847_v10 = vld [vmem:[%s7488_s11 + $0xa0] sm:$0xff]  ;;  %v8930_v9 = vld [vmem:[%s7488_s11 + $0x128] sm:$0xff] }
 0x199   : > { %12063 = vst [vmem:[#allocation95_spill] sm:$0xff] %v8628_v38  ;;  %v8950_v32 = vld [vmem:[%s7488_s11 + $0x148] sm:$0xff]  ;;  %v8980_v35 = vld [vmem:[%s7488_s11 + $0x178] sm:$0xff]  ;;  %v8997_v33 = vld [vmem:[%s7488_s11 + $0x190] sm:$0xff] }
 0x19a   : > { %12066 = vst [vmem:[#allocation96_spill] sm:$0xff] %v8632_v26  ;;  %v8970_v28 = vld [vmem:[%s7488_s11 + $0x168] sm:$0xff]  ;;  %v9007_v21 = vld [vmem:[%s7488_s11 + $0x1a0] sm:$0xff]  ;;  %v9020_v7 = vld [vmem:[%s7488_s11 + $0x1b8] sm:$0xff] }
 0x19b   : > { %12069 = vst [vmem:[#allocation97_spill] sm:$0xff] %v8636_v43  ;;  %v8987_v43 = vld [vmem:[%s7488_s11 + $0x180] sm:$0xff]  ;;  %v8990_v12 = vld [vmem:[%s7488_s11 + $0x188] sm:$0xff]  ;;  %v9037_v27 = vld [vmem:[%s7488_s11 + $0x1d0] sm:$0xff] }
 0x19c   : > { %12072 = vst [vmem:[#allocation37_spill] sm:$0xff] %v8640_v59  ;;  %v9000_v59 = vld [vmem:[%s7488_s11 + $0x198] sm:$0xff]  ;;  %v9010_v34 = vld [vmem:[%s7488_s11 + $0x1a8] sm:$0xff]  ;;  %v9027_v26 = vld [vmem:[%s7488_s11 + $0x1c0] sm:$0xff] }
 0x19d   : > { %12075 = vst [vmem:[#allocation34_spill] sm:$0xff] %v8644_v56  ;;  %v8960_v56 = vld [vmem:[%s7488_s11 + $0x158] sm:$0xff]  ;;  %v9030_v41 = vld [vmem:[%s7488_s11 + $0x1c8] sm:$0xff]  ;;  %v9047_v44 = vld [vmem:[%s7488_s11 + $0x1e0] sm:$0xff] }
 0x19e   : > { %12078 = vst [vmem:[#allocation38_spill] sm:$0xff] %v8648_v3  ;;  %v8920_v3 = vld [vmem:[%s7488_s11 + $0x118] sm:$0xff]  ;;  %v9067_v38 = vld [vmem:[%s7488_s11 + $0x200] sm:$0xff]  ;;  %v9077_v20 = vld [vmem:[%s7488_s11 + $0x210] sm:$0xff] }
 0x19f   : > { %12081 = vst [vmem:[#allocation35_spill] sm:$0xff] %v8652_v5  ;;  %v9057_v5 = vld [vmem:[%s7488_s11 + $0x1f0] sm:$0xff]  ;;  %v9087_v48 = vld [vmem:[%s7488_s11 + $0x220] sm:$0xff] }
 0x1a0   : > { %12084 = vst [vmem:[#allocation116_spill] sm:$0xff] %v8656_v29  ;;  %v9017_v29 = vld [vmem:[%s7488_s11 + $0x1b0] sm:$0xff] }
 0x1a1   : > { %12087 = vst [vmem:[#allocation117_spill] sm:$0xff] %v8660_v42  ;;  %v8977_v42 = vld [vmem:[%s7488_s11 + $0x170] sm:$0xff] }
 0x1a2   : > { %12090 = vst [vmem:[#allocation49_spill] sm:$0xff] %v8664_v47  ;;  %v8910_v47 = vld [vmem:[%s7488_s11 + $0x108] sm:$0xff] }
 0x1a3   : > { %12093 = vst [vmem:[#allocation46_spill] sm:$0xff] %v8668_v49  ;;  %v8870_v49 = vld [vmem:[%s7488_s11 + $0xc8] sm:$0xff] }
 0x1a4   : > { %12096 = vst [vmem:[#allocation50_spill] sm:$0xff] %v8672_v15  ;;  %v8830_v15 = vld [vmem:[%s7488_s11 + $0x88] sm:$0xff] }
 0x1a5   : > { %12099 = vst [vmem:[#allocation47_spill] sm:$0xff] %v8676_v57  ;;  %v8967_v57 = vld [vmem:[%s7488_s11 + $0x160] sm:$0xff] }
 0x1a6   : > { %12102 = vst [vmem:[#allocation51_spill] sm:$0xff] %v8680_v24  ;;  %v8927_v24 = vld [vmem:[%s7488_s11 + $0x120] sm:$0xff] }
 0x1a7   : > { %12105 = vst [vmem:[#allocation48_spill] sm:$0xff] %v8684_v14  ;;  %v8887_v14 = vld [vmem:[%s7488_s11 + $0xe0] sm:$0xff] }
 0x1a8   : > { %12108 = vst [vmem:[#allocation55_spill] sm:$0xff] %v8688_v16  ;;  %v8900_v16 = vld [vmem:[%s7488_s11 + $0xf8] sm:$0xff] }
 0x1a9   : > { %12111 = vst [vmem:[#allocation52_spill] sm:$0xff] %v8692_v1  ;;  %v8860_v1 = vld [vmem:[%s7488_s11 + $0xb8] sm:$0xff] }
 0x1aa   : > { %12114 = vst [vmem:[#allocation56_spill] sm:$0xff] %v8696_v2  ;;  %v8820_v2 = vld [vmem:[%s7488_s11 + $0x78] sm:$0xff] }
 0x1ab   : > { %12117 = vst [vmem:[#allocation53_spill] sm:$0xff] %v8700_v52  ;;  %v8957_v52 = vld [vmem:[%s7488_s11 + $0x150] sm:$0xff] }
 0x1ac   : > { %12120 = vst [vmem:[#allocation57_spill] sm:$0xff] %v8704_v0  ;;  %v8917_v0 = vld [vmem:[%s7488_s11 + $0x110] sm:$0xff] }
 0x1ad   : > { %12123 = vst [vmem:[#allocation54_spill] sm:$0xff] %v8708_v25  ;;  %v8877_v25 = vld [vmem:[%s7488_s11 + $0xd0] sm:$0xff] }
 0x1ae   : > { %12126 = vst [vmem:[#allocation61_spill] sm:$0xff] %v8712_v39  ;;  %v8890_v39 = vld [vmem:[%s7488_s11 + $0xe8] sm:$0xff] }
 0x1af   : > { %12129 = vst [vmem:[#allocation58_spill] sm:$0xff] %v8716_v31  ;;  %v8850_v31 = vld [vmem:[%s7488_s11 + $0xa8] sm:$0xff] }
 0x1b0   : > { %12132 = vst [vmem:[#allocation62_spill] sm:$0xff] %v8720_v54  ;;  %v8810_v54 = vld [vmem:[%s7488_s11 + $0x68] sm:$0xff] }
 0x1b1   : > { %12135 = vst [vmem:[#allocation59_spill] sm:$0xff] %v8724_v4  ;;  %v8947_v4 = vld [vmem:[%s7488_s11 + $0x140] sm:$0xff] }
 0x1b2   : > { %12138 = vst [vmem:[#allocation63_spill] sm:$0xff] %v8734_v55  ;;  %v8907_v55 = vld [vmem:[%s7488_s11 + $0x100] sm:$0xff] }
 0x1b3   : > { %12141 = vst [vmem:[#allocation60_spill] sm:$0xff] %v8738_v18  ;;  %v8867_v18 = vld [vmem:[%s7488_s11 + $0xc0] sm:$0xff] }
 0x1b4   : > { %12144 = vst [vmem:[#allocation67_spill] sm:$0xff] %v8742_v30  ;;  %v8880_v30 = vld [vmem:[%s7488_s11 + $0xd8] sm:$0xff] }
 0x1b5   : > { %12147 = vst [vmem:[#allocation64_spill] sm:$0xff] %v8746_v50  ;;  %v8840_v50 = vld [vmem:[%s7488_s11 + $0x98] sm:$0xff] }
 0x1b6   : > { %12148 = vst [vmem:[#allocation68_spill] sm:$0xff] %v8756_v40  ;;  %v8800_v40 = vld [vmem:[%s7488_s11 + $0x58] sm:$0xff] }
 0x1b7   : > { %12149 = vst [vmem:[#allocation65_spill] sm:$0xff] %v8760_v17  ;;  %v8937_v17 = vld [vmem:[%s7488_s11 + $0x130] sm:$0xff] }
 0x1b8   : > { %12150 = vst [vmem:[#allocation69_spill] sm:$0xff] %v8764_v60  ;;  %v8897_v60 = vld [vmem:[%s7488_s11 + $0xf0] sm:$0xff] }
 0x1b9   : > { %12151 = vst [vmem:[#allocation66_spill] sm:$0xff] %v8768_v63  ;;  %v8857_v63 = vld [vmem:[%s7488_s11 + $0xb0] sm:$0xff] }
 0x1ba   : > { %12152 = vst [vmem:[#allocation73_spill] sm:$0xff] %v8927_v24 }
 0x1bb   : > { %12153 = vst [vmem:[#allocation70_spill] sm:$0xff] %v8930_v9 }
 0x1bc   : > { %12154 = vst [vmem:[#allocation74_spill] sm:$0xff] %v8937_v17 }
 0x1bd   : > { %12155 = vst [vmem:[#allocation71_spill] sm:$0xff] %v8940_v45 }
 0x1be   : > { %12156 = vst [vmem:[#allocation75_spill] sm:$0xff] %v8947_v4 }
 0x1bf   : > { %12157 = vst [vmem:[#allocation72_spill] sm:$0xff] %v8950_v32 }
 0x1c0   : > { %12158 = vst [vmem:[#allocation79_spill] sm:$0xff] %v8957_v52 }
 0x1c1   : > { %12159 = vst [vmem:[#allocation76_spill] sm:$0xff] %v8960_v56  ;;  %v9217_v56 = vld [vmem:[%s7488_s11 + $0x2f0] sm:$0xff] }
 0x1c2   : > { %12160 = vst [vmem:[#allocation80_spill] sm:$0xff] %v8967_v57  ;;  %v9097_v57 = vld [vmem:[%s7488_s11 + $0x230] sm:$0xff] }
 0x1c3   : > { %12161 = vst [vmem:[#allocation77_spill] sm:$0xff] %v8970_v28 }
 0x1c4   : > { %12162 = vst [vmem:[#allocation81_spill] sm:$0xff] %v8977_v42 }
 0x1c5   : > { %12163 = vst [vmem:[#allocation78_spill] sm:$0xff] %v8980_v35  ;;  %v9207_v35 = vld [vmem:[%s7488_s11 + $0x2e0] sm:$0xff] }
 0x1c6   : > { %12164 = vst [vmem:[#allocation118_spill] sm:$0xff] %v8987_v43  ;;  %v9040_v43 = vld [vmem:[%s7488_s11 + $0x1d8] sm:$0xff] }
 0x1c7   : > { %12165 = vst [vmem:[#allocation119_spill] sm:$0xff] %v8990_v12  ;;  %v9107_v12 = vld [vmem:[%s7488_s11 + $0x240] sm:$0xff] }
 0x1c8   : > { %12166 = vst [vmem:[#allocation120_spill] sm:$0xff] %v8997_v33  ;;  %v9050_v33 = vld [vmem:[%s7488_s11 + $0x1e8] sm:$0xff] }
 0x1c9   : > { %12167 = vst [vmem:[#allocation121_spill] sm:$0xff] %v9000_v59  ;;  %v9117_v59 = vld [vmem:[%s7488_s11 + $0x250] sm:$0xff] }
 0x1ca   : > { %12168 = vst [vmem:[#allocation122_spill] sm:$0xff] %v9007_v21  ;;  %v9060_v21 = vld [vmem:[%s7488_s11 + $0x1f8] sm:$0xff] }
 0x1cb   : > { %12169 = vst [vmem:[#allocation123_spill] sm:$0xff] %v9010_v34  ;;  %v9127_v34 = vld [vmem:[%s7488_s11 + $0x260] sm:$0xff] }
 0x1cc   : > { %12170 = vst [vmem:[#allocation124_spill] sm:$0xff] %v9017_v29  ;;  %v9070_v29 = vld [vmem:[%s7488_s11 + $0x208] sm:$0xff] }
 0x1cd   : > { %12171 = vst [vmem:[#allocation125_spill] sm:$0xff] %v9020_v7  ;;  %v9137_v7 = vld [vmem:[%s7488_s11 + $0x270] sm:$0xff] }
 0x1ce   : > { %12172 = vst [vmem:[#allocation126_spill] sm:$0xff] %v9027_v26  ;;  %v9080_v26 = vld [vmem:[%s7488_s11 + $0x218] sm:$0xff] }
 0x1cf   : > { %12173 = vst [vmem:[#allocation127_spill] sm:$0xff] %v9030_v41  ;;  %v9147_v41 = vld [vmem:[%s7488_s11 + $0x280] sm:$0xff] }
 0x1d0   : > { %12174 = vst [vmem:[#allocation128_spill] sm:$0xff] %v9037_v27  ;;  %v9090_v27 = vld [vmem:[%s7488_s11 + $0x228] sm:$0xff] }
 0x1d1   : > { %12175 = vst [vmem:[#allocation129_spill] sm:$0xff] %v9040_v43  ;;  %v9157_v43 = vld [vmem:[%s7488_s11 + $0x290] sm:$0xff] }
 0x1d2   : > { %12176 = vst [vmem:[#allocation130_spill] sm:$0xff] %v9047_v44  ;;  %v9100_v44 = vld [vmem:[%s7488_s11 + $0x238] sm:$0xff] }
 0x1d3   : > { %12177 = vst [vmem:[#allocation131_spill] sm:$0xff] %v9050_v33  ;;  %v9167_v33 = vld [vmem:[%s7488_s11 + $0x2a0] sm:$0xff] }
 0x1d4   : > { %12178 = vst [vmem:[#allocation132_spill] sm:$0xff] %v9057_v5  ;;  %v9110_v5 = vld [vmem:[%s7488_s11 + $0x248] sm:$0xff] }
 0x1d5   : > { %12179 = vst [vmem:[#allocation133_spill] sm:$0xff] %v9060_v21  ;;  %v9177_v21 = vld [vmem:[%s7488_s11 + $0x2b0] sm:$0xff] }
 0x1d6   : > { %12180 = vst [vmem:[#allocation134_spill] sm:$0xff] %v9067_v38  ;;  %v9120_v38 = vld [vmem:[%s7488_s11 + $0x258] sm:$0xff] }
 0x1d7   : > { %12181 = vst [vmem:[#allocation135_spill] sm:$0xff] %v9070_v29  ;;  %v9187_v29 = vld [vmem:[%s7488_s11 + $0x2c0] sm:$0xff] }
 0x1d8   : > { %12182 = vst [vmem:[#allocation136_spill] sm:$0xff] %v9077_v20  ;;  %v9130_v20 = vld [vmem:[%s7488_s11 + $0x268] sm:$0xff] }
 0x1d9   : > { %12183 = vst [vmem:[#allocation137_spill] sm:$0xff] %v9080_v26  ;;  %v9197_v26 = vld [vmem:[%s7488_s11 + $0x2d0] sm:$0xff] }
 0x1da   : > { %12184 = vst [vmem:[#allocation138_spill] sm:$0xff] %v9087_v48  ;;  %v9140_v48 = vld [vmem:[%s7488_s11 + $0x278] sm:$0xff] }
 0x1db   : > { %12185 = vst [vmem:[#allocation139_spill] sm:$0xff] %v9090_v27  ;;  %v9210_v27 = vld [vmem:[%s7488_s11 + $0x2e8] sm:$0xff] }
 0x1dc   : > { %12186 = vst [vmem:[#allocation140_spill] sm:$0xff] %v9097_v57  ;;  %v9150_v57 = vld [vmem:[%s7488_s11 + $0x288] sm:$0xff] }
 0x1dd   : > { %12187 = vst [vmem:[#allocation141_spill] sm:$0xff] %v9100_v44  ;;  %v12217_v44 = vunpack.c.l.bf16 %v8730_v51 }
 0x1de   : > { %12188 = vst [vmem:[#allocation142_spill] sm:$0xff] %v9107_v12  ;;  %v9160_v12 = vld [vmem:[%s7488_s11 + $0x298] sm:$0xff] }
 0x1df   : > { %12189 = vst [vmem:[#allocation143_spill] sm:$0xff] %v9110_v5  ;;  %v12219_v5 = vunpack.c.h.bf16 %v8730_v51  ;;  %v12227_v51 = vunpack.c.h.bf16 %v8777_v8 }
 0x1e0   : > { %12190 = vst [vmem:[#allocation144_spill] sm:$0xff] %v9117_v59  ;;  %v9170_v59 = vld [vmem:[%s7488_s11 + $0x2a8] sm:$0xff] }
 0x1e1   : > { %12191 = vst [vmem:[#allocation145_spill] sm:$0xff] %v9120_v38  ;;  %v12216_v38 = vunpack.c.l.bf16 %v8771_v58 }
 0x1e2   : > { %12192 = vst [vmem:[#allocation146_spill] sm:$0xff] %v9127_v34  ;;  %v9180_v34 = vld [vmem:[%s7488_s11 + $0x2b8] sm:$0xff] }
 0x1e3   : > { %12193 = vst [vmem:[#allocation147_spill] sm:$0xff] %v9130_v20  ;;  %v9220_v20 = vld [vmem:[%s7488_s11 + $0x2f8] sm:$0xff] }
 0x1e4   : > { %12194 = vst [vmem:[#allocation148_spill] sm:$0xff] %v9137_v7  ;;  %v9190_v7 = vld [vmem:[%s7488_s11 + $0x2c8] sm:$0xff] }
 0x1e5   : > { %12195 = vst [vmem:[#allocation149_spill] sm:$0xff] %v9140_v48 }
 0x1e6   : > { %12196 = vst [vmem:[#allocation150_spill] sm:$0xff] %v9147_v41  ;;  %v9200_v41 = vld [vmem:[%s7488_s11 + $0x2d8] sm:$0xff] }
 0x1e7   : > { %12197 = vst [vmem:[#allocation151_spill] sm:$0xff] %v9150_v57 }
 0x1e8   : > { %12198 = vst [vmem:[#allocation152_spill] sm:$0xff] %v9157_v43  ;;  %v12213_v43 = vunpack.c.l.bf16 %v8727_v23 }
 0x1e9   : > { %12199 = vst [vmem:[#allocation153_spill] sm:$0xff] %v9160_v12  ;;  %v12212_v12 = vunpack.c.l.bf16 %v8752_v46 }
 0x1ea   : > { %12200 = vst [vmem:[#allocation154_spill] sm:$0xff] %v9167_v33  ;;  %v12215_v33 = vunpack.c.h.bf16 %v8727_v23  ;;  %v12223_v23 = vunpack.c.h.bf16 %v8749_v22 }
 0x1eb   : > { %12201 = vst [vmem:[#allocation155_spill] sm:$0xff] %v9170_v59  ;;  %v12218_v59 = vunpack.c.h.bf16 %v8771_v58 }
 0x1ec   : > { %12202 = vst [vmem:[#allocation156_spill] sm:$0xff] %v9177_v21  ;;  %v12214_v21 = vunpack.c.h.bf16 %v8752_v46  ;;  %v12225_v46 = vunpack.c.l.bf16 %v8777_v8 }
 0x1ed   : > { %12203 = vst [vmem:[#allocation157_spill] sm:$0xff] %v9180_v34  ;;  %v2121_v48 = vmax.f32 %v12219_v5, %v12218_v59 }
 0x1ee   : > { %12204 = vst [vmem:[#allocation158_spill] sm:$0xff] %v9187_v29  ;;  %v2107_v57 = vmax.f32 %v12215_v33, %v12214_v21  ;;  %v12224_v33 = vunpack.c.l.bf16 %v8790_v61 }
 0x1ef   : > { %12205 = vst [vmem:[#allocation159_spill] sm:$0xff] %v9190_v7 }
 0x1f0   : > { %12206 = vst [vmem:[#allocation160_spill] sm:$0xff] %v9197_v26  ;;  %v2108_v58 = vrot.slane %v2107_v57, 4 }
 0x1f1   : > { %12207 = vst [vmem:[#allocation161_spill] sm:$0xff] %v9200_v41  ;;  %v2100_v41 = vmax.f32 %v12213_v43, %v12212_v12  ;;  %v12222_v43 = vunpack.c.h.bf16 %v8774_v19 }
 0x1f2   : > { %12208 = vst [vmem:[#allocation162_spill] sm:$0xff] %v9207_v35  ;;  %v2114_v35 = vmax.f32 %v12217_v44, %v12216_v38  ;;  %v2142_v44 = vmax.f32 %v12225_v46, %v12224_v33  ;;  %v12226_v38 = vunpack.c.h.bf16 %v8790_v61 }
 0x1f3   : > { %12209 = vst [vmem:[#allocation163_spill] sm:$0xff] %v9210_v27  ;;  %v2135_v21 = vmax.f32 %v12223_v23, %v12222_v43  ;;  %v2101_v5 = vrot.slane %v2100_v41, 4  ;;  %v2122_v27 = vrot.slane %v2121_v48, 4  ;;  %v2109_v43 = vmax.f32 %v2107_v57, %v2108_v58 }
 0x1f4   : > { %12210 = vst [vmem:[#allocation164_spill] sm:$0xff] %v9217_v56  ;;  %v12221_v56 = vunpack.c.l.bf16 %v8749_v22  ;;  %v2149_v59 = vmax.f32 %v12227_v51, %v12226_v38  ;;  %v2115_v26 = vrot.slane %v2114_v35, 4 }
 0x1f5   : > { %12211 = vst [vmem:[#allocation165_spill] sm:$0xff] %v9220_v20  ;;  %v12220_v20 = vunpack.c.l.bf16 %v8774_v19  ;;  %v2143_v19 = vrot.slane %v2142_v44, 4  ;;  %v2102_v22 = vmax.f32 %v2100_v41, %v2101_v5  ;;  %v2123_v29 = vmax.f32 %v2121_v48, %v2122_v27 }
 0x1f6   : > { %v2150_v7 = vrot.slane %v2149_v59, 4  ;;  %v2116_v23 = vmax.f32 %v2114_v35, %v2115_v26  ;;  %v2110_v52 = vrot.slane %v2109_v43, 2 }
 0x1f7   : > { %v2128_v12 = vmax.f32 %v12221_v56, %v12220_v20  ;;  %v2136_v56 = vrot.slane %v2135_v21, 4  ;;  %v2144_v33 = vmax.f32 %v2142_v44, %v2143_v19  ;;  %v2103_v61 = vrot.slane %v2102_v22, 2 }
 0x1f8   : > { %v2151_v46 = vmax.f32 %v2149_v59, %v2150_v7  ;;  %v2117_v8 = vrot.slane %v2116_v23, 2  ;;  %v2124_v38 = vrot.slane %v2123_v29, 2  ;;  %v2111_v4 = vmax.f32 %v2109_v43, %v2110_v52 }
 0x1f9   : > { %v2129_v20 = vrot.slane %v2128_v12, 4  ;;  %v2137_v42 = vmax.f32 %v2135_v21, %v2136_v56  ;;  %v2145_v17 = vrot.slane %v2144_v33, 2  ;;  %v2104_v9 = vmax.f32 %v2102_v22, %v2103_v61 }
 0x1fa   : > { %v2152_v32 = vrot.slane %v2151_v46, 2  ;;  %v2118_v24 = vmax.f32 %v2116_v23, %v2117_v8  ;;  %v2125_v45 = vmax.f32 %v2123_v29, %v2124_v38  ;;  %v2112_v26 = vrot.slane %v2111_v4, 1 }
 0x1fb   : > { %v2130_v34 = vmax.f32 %v2128_v12, %v2129_v20  ;;  %v2138_v28 = vrot.slane %v2137_v42, 2  ;;  %v2146_v35 = vmax.f32 %v2144_v33, %v2145_v17  ;;  %v2105_v27 = vrot.slane %v2104_v9, 1 }
 0x1fc   : > { %v2153_v48 = vmax.f32 %v2151_v46, %v2152_v32  ;;  %v2119_v12 = vrot.slane %v2118_v24, 1  ;;  %v2126_v7 = vrot.slane %v2125_v45, 1  ;;  %v9272_v20 = vmax.f32 %v2111_v4, %v2112_v26 }
 0x1fd   : > { %v2131_v51 = vrot.slane %v2130_v34, 2  ;;  %v2139_v57 = vmax.f32 %v2137_v42, %v2138_v28  ;;  %v2147_v59 = vrot.slane %v2146_v35, 1  ;;  %v9270_v58 = vmax.f32 %v2104_v9, %v2105_v27 }
 0x1fe   : > { %v2154_v5 = vrot.slane %v2153_v48, 1  ;;  %v9274_v56 = vmax.f32 %v2118_v24, %v2119_v12  ;;  %v9276_v52 = vmax.f32 %v2125_v45, %v2126_v7  ;;  %v12228_v42 = vunpack.c.l.bf16 %v8797_v53 }
 0x1ff   : > { %v2132_v41 = vmax.f32 %v2130_v34, %v2131_v51  ;;  %v2140_v44 = vrot.slane %v2139_v57, 1  ;;  %v9282_v32 = vmax.f32 %v2146_v35, %v2147_v59  ;;  %v12229_v17 = vunpack.c.l.bf16 %v8780_v13 }
 0x200   : > { %v9284_v29 = vmax.f32 %v2153_v48, %v2154_v5  ;;  %v12230_v4 = vunpack.c.h.bf16 %v8797_v53  ;;  %v12231_v24 = vunpack.c.h.bf16 %v8780_v13  ;;  %v12232_v45 = vunpack.c.l.bf16 %v8800_v40 }
 0x201   : > { %v2133_v21 = vrot.slane %v2132_v41, 1  ;;  %v9280_v28 = vmax.f32 %v2139_v57, %v2140_v44  ;;  %v2156_v9 = vmax.f32 %v12229_v17, %v12228_v42  ;;  %v12233_v22 = vunpack.c.l.bf16 %v8787_v11 }
 0x202   : > { %v2163_v19 = vmax.f32 %v12231_v24, %v12230_v4  ;;  %v12234_v23 = vunpack.c.h.bf16 %v8800_v40  ;;  %v12235_v33 = vunpack.c.h.bf16 %v8787_v11  ;;  %v12236_v61 = vunpack.c.l.bf16 %v8820_v2 }
 0x203   : > { %v9278_v34 = vmax.f32 %v2132_v41, %v2133_v21  ;;  %v2170_v43 = vmax.f32 %v12233_v22, %v12232_v45  ;;  %v12237_v8 = vunpack.c.l.bf16 %v8807_v6  ;;  %v12238_v53 = vunpack.c.h.bf16 %v8820_v2 }
 0x204   : > { %v2177_v46 = vmax.f32 %v12235_v33, %v12234_v23  ;;  %v12239_v13 = vunpack.c.h.bf16 %v8807_v6  ;;  %v12240_v41 = vunpack.c.l.bf16 %v8827_v36  ;;  %v12241_v57 = vunpack.c.l.bf16 %v8810_v54 }
 0x205   : > { %v2184_v38 = vmax.f32 %v12237_v8, %v12236_v61  ;;  %v12242_v40 = vunpack.c.h.bf16 %v8827_v36  ;;  %v12243_v11 = vunpack.c.h.bf16 %v8810_v54  ;;  %v2157_v27 = vrot.slane %v2156_v9, 4 }
 0x206   : > { %v2191_v51 = vmax.f32 %v12239_v13, %v12238_v53  ;;  %v2198_v35 = vmax.f32 %v12241_v57, %v12240_v41  ;;  %v2164_v26 = vrot.slane %v2163_v19, 4  ;;  %v2171_v12 = vrot.slane %v2170_v43, 4 }
 0x207   : > { %v2205_v48 = vmax.f32 %v12243_v11, %v12242_v40  ;;  %v2178_v7 = vrot.slane %v2177_v46, 4  ;;  %v2185_v21 = vrot.slane %v2184_v38, 4  ;;  %v2158_v6 = vmax.f32 %v2156_v9, %v2157_v27 }
 0x208   : > { %v2192_v44 = vrot.slane %v2191_v51, 4  ;;  %v2199_v2 = vrot.slane %v2198_v35, 4  ;;  %v2165_v5 = vmax.f32 %v2163_v19, %v2164_v26  ;;  %v2172_v42 = vmax.f32 %v2170_v43, %v2171_v12 }
 0x209   : > { %v2206_v59 = vrot.slane %v2205_v48, 4  ;;  %v2179_v17 = vmax.f32 %v2177_v46, %v2178_v7  ;;  %v2186_v4 = vmax.f32 %v2184_v38, %v2185_v21  ;;  %v2159_v36 = vrot.slane %v2158_v6, 2 }
 0x20a   : > { %v2193_v24 = vmax.f32 %v2191_v51, %v2192_v44  ;;  %v2200_v45 = vmax.f32 %v2198_v35, %v2199_v2  ;;  %v2166_v23 = vrot.slane %v2165_v5, 2  ;;  %v2173_v54 = vrot.slane %v2172_v42, 2 }
 0x20b   : > { %v2207_v22 = vmax.f32 %v2205_v48, %v2206_v59  ;;  %v2180_v33 = vrot.slane %v2179_v17, 2  ;;  %v2187_v61 = vrot.slane %v2186_v4, 2  ;;  %v2160_v41 = vmax.f32 %v2158_v6, %v2159_v36 }
 0x20c   : > { %v2194_v8 = vrot.slane %v2193_v24, 2  ;;  %v2201_v53 = vrot.slane %v2200_v45, 2  ;;  %v2167_v57 = vmax.f32 %v2165_v5, %v2166_v23  ;;  %v2174_v40 = vmax.f32 %v2172_v42, %v2173_v54 }
 0x20d   : > { %v2208_v13 = vrot.slane %v2207_v22, 2  ;;  %v2181_v11 = vmax.f32 %v2179_v17, %v2180_v33  ;;  %v2188_v9 = vmax.f32 %v2186_v4, %v2187_v61  ;;  %v2161_v38 = vrot.slane %v2160_v41, 1 }
 0x20e   : > { %v2195_v19 = vmax.f32 %v2193_v24, %v2194_v8  ;;  %v2202_v43 = vmax.f32 %v2200_v45, %v2201_v53  ;;  %v2168_v51 = vrot.slane %v2167_v57, 1  ;;  %v2175_v35 = vrot.slane %v2174_v40, 1 }
 0x20f   : > { %v2209_v46 = vmax.f32 %v2207_v22, %v2208_v13  ;;  %v2182_v48 = vrot.slane %v2181_v11, 1  ;;  %v2189_v27 = vrot.slane %v2188_v9, 1  ;;  %v9318_v21 = vmax.f32 %v2160_v41, %v2161_v38 }
 0x210   : > { %v2196_v26 = vrot.slane %v2195_v19, 1  ;;  %v2203_v12 = vrot.slane %v2202_v43, 1  ;;  %v9320_v44 = vmax.f32 %v2167_v57, %v2168_v51  ;;  %v9322_v2 = vmax.f32 %v2174_v40, %v2175_v35 }
 0x211   : > { %v2210_v7 = vrot.slane %v2209_v46, 1  ;;  %v9324_v59 = vmax.f32 %v2181_v11, %v2182_v48  ;;  %v9326_v6 = vmax.f32 %v2188_v9, %v2189_v27  ;;  %v12244_v4 = vunpack.c.l.bf16 %v8830_v15 }
 0x212   : > { %v9328_v5 = vmax.f32 %v2195_v19, %v2196_v26  ;;  %v9330_v42 = vmax.f32 %v2202_v43, %v2203_v12  ;;  %v12245_v24 = vunpack.c.l.bf16 %v8817_v37  ;;  %v12246_v22 = vunpack.c.h.bf16 %v8830_v15 }
 0x213   : > { %v9332_v17 = vmax.f32 %v2209_v46, %v2210_v7  ;;  %v12247_v36 = vunpack.c.h.bf16 %v8817_v37  ;;  %v12248_v54 = vunpack.c.l.bf16 %v8850_v31  ;;  %v12249_v33 = vunpack.c.l.bf16 %v8837_v62 }
 0x214   : > { %v2212_v45 = vmax.f32 %v12245_v24, %v12244_v4  ;;  %v12250_v8 = vunpack.c.h.bf16 %v8850_v31  ;;  %v12251_v53 = vunpack.c.h.bf16 %v8837_v62  ;;  %v12252_v41 = vunpack.c.l.bf16 %v8857_v63 }
 0x215   : > { %v2219_v23 = vmax.f32 %v12247_v36, %v12246_v22  ;;  %v2226_v61 = vmax.f32 %v12249_v33, %v12248_v54  ;;  %v12253_v57 = vunpack.c.l.bf16 %v8840_v50  ;;  %v12254_v15 = vunpack.c.h.bf16 %v8857_v63 }
 0x216   : > { %v2233_v13 = vmax.f32 %v12251_v53, %v12250_v8  ;;  %v12255_v37 = vunpack.c.h.bf16 %v8840_v50  ;;  %v12256_v9 = vunpack.c.l.bf16 %v8860_v1  ;;  %v12257_v19 = vunpack.c.l.bf16 %v8847_v10 }
 0x217   : > { %v2240_v40 = vmax.f32 %v12253_v57, %v12252_v41  ;;  %v12258_v31 = vunpack.c.h.bf16 %v8860_v1  ;;  %v12259_v62 = vunpack.c.h.bf16 %v8847_v10  ;;  %v2213_v38 = vrot.slane %v2212_v45, 4 }
 0x218   : > { %v2247_v11 = vmax.f32 %v12255_v37, %v12254_v15  ;;  %v2254_v43 = vmax.f32 %v12257_v19, %v12256_v9  ;;  %v2220_v51 = vrot.slane %v2219_v23, 4  ;;  %v2227_v35 = vrot.slane %v2226_v61, 4 }
 0x219   : > { %v2261_v46 = vmax.f32 %v12259_v62, %v12258_v31  ;;  %v2234_v48 = vrot.slane %v2233_v13, 4  ;;  %v2241_v27 = vrot.slane %v2240_v40, 4  ;;  %v2214_v50 = vmax.f32 %v2212_v45, %v2213_v38 }
 0x21a   : > { %v2248_v26 = vrot.slane %v2247_v11, 4  ;;  %v2255_v63 = vrot.slane %v2254_v43, 4  ;;  %v2221_v7 = vmax.f32 %v2219_v23, %v2220_v51  ;;  %v2228_v4 = vmax.f32 %v2226_v61, %v2227_v35 }
 0x21b   : > { %v2262_v12 = vrot.slane %v2261_v46, 4  ;;  %v2235_v24 = vmax.f32 %v2233_v13, %v2234_v48  ;;  %v2242_v22 = vmax.f32 %v2240_v40, %v2241_v27  ;;  %v2215_v1 = vrot.slane %v2214_v50, 2 }
 0x21c   : > { %v2249_v36 = vmax.f32 %v2247_v11, %v2248_v26  ;;  %v2256_v54 = vmax.f32 %v2254_v43, %v2255_v63  ;;  %v2222_v8 = vrot.slane %v2221_v7, 2  ;;  %v2229_v10 = vrot.slane %v2228_v4, 2 }
 0x21d   : > { %v2263_v33 = vmax.f32 %v2261_v46, %v2262_v12  ;;  %v2236_v53 = vrot.slane %v2235_v24, 2  ;;  %v2243_v41 = vrot.slane %v2242_v22, 2  ;;  %v2216_v9 = vmax.f32 %v2214_v50, %v2215_v1 }
 0x21e   : > { %v2250_v57 = vrot.slane %v2249_v36, 2  ;;  %v2257_v15 = vrot.slane %v2256_v54, 2  ;;  %v2223_v19 = vmax.f32 %v2221_v7, %v2222_v8  ;;  %v2230_v31 = vmax.f32 %v2228_v4, %v2229_v10 }
 0x21f   : > { %v2264_v37 = vrot.slane %v2263_v33, 2  ;;  %v2237_v62 = vmax.f32 %v2235_v24, %v2236_v53  ;;  %v2244_v45 = vmax.f32 %v2242_v22, %v2243_v41  ;;  %v2217_v40 = vrot.slane %v2216_v9, 1 }
 0x220   : > { %v2251_v23 = vmax.f32 %v2249_v36, %v2250_v57  ;;  %v2258_v61 = vmax.f32 %v2256_v54, %v2257_v15  ;;  %v2224_v11 = vrot.slane %v2223_v19, 1  ;;  %v2231_v43 = vrot.slane %v2230_v31, 1 }
 0x221   : > { %v2265_v13 = vmax.f32 %v2263_v33, %v2264_v37  ;;  %v2238_v46 = vrot.slane %v2237_v62, 1  ;;  %v2245_v38 = vrot.slane %v2244_v45, 1  ;;  %v9366_v27 = vmax.f32 %v2216_v9, %v2217_v40 }
 0x222   : > { %v2252_v51 = vrot.slane %v2251_v23, 1  ;;  %v2259_v35 = vrot.slane %v2258_v61, 1  ;;  %v9368_v26 = vmax.f32 %v2223_v19, %v2224_v11  ;;  %v9370_v63 = vmax.f32 %v2230_v31, %v2231_v43 }
 0x223   : > { %v2266_v48 = vrot.slane %v2265_v13, 1  ;;  %v9372_v12 = vmax.f32 %v2237_v62, %v2238_v46  ;;  %v9374_v50 = vmax.f32 %v2244_v45, %v2245_v38  ;;  %v12260_v22 = vunpack.c.l.bf16 %v8880_v30 }
 0x224   : > { %v9376_v7 = vmax.f32 %v2251_v23, %v2252_v51  ;;  %v9378_v4 = vmax.f32 %v2258_v61, %v2259_v35  ;;  %v12261_v36 = vunpack.c.l.bf16 %v8867_v18  ;;  %v12262_v33 = vunpack.c.h.bf16 %v8880_v30 }
 0x225   : > { %v9380_v24 = vmax.f32 %v2265_v13, %v2266_v48  ;;  %v12263_v1 = vunpack.c.h.bf16 %v8867_v18  ;;  %v12264_v10 = vunpack.c.l.bf16 %v8887_v14  ;;  %v12265_v53 = vunpack.c.l.bf16 %v8870_v49 }
 0x226   : > { %v2268_v54 = vmax.f32 %v12261_v36, %v12260_v22  ;;  %v12266_v57 = vunpack.c.h.bf16 %v8887_v14  ;;  %v12267_v15 = vunpack.c.h.bf16 %v8870_v49  ;;  %v12268_v9 = vunpack.c.l.bf16 %v8890_v39 }
 0x227   : > { %v2275_v8 = vmax.f32 %v12263_v1, %v12262_v33  ;;  %v2282_v41 = vmax.f32 %v12265_v53, %v12264_v10  ;;  %v12269_v19 = vunpack.c.l.bf16 %v8877_v25  ;;  %v12270_v30 = vunpack.c.h.bf16 %v8890_v39 }
 0x228   : > { %v2289_v37 = vmax.f32 %v12267_v15, %v12266_v57  ;;  %v12271_v18 = vunpack.c.h.bf16 %v8877_v25  ;;  %v12272_v45 = vunpack.c.l.bf16 %v8910_v47  ;;  %v12273_v23 = vunpack.c.l.bf16 %v8897_v60 }
 0x229   : > { %v2296_v31 = vmax.f32 %v12269_v19, %v12268_v9  ;;  %v12274_v14 = vunpack.c.h.bf16 %v8910_v47  ;;  %v12275_v49 = vunpack.c.h.bf16 %v8897_v60  ;;  %v2269_v40 = vrot.slane %v2268_v54, 4 }
 0x22a   : > { %v2303_v62 = vmax.f32 %v12271_v18, %v12270_v30  ;;  %v2310_v61 = vmax.f32 %v12273_v23, %v12272_v45  ;;  %v2276_v11 = vrot.slane %v2275_v8, 4  ;;  %v2283_v43 = vrot.slane %v2282_v41, 4 }
 0x22b   : > { %v2317_v13 = vmax.f32 %v12275_v49, %v12274_v14  ;;  %v2290_v46 = vrot.slane %v2289_v37, 4  ;;  %v2297_v38 = vrot.slane %v2296_v31, 4  ;;  %v2270_v25 = vmax.f32 %v2268_v54, %v2269_v40 }
 0x22c   : > { %v2304_v51 = vrot.slane %v2303_v62, 4  ;;  %v2311_v39 = vrot.slane %v2310_v61, 4  ;;  %v2277_v48 = vmax.f32 %v2275_v8, %v2276_v11  ;;  %v2284_v22 = vmax.f32 %v2282_v41, %v2283_v43 }
 0x22d   : > { %v2318_v35 = vrot.slane %v2317_v13, 4  ;;  %v2291_v36 = vmax.f32 %v2289_v37, %v2290_v46  ;;  %v2298_v33 = vmax.f32 %v2296_v31, %v2297_v38  ;;  %v2271_v47 = vrot.slane %v2270_v25, 2 }
 0x22e   : > { %v2305_v1 = vmax.f32 %v2303_v62, %v2304_v51  ;;  %v2312_v10 = vmax.f32 %v2310_v61, %v2311_v39  ;;  %v2278_v57 = vrot.slane %v2277_v48, 2  ;;  %v2285_v60 = vrot.slane %v2284_v22, 2 }
 0x22f   : > { %v2319_v53 = vmax.f32 %v2317_v13, %v2318_v35  ;;  %v2292_v15 = vrot.slane %v2291_v36, 2  ;;  %v2299_v9 = vrot.slane %v2298_v33, 2  ;;  %v2272_v45 = vmax.f32 %v2270_v25, %v2271_v47 }
 0x230   : > { %v2306_v19 = vrot.slane %v2305_v1, 2  ;;  %v2313_v30 = vrot.slane %v2312_v10, 2  ;;  %v2279_v23 = vmax.f32 %v2277_v48, %v2278_v57  ;;  %v2286_v14 = vmax.f32 %v2284_v22, %v2285_v60 }
 0x231   : > { %v2320_v18 = vrot.slane %v2319_v53, 2  ;;  %v2293_v49 = vmax.f32 %v2291_v36, %v2292_v15  ;;  %v2300_v54 = vmax.f32 %v2298_v33, %v2299_v9  ;;  %v2273_v31 = vrot.slane %v2272_v45, 1 }
 0x232   : > { %v2307_v8 = vmax.f32 %v2305_v1, %v2306_v19  ;;  %v2314_v41 = vmax.f32 %v2312_v10, %v2313_v30  ;;  %v2280_v62 = vrot.slane %v2279_v23, 1  ;;  %v2287_v61 = vrot.slane %v2286_v14, 1 }
 0x233   : > { %v2321_v37 = vmax.f32 %v2319_v53, %v2320_v18  ;;  %v2294_v13 = vrot.slane %v2293_v49, 1  ;;  %v2301_v40 = vrot.slane %v2300_v54, 1  ;;  %v9414_v38 = vmax.f32 %v2272_v45, %v2273_v31  ;;  %v12288_v45 = vld [vmem:[#allocation71_spill] sm:$0xff]  ;;  %v12296_v31 = vld [vmem:[#allocation70_spill] sm:$0xff] }
 0x234   : > { %v2308_v11 = vrot.slane %v2307_v8, 1  ;;  %v2315_v43 = vrot.slane %v2314_v41, 1  ;;  %v9416_v51 = vmax.f32 %v2279_v23, %v2280_v62  ;;  %v9418_v39 = vmax.f32 %v2286_v14, %v2287_v61  ;;  %v12290_v14 = vld [vmem:[#allocation73_spill] sm:$0xff] }
 0x235   : > { %v2322_v46 = vrot.slane %v2321_v37, 1  ;;  %v9420_v35 = vmax.f32 %v2293_v49, %v2294_v13  ;;  %v9422_v25 = vmax.f32 %v2300_v54, %v2301_v40  ;;  %v12280_v33 = vunpack.c.l.bf16 %v8917_v0 }
 0x236   : > { %v9424_v48 = vmax.f32 %v2307_v8, %v2308_v11  ;;  %v9426_v22 = vmax.f32 %v2314_v41, %v2315_v43  ;;  %v12281_v1 = vunpack.c.l.bf16 %v8900_v16  ;;  %v12282_v53 = vunpack.c.h.bf16 %v8917_v0  ;;  %v12294_v41 = vld [vmem:[#allocation75_spill] sm:$0xff] }
 0x237   : > { %12276 = vst [vmem:[#allocation166_spill] sm:$0xff] %v9422_v25  ;;  %v9428_v36 = vmax.f32 %v2321_v37, %v2322_v46  ;;  %v12283_v47 = vunpack.c.h.bf16 %v8900_v16  ;;  %v12284_v60 = vunpack.c.l.bf16 %v8920_v3  ;;  %v12285_v15 = vunpack.c.l.bf16 %v8907_v55 }
 0x238   : > { %12277 = vst [vmem:[#allocation167_spill] sm:$0xff] %v9424_v48  ;;  %v2324_v10 = vmax.f32 %v12281_v1, %v12280_v33  ;;  %v12286_v19 = vunpack.c.h.bf16 %v8920_v3  ;;  %v12287_v30 = vunpack.c.h.bf16 %v8907_v55  ;;  %v12289_v23 = vunpack.c.l.bf16 %v12288_v45 }
 0x239   : > { %12278 = vst [vmem:[#allocation168_spill] sm:$0xff] %v9426_v22  ;;  %v2331_v57 = vmax.f32 %v12283_v47, %v12282_v53  ;;  %v2338_v9 = vmax.f32 %v12285_v15, %v12284_v60  ;;  %v12291_v49 = vunpack.c.l.bf16 %v12290_v14  ;;  %v12292_v0 = vunpack.c.h.bf16 %v12288_v45 }
 0x23a   : > { %12279 = vst [vmem:[#allocation169_spill] sm:$0xff] %v9428_v36  ;;  %v2345_v18 = vmax.f32 %v12287_v30, %v12286_v19  ;;  %v12293_v16 = vunpack.c.h.bf16 %v12290_v14  ;;  %v12295_v37 = vunpack.c.l.bf16 %v12294_v41  ;;  %v12297_v62 = vunpack.c.l.bf16 %v12296_v31 }
 0x23b   : > { %v2352_v54 = vmax.f32 %v12291_v49, %v12289_v23  ;;  %v12298_v3 = vunpack.c.h.bf16 %v12294_v41  ;;  %v12299_v55 = vunpack.c.h.bf16 %v12296_v31  ;;  %v2325_v40 = vrot.slane %v2324_v10, 4 }
 0x23c   : > { %v2359_v8 = vmax.f32 %v12293_v16, %v12292_v0  ;;  %v2366_v61 = vmax.f32 %v12297_v62, %v12295_v37  ;;  %v2332_v11 = vrot.slane %v2331_v57, 4  ;;  %v2339_v43 = vrot.slane %v2338_v9, 4 }
 0x23d   : > { %v2373_v13 = vmax.f32 %v12299_v55, %v12298_v3  ;;  %v2346_v46 = vrot.slane %v2345_v18, 4  ;;  %v2353_v33 = vrot.slane %v2352_v54, 4  ;;  %v2326_v60 = vmax.f32 %v2324_v10, %v2325_v40 }
 0x23e   : > { %v2360_v1 = vrot.slane %v2359_v8, 4  ;;  %v2367_v53 = vrot.slane %v2366_v61, 4  ;;  %v2333_v15 = vmax.f32 %v2331_v57, %v2332_v11  ;;  %v2340_v19 = vmax.f32 %v2338_v9, %v2339_v43 }
 0x23f   : > { %v2374_v47 = vrot.slane %v2373_v13, 4  ;;  %v2347_v30 = vmax.f32 %v2345_v18, %v2346_v46  ;;  %v2354_v45 = vmax.f32 %v2352_v54, %v2353_v33  ;;  %v2327_v0 = vrot.slane %v2326_v60, 2 }
 0x240   : > { %v2361_v23 = vmax.f32 %v2359_v8, %v2360_v1  ;;  %v2368_v14 = vmax.f32 %v2366_v61, %v2367_v53  ;;  %v2334_v16 = vrot.slane %v2333_v15, 2  ;;  %v2341_v41 = vrot.slane %v2340_v19, 2 }
 0x241   : > { %v2375_v49 = vmax.f32 %v2373_v13, %v2374_v47  ;;  %v2348_v37 = vrot.slane %v2347_v30, 2  ;;  %v2355_v31 = vrot.slane %v2354_v45, 2  ;;  %v2328_v36 = vmax.f32 %v2326_v60, %v2327_v0 }
 0x242   : > { %v2362_v62 = vrot.slane %v2361_v23, 2  ;;  %v2369_v3 = vrot.slane %v2368_v14, 2  ;;  %v2335_v22 = vmax.f32 %v2333_v15, %v2334_v16  ;;  %v2342_v48 = vmax.f32 %v2340_v19, %v2341_v41  ;;  %v12316_v41 = vld [vmem:[#allocation79_spill] sm:$0xff] }
 0x243   : > { %v2376_v55 = vrot.slane %v2375_v49, 2  ;;  %v2349_v25 = vmax.f32 %v2347_v30, %v2348_v37  ;;  %v2356_v10 = vmax.f32 %v2354_v45, %v2355_v31  ;;  %v2329_v54 = vrot.slane %v2328_v36, 1  ;;  %v12308_v45 = vld [vmem:[#allocation72_spill] sm:$0xff] }
 0x244   : > { %v2363_v57 = vmax.f32 %v2361_v23, %v2362_v62  ;;  %v2370_v9 = vmax.f32 %v2368_v14, %v2369_v3  ;;  %v2336_v8 = vrot.slane %v2335_v22, 1  ;;  %v2343_v61 = vrot.slane %v2342_v48, 1  ;;  %v12310_v14 = vld [vmem:[#allocation74_spill] sm:$0xff] }
 0x245   : > { %v2377_v18 = vmax.f32 %v2375_v49, %v2376_v55  ;;  %v2350_v13 = vrot.slane %v2349_v25, 1  ;;  %v2357_v40 = vrot.slane %v2356_v10, 1  ;;  %v9462_v33 = vmax.f32 %v2328_v36, %v2329_v54 }
 0x246   : > { %v2364_v11 = vrot.slane %v2363_v57, 1  ;;  %v2371_v43 = vrot.slane %v2370_v9, 1  ;;  %v9464_v1 = vmax.f32 %v2335_v22, %v2336_v8  ;;  %v9466_v53 = vmax.f32 %v2342_v48, %v2343_v61 }
 0x247   : > { %v2378_v46 = vrot.slane %v2377_v18, 1  ;;  %12300 = vst [vmem:[#allocation71_spill] sm:$0xff] %v9462_v33  ;;  %v9468_v47 = vmax.f32 %v2349_v25, %v2350_v13  ;;  %v9470_v60 = vmax.f32 %v2356_v10, %v2357_v40  ;;  %v12309_v23 = vunpack.c.l.bf16 %v12308_v45  ;;  %v12314_v25 = vld [vmem:[#allocation77_spill] sm:$0xff]  ;;  %v12326_v40 = vld [vmem:[#allocation78_spill] sm:$0xff] }
 0x248   : > { %12301 = vst [vmem:[#allocation73_spill] sm:$0xff] %v9464_v1  ;;  %v9472_v15 = vmax.f32 %v2363_v57, %v2364_v11  ;;  %v9474_v19 = vmax.f32 %v2370_v9, %v2371_v43  ;;  %v12311_v49 = vunpack.c.l.bf16 %v12310_v14  ;;  %v12312_v22 = vunpack.c.h.bf16 %v12308_v45  ;;  %v12320_v10 = vld [vmem:[#allocation81_spill] sm:$0xff]  ;;  %v12322_v9 = vld [vmem:[#allocation76_spill] sm:$0xff] }
 0x249   : > { %12302 = vst [vmem:[#allocation75_spill] sm:$0xff] %v9466_v53  ;;  %v9476_v30 = vmax.f32 %v2377_v18, %v2378_v46  ;;  %v12313_v48 = vunpack.c.h.bf16 %v12310_v14  ;;  %v12315_v16 = vunpack.c.l.bf16 %v12314_v25  ;;  %v12317_v37 = vunpack.c.l.bf16 %v12316_v41  ;;  %v12328_v43 = vld [vmem:[#allocation80_spill] sm:$0xff] }
 0x24a   : > { %12303 = vst [vmem:[#allocation70_spill] sm:$0xff] %v9468_v47  ;;  %v2380_v36 = vmax.f32 %v12311_v49, %v12309_v23  ;;  %v12318_v62 = vunpack.c.h.bf16 %v12314_v25  ;;  %v12319_v3 = vunpack.c.h.bf16 %v12316_v41  ;;  %v12321_v57 = vunpack.c.l.bf16 %v12320_v10 }
 0x24b   : > { %12304 = vst [vmem:[#allocation170_spill] sm:$0xff] %v9470_v60  ;;  %v2387_v0 = vmax.f32 %v12313_v48, %v12312_v22  ;;  %v2394_v31 = vmax.f32 %v12317_v37, %v12315_v16  ;;  %v12323_v18 = vunpack.c.l.bf16 %v12322_v9  ;;  %v12324_v8 = vunpack.c.h.bf16 %v12320_v10 }
 0x24c   : > { %12305 = vst [vmem:[#allocation171_spill] sm:$0xff] %v9472_v15  ;;  %v2401_v55 = vmax.f32 %v12319_v3, %v12318_v62  ;;  %v12325_v61 = vunpack.c.h.bf16 %v12322_v9  ;;  %v12327_v11 = vunpack.c.l.bf16 %v12326_v40  ;;  %v12329_v46 = vunpack.c.l.bf16 %v12328_v43 }
 0x24d   : > { %12306 = vst [vmem:[#allocation172_spill] sm:$0xff] %v9474_v19  ;;  %v2408_v54 = vmax.f32 %v12323_v18, %v12321_v57  ;;  %v12330_v23 = vunpack.c.h.bf16 %v12326_v40  ;;  %v12331_v14 = vunpack.c.h.bf16 %v12328_v43  ;;  %v2381_v22 = vrot.slane %v2380_v36, 4 }
 0x24e   : > { %12307 = vst [vmem:[#allocation173_spill] sm:$0xff] %v9476_v30  ;;  %v2415_v13 = vmax.f32 %v12325_v61, %v12324_v8  ;;  %v2422_v45 = vmax.f32 %v12329_v46, %v12327_v11  ;;  %v2388_v48 = vrot.slane %v2387_v0, 4  ;;  %v2395_v25 = vrot.slane %v2394_v31, 4 }
 0x24f   : > { %v2429_v49 = vmax.f32 %v12331_v14, %v12330_v23  ;;  %v2402_v16 = vrot.slane %v2401_v55, 4  ;;  %v2409_v41 = vrot.slane %v2408_v54, 4  ;;  %v2382_v10 = vmax.f32 %v2380_v36, %v2381_v22 }
 0x250   : > { %v2416_v37 = vrot.slane %v2415_v13, 4  ;;  %v2423_v62 = vrot.slane %v2422_v45, 4  ;;  %v2389_v57 = vmax.f32 %v2387_v0, %v2388_v48  ;;  %v2396_v9 = vmax.f32 %v2394_v31, %v2395_v25 }
 0x251   : > { %v2430_v3 = vrot.slane %v2429_v49, 4  ;;  %v2403_v18 = vmax.f32 %v2401_v55, %v2402_v16  ;;  %v2410_v8 = vmax.f32 %v2408_v54, %v2409_v41  ;;  %v2383_v40 = vrot.slane %v2382_v10, 2 }
 0x252   : > { %v2417_v61 = vmax.f32 %v2415_v13, %v2416_v37  ;;  %v2424_v11 = vmax.f32 %v2422_v45, %v2423_v62  ;;  %v2390_v30 = vrot.slane %v2389_v57, 2  ;;  %v2397_v43 = vrot.slane %v2396_v9, 2 }
 0x253   : > { %v2431_v46 = vmax.f32 %v2429_v49, %v2430_v3  ;;  %v2404_v23 = vrot.slane %v2403_v18, 2  ;;  %v2411_v14 = vrot.slane %v2410_v8, 2  ;;  %v2384_v47 = vmax.f32 %v2382_v10, %v2383_v40  ;;  %v12340_v10 = vld [vmem:[#allocation121_spill] sm:$0xff] }
 0x254   : > { %v2418_v19 = vrot.slane %v2417_v61, 2  ;;  %v2425_v15 = vrot.slane %v2424_v11, 2  ;;  %v2391_v53 = vmax.f32 %v2389_v57, %v2390_v30  ;;  %v2398_v1 = vmax.f32 %v2396_v9, %v2397_v43  ;;  %v12342_v9 = vld [vmem:[#allocation118_spill] sm:$0xff] }
 0x255   : > { %v2432_v60 = vrot.slane %v2431_v46, 2  ;;  %v2405_v33 = vmax.f32 %v2403_v18, %v2404_v23  ;;  %v2412_v36 = vmax.f32 %v2410_v8, %v2411_v14  ;;  %v2385_v54 = vrot.slane %v2384_v47, 1 }
 0x256   : > { %v2419_v0 = vmax.f32 %v2417_v61, %v2418_v19  ;;  %v2426_v31 = vmax.f32 %v2424_v11, %v2425_v15  ;;  %v2392_v13 = vrot.slane %v2391_v53, 1  ;;  %v2399_v45 = vrot.slane %v2398_v1, 1  ;;  %v12348_v11 = vld [vmem:[#allocation119_spill] sm:$0xff] }
 0x257   : > { %v2433_v55 = vmax.f32 %v2431_v46, %v2432_v60  ;;  %v2406_v49 = vrot.slane %v2405_v33, 1  ;;  %v2413_v22 = vrot.slane %v2412_v36, 1  ;;  %v9510_v41 = vmax.f32 %v2384_v47, %v2385_v54 }
 0x258   : > { %v2420_v48 = vrot.slane %v2419_v0, 1  ;;  %v2427_v25 = vrot.slane %v2426_v31, 1  ;;  %v9512_v37 = vmax.f32 %v2391_v53, %v2392_v13  ;;  %v9514_v62 = vmax.f32 %v2398_v1, %v2399_v45 }
 0x259   : > { %v2434_v16 = vrot.slane %v2433_v55, 1  ;;  %12332 = vst [vmem:[#allocation72_spill] sm:$0xff] %v9510_v41  ;;  %v9516_v30 = vmax.f32 %v2405_v33, %v2406_v49  ;;  %v9518_v3 = vmax.f32 %v2412_v36, %v2413_v22  ;;  %v12341_v57 = vunpack.c.l.bf16 %v12340_v10  ;;  %v12346_v33 = vld [vmem:[#allocation122_spill] sm:$0xff]  ;;  %v12352_v36 = vld [vmem:[#allocation123_spill] sm:$0xff] }
 0x25a   : > { %12333 = vst [vmem:[#allocation74_spill] sm:$0xff] %v9512_v37  ;;  %v9520_v15 = vmax.f32 %v2419_v0, %v2420_v48  ;;  %v9522_v60 = vmax.f32 %v2426_v31, %v2427_v25  ;;  %v12343_v18 = vunpack.c.l.bf16 %v12342_v9  ;;  %v12344_v53 = vunpack.c.h.bf16 %v12340_v10  ;;  %v12354_v31 = vld [vmem:[#allocation120_spill] sm:$0xff]  ;;  %v12358_v22 = vld [vmem:[#allocation127_spill] sm:$0xff] }
 0x25b   : > { %12334 = vst [vmem:[#allocation77_spill] sm:$0xff] %v9514_v62  ;;  %v9524_v19 = vmax.f32 %v2433_v55, %v2434_v16  ;;  %v12345_v1 = vunpack.c.h.bf16 %v12342_v9  ;;  %v12347_v61 = vunpack.c.l.bf16 %v12346_v33  ;;  %v12349_v46 = vunpack.c.l.bf16 %v12348_v11  ;;  %v12360_v25 = vld [vmem:[#allocation124_spill] sm:$0xff] }
 0x25c   : > { %12335 = vst [vmem:[#allocation79_spill] sm:$0xff] %v9516_v30  ;;  %v2436_v47 = vmax.f32 %v12343_v18, %v12341_v57  ;;  %v12350_v43 = vunpack.c.h.bf16 %v12346_v33  ;;  %v12351_v23 = vunpack.c.h.bf16 %v12348_v11  ;;  %v12353_v0 = vunpack.c.l.bf16 %v12352_v36 }
 0x25d   : > { %12336 = vst [vmem:[#allocation81_spill] sm:$0xff] %v9518_v3  ;;  %v2443_v8 = vmax.f32 %v12345_v1, %v12344_v53  ;;  %v2450_v40 = vmax.f32 %v12349_v46, %v12347_v61  ;;  %v12355_v55 = vunpack.c.l.bf16 %v12354_v31  ;;  %v12356_v13 = vunpack.c.h.bf16 %v12352_v36 }
 0x25e   : > { %12337 = vst [vmem:[#allocation76_spill] sm:$0xff] %v9520_v15  ;;  %v2457_v14 = vmax.f32 %v12351_v23, %v12350_v43  ;;  %v12357_v45 = vunpack.c.h.bf16 %v12354_v31  ;;  %v12359_v48 = vunpack.c.l.bf16 %v12358_v22  ;;  %v12361_v16 = vunpack.c.l.bf16 %v12360_v25 }
 0x25f   : > { %12338 = vst [vmem:[#allocation78_spill] sm:$0xff] %v9522_v60  ;;  %v2464_v54 = vmax.f32 %v12355_v55, %v12353_v0  ;;  %v12362_v57 = vunpack.c.h.bf16 %v12358_v22  ;;  %v12363_v9 = vunpack.c.h.bf16 %v12360_v25  ;;  %v2437_v53 = vrot.slane %v2436_v47, 4 }
 0x260   : > { %12339 = vst [vmem:[#allocation80_spill] sm:$0xff] %v9524_v19  ;;  %v2471_v49 = vmax.f32 %v12357_v45, %v12356_v13  ;;  %v2478_v10 = vmax.f32 %v12361_v16, %v12359_v48  ;;  %v2444_v1 = vrot.slane %v2443_v8, 4  ;;  %v2451_v33 = vrot.slane %v2450_v40, 4 }
 0x261   : > { %v2485_v18 = vmax.f32 %v12363_v9, %v12362_v57  ;;  %v2458_v61 = vrot.slane %v2457_v14, 4  ;;  %v2465_v11 = vrot.slane %v2464_v54, 4  ;;  %v2438_v36 = vmax.f32 %v2436_v47, %v2437_v53 }
 0x262   : > { %v2472_v46 = vrot.slane %v2471_v49, 4  ;;  %v2479_v43 = vrot.slane %v2478_v10, 4  ;;  %v2445_v0 = vmax.f32 %v2443_v8, %v2444_v1  ;;  %v2452_v31 = vmax.f32 %v2450_v40, %v2451_v33 }
 0x263   : > { %v2486_v23 = vrot.slane %v2485_v18, 4  ;;  %v2459_v55 = vmax.f32 %v2457_v14, %v2458_v61  ;;  %v2466_v13 = vmax.f32 %v2464_v54, %v2465_v11  ;;  %v2439_v22 = vrot.slane %v2438_v36, 2 }
 0x264   : > { %v2473_v45 = vmax.f32 %v2471_v49, %v2472_v46  ;;  %v2480_v48 = vmax.f32 %v2478_v10, %v2479_v43  ;;  %v2446_v19 = vrot.slane %v2445_v0, 2  ;;  %v2453_v25 = vrot.slane %v2452_v31, 2 }
 0x265   : > { %v2487_v16 = vmax.f32 %v2485_v18, %v2486_v23  ;;  %v2460_v57 = vrot.slane %v2459_v55, 2  ;;  %v2467_v9 = vrot.slane %v2466_v13, 2  ;;  %v2440_v30 = vmax.f32 %v2438_v36, %v2439_v22  ;;  %v12372_v36 = vld [vmem:[#allocation128_spill] sm:$0xff] }
 0x266   : > { %v2474_v60 = vrot.slane %v2473_v45, 2  ;;  %v2481_v15 = vrot.slane %v2480_v48, 2  ;;  %v2447_v62 = vmax.f32 %v2445_v0, %v2446_v19  ;;  %v2454_v37 = vmax.f32 %v2452_v31, %v2453_v25  ;;  %v12374_v31 = vld [vmem:[#allocation125_spill] sm:$0xff] }
 0x267   : > { %v2488_v3 = vrot.slane %v2487_v16, 2  ;;  %v2461_v41 = vmax.f32 %v2459_v55, %v2460_v57  ;;  %v2468_v47 = vmax.f32 %v2466_v13, %v2467_v9  ;;  %v2441_v54 = vrot.slane %v2440_v30, 1 }
 0x268   : > { %v2475_v8 = vmax.f32 %v2473_v45, %v2474_v60  ;;  %v2482_v40 = vmax.f32 %v2480_v48, %v2481_v15  ;;  %v2448_v49 = vrot.slane %v2447_v62, 1  ;;  %v2455_v10 = vrot.slane %v2454_v37, 1  ;;  %v12380_v48 = vld [vmem:[#allocation126_spill] sm:$0xff] }
 0x269   : > { %v2489_v14 = vmax.f32 %v2487_v16, %v2488_v3  ;;  %v2462_v18 = vrot.slane %v2461_v41, 1  ;;  %v2469_v53 = vrot.slane %v2468_v47, 1  ;;  %v9558_v11 = vmax.f32 %v2440_v30, %v2441_v54 }
 0x26a   : > { %v2476_v1 = vrot.slane %v2475_v8, 1  ;;  %v2483_v33 = vrot.slane %v2482_v40, 1  ;;  %v9560_v46 = vmax.f32 %v2447_v62, %v2448_v49  ;;  %v9562_v43 = vmax.f32 %v2454_v37, %v2455_v10 }
 0x26b   : > { %v2490_v61 = vrot.slane %v2489_v14, 1  ;;  %12364 = vst [vmem:[#allocation121_spill] sm:$0xff] %v9558_v11  ;;  %v9564_v19 = vmax.f32 %v2461_v41, %v2462_v18  ;;  %v9566_v23 = vmax.f32 %v2468_v47, %v2469_v53  ;;  %v12373_v0 = vunpack.c.l.bf16 %v12372_v36  ;;  %v12378_v41 = vld [vmem:[#allocation129_spill] sm:$0xff]  ;;  %v12390_v53 = vld [vmem:[#allocation134_spill] sm:$0xff] }
 0x26c   : > { %12365 = vst [vmem:[#allocation118_spill] sm:$0xff] %v9560_v46  ;;  %v9568_v15 = vmax.f32 %v2475_v8, %v2476_v1  ;;  %v9570_v3 = vmax.f32 %v2482_v40, %v2483_v33  ;;  %v12375_v55 = vunpack.c.l.bf16 %v12374_v31  ;;  %v12376_v62 = vunpack.c.h.bf16 %v12372_v36  ;;  %v12384_v47 = vld [vmem:[#allocation133_spill] sm:$0xff]  ;;  %v12386_v40 = vld [vmem:[#allocation130_spill] sm:$0xff]  ;;  %v12392_v33 = vld [vmem:[#allocation131_spill] sm:$0xff] }
 0x26d   : > { %12366 = vst [vmem:[#allocation122_spill] sm:$0xff] %v9562_v43  ;;  %v9572_v60 = vmax.f32 %v2489_v14, %v2490_v61  ;;  %v12377_v37 = vunpack.c.h.bf16 %v12374_v31  ;;  %v12379_v45 = vunpack.c.l.bf16 %v12378_v41  ;;  %v12381_v16 = vunpack.c.l.bf16 %v12380_v48 }
 0x26e   : > { %12367 = vst [vmem:[#allocation119_spill] sm:$0xff] %v9564_v19  ;;  %v2492_v30 = vmax.f32 %v12375_v55, %v12373_v0  ;;  %v12382_v25 = vunpack.c.h.bf16 %v12378_v41  ;;  %v12383_v57 = vunpack.c.h.bf16 %v12380_v48  ;;  %v12385_v8 = vunpack.c.l.bf16 %v12384_v47 }
 0x26f   : > { %12368 = vst [vmem:[#allocation123_spill] sm:$0xff] %v9566_v23  ;;  %v2499_v13 = vmax.f32 %v12377_v37, %v12376_v62  ;;  %v2506_v22 = vmax.f32 %v12381_v16, %v12379_v45  ;;  %v12387_v14 = vunpack.c.l.bf16 %v12386_v40  ;;  %v12388_v49 = vunpack.c.h.bf16 %v12384_v47 }
 0x270   : > { %12369 = vst [vmem:[#allocation120_spill] sm:$0xff] %v9568_v15  ;;  %v2513_v9 = vmax.f32 %v12383_v57, %v12382_v25  ;;  %v12389_v10 = vunpack.c.h.bf16 %v12386_v40  ;;  %v12391_v1 = vunpack.c.l.bf16 %v12390_v53  ;;  %v12393_v61 = vunpack.c.l.bf16 %v12392_v33 }
 0x271   : > { %12370 = vst [vmem:[#allocation127_spill] sm:$0xff] %v9570_v3  ;;  %v2520_v54 = vmax.f32 %v12387_v14, %v12385_v8  ;;  %v12394_v0 = vunpack.c.h.bf16 %v12390_v53  ;;  %v12395_v31 = vunpack.c.h.bf16 %v12392_v33  ;;  %v2493_v62 = vrot.slane %v2492_v30, 4 }
 0x272   : > { %12371 = vst [vmem:[#allocation124_spill] sm:$0xff] %v9572_v60  ;;  %v2527_v18 = vmax.f32 %v12389_v10, %v12388_v49  ;;  %v2534_v36 = vmax.f32 %v12393_v61, %v12391_v1  ;;  %v2500_v37 = vrot.slane %v2499_v13, 4  ;;  %v2507_v41 = vrot.slane %v2506_v22, 4 }
 0x273   : > { %v2541_v55 = vmax.f32 %v12395_v31, %v12394_v0  ;;  %v2514_v45 = vrot.slane %v2513_v9, 4  ;;  %v2521_v48 = vrot.slane %v2520_v54, 4  ;;  %v2494_v47 = vmax.f32 %v2492_v30, %v2493_v62 }
 0x274   : > { %v2528_v16 = vrot.slane %v2527_v18, 4  ;;  %v2535_v25 = vrot.slane %v2534_v36, 4  ;;  %v2501_v8 = vmax.f32 %v2499_v13, %v2500_v37  ;;  %v2508_v40 = vmax.f32 %v2506_v22, %v2507_v41 }
 0x275   : > { %v2542_v57 = vrot.slane %v2541_v55, 4  ;;  %v2515_v14 = vmax.f32 %v2513_v9, %v2514_v45  ;;  %v2522_v49 = vmax.f32 %v2520_v54, %v2521_v48  ;;  %v2495_v53 = vrot.slane %v2494_v47, 2 }
 0x276   : > { %v2529_v10 = vmax.f32 %v2527_v18, %v2528_v16  ;;  %v2536_v1 = vmax.f32 %v2534_v36, %v2535_v25  ;;  %v2502_v60 = vrot.slane %v2501_v8, 2  ;;  %v2509_v33 = vrot.slane %v2508_v40, 2 }
 0x277   : > { %v2543_v61 = vmax.f32 %v2541_v55, %v2542_v57  ;;  %v2516_v0 = vrot.slane %v2515_v14, 2  ;;  %v2523_v31 = vrot.slane %v2522_v49, 2  ;;  %v2496_v19 = vmax.f32 %v2494_v47, %v2495_v53  ;;  %v12404_v47 = vld [vmem:[#allocation135_spill] sm:$0xff] }
 0x278   : > { %v2530_v3 = vrot.slane %v2529_v10, 2  ;;  %v2537_v15 = vrot.slane %v2536_v1, 2  ;;  %v2503_v43 = vmax.f32 %v2501_v8, %v2502_v60  ;;  %v2510_v46 = vmax.f32 %v2508_v40, %v2509_v33  ;;  %v12406_v40 = vld [vmem:[#allocation132_spill] sm:$0xff] }
 0x279   : > { %v2544_v23 = vrot.slane %v2543_v61, 2  ;;  %v2517_v11 = vmax.f32 %v2515_v14, %v2516_v0  ;;  %v2524_v30 = vmax.f32 %v2522_v49, %v2523_v31  ;;  %v2497_v54 = vrot.slane %v2496_v19, 1 }
 0x27a   : > { %v2531_v13 = vmax.f32 %v2529_v10, %v2530_v3  ;;  %v2538_v22 = vmax.f32 %v2536_v1, %v2537_v15  ;;  %v2504_v18 = vrot.slane %v2503_v43, 1  ;;  %v2511_v36 = vrot.slane %v2510_v46, 1  ;;  %v12412_v1 = vld [vmem:[#allocation136_spill] sm:$0xff] }
 0x27b   : > { %v2545_v9 = vmax.f32 %v2543_v61, %v2544_v23  ;;  %v2518_v55 = vrot.slane %v2517_v11, 1  ;;  %v2525_v62 = vrot.slane %v2524_v30, 1  ;;  %v9606_v48 = vmax.f32 %v2496_v19, %v2497_v54 }
 0x27c   : > { %v2532_v37 = vrot.slane %v2531_v13, 1  ;;  %v2539_v41 = vrot.slane %v2538_v22, 1  ;;  %v9608_v16 = vmax.f32 %v2503_v43, %v2504_v18  ;;  %v9610_v25 = vmax.f32 %v2510_v46, %v2511_v36 }
 0x27d   : > { %v2546_v45 = vrot.slane %v2545_v9, 1  ;;  %12396 = vst [vmem:[#allocation128_spill] sm:$0xff] %v9606_v48  ;;  %v9612_v60 = vmax.f32 %v2517_v11, %v2518_v55  ;;  %v9614_v57 = vmax.f32 %v2524_v30, %v2525_v62  ;;  %v12405_v8 = vunpack.c.l.bf16 %v12404_v47  ;;  %v12410_v11 = vld [vmem:[#allocation139_spill] sm:$0xff]  ;;  %v12416_v30 = vld [vmem:[#allocation140_spill] sm:$0xff]  ;;  %v12422_v62 = vld [vmem:[#allocation141_spill] sm:$0xff] }
 0x27e   : > { %12397 = vst [vmem:[#allocation125_spill] sm:$0xff] %v9608_v16  ;;  %v9616_v15 = vmax.f32 %v2531_v13, %v2532_v37  ;;  %v9618_v23 = vmax.f32 %v2538_v22, %v2539_v41  ;;  %v12407_v14 = vunpack.c.l.bf16 %v12406_v40  ;;  %v12408_v43 = vunpack.c.h.bf16 %v12404_v47  ;;  %v12418_v22 = vld [vmem:[#allocation137_spill] sm:$0xff]  ;;  %v12424_v41 = vld [vmem:[#allocation138_spill] sm:$0xff] }
 0x27f   : > { %12398 = vst [vmem:[#allocation129_spill] sm:$0xff] %v9610_v25  ;;  %v9620_v3 = vmax.f32 %v2545_v9, %v2546_v45  ;;  %v12409_v46 = vunpack.c.h.bf16 %v12406_v40  ;;  %v12411_v10 = vunpack.c.l.bf16 %v12410_v11  ;;  %v12413_v61 = vunpack.c.l.bf16 %v12412_v1 }
 0x280   : > { %12399 = vst [vmem:[#allocation126_spill] sm:$0xff] %v9612_v60  ;;  %v2548_v19 = vmax.f32 %v12407_v14, %v12405_v8  ;;  %v12414_v33 = vunpack.c.h.bf16 %v12410_v11  ;;  %v12415_v0 = vunpack.c.h.bf16 %v12412_v1  ;;  %v12417_v13 = vunpack.c.l.bf16 %v12416_v30 }
 0x281   : > { %12400 = vst [vmem:[#allocation133_spill] sm:$0xff] %v9614_v57  ;;  %v2555_v49 = vmax.f32 %v12409_v46, %v12408_v43  ;;  %v2562_v53 = vmax.f32 %v12413_v61, %v12411_v10  ;;  %v12419_v9 = vunpack.c.l.bf16 %v12418_v22  ;;  %v12420_v18 = vunpack.c.h.bf16 %v12416_v30 }
 0x282   : > { %12401 = vst [vmem:[#allocation130_spill] sm:$0xff] %v9616_v15  ;;  %v2569_v31 = vmax.f32 %v12415_v0, %v12414_v33  ;;  %v12421_v36 = vunpack.c.h.bf16 %v12418_v22  ;;  %v12423_v37 = vunpack.c.l.bf16 %v12422_v62  ;;  %v12425_v45 = vunpack.c.l.bf16 %v12424_v41 }
 0x283   : > { %12402 = vst [vmem:[#allocation134_spill] sm:$0xff] %v9618_v23  ;;  %v2576_v54 = vmax.f32 %v12419_v9, %v12417_v13  ;;  %v12426_v8 = vunpack.c.h.bf16 %v12422_v62  ;;  %v12427_v40 = vunpack.c.h.bf16 %v12424_v41  ;;  %v2549_v43 = vrot.slane %v2548_v19, 4 }
 0x284   : > { %12403 = vst [vmem:[#allocation131_spill] sm:$0xff] %v9620_v3  ;;  %v2583_v55 = vmax.f32 %v12421_v36, %v12420_v18  ;;  %v2590_v47 = vmax.f32 %v12425_v45, %v12423_v37  ;;  %v2556_v46 = vrot.slane %v2555_v49, 4  ;;  %v2563_v11 = vrot.slane %v2562_v53, 4 }
 0x285   : > { %v2597_v14 = vmax.f32 %v12427_v40, %v12426_v8  ;;  %v2570_v10 = vrot.slane %v2569_v31, 4  ;;  %v2577_v1 = vrot.slane %v2576_v54, 4  ;;  %v2550_v30 = vmax.f32 %v2548_v19, %v2549_v43 }
 0x286   : > { %v2584_v61 = vrot.slane %v2583_v55, 4  ;;  %v2591_v33 = vrot.slane %v2590_v47, 4  ;;  %v2557_v13 = vmax.f32 %v2555_v49, %v2556_v46  ;;  %v2564_v22 = vmax.f32 %v2562_v53, %v2563_v11 }
 0x287   : > { %v2598_v0 = vrot.slane %v2597_v14, 4  ;;  %v2571_v9 = vmax.f32 %v2569_v31, %v2570_v10  ;;  %v2578_v18 = vmax.f32 %v2576_v54, %v2577_v1  ;;  %v2551_v62 = vrot.slane %v2550_v30, 2 }
 0x288   : > { %v2585_v36 = vmax.f32 %v2583_v55, %v2584_v61  ;;  %v2592_v37 = vmax.f32 %v2590_v47, %v2591_v33  ;;  %v2558_v3 = vrot.slane %v2557_v13, 2  ;;  %v2565_v41 = vrot.slane %v2564_v22, 2 }
 0x289   : > { %v2599_v45 = vmax.f32 %v2597_v14, %v2598_v0  ;;  %v2572_v8 = vrot.slane %v2571_v9, 2  ;;  %v2579_v40 = vrot.slane %v2578_v18, 2  ;;  %v2552_v60 = vmax.f32 %v2550_v30, %v2551_v62  ;;  %v12436_v30 = vld [vmem:[#allocation145_spill] sm:$0xff] }
 0x28a   : > { %v2586_v23 = vrot.slane %v2585_v36, 2  ;;  %v2593_v15 = vrot.slane %v2592_v37, 2  ;;  %v2559_v25 = vmax.f32 %v2557_v13, %v2558_v3  ;;  %v2566_v16 = vmax.f32 %v2564_v22, %v2565_v41  ;;  %v12438_v22 = vld [vmem:[#allocation142_spill] sm:$0xff] }
 0x28b   : > { %v2600_v57 = vrot.slane %v2599_v45, 2  ;;  %v2573_v48 = vmax.f32 %v2571_v9, %v2572_v8  ;;  %v2580_v19 = vmax.f32 %v2578_v18, %v2579_v40  ;;  %v2553_v54 = vrot.slane %v2552_v60, 1 }
 0x28c   : > { %v2587_v49 = vmax.f32 %v2585_v36, %v2586_v23  ;;  %v2594_v53 = vmax.f32 %v2592_v37, %v2593_v15  ;;  %v2560_v55 = vrot.slane %v2559_v25, 1  ;;  %v2567_v47 = vrot.slane %v2566_v16, 1  ;;  %v12444_v37 = vld [vmem:[#allocation143_spill] sm:$0xff] }
 0x28d   : > { %v2601_v31 = vmax.f32 %v2599_v45, %v2600_v57  ;;  %v2574_v14 = vrot.slane %v2573_v48, 1  ;;  %v2581_v43 = vrot.slane %v2580_v19, 1  ;;  %v9654_v1 = vmax.f32 %v2552_v60, %v2553_v54 }
 0x28e   : > { %v2588_v46 = vrot.slane %v2587_v49, 1  ;;  %v2595_v11 = vrot.slane %v2594_v53, 1  ;;  %v9656_v61 = vmax.f32 %v2559_v25, %v2560_v55  ;;  %v9658_v33 = vmax.f32 %v2566_v16, %v2567_v47 }
 0x28f   : > { %v2602_v10 = vrot.slane %v2601_v31, 1  ;;  %12428 = vst [vmem:[#allocation135_spill] sm:$0xff] %v9654_v1  ;;  %v9660_v3 = vmax.f32 %v2573_v48, %v2574_v14  ;;  %v9662_v0 = vmax.f32 %v2580_v19, %v2581_v43  ;;  %v12437_v13 = vunpack.c.l.bf16 %v12436_v30  ;;  %v12442_v48 = vld [vmem:[#allocation146_spill] sm:$0xff]  ;;  %v12448_v19 = vld [vmem:[#allocation147_spill] sm:$0xff] }
 0x290   : > { %12429 = vst [vmem:[#allocation132_spill] sm:$0xff] %v9656_v61  ;;  %v9664_v15 = vmax.f32 %v2587_v49, %v2588_v46  ;;  %v9666_v57 = vmax.f32 %v2594_v53, %v2595_v11  ;;  %v12439_v9 = vunpack.c.l.bf16 %v12438_v22  ;;  %v12440_v25 = vunpack.c.h.bf16 %v12436_v30  ;;  %v12450_v53 = vld [vmem:[#allocation144_spill] sm:$0xff]  ;;  %v12454_v43 = vld [vmem:[#allocation151_spill] sm:$0xff] }
 0x291   : > { %12430 = vst [vmem:[#allocation139_spill] sm:$0xff] %v9658_v33  ;;  %v9668_v23 = vmax.f32 %v2601_v31, %v2602_v10  ;;  %v12441_v16 = vunpack.c.h.bf16 %v12438_v22  ;;  %v12443_v36 = vunpack.c.l.bf16 %v12442_v48  ;;  %v12445_v45 = vunpack.c.l.bf16 %v12444_v37  ;;  %v12456_v11 = vld [vmem:[#allocation148_spill] sm:$0xff] }
 0x292   : > { %12431 = vst [vmem:[#allocation136_spill] sm:$0xff] %v9660_v3  ;;  %v2604_v60 = vmax.f32 %v12439_v9, %v12437_v13  ;;  %v12446_v41 = vunpack.c.h.bf16 %v12442_v48  ;;  %v12447_v8 = vunpack.c.h.bf16 %v12444_v37  ;;  %v12449_v49 = vunpack.c.l.bf16 %v12448_v19 }
 0x293   : > { %12432 = vst [vmem:[#allocation140_spill] sm:$0xff] %v9662_v0  ;;  %v2611_v18 = vmax.f32 %v12441_v16, %v12440_v25  ;;  %v2618_v62 = vmax.f32 %v12445_v45, %v12443_v36  ;;  %v12451_v31 = vunpack.c.l.bf16 %v12450_v53  ;;  %v12452_v55 = vunpack.c.h.bf16 %v12448_v19 }
 0x294   : > { %12433 = vst [vmem:[#allocation137_spill] sm:$0xff] %v9664_v15  ;;  %v2625_v40 = vmax.f32 %v12447_v8, %v12446_v41  ;;  %v12453_v47 = vunpack.c.h.bf16 %v12450_v53  ;;  %v12455_v46 = vunpack.c.l.bf16 %v12454_v43  ;;  %v12457_v10 = vunpack.c.l.bf16 %v12456_v11 }
 0x295   : > { %12434 = vst [vmem:[#allocation141_spill] sm:$0xff] %v9666_v57  ;;  %v2632_v54 = vmax.f32 %v12451_v31, %v12449_v49  ;;  %v12458_v13 = vunpack.c.h.bf16 %v12454_v43  ;;  %v12459_v22 = vunpack.c.h.bf16 %v12456_v11  ;;  %v2605_v25 = vrot.slane %v2604_v60, 4 }
 0x296   : > { %12435 = vst [vmem:[#allocation138_spill] sm:$0xff] %v9668_v23  ;;  %v2639_v14 = vmax.f32 %v12453_v47, %v12452_v55  ;;  %v2646_v30 = vmax.f32 %v12457_v10, %v12455_v46  ;;  %v2612_v16 = vrot.slane %v2611_v18, 4  ;;  %v2619_v48 = vrot.slane %v2618_v62, 4 }
 0x297   : > { %v2653_v9 = vmax.f32 %v12459_v22, %v12458_v13  ;;  %v2626_v36 = vrot.slane %v2625_v40, 4  ;;  %v2633_v37 = vrot.slane %v2632_v54, 4  ;;  %v2606_v19 = vmax.f32 %v2604_v60, %v2605_v25 }
 0x298   : > { %v2640_v45 = vrot.slane %v2639_v14, 4  ;;  %v2647_v41 = vrot.slane %v2646_v30, 4  ;;  %v2613_v49 = vmax.f32 %v2611_v18, %v2612_v16  ;;  %v2620_v53 = vmax.f32 %v2618_v62, %v2619_v48 }
 0x299   : > { %v2654_v8 = vrot.slane %v2653_v9, 4  ;;  %v2627_v31 = vmax.f32 %v2625_v40, %v2626_v36  ;;  %v2634_v55 = vmax.f32 %v2632_v54, %v2633_v37  ;;  %v2607_v43 = vrot.slane %v2606_v19, 2 }
 0x29a   : > { %v2641_v47 = vmax.f32 %v2639_v14, %v2640_v45  ;;  %v2648_v46 = vmax.f32 %v2646_v30, %v2647_v41  ;;  %v2614_v23 = vrot.slane %v2613_v49, 2  ;;  %v2621_v11 = vrot.slane %v2620_v53, 2 }
 0x29b   : > { %v2655_v10 = vmax.f32 %v2653_v9, %v2654_v8  ;;  %v2628_v13 = vrot.slane %v2627_v31, 2  ;;  %v2635_v22 = vrot.slane %v2634_v55, 2  ;;  %v2608_v3 = vmax.f32 %v2606_v19, %v2607_v43  ;;  %v12468_v19 = vld [vmem:[#allocation152_spill] sm:$0xff] }
 0x29c   : > { %v2642_v57 = vrot.slane %v2641_v47, 2  ;;  %v2649_v15 = vrot.slane %v2648_v46, 2  ;;  %v2615_v33 = vmax.f32 %v2613_v49, %v2614_v23  ;;  %v2622_v61 = vmax.f32 %v2620_v53, %v2621_v11  ;;  %v12470_v53 = vld [vmem:[#allocation149_spill] sm:$0xff] }
 0x29d   : > { %v2656_v0 = vrot.slane %v2655_v10, 2  ;;  %v2629_v1 = vmax.f32 %v2627_v31, %v2628_v13  ;;  %v2636_v60 = vmax.f32 %v2634_v55, %v2635_v22  ;;  %v2609_v54 = vrot.slane %v2608_v3, 1 }
 0x29e   : > { %v2643_v18 = vmax.f32 %v2641_v47, %v2642_v57  ;;  %v2650_v62 = vmax.f32 %v2648_v46, %v2649_v15  ;;  %v2616_v14 = vrot.slane %v2615_v33, 1  ;;  %v2623_v30 = vrot.slane %v2622_v61, 1  ;;  %v12476_v46 = vld [vmem:[#allocation150_spill] sm:$0xff] }
 0x29f   : > { %v2657_v40 = vmax.f32 %v2655_v10, %v2656_v0  ;;  %v2630_v9 = vrot.slane %v2629_v1, 1  ;;  %v2637_v25 = vrot.slane %v2636_v60, 1  ;;  %v9702_v37 = vmax.f32 %v2608_v3, %v2609_v54 }
 0x2a0   : > { %v2644_v16 = vrot.slane %v2643_v18, 1  ;;  %v2651_v48 = vrot.slane %v2650_v62, 1  ;;  %v9704_v45 = vmax.f32 %v2615_v33, %v2616_v14  ;;  %v9706_v41 = vmax.f32 %v2622_v61, %v2623_v30 }
 0x2a1   : > { %v2658_v36 = vrot.slane %v2657_v40, 1  ;;  %12460 = vst [vmem:[#allocation145_spill] sm:$0xff] %v9702_v37  ;;  %v9708_v23 = vmax.f32 %v2629_v1, %v2630_v9  ;;  %v9710_v8 = vmax.f32 %v2636_v60, %v2637_v25  ;;  %v12469_v49 = vunpack.c.l.bf16 %v12468_v19  ;;  %v12474_v1 = vld [vmem:[#allocation153_spill] sm:$0xff]  ;;  %v12486_v25 = vld [vmem:[#allocation158_spill] sm:$0xff] }
 0x2a2   : > { %12461 = vst [vmem:[#allocation142_spill] sm:$0xff] %v9704_v45  ;;  %v9712_v15 = vmax.f32 %v2643_v18, %v2644_v16  ;;  %v9714_v0 = vmax.f32 %v2650_v62, %v2651_v48  ;;  %v12471_v31 = vunpack.c.l.bf16 %v12470_v53  ;;  %v12472_v33 = vunpack.c.h.bf16 %v12468_v19  ;;  %v12480_v60 = vld [vmem:[#allocation157_spill] sm:$0xff]  ;;  %v12482_v62 = vld [vmem:[#allocation154_spill] sm:$0xff]  ;;  %v12488_v48 = vld [vmem:[#allocation155_spill] sm:$0xff] }
 0x2a3   : > { %12462 = vst [vmem:[#allocation146_spill] sm:$0xff] %v9706_v41  ;;  %v9716_v57 = vmax.f32 %v2657_v40, %v2658_v36  ;;  %v12473_v61 = vunpack.c.h.bf16 %v12470_v53  ;;  %v12475_v47 = vunpack.c.l.bf16 %v12474_v1  ;;  %v12477_v10 = vunpack.c.l.bf16 %v12476_v46 }
 0x2a4   : > { %12463 = vst [vmem:[#allocation143_spill] sm:$0xff] %v9708_v23  ;;  %v2660_v3 = vmax.f32 %v12471_v31, %v12469_v49  ;;  %v12478_v11 = vunpack.c.h.bf16 %v12474_v1  ;;  %v12479_v13 = vunpack.c.h.bf16 %v12476_v46  ;;  %v12481_v18 = vunpack.c.l.bf16 %v12480_v60 }
 0x2a5   : > { %12464 = vst [vmem:[#allocation147_spill] sm:$0xff] %v9710_v8  ;;  %v2667_v55 = vmax.f32 %v12473_v61, %v12472_v33  ;;  %v2674_v43 = vmax.f32 %v12477_v10, %v12475_v47  ;;  %v12483_v40 = vunpack.c.l.bf16 %v12482_v62  ;;  %v12484_v14 = vunpack.c.h.bf16 %v12480_v60 }
 0x2a6   : > { %12465 = vst [vmem:[#allocation144_spill] sm:$0xff] %v9712_v15  ;;  %v2681_v22 = vmax.f32 %v12479_v13, %v12478_v11  ;;  %v12485_v30 = vunpack.c.h.bf16 %v12482_v62  ;;  %v12487_v16 = vunpack.c.l.bf16 %v12486_v25  ;;  %v12489_v36 = vunpack.c.l.bf16 %v12488_v48 }
 0x2a7   : > { %12466 = vst [vmem:[#allocation151_spill] sm:$0xff] %v9714_v0  ;;  %v2688_v54 = vmax.f32 %v12483_v40, %v12481_v18  ;;  %v12490_v49 = vunpack.c.h.bf16 %v12486_v25  ;;  %v12491_v53 = vunpack.c.h.bf16 %v12488_v48  ;;  %v2661_v33 = vrot.slane %v2660_v3, 4 }
 0x2a8   : > { %12467 = vst [vmem:[#allocation148_spill] sm:$0xff] %v9716_v57  ;;  %v2695_v9 = vmax.f32 %v12485_v30, %v12484_v14  ;;  %v2702_v19 = vmax.f32 %v12489_v36, %v12487_v16  ;;  %v2668_v61 = vrot.slane %v2667_v55, 4  ;;  %v2675_v1 = vrot.slane %v2674_v43, 4 }
 0x2a9   : > { %v2709_v31 = vmax.f32 %v12491_v53, %v12490_v49  ;;  %v2682_v47 = vrot.slane %v2681_v22, 4  ;;  %v2689_v46 = vrot.slane %v2688_v54, 4  ;;  %v2662_v60 = vmax.f32 %v2660_v3, %v2661_v33 }
 0x2aa   : > { %v2696_v10 = vrot.slane %v2695_v9, 4  ;;  %v2703_v11 = vrot.slane %v2702_v19, 4  ;;  %v2669_v18 = vmax.f32 %v2667_v55, %v2668_v61  ;;  %v2676_v62 = vmax.f32 %v2674_v43, %v2675_v1 }
 0x2ab   : > { %v2710_v13 = vrot.slane %v2709_v31, 4  ;;  %v2683_v40 = vmax.f32 %v2681_v22, %v2682_v47  ;;  %v2690_v14 = vmax.f32 %v2688_v54, %v2689_v46  ;;  %v2663_v25 = vrot.slane %v2662_v60, 2 }
 0x2ac   : > { %v2697_v30 = vmax.f32 %v2695_v9, %v2696_v10  ;;  %v2704_v16 = vmax.f32 %v2702_v19, %v2703_v11  ;;  %v2670_v57 = vrot.slane %v2669_v18, 2  ;;  %v2677_v48 = vrot.slane %v2676_v62, 2 }
 0x2ad   : > { %v2711_v36 = vmax.f32 %v2709_v31, %v2710_v13  ;;  %v2684_v49 = vrot.slane %v2683_v40, 2  ;;  %v2691_v53 = vrot.slane %v2690_v14, 2  ;;  %v2664_v23 = vmax.f32 %v2662_v60, %v2663_v25  ;;  %v12500_v60 = vld [vmem:[#allocation159_spill] sm:$0xff] }
 0x2ae   : > { %v2698_v0 = vrot.slane %v2697_v30, 2  ;;  %v2705_v15 = vrot.slane %v2704_v16, 2  ;;  %v2671_v41 = vmax.f32 %v2669_v18, %v2670_v57  ;;  %v2678_v45 = vmax.f32 %v2676_v62, %v2677_v48  ;;  %v12502_v62 = vld [vmem:[#allocation156_spill] sm:$0xff] }
 0x2af   : > { %v2712_v8 = vrot.slane %v2711_v36, 2  ;;  %v2685_v37 = vmax.f32 %v2683_v40, %v2684_v49  ;;  %v2692_v3 = vmax.f32 %v2690_v14, %v2691_v53  ;;  %v2665_v54 = vrot.slane %v2664_v23, 1 }
 0x2b0   : > { %v2699_v55 = vmax.f32 %v2697_v30, %v2698_v0  ;;  %v2706_v43 = vmax.f32 %v2704_v16, %v2705_v15  ;;  %v2672_v9 = vrot.slane %v2671_v41, 1  ;;  %v2679_v19 = vrot.slane %v2678_v45, 1  ;;  %v12508_v16 = vld [vmem:[#allocation160_spill] sm:$0xff] }
 0x2b1   : > { %v2713_v22 = vmax.f32 %v2711_v36, %v2712_v8  ;;  %v2686_v31 = vrot.slane %v2685_v37, 1  ;;  %v2693_v33 = vrot.slane %v2692_v3, 1  ;;  %v9750_v46 = vmax.f32 %v2664_v23, %v2665_v54 }
 0x2b2   : > { %v2700_v61 = vrot.slane %v2699_v55, 1  ;;  %v2707_v1 = vrot.slane %v2706_v43, 1  ;;  %v9752_v10 = vmax.f32 %v2671_v41, %v2672_v9  ;;  %v9754_v11 = vmax.f32 %v2678_v45, %v2679_v19 }
 0x2b3   : > { %v2714_v47 = vrot.slane %v2713_v22, 1  ;;  %12492 = vst [vmem:[#allocation152_spill] sm:$0xff] %v9750_v46  ;;  %v9756_v57 = vmax.f32 %v2685_v37, %v2686_v31  ;;  %v9758_v13 = vmax.f32 %v2692_v3, %v2693_v33  ;;  %v12501_v18 = vunpack.c.l.bf16 %v12500_v60  ;;  %v12506_v37 = vld [vmem:[#allocation163_spill] sm:$0xff]  ;;  %v12512_v3 = vld [vmem:[#allocation164_spill] sm:$0xff]  ;;  %v12518_v33 = vld [vmem:[#allocation165_spill] sm:$0xff] }
 0x2b4   : > { %12493 = vst [vmem:[#allocation149_spill] sm:$0xff] %v9752_v10  ;;  %v9760_v15 = vmax.f32 %v2699_v55, %v2700_v61  ;;  %v9762_v8 = vmax.f32 %v2706_v43, %v2707_v1  ;;  %v12503_v40 = vunpack.c.l.bf16 %v12502_v62  ;;  %v12504_v41 = vunpack.c.h.bf16 %v12500_v60  ;;  %v12514_v43 = vld [vmem:[#allocation161_spill] sm:$0xff]  ;;  %v12520_v1 = vld [vmem:[#allocation162_spill] sm:$0xff] }
 0x2b5   : > { %12494 = vst [vmem:[#allocation153_spill] sm:$0xff] %v9754_v11  ;;  %v9764_v0 = vmax.f32 %v2713_v22, %v2714_v47  ;;  %v12505_v45 = vunpack.c.h.bf16 %v12502_v62  ;;  %v12507_v30 = vunpack.c.l.bf16 %v12506_v37  ;;  %v12509_v36 = vunpack.c.l.bf16 %v12508_v16 }
 0x2b6   : > { %12495 = vst [vmem:[#allocation150_spill] sm:$0xff] %v9756_v57  ;;  %v2716_v23 = vmax.f32 %v12503_v40, %v12501_v18  ;;  %v12510_v48 = vunpack.c.h.bf16 %v12506_v37  ;;  %v12511_v49 = vunpack.c.h.bf16 %v12508_v16  ;;  %v12513_v55 = vunpack.c.l.bf16 %v12512_v3 }
 0x2b7   : > { %12496 = vst [vmem:[#allocation157_spill] sm:$0xff] %v9758_v13  ;;  %v2723_v14 = vmax.f32 %v12505_v45, %v12504_v41  ;;  %v2730_v25 = vmax.f32 %v12509_v36, %v12507_v30  ;;  %v12515_v22 = vunpack.c.l.bf16 %v12514_v43  ;;  %v12516_v9 = vunpack.c.h.bf16 %v12512_v3 }
 0x2b8   : > { %12497 = vst [vmem:[#allocation154_spill] sm:$0xff] %v9760_v15  ;;  %v2737_v53 = vmax.f32 %v12511_v49, %v12510_v48  ;;  %v12517_v19 = vunpack.c.h.bf16 %v12514_v43  ;;  %v12519_v61 = vunpack.c.l.bf16 %v12518_v33  ;;  %v12521_v47 = vunpack.c.l.bf16 %v12520_v1 }
 0x2b9   : > { %12498 = vst [vmem:[#allocation158_spill] sm:$0xff] %v9762_v8  ;;  %v2744_v54 = vmax.f32 %v12515_v22, %v12513_v55  ;;  %v12522_v18 = vunpack.c.h.bf16 %v12518_v33  ;;  %v12523_v62 = vunpack.c.h.bf16 %v12520_v1  ;;  %v2717_v41 = vrot.slane %v2716_v23, 4 }
 0x2ba   : > { %12499 = vst [vmem:[#allocation155_spill] sm:$0xff] %v9764_v0  ;;  %v2751_v31 = vmax.f32 %v12517_v19, %v12516_v9  ;;  %v2758_v60 = vmax.f32 %v12521_v47, %v12519_v61  ;;  %v2724_v45 = vrot.slane %v2723_v14, 4  ;;  %v2731_v37 = vrot.slane %v2730_v25, 4 }
 0x2bb   : > { %v2765_v40 = vmax.f32 %v12523_v62, %v12522_v18  ;;  %v2738_v30 = vrot.slane %v2737_v53, 4  ;;  %v2745_v16 = vrot.slane %v2744_v54, 4  ;;  %v2718_v3 = vmax.f32 %v2716_v23, %v2717_v41 }
 0x2bc   : > { %v2752_v36 = vrot.slane %v2751_v31, 4  ;;  %v2759_v48 = vrot.slane %v2758_v60, 4  ;;  %v2725_v55 = vmax.f32 %v2723_v14, %v2724_v45  ;;  %v2732_v43 = vmax.f32 %v2730_v25, %v2731_v37 }
 0x2bd   : > { %v2766_v49 = vrot.slane %v2765_v40, 4  ;;  %v2739_v22 = vmax.f32 %v2737_v53, %v2738_v30  ;;  %v2746_v9 = vmax.f32 %v2744_v54, %v2745_v16  ;;  %v2719_v33 = vrot.slane %v2718_v3, 2 }
 0x2be   : > { %v2753_v19 = vmax.f32 %v2751_v31, %v2752_v36  ;;  %v2760_v61 = vmax.f32 %v2758_v60, %v2759_v48  ;;  %v2726_v0 = vrot.slane %v2725_v55, 2  ;;  %v2733_v1 = vrot.slane %v2732_v43, 2 }
 0x2bf   : > { %v2767_v47 = vmax.f32 %v2765_v40, %v2766_v49  ;;  %v2740_v18 = vrot.slane %v2739_v22, 2  ;;  %v2747_v62 = vrot.slane %v2746_v9, 2  ;;  %v2720_v57 = vmax.f32 %v2718_v3, %v2719_v33 }
 0x2c0   : > { %v2754_v8 = vrot.slane %v2753_v19, 2  ;;  %v2761_v15 = vrot.slane %v2760_v61, 2  ;;  %v2727_v11 = vmax.f32 %v2725_v55, %v2726_v0  ;;  %v2734_v10 = vmax.f32 %v2732_v43, %v2733_v1  ;;  %v12545_v55 = vld [vmem:[#allocation74_spill] sm:$0xff] }
 0x2c1   : > { %v2768_v13 = vrot.slane %v2767_v47, 2  ;;  %v2741_v46 = vmax.f32 %v2739_v22, %v2740_v18  ;;  %v2748_v23 = vmax.f32 %v2746_v9, %v2747_v62  ;;  %v2721_v54 = vrot.slane %v2720_v57, 1  ;;  %v12546_v22 = vld [vmem:[#allocation77_spill] sm:$0xff]  ;;  %v12547_v9 = vld [vmem:[#allocation79_spill] sm:$0xff]  ;;  %v12550_v1 = vld [vmem:[#allocation78_spill] sm:$0xff] }
 0x2c2   : > { %v2755_v14 = vmax.f32 %v2753_v19, %v2754_v8  ;;  %v2762_v25 = vmax.f32 %v2760_v61, %v2761_v15  ;;  %v2728_v31 = vrot.slane %v2727_v11, 1  ;;  %v2735_v60 = vrot.slane %v2734_v10, 1  ;;  %v12548_v61 = vld [vmem:[#allocation81_spill] sm:$0xff]  ;;  %v12551_v18 = vld [vmem:[#allocation80_spill] sm:$0xff] }
 0x2c3   : > { %v2769_v53 = vmax.f32 %v2767_v47, %v2768_v13  ;;  %v2742_v40 = vrot.slane %v2741_v46, 1  ;;  %v2749_v41 = vrot.slane %v2748_v23, 1  ;;  %v9798_v16 = vmax.f32 %v2720_v57, %v2721_v54  ;;  %v12549_v47 = vld [vmem:[#allocation76_spill] sm:$0xff]  ;;  %v12555_v54 = vld [vmem:[#allocation119_spill] sm:$0xff] }
 0x2c4   : > { %v2756_v45 = vrot.slane %v2755_v14, 1  ;;  %v2763_v37 = vrot.slane %v2762_v25, 1  ;;  %v9800_v36 = vmax.f32 %v2727_v11, %v2728_v31  ;;  %v9802_v48 = vmax.f32 %v2734_v10, %v2735_v60  ;;  %v12556_v60 = vld [vmem:[#allocation123_spill] sm:$0xff] }
 0x2c5   : > { %v2770_v30 = vrot.slane %v2769_v53, 1  ;;  %12524 = vst [vmem:[#allocation159_spill] sm:$0xff] %v9798_v16  ;;  %v9804_v0 = vmax.f32 %v2741_v46, %v2742_v40  ;;  %v9806_v49 = vmax.f32 %v2748_v23, %v2749_v41  ;;  %v9816_v3 = vpack.c.bf16 %v9272_v20, %v9270_v58  ;;  %v12552_v23 = vld [vmem:[#allocation121_spill] sm:$0xff]  ;;  %v12557_v40 = vld [vmem:[#allocation120_spill] sm:$0xff] }
 0x2c6   : > { %12525 = vst [vmem:[#allocation156_spill] sm:$0xff] %v9800_v36  ;;  %v9808_v15 = vmax.f32 %v2755_v14, %v2756_v45  ;;  %v9810_v13 = vmax.f32 %v2762_v25, %v2763_v37  ;;  %v9820_v11 = vpack.c.bf16 %v9276_v52, %v9274_v56  ;;  %v9824_v46 = vpack.c.bf16 %v9280_v28, %v9278_v34  ;;  %v12553_v14 = vld [vmem:[#allocation118_spill] sm:$0xff]  ;;  %v12559_v45 = vld [vmem:[#allocation127_spill] sm:$0xff]  ;;  %v12560_v37 = vld [vmem:[#allocation124_spill] sm:$0xff] }
 0x2c7   : > { %12526 = vst [vmem:[#allocation163_spill] sm:$0xff] %v9802_v48  ;;  %v9812_v8 = vmax.f32 %v2769_v53, %v2770_v30  ;;  %v9828_v10 = vpack.c.bf16 %v9284_v29, %v9282_v32  ;;  %v9832_v57 = vpack.c.bf16 %v9320_v44, %v9318_v21  ;;  %v9836_v58 = vpack.c.bf16 %v9324_v59, %v9322_v2  ;;  %v12532_v44 = vld [vmem:[#allocation166_spill] sm:$0xff]  ;;  %v12533_v2 = vld [vmem:[#allocation167_spill] sm:$0xff] }
 0x2c8   : > { %12527 = vst [vmem:[#allocation160_spill] sm:$0xff] %v9804_v0  ;;  %v9840_v20 = vpack.c.bf16 %v9328_v5, %v9326_v6  ;;  %v9844_v56 = vpack.c.bf16 %v9332_v17, %v9330_v42  ;;  %v9848_v52 = vpack.c.bf16 %v9368_v26, %v9366_v27  ;;  %v9852_v34 = vpack.c.bf16 %v9372_v12, %v9370_v63  ;;  %v12534_v6 = vld [vmem:[#allocation168_spill] sm:$0xff]  ;;  %v12535_v5 = vld [vmem:[#allocation169_spill] sm:$0xff]  ;;  %v12536_v17 = vld [vmem:[#allocation71_spill] sm:$0xff] }
 0x2c9   : > { %12528 = vst [vmem:[#allocation164_spill] sm:$0xff] %v9806_v49  ;;  %v9856_v28 = vpack.c.bf16 %v9376_v7, %v9374_v50  ;;  %v9860_v32 = vpack.c.bf16 %v9380_v24, %v9378_v4  ;;  %v9864_v29 = vpack.c.bf16 %v9416_v51, %v9414_v38  ;;  %v9868_v21 = vpack.c.bf16 %v9420_v35, %v9418_v39  ;;  %v12537_v27 = vld [vmem:[#allocation73_spill] sm:$0xff]  ;;  %v12538_v63 = vld [vmem:[#allocation75_spill] sm:$0xff]  ;;  %v12539_v12 = vld [vmem:[#allocation70_spill] sm:$0xff] }
 0x2ca   : > { %12529 = vst [vmem:[#allocation161_spill] sm:$0xff] %v9808_v15  ;;  %v9872_v59 = vpack.c.bf16 %v12533_v2, %v12532_v44  ;;  %v9876_v42 = vpack.c.bf16 %v12535_v5, %v12534_v6  ;;  %v9880_v26 = vpack.c.bf16 %v12537_v27, %v12536_v17  ;;  %v9884_v50 = vpack.c.bf16 %v12539_v12, %v12538_v63  ;;  %v12540_v7 = vld [vmem:[#allocation170_spill] sm:$0xff]  ;;  %v12541_v4 = vld [vmem:[#allocation171_spill] sm:$0xff]  ;;  %v12542_v38 = vld [vmem:[#allocation172_spill] sm:$0xff] }
 0x2cb   : > { %12530 = vst [vmem:[#allocation165_spill] sm:$0xff] %v9810_v13  ;;  %v9888_v24 = vpack.c.bf16 %v12541_v4, %v12540_v7  ;;  %v12543_v51 = vld [vmem:[#allocation173_spill] sm:$0xff]  ;;  %v12544_v35 = vld [vmem:[#allocation72_spill] sm:$0xff]  ;;  %v9900_v19 = vpack.c.bf16 %v12547_v9, %v12546_v22  ;;  %v9904_v33 = vpack.c.bf16 %v12549_v47, %v12548_v61  ;;  %v9908_v62 = vpack.c.bf16 %v12551_v18, %v12550_v1  ;;  %v12554_v53 = vld [vmem:[#allocation122_spill] sm:$0xff] }
 0x2cc   : > { %12531 = vst [vmem:[#allocation162_spill] sm:$0xff] %v9812_v8  ;;  %v9892_v39 = vpack.c.bf16 %v12543_v51, %v12542_v38  ;;  %v9896_v43 = vpack.c.bf16 %v12545_v55, %v12544_v35  ;;  %v9912_v25 = vpack.c.bf16 %v12553_v14, %v12552_v23  ;;  %v9916_v31 = vpack.c.bf16 %v12555_v54, %v12554_v53  ;;  %v12561_v44 = vld [vmem:[#allocation128_spill] sm:$0xff]  ;;  %v12562_v2 = vld [vmem:[#allocation125_spill] sm:$0xff]  ;;  %v12564_v17 = vld [vmem:[#allocation126_spill] sm:$0xff] }
 0x2cd   : > { %v9920_v41 = vpack.c.bf16 %v12557_v40, %v12556_v60  ;;  %v9924_v30 = vpack.c.bf16 %v12560_v37, %v12559_v45  ;;  %v9928_v6 = vpack.c.bf16 %v12562_v2, %v12561_v44  ;;  %v12563_v5 = vld [vmem:[#allocation129_spill] sm:$0xff]  ;;  %v12567_v12 = vld [vmem:[#allocation130_spill] sm:$0xff]  ;;  %v12569_v38 = vld [vmem:[#allocation131_spill] sm:$0xff] }
 0x2ce   : > { %v9932_v27 = vpack.c.bf16 %v12564_v17, %v12563_v5  ;;  %v12566_v63 = vld [vmem:[#allocation133_spill] sm:$0xff]  ;;  %v12568_v4 = vld [vmem:[#allocation134_spill] sm:$0xff]  ;;  %v12570_v35 = vld [vmem:[#allocation135_spill] sm:$0xff] }
 0x2cf   : > { %12558 = vst [vmem:[#allocation166_spill] sm:$0xff] %v9920_v41  ;;  %v9936_v7 = vpack.c.bf16 %v12567_v12, %v12566_v63  ;;  %v9940_v51 = vpack.c.bf16 %v12569_v38, %v12568_v4  ;;  %v12571_v55 = vld [vmem:[#allocation132_spill] sm:$0xff]  ;;  %v12573_v9 = vld [vmem:[#allocation139_spill] sm:$0xff]  ;;  %v12576_v18 = vld [vmem:[#allocation137_spill] sm:$0xff] }
 0x2d0   : > { %12565 = vst [vmem:[#allocation167_spill] sm:$0xff] %v9932_v27  ;;  %v9944_v22 = vpack.c.bf16 %v12571_v55, %v12570_v35  ;;  %v12574_v61 = vld [vmem:[#allocation136_spill] sm:$0xff]  ;;  %v12577_v14 = vld [vmem:[#allocation141_spill] sm:$0xff]  ;;  %v12578_v53 = vld [vmem:[#allocation138_spill] sm:$0xff] }
 0x2d1   : > { %v9948_v47 = vpack.c.bf16 %v12574_v61, %v12573_v9  ;;  %v12575_v1 = vld [vmem:[#allocation140_spill] sm:$0xff]  ;;  %v9956_v54 = vpack.c.bf16 %v12578_v53, %v12577_v14  ;;  %v12580_v60 = vld [vmem:[#allocation145_spill] sm:$0xff]  ;;  %v12581_v40 = vld [vmem:[#allocation142_spill] sm:$0xff] }
 0x2d2   : > { %12572 = vst [vmem:[#allocation168_spill] sm:$0xff] %v9944_v22  ;;  %v9952_v23 = vpack.c.bf16 %v12576_v18, %v12575_v1  ;;  %v9960_v45 = vpack.c.bf16 %v12581_v40, %v12580_v60  ;;  %v12582_v37 = vld [vmem:[#allocation146_spill] sm:$0xff]  ;;  %v12583_v44 = vld [vmem:[#allocation143_spill] sm:$0xff]  ;;  %v12585_v17 = vld [vmem:[#allocation144_spill] sm:$0xff] }
 0x2d3   : > { %12579 = vst [vmem:[#allocation169_spill] sm:$0xff] %v9956_v54  ;;  %v9964_v2 = vpack.c.bf16 %v12583_v44, %v12582_v37  ;;  %v12584_v5 = vld [vmem:[#allocation147_spill] sm:$0xff]  ;;  %v12588_v4 = vld [vmem:[#allocation148_spill] sm:$0xff]  ;;  %v12590_v55 = vld [vmem:[#allocation149_spill] sm:$0xff] }
 0x2d4   : > { %v9968_v63 = vpack.c.bf16 %v12585_v17, %v12584_v5  ;;  %v12587_v12 = vld [vmem:[#allocation151_spill] sm:$0xff]  ;;  %v12589_v35 = vld [vmem:[#allocation152_spill] sm:$0xff]  ;;  %v12592_v61 = vld [vmem:[#allocation153_spill] sm:$0xff]  ;;  %v9992_v5 = vpack.c.bf16 %v9800_v36, %v9798_v16  ;;  %v9996_v17 = vpack.c.bf16 %v9804_v0, %v9802_v48 }
 0x2d5   : > { %v9972_v38 = vpack.c.bf16 %v12588_v4, %v12587_v12  ;;  %v9976_v9 = vpack.c.bf16 %v12590_v55, %v12589_v35  ;;  %v12593_v1 = vld [vmem:[#allocation150_spill] sm:$0xff]  ;;  %v12595_v14 = vld [vmem:[#allocation157_spill] sm:$0xff]  ;;  %v12598_v37 = vld [vmem:[#allocation155_spill] sm:$0xff]  ;;  %v10000_v12 = vpack.c.bf16 %v9808_v15, %v9806_v49  ;;  %v10004_v4 = vpack.c.bf16 %v9812_v8, %v9810_v13 }
 0x2d6   : > { %12586 = vst [vmem:[#allocation71_spill] sm:$0xff] %v9968_v63  ;;  %v9980_v18 = vpack.c.bf16 %v12593_v1, %v12592_v61  ;;  %v12596_v53 = vld [vmem:[#allocation154_spill] sm:$0xff] }
 0x2d7   : > { %12591 = vst [vmem:[#allocation73_spill] sm:$0xff] %v9976_v9  ;;  %v9984_v60 = vpack.c.bf16 %v12596_v53, %v12595_v14  ;;  %v12597_v40 = vld [vmem:[#allocation158_spill] sm:$0xff] }
 0x2d8   : > { %12594 = vst [vmem:[#allocation75_spill] sm:$0xff] %v9980_v18  ;;  %v9988_v44 = vpack.c.bf16 %v12598_v37, %v12597_v40  ;;  %2823 = sbr.rel (%p6120_p9) target bundleno = 833 (0x341), region = 132 }
 0x2d9   : > { %12600 = vst [vmem:[#allocation121_spill] sm:$0xff] %v9992_v5 }
 0x2da   : > { %12599 = vst [vmem:[#allocation70_spill] sm:$0xff] %v9988_v44 }
 0x2db   : > { %12601 = vst [vmem:[#allocation118_spill] sm:$0xff] %v10000_v12 }
 0x2dc   : > { %12602 = vst [vmem:[#allocation122_spill] sm:$0xff] %v10004_v4 }
 0x2dd   : > { %v12603_v35 = vld [vmem:[#allocation102_spill] sm:$0xff]  ;;  %v12604_v1 = vld [vmem:[#allocation105_spill] sm:$0xff]  ;;  %v12605_v40 = vld [vmem:[#allocation108_spill] sm:$0xff]  ;;  %vm2968_vm0 = vcmask 1041409   ;;  %vm2970_vm1 = vcmask 1042434   ;;  %vm2972_vm2 = vcmask 1043459  }
 0x2de   : > { %v2872_v55 = vunpack.c.l.b16 %v12603_v35  ;;  %v2873_v61 = vunpack.c.h.b16 %v12603_v35  ;;  %v2878_v14 = vunpack.c.l.b16 %v12604_v1  ;;  %v2879_v53 = vunpack.c.h.b16 %v12604_v1  ;;  %v12606_v16 = vld [vmem:[#allocation111_spill] sm:$0xff]  ;;  %v12607_v13 = vld [vmem:[#allocation114_spill] sm:$0xff]  ;;  %v12609_v5 = vld [vmem:[#allocation37_spill] sm:$0xff] }
 0x2df   : > { %v2884_v37 = vunpack.c.l.b16 %v12605_v40  ;;  %v2885_v36 = vunpack.c.h.b16 %v12605_v40  ;;  %v2890_v15 = vunpack.c.l.b16 %v12606_v16  ;;  %v2891_v8 = vunpack.c.h.b16 %v12606_v16  ;;  %v12608_v48 = vld [vmem:[#allocation95_spill] sm:$0xff] }
 0x2e0   : > { %v2896_v49 = vunpack.c.l.b16 %v12607_v13  ;;  %v2897_v0 = vunpack.c.h.b16 %v12607_v13  ;;  %v2902_v4 = vunpack.c.l.b16 %v12608_v48  ;;  %v2903_v35 = vunpack.c.h.b16 %v12608_v48  ;;  %v12610_v40 = vld [vmem:[#allocation35_spill] sm:$0xff] }
 0x2e1   : > { %v2908_v18 = vunpack.c.l.b16 %v12609_v5  ;;  %v2909_v1 = vunpack.c.h.b16 %v12609_v5  ;;  %v2914_v63 = vunpack.c.l.b16 %v12610_v40  ;;  %v2969_v54 = vsel %vm2968_vm0, %v2878_v14, %v2872_v55  ;;  %v12611_v12 = vld [vmem:[#allocation103_spill] sm:$0xff] }
 0x2e2   : > { %vm2974_vm3 = vcmask 1044484   ;;  %v2915_v16 = vunpack.c.h.b16 %v12610_v40  ;;  %v2971_v13 = vsel %vm2970_vm1, %v2884_v37, %v2969_v54  ;;  %vm2976_vm4 = vcmask 1045509   ;;  %v12612_v37 = vld [vmem:[#allocation106_spill] sm:$0xff] }
 0x2e3   : > { %v2982_v22 = vsel %vm2968_vm0, %v2879_v53, %v2873_v61  ;;  %v2973_v48 = vsel %vm2972_vm2, %v2890_v15, %v2971_v13  ;;  %vm2978_vm5 = vcmask 1046534   ;;  %vm2980_vm6 = vcmask 1047559   ;;  %v12614_v13 = vld [vmem:[#allocation112_spill] sm:$0xff] }
 0x2e4   : > { %v2983_v27 = vsel %vm2970_vm1, %v2885_v36, %v2982_v22  ;;  %v2975_v5 = vsel %vm2974_vm3, %v2896_v49, %v2973_v48  ;;  %v2874_v55 = vunpack.c.l.b16 %v12611_v12  ;;  %v2875_v14 = vunpack.c.h.b16 %v12611_v12  ;;  %v12613_v22 = vld [vmem:[#allocation109_spill] sm:$0xff]  ;;  %v12615_v48 = vld [vmem:[#allocation115_spill] sm:$0xff] }
 0x2e5   : > { %v2984_v41 = vsel %vm2972_vm2, %v2891_v8, %v2983_v27  ;;  %v2977_v40 = vsel %vm2976_vm4, %v2902_v4, %v2975_v5  ;;  %v2880_v61 = vunpack.c.l.b16 %v12612_v37  ;;  %v2881_v15 = vunpack.c.h.b16 %v12612_v37 }
 0x2e6   : > { %v2985_v54 = vsel %vm2974_vm3, %v2897_v0, %v2984_v41  ;;  %v2979_v53 = vsel %vm2978_vm5, %v2908_v18, %v2977_v40  ;;  %v2886_v49 = vunpack.c.l.b16 %v12613_v22  ;;  %v2887_v8 = vunpack.c.h.b16 %v12613_v22  ;;  %v12616_v40 = vld [vmem:[#allocation96_spill] sm:$0xff] }
 0x2e7   : > { %v2986_v36 = vsel %vm2976_vm4, %v2903_v35, %v2985_v54  ;;  %v2981_v27 = vsel %vm2980_vm6, %v2914_v63, %v2979_v53  ;;  %v2892_v4 = vunpack.c.l.b16 %v12614_v13  ;;  %v2893_v0 = vunpack.c.h.b16 %v12614_v13 }
 0x2e8   : > { %v2987_v12 = vsel %vm2978_vm5, %v2909_v1, %v2986_v36  ;;  %v2898_v5 = vunpack.c.l.b16 %v12615_v48  ;;  %v2899_v18 = vunpack.c.h.b16 %v12615_v48  ;;  %v2904_v35 = vunpack.c.l.b16 %v12616_v40  ;;  %v12617_v1 = vld [vmem:[#allocation34_spill] sm:$0xff] }
 0x2e9   : > { %v2988_v41 = vsel %vm2980_vm6, %v2915_v16, %v2987_v12  ;;  %v2905_v37 = vunpack.c.h.b16 %v12616_v40  ;;  %v2989_v22 = vsel %vm2968_vm0, %v2880_v61, %v2874_v55  ;;  %v2996_v63 = vsel %vm2968_vm0, %v2881_v15, %v2875_v14  ;;  %v12618_v12 = vld [vmem:[#allocation116_spill] sm:$0xff] }
 0x2ea   : > { %v3059_v54 = vpack.c.b16 %v2988_v41, %v2981_v27  ;;  %v2910_v53 = vunpack.c.l.b16 %v12617_v1  ;;  %v2911_v36 = vunpack.c.h.b16 %v12617_v1  ;;  %v2990_v13 = vsel %vm2970_vm1, %v2886_v49, %v2989_v22  ;;  %v12619_v61 = vld [vmem:[#allocation104_spill] sm:$0xff]  ;;  %v12621_v1 = vld [vmem:[#allocation110_spill] sm:$0xff] }
 0x2eb   : > { %v2997_v16 = vsel %vm2970_vm1, %v2887_v8, %v2996_v63  ;;  %v2916_v48 = vunpack.c.l.b16 %v12618_v12  ;;  %v2917_v44 = vunpack.c.h.b16 %v12618_v12  ;;  %v2991_v27 = vsel %vm2972_vm2, %v2892_v4, %v2990_v13  ;;  %v12622_v12 = vld [vmem:[#allocation113_spill] sm:$0xff] }
 0x2ec   : > { %3071 = vst [vmem:[#allocation2] sm:$0xff] %v3059_v54  ;;  %v2998_v41 = vsel %vm2972_vm2, %v2893_v0, %v2997_v16  ;;  %v2992_v55 = vsel %vm2974_vm3, %v2898_v5, %v2991_v27  ;;  %v2876_v15 = vunpack.c.l.b16 %v12619_v61  ;;  %v2877_v40 = vunpack.c.h.b16 %v12619_v61  ;;  %v12620_v54 = vld [vmem:[#allocation107_spill] sm:$0xff] }
 0x2ed   : > { %v2999_v14 = vsel %vm2974_vm3, %v2899_v18, %v2998_v41  ;;  %v2993_v49 = vsel %vm2976_vm4, %v2904_v35, %v2992_v55  ;;  %v2882_v22 = vunpack.c.l.b16 %v12620_v54  ;;  %v2883_v63 = vunpack.c.h.b16 %v12620_v54  ;;  %v12623_v41 = vld [vmem:[#allocation94_spill] sm:$0xff] }
 0x2ee   : > { %v3000_v8 = vsel %vm2976_vm4, %v2905_v37, %v2999_v14  ;;  %v2994_v4 = vsel %vm2978_vm5, %v2910_v53, %v2993_v49  ;;  %v2888_v5 = vunpack.c.l.b16 %v12621_v1  ;;  %v2889_v18 = vunpack.c.h.b16 %v12621_v1  ;;  %v12624_v53 = vld [vmem:[#allocation97_spill] sm:$0xff]  ;;  %v12625_v49 = vld [vmem:[#allocation38_spill] sm:$0xff] }
 0x2ef   : > { %v3001_v0 = vsel %vm2978_vm5, %v2911_v36, %v3000_v8  ;;  %v2995_v13 = vsel %vm2980_vm6, %v2916_v48, %v2994_v4  ;;  %v2894_v35 = vunpack.c.l.b16 %v12622_v12  ;;  %v2895_v37 = vunpack.c.h.b16 %v12622_v12  ;;  %v12626_v4 = vld [vmem:[#allocation117_spill] sm:$0xff] }
 0x2f0   : > { %v3002_v16 = vsel %vm2980_vm6, %v2917_v44, %v3001_v0  ;;  %v2900_v55 = vunpack.c.l.b16 %v12623_v41  ;;  %v2901_v14 = vunpack.c.h.b16 %v12623_v41  ;;  %v2906_v61 = vunpack.c.l.b16 %v12624_v53 }
 0x2f1   : > { %v3060_v27 = vpack.c.b16 %v3002_v16, %v2995_v13  ;;  %v2907_v36 = vunpack.c.h.b16 %v12624_v53  ;;  %v2912_v8 = vunpack.c.l.b16 %v12625_v49  ;;  %v3003_v54 = vsel %vm2968_vm0, %v2882_v22, %v2876_v15  ;;  %v12627_v53 = vld [vmem:[#allocation49_spill] sm:$0xff] }
 0x2f2   : > { %v3010_v48 = vsel %vm2968_vm0, %v2883_v63, %v2877_v40  ;;  %v2913_v44 = vunpack.c.h.b16 %v12625_v49  ;;  %v2918_v0 = vunpack.c.l.b16 %v12626_v4  ;;  %v3004_v1 = vsel %vm2970_vm1, %v2888_v5, %v3003_v54  ;;  %v12628_v63 = vld [vmem:[#allocation47_spill] sm:$0xff] }
 0x2f3   : > { %3072 = vst [vmem:[#allocation2 + $0x8] sm:$0xff] %v3060_v27  ;;  %v3011_v13 = vsel %vm2970_vm1, %v2889_v18, %v3010_v48  ;;  %v2919_v16 = vunpack.c.h.b16 %v12626_v4  ;;  %v3005_v12 = vsel %vm2972_vm2, %v2894_v35, %v3004_v1  ;;  %v2920_v9 = vunpack.c.l.b16 %v12627_v53  ;;  %v12629_v54 = vld [vmem:[#allocation55_spill] sm:$0xff]  ;;  %v12630_v4 = vld [vmem:[#allocation53_spill] sm:$0xff] }
 0x2f4   : > { %v3012_v41 = vsel %vm2972_vm2, %v2895_v37, %v3011_v13  ;;  %v3006_v15 = vsel %vm2974_vm3, %v2900_v55, %v3005_v12  ;;  %v2921_v22 = vunpack.c.h.b16 %v12627_v53  ;;  %v2926_v27 = vunpack.c.l.b16 %v12628_v63  ;;  %v12631_v12 = vld [vmem:[#allocation61_spill] sm:$0xff] }
 0x2f5   : > { %v3013_v40 = vsel %vm2974_vm3, %v2901_v14, %v3012_v41  ;;  %v3007_v5 = vsel %vm2976_vm4, %v2906_v61, %v3006_v15  ;;  %v2927_v49 = vunpack.c.h.b16 %v12628_v63  ;;  %v2932_v35 = vunpack.c.l.b16 %v12629_v54  ;;  %v12632_v15 = vld [vmem:[#allocation59_spill] sm:$0xff] }
 0x2f6   : > { %v3014_v18 = vsel %vm2976_vm4, %v2907_v36, %v3013_v40  ;;  %v3008_v37 = vsel %vm2978_vm5, %v2912_v8, %v3007_v5  ;;  %v2933_v55 = vunpack.c.h.b16 %v12629_v54  ;;  %v2938_v14 = vunpack.c.l.b16 %v12630_v4 }
 0x2f7   : > { %v3015_v48 = vsel %vm2978_vm5, %v2913_v44, %v3014_v18  ;;  %v3009_v1 = vsel %vm2980_vm6, %v2918_v0, %v3008_v37  ;;  %v2939_v61 = vunpack.c.h.b16 %v12630_v4  ;;  %v2944_v36 = vunpack.c.l.b16 %v12631_v12  ;;  %v12633_v44 = vld [vmem:[#allocation67_spill] sm:$0xff] }
 0x2f8   : > { %v3016_v13 = vsel %vm2980_vm6, %v2919_v16, %v3015_v48  ;;  %v2945_v53 = vunpack.c.h.b16 %v12631_v12  ;;  %v2950_v40 = vunpack.c.l.b16 %v12632_v15  ;;  %v2951_v8 = vunpack.c.h.b16 %v12632_v15  ;;  %v12634_v16 = vld [vmem:[#allocation65_spill] sm:$0xff]  ;;  %v12635_v12 = vld [vmem:[#allocation46_spill] sm:$0xff] }
 0x2f9   : > { %v3061_v41 = vpack.c.b16 %v3016_v13, %v3009_v1  ;;  %v2956_v63 = vunpack.c.l.b16 %v12633_v44  ;;  %v2957_v5 = vunpack.c.h.b16 %v12633_v44  ;;  %v3017_v18 = vsel %vm2968_vm0, %v2926_v27, %v2920_v9  ;;  %v12636_v27 = vld [vmem:[#allocation51_spill] sm:$0xff] }
 0x2fa   : > { %v3024_v0 = vsel %vm2968_vm0, %v2927_v49, %v2921_v22  ;;  %v2962_v54 = vunpack.c.l.b16 %v12634_v16  ;;  %v2963_v37 = vunpack.c.h.b16 %v12634_v16  ;;  %v3018_v48 = vsel %vm2970_vm1, %v2932_v35, %v3017_v18  ;;  %v12637_v18 = vld [vmem:[#allocation52_spill] sm:$0xff] }
 0x2fb   : > { %3073 = vst [vmem:[#allocation2 + $0x10] sm:$0xff] %v3061_v41  ;;  %v3025_v4 = vsel %vm2970_vm1, %v2933_v55, %v3024_v0  ;;  %v3019_v1 = vsel %vm2972_vm2, %v2938_v14, %v3018_v48  ;;  %v2922_v15 = vunpack.c.l.b16 %v12635_v12  ;;  %v2923_v44 = vunpack.c.h.b16 %v12635_v12  ;;  %v12638_v48 = vld [vmem:[#allocation57_spill] sm:$0xff] }
 0x2fc   : > { %v3026_v13 = vsel %vm2972_vm2, %v2939_v61, %v3025_v4  ;;  %v3020_v9 = vsel %vm2974_vm3, %v2944_v36, %v3019_v1  ;;  %v2928_v49 = vunpack.c.l.b16 %v12636_v27  ;;  %v2929_v41 = vunpack.c.h.b16 %v12636_v27 }
 0x2fd   : > { %v3027_v22 = vsel %vm2974_vm3, %v2945_v53, %v3026_v13  ;;  %v3021_v35 = vsel %vm2976_vm4, %v2950_v40, %v3020_v9  ;;  %v2934_v14 = vunpack.c.l.b16 %v12637_v18  ;;  %v2935_v61 = vunpack.c.h.b16 %v12637_v18  ;;  %v12639_v13 = vld [vmem:[#allocation58_spill] sm:$0xff]  ;;  %v12640_v9 = vld [vmem:[#allocation63_spill] sm:$0xff] }
 0x2fe   : > { %v3028_v55 = vsel %vm2976_vm4, %v2951_v8, %v3027_v22  ;;  %v3022_v0 = vsel %vm2978_vm5, %v2956_v63, %v3021_v35  ;;  %v2940_v36 = vunpack.c.l.b16 %v12638_v48  ;;  %v2941_v53 = vunpack.c.h.b16 %v12638_v48 }
 0x2ff   : > { %v3029_v16 = vsel %vm2978_vm5, %v2957_v5, %v3028_v55  ;;  %v3023_v4 = vsel %vm2980_vm6, %v2962_v54, %v3022_v0  ;;  %v2946_v40 = vunpack.c.l.b16 %v12639_v13  ;;  %v2947_v8 = vunpack.c.h.b16 %v12639_v13  ;;  %v12641_v5 = vld [vmem:[#allocation64_spill] sm:$0xff] }
 0x300   : > { %v3030_v1 = vsel %vm2980_vm6, %v2963_v37, %v3029_v16  ;;  %v2952_v22 = vunpack.c.l.b16 %v12640_v9  ;;  %v2953_v27 = vunpack.c.h.b16 %v12640_v9  ;;  %v3031_v63 = vsel %vm2968_vm0, %v2928_v49, %v2922_v15  ;;  %v12642_v37 = vld [vmem:[#allocation69_spill] sm:$0xff]  ;;  %v12643_v49 = vld [vmem:[#allocation50_spill] sm:$0xff] }
 0x301   : > { %v3062_v12 = vpack.c.b16 %v3030_v1, %v3023_v4  ;;  %v2958_v35 = vunpack.c.l.b16 %v12641_v5  ;;  %v2959_v55 = vunpack.c.h.b16 %v12641_v5  ;;  %v3032_v18 = vsel %vm2970_vm1, %v2934_v14, %v3031_v63  ;;  %v12645_v5 = vld [vmem:[#allocation56_spill] sm:$0xff] }
 0x302   : > { %v3038_v54 = vsel %vm2968_vm0, %v2929_v41, %v2923_v44  ;;  %v2964_v0 = vunpack.c.l.b16 %v12642_v37  ;;  %v2965_v16 = vunpack.c.h.b16 %v12642_v37  ;;  %v3033_v48 = vsel %vm2972_vm2, %v2940_v36, %v3032_v18  ;;  %v12644_v41 = vld [vmem:[#allocation48_spill] sm:$0xff]  ;;  %v12646_v37 = vld [vmem:[#allocation54_spill] sm:$0xff] }
 0x303   : > { %3074 = vst [vmem:[#allocation2 + $0x18] sm:$0xff] %v3062_v12  ;;  %v3039_v4 = vsel %vm2970_vm1, %v2935_v61, %v3038_v54  ;;  %v3034_v1 = vsel %vm2974_vm3, %v2946_v40, %v3033_v48  ;;  %v2924_v13 = vunpack.c.l.b16 %v12643_v49  ;;  %v2925_v9 = vunpack.c.h.b16 %v12643_v49 }
 0x304   : > { %v3040_v15 = vsel %vm2972_vm2, %v2941_v53, %v3039_v4  ;;  %v3035_v14 = vsel %vm2976_vm4, %v2952_v22, %v3034_v1  ;;  %v2930_v12 = vunpack.c.l.b16 %v12644_v41  ;;  %v2931_v63 = vunpack.c.h.b16 %v12644_v41  ;;  %v12647_v4 = vld [vmem:[#allocation62_spill] sm:$0xff] }
 0x305   : > { %v3041_v44 = vsel %vm2974_vm3, %v2947_v8, %v3040_v15  ;;  %v3036_v36 = vsel %vm2978_vm5, %v2958_v35, %v3035_v14  ;;  %v2936_v40 = vunpack.c.l.b16 %v12645_v5  ;;  %v2937_v53 = vunpack.c.h.b16 %v12645_v5  ;;  %v12648_v15 = vld [vmem:[#allocation60_spill] sm:$0xff]  ;;  %v12650_v5 = vld [vmem:[#allocation66_spill] sm:$0xff] }
 0x306   : > { %v3042_v61 = vsel %vm2976_vm4, %v2953_v27, %v3041_v44  ;;  %v3037_v18 = vsel %vm2980_vm6, %v2964_v0, %v3036_v36  ;;  %v2942_v22 = vunpack.c.l.b16 %v12646_v37  ;;  %v2943_v8 = vunpack.c.h.b16 %v12646_v37 }
 0x307   : > { %v3043_v54 = vsel %vm2978_vm5, %v2959_v55, %v3042_v61  ;;  %v2948_v1 = vunpack.c.l.b16 %v12647_v4  ;;  %v2949_v35 = vunpack.c.h.b16 %v12647_v4  ;;  %v2954_v27 = vunpack.c.l.b16 %v12648_v15  ;;  %v12649_v55 = vld [vmem:[#allocation68_spill] sm:$0xff] }
 0x308   : > { %v3044_v48 = vsel %vm2980_vm6, %v2965_v16, %v3043_v54  ;;  %v2955_v14 = vunpack.c.h.b16 %v12648_v15  ;;  %v3045_v44 = vsel %vm2968_vm0, %v2930_v12, %v2924_v13  ;;  %v3052_v0 = vsel %vm2968_vm0, %v2931_v63, %v2925_v9 }
 0x309   : > { %v3063_v49 = vpack.c.b16 %v3044_v48, %v3037_v18  ;;  %v2960_v41 = vunpack.c.l.b16 %v12649_v55  ;;  %v2961_v36 = vunpack.c.h.b16 %v12649_v55  ;;  %v3046_v61 = vsel %vm2970_vm1, %v2936_v40, %v3045_v44 }
 0x30a   : > { %v3053_v16 = vsel %vm2970_vm1, %v2937_v53, %v3052_v0  ;;  %v2966_v54 = vunpack.c.l.b16 %v12650_v5  ;;  %v2967_v37 = vunpack.c.h.b16 %v12650_v5  ;;  %v3047_v18 = vsel %vm2972_vm2, %v2942_v22, %v3046_v61 }
 0x30b   : > { %3075 = vst [vmem:[#allocation2 + $0x20] sm:$0xff] %v3063_v49  ;;  %v3054_v48 = vsel %vm2972_vm2, %v2943_v8, %v3053_v16  ;;  %v3048_v13 = vsel %vm2974_vm3, %v2948_v1, %v3047_v18  ;;  %v3125_v12 = vunpack.c.l.b16 %v9816_v3  ;;  %v3126_v63 = vunpack.c.h.b16 %v9816_v3 }
 0x30c   : > { %v3055_v9 = vsel %vm2974_vm3, %v2949_v35, %v3054_v48  ;;  %v3049_v40 = vsel %vm2976_vm4, %v2954_v27, %v3048_v13  ;;  %v3131_v4 = vunpack.c.l.b16 %v9828_v10  ;;  %v3132_v15 = vunpack.c.h.b16 %v9828_v10 }
 0x30d   : > { %v3056_v53 = vsel %vm2976_vm4, %v2955_v14, %v3055_v9  ;;  %v3050_v22 = vsel %vm2978_vm5, %v2960_v41, %v3049_v40  ;;  %v3137_v1 = vunpack.c.l.b16 %v9840_v20  ;;  %v3138_v35 = vunpack.c.h.b16 %v9840_v20 }
 0x30e   : > { %v3057_v8 = vsel %vm2978_vm5, %v2961_v36, %v3056_v53  ;;  %v3051_v49 = vsel %vm2980_vm6, %v2966_v54, %v3050_v22  ;;  %v3143_v27 = vunpack.c.l.b16 %v9852_v34  ;;  %v3144_v14 = vunpack.c.h.b16 %v9852_v34 }
 0x30f   : > { %v3058_v44 = vsel %vm2980_vm6, %v2967_v37, %v3057_v8  ;;  %v3149_v55 = vunpack.c.l.b16 %v9864_v29  ;;  %v3150_v61 = vunpack.c.h.b16 %v9864_v29  ;;  %v3155_v41 = vunpack.c.l.b16 %v9876_v42 }
 0x310   : > { %v3064_v0 = vpack.c.b16 %v3058_v44, %v3051_v49  ;;  %v3156_v36 = vunpack.c.h.b16 %v9876_v42  ;;  %v3161_v16 = vunpack.c.l.b16 %v9888_v24  ;;  %v3221_v5 = vsel %vm2968_vm0, %v3131_v4, %v3125_v12 }
 0x311   : > { %v3228_v54 = vsel %vm2968_vm0, %v3132_v15, %v3126_v63  ;;  %v3162_v37 = vunpack.c.h.b16 %v9888_v24  ;;  %v3167_v18 = vunpack.c.l.b16 %v9900_v19  ;;  %v3222_v48 = vsel %vm2970_vm1, %v3137_v1, %v3221_v5 }
 0x312   : > { %3076 = vst [vmem:[#allocation2 + $0x28] sm:$0xff] %v3064_v0  ;;  %v3229_v13 = vsel %vm2970_vm1, %v3138_v35, %v3228_v54  ;;  %v3168_v9 = vunpack.c.h.b16 %v9900_v19  ;;  %v3223_v40 = vsel %vm2972_vm2, %v3143_v27, %v3222_v48  ;;  %v3127_v22 = vunpack.c.l.b16 %v9820_v11 }
 0x313   : > { %v3230_v53 = vsel %vm2972_vm2, %v3144_v14, %v3229_v13  ;;  %v3224_v12 = vsel %vm2974_vm3, %v3149_v55, %v3223_v40  ;;  %v3128_v24 = vunpack.c.h.b16 %v9820_v11  ;;  %v3133_v4 = vunpack.c.l.b16 %v9832_v57 }
 0x314   : > { %v3231_v63 = vsel %vm2974_vm3, %v3150_v61, %v3230_v53  ;;  %v3225_v15 = vsel %vm2976_vm4, %v3155_v41, %v3224_v12  ;;  %v3134_v19 = vunpack.c.h.b16 %v9832_v57  ;;  %v3139_v1 = vunpack.c.l.b16 %v9844_v56 }
 0x315   : > { %v3232_v8 = vsel %vm2976_vm4, %v3156_v36, %v3231_v63  ;;  %v3226_v35 = vsel %vm2978_vm5, %v3161_v16, %v3225_v15  ;;  %v3140_v44 = vunpack.c.h.b16 %v9844_v56  ;;  %v3145_v27 = vunpack.c.l.b16 %v9856_v28 }
 0x316   : > { %v3233_v49 = vsel %vm2978_vm5, %v3162_v37, %v3232_v8  ;;  %v3227_v14 = vsel %vm2980_vm6, %v3167_v18, %v3226_v35  ;;  %v3146_v55 = vunpack.c.h.b16 %v9856_v28  ;;  %v3151_v61 = vunpack.c.l.b16 %v9868_v21 }
 0x317   : > { %v3234_v0 = vsel %vm2980_vm6, %v3168_v9, %v3233_v49  ;;  %v3152_v36 = vunpack.c.h.b16 %v9868_v21  ;;  %v3157_v5 = vunpack.c.l.b16 %v9880_v26  ;;  %v3158_v16 = vunpack.c.h.b16 %v9880_v26 }
 0x318   : > { %v3305_v41 = vpack.c.b16 %v3234_v0, %v3227_v14  ;;  %v3163_v54 = vunpack.c.l.b16 %v9892_v39  ;;  %v3164_v37 = vunpack.c.h.b16 %v9892_v39  ;;  %v3235_v48 = vsel %vm2968_vm0, %v3133_v4, %v3127_v22 }
 0x319   : > { %v3242_v18 = vsel %vm2968_vm0, %v3134_v19, %v3128_v24  ;;  %v3169_v13 = vunpack.c.l.b16 %v9904_v33  ;;  %v3170_v9 = vunpack.c.h.b16 %v9904_v33  ;;  %v3236_v40 = vsel %vm2970_vm1, %v3139_v1, %v3235_v48 }
 0x31a   : > { %3317 = vst [vmem:[#allocation3] sm:$0xff] %v3305_v41  ;;  %v3243_v53 = vsel %vm2970_vm1, %v3140_v44, %v3242_v18  ;;  %v3237_v12 = vsel %vm2972_vm2, %v3145_v27, %v3236_v40  ;;  %v3129_v15 = vunpack.c.l.b16 %v9824_v46  ;;  %v3130_v39 = vunpack.c.h.b16 %v9824_v46 }
 0x31b   : > { %v3244_v63 = vsel %vm2972_vm2, %v3146_v55, %v3243_v53  ;;  %v3238_v22 = vsel %vm2974_vm3, %v3151_v61, %v3237_v12  ;;  %v3135_v4 = vunpack.c.l.b16 %v9836_v58  ;;  %v3136_v33 = vunpack.c.h.b16 %v9836_v58 }
 0x31c   : > { %v3245_v24 = vsel %vm2974_vm3, %v3152_v36, %v3244_v63  ;;  %v3239_v8 = vsel %vm2976_vm4, %v3157_v5, %v3238_v22  ;;  %v3141_v1 = vunpack.c.l.b16 %v9848_v52  ;;  %v3142_v35 = vunpack.c.h.b16 %v9848_v52 }
 0x31d   : > { %v3246_v19 = vsel %vm2976_vm4, %v3158_v16, %v3245_v24  ;;  %v3240_v49 = vsel %vm2978_vm5, %v3163_v54, %v3239_v8  ;;  %v3147_v27 = vunpack.c.l.b16 %v9860_v32  ;;  %v3148_v14 = vunpack.c.h.b16 %v9860_v32 }
 0x31e   : > { %v3247_v44 = vsel %vm2978_vm5, %v3164_v37, %v3246_v19  ;;  %v3241_v0 = vsel %vm2980_vm6, %v3169_v13, %v3240_v49  ;;  %v3153_v61 = vunpack.c.l.b16 %v9872_v59  ;;  %v3154_v41 = vunpack.c.h.b16 %v9872_v59 }
 0x31f   : > { %v3248_v55 = vsel %vm2980_vm6, %v3170_v9, %v3247_v44  ;;  %v3159_v5 = vunpack.c.l.b16 %v9884_v50  ;;  %v3160_v16 = vunpack.c.h.b16 %v9884_v50  ;;  %v3249_v54 = vsel %vm2968_vm0, %v3135_v4, %v3129_v15 }
 0x320   : > { %v3306_v36 = vpack.c.b16 %v3248_v55, %v3241_v0  ;;  %v3165_v37 = vunpack.c.l.b16 %v9896_v43  ;;  %v3166_v48 = vunpack.c.h.b16 %v9896_v43  ;;  %v3250_v18 = vsel %vm2970_vm1, %v3141_v1, %v3249_v54 }
 0x321   : > { %v3256_v13 = vsel %vm2968_vm0, %v3136_v33, %v3130_v39  ;;  %v3171_v9 = vunpack.c.l.b16 %v9908_v62  ;;  %v3172_v40 = vunpack.c.h.b16 %v9908_v62  ;;  %v3251_v53 = vsel %vm2972_vm2, %v3147_v27, %v3250_v18 }
 0x322   : > { %3318 = vst [vmem:[#allocation3 + $0x8] sm:$0xff] %v3306_v36  ;;  %v3257_v12 = vsel %vm2970_vm1, %v3142_v35, %v3256_v13  ;;  %v3252_v63 = vsel %vm2974_vm3, %v3153_v61, %v3251_v53  ;;  %v3173_v22 = vunpack.c.l.b16 %v9912_v25  ;;  %v3174_v43 = vunpack.c.h.b16 %v9912_v25 }
 0x323   : > { %v3258_v15 = vsel %vm2972_vm2, %v3148_v14, %v3257_v12  ;;  %v3253_v24 = vsel %vm2976_vm4, %v3159_v5, %v3252_v63  ;;  %v3179_v4 = vunpack.c.l.b16 %v9924_v30  ;;  %v3180_v62 = vunpack.c.h.b16 %v9924_v30 }
 0x324   : > { %v3259_v39 = vsel %vm2974_vm3, %v3154_v41, %v3258_v15  ;;  %v3254_v33 = vsel %vm2978_vm5, %v3165_v37, %v3253_v24  ;;  %v3185_v19 = vunpack.c.l.b16 %v9936_v7  ;;  %v3186_v1 = vunpack.c.h.b16 %v9936_v7 }
 0x325   : > { %v3260_v8 = vsel %vm2976_vm4, %v3160_v16, %v3259_v39  ;;  %v3255_v35 = vsel %vm2980_vm6, %v3171_v9, %v3254_v33  ;;  %v3191_v44 = vunpack.c.l.b16 %v9948_v47  ;;  %v3192_v27 = vunpack.c.h.b16 %v9948_v47 }
 0x326   : > { %v3261_v49 = vsel %vm2978_vm5, %v3166_v48, %v3260_v8  ;;  %v3197_v0 = vunpack.c.l.b16 %v9960_v45  ;;  %v3198_v55 = vunpack.c.h.b16 %v9960_v45  ;;  %v3203_v61 = vunpack.c.l.b16 %v9972_v38 }
 0x327   : > { %v3262_v14 = vsel %vm2980_vm6, %v3172_v40, %v3261_v49  ;;  %v3204_v36 = vunpack.c.h.b16 %v9972_v38  ;;  %v3263_v5 = vsel %vm2968_vm0, %v3179_v4, %v3173_v22  ;;  %v3270_v16 = vsel %vm2968_vm0, %v3180_v62, %v3174_v43 }
 0x328   : > { %v3307_v41 = vpack.c.b16 %v3262_v14, %v3255_v35  ;;  %v3209_v54 = vunpack.c.l.b16 %v9984_v60  ;;  %v3210_v37 = vunpack.c.h.b16 %v9984_v60  ;;  %v3264_v48 = vsel %vm2970_vm1, %v3185_v19, %v3263_v5  ;;  %v12651_v14 = vld [vmem:[#allocation73_spill] sm:$0xff] }
 0x329   : > { %v3271_v18 = vsel %vm2970_vm1, %v3186_v1, %v3270_v16  ;;  %v3215_v13 = vunpack.c.l.b16 %v9996_v17  ;;  %v3216_v9 = vunpack.c.h.b16 %v9996_v17  ;;  %v3265_v40 = vsel %vm2972_vm2, %v3191_v44, %v3264_v48  ;;  %v12653_v48 = vld [vmem:[#allocation118_spill] sm:$0xff] }
 0x32a   : > { %3319 = vst [vmem:[#allocation3 + $0x10] sm:$0xff] %v3307_v41  ;;  %v3272_v53 = vsel %vm2972_vm2, %v3192_v27, %v3271_v18  ;;  %v3266_v12 = vsel %vm2974_vm3, %v3197_v0, %v3265_v40  ;;  %v3175_v15 = vunpack.c.l.b16 %v9916_v31  ;;  %v3176_v60 = vunpack.c.h.b16 %v9916_v31 }
 0x32b   : > { %v3273_v63 = vsel %vm2974_vm3, %v3198_v55, %v3272_v53  ;;  %v3267_v22 = vsel %vm2976_vm4, %v3203_v61, %v3266_v12  ;;  %v3181_v24 = vunpack.c.l.b16 %v9928_v6  ;;  %v3182_v17 = vunpack.c.h.b16 %v9928_v6 }
 0x32c   : > { %v3274_v43 = vsel %vm2976_vm4, %v3204_v36, %v3273_v63  ;;  %v3268_v39 = vsel %vm2978_vm5, %v3209_v54, %v3267_v22  ;;  %v3187_v62 = vunpack.c.l.b16 %v9940_v51  ;;  %v3188_v33 = vunpack.c.h.b16 %v9940_v51  ;;  %v12652_v36 = vld [vmem:[#allocation70_spill] sm:$0xff] }
 0x32d   : > { %v3275_v4 = vsel %vm2978_vm5, %v3210_v37, %v3274_v43  ;;  %v3269_v8 = vsel %vm2980_vm6, %v3215_v13, %v3268_v39  ;;  %v3193_v1 = vunpack.c.l.b16 %v9952_v23  ;;  %v3194_v35 = vunpack.c.h.b16 %v9952_v23  ;;  %v12654_v63 = vld [vmem:[#allocation166_spill] sm:$0xff] }
 0x32e   : > { %v3276_v19 = vsel %vm2980_vm6, %v3216_v9, %v3275_v4  ;;  %v3199_v44 = vunpack.c.l.b16 %v9964_v2  ;;  %v3200_v27 = vunpack.c.h.b16 %v9964_v2  ;;  %v3205_v0 = vunpack.c.l.b16 %v12651_v14 }
 0x32f   : > { %v3308_v49 = vpack.c.b16 %v3276_v19, %v3269_v8  ;;  %v3206_v55 = vunpack.c.h.b16 %v12651_v14  ;;  %v3277_v61 = vsel %vm2968_vm0, %v3181_v24, %v3175_v15  ;;  %v3284_v41 = vsel %vm2968_vm0, %v3182_v17, %v3176_v60  ;;  %v12655_v24 = vld [vmem:[#allocation167_spill] sm:$0xff] }
 0x330   : > { %v3211_v5 = vunpack.c.l.b16 %v12652_v36  ;;  %v3212_v16 = vunpack.c.h.b16 %v12652_v36  ;;  %v3278_v54 = vsel %vm2970_vm1, %v3187_v62, %v3277_v61  ;;  %v3285_v37 = vsel %vm2970_vm1, %v3188_v33, %v3284_v41  ;;  %v12656_v33 = vld [vmem:[#allocation168_spill] sm:$0xff]  ;;  %v12659_v41 = vld [vmem:[#allocation75_spill] sm:$0xff] }
 0x331   : > { %3320 = vst [vmem:[#allocation3 + $0x18] sm:$0xff] %v3308_v49  ;;  %v3217_v18 = vunpack.c.l.b16 %v12653_v48  ;;  %v3218_v13 = vunpack.c.h.b16 %v12653_v48  ;;  %v3279_v9 = vsel %vm2972_vm2, %v3193_v1, %v3278_v54  ;;  %v3286_v40 = vsel %vm2972_vm2, %v3194_v35, %v3285_v37  ;;  %v12657_v49 = vld [vmem:[#allocation169_spill] sm:$0xff] }
 0x332   : > { %v3280_v53 = vsel %vm2974_vm3, %v3199_v44, %v3279_v9  ;;  %v3287_v12 = vsel %vm2974_vm3, %v3200_v27, %v3286_v40  ;;  %v3177_v15 = vunpack.c.l.b16 %v12654_v63  ;;  %v3178_v60 = vunpack.c.h.b16 %v12654_v63  ;;  %v12660_v37 = vld [vmem:[#allocation121_spill] sm:$0xff]  ;;  %v12661_v40 = vld [vmem:[#allocation122_spill] sm:$0xff] }
 0x333   : > { %v3281_v22 = vsel %vm2976_vm4, %v3205_v0, %v3280_v53  ;;  %v3288_v43 = vsel %vm2976_vm4, %v3206_v55, %v3287_v12  ;;  %v3183_v17 = vunpack.c.l.b16 %v12655_v24  ;;  %v3184_v39 = vunpack.c.h.b16 %v12655_v24  ;;  %v12658_v0 = vld [vmem:[#allocation71_spill] sm:$0xff] }
 0x334   : > { %v3282_v4 = vsel %vm2978_vm5, %v3211_v5, %v3281_v22  ;;  %v3289_v62 = vsel %vm2978_vm5, %v3212_v16, %v3288_v43  ;;  %v3189_v8 = vunpack.c.l.b16 %v12656_v33  ;;  %v3190_v19 = vunpack.c.h.b16 %v12656_v33 }
 0x335   : > { %v3283_v1 = vsel %vm2980_vm6, %v3217_v18, %v3282_v4  ;;  %v3290_v35 = vsel %vm2980_vm6, %v3218_v13, %v3289_v62  ;;  %v3195_v44 = vunpack.c.l.b16 %v12657_v49  ;;  %v3196_v27 = vunpack.c.h.b16 %v12657_v49 }
 0x336   : > { %v3309_v14 = vpack.c.b16 %v3290_v35, %v3283_v1  ;;  %v3201_v55 = vunpack.c.l.b16 %v12658_v0  ;;  %v3202_v61 = vunpack.c.h.b16 %v12658_v0  ;;  %v3207_v36 = vunpack.c.l.b16 %v12659_v41 }
 0x337   : > { %v3208_v5 = vunpack.c.h.b16 %v12659_v41  ;;  %v3291_v16 = vsel %vm2968_vm0, %v3183_v17, %v3177_v15  ;;  %v3298_v54 = vsel %vm2968_vm0, %v3184_v39, %v3178_v60  ;;  %v3213_v48 = vunpack.c.l.b16 %v12660_v37 }
 0x338   : > { %3321 = vst [vmem:[#allocation3 + $0x20] sm:$0xff] %v3309_v14  ;;  %v3214_v18 = vunpack.c.h.b16 %v12660_v37  ;;  %v3292_v13 = vsel %vm2970_vm1, %v3189_v8, %v3291_v16  ;;  %v3299_v9 = vsel %vm2970_vm1, %v3190_v19, %v3298_v54  ;;  %v3219_v53 = vunpack.c.l.b16 %v12661_v40 }
 0x339   : > { %v3220_v12 = vunpack.c.h.b16 %v12661_v40  ;;  %v3293_v63 = vsel %vm2972_vm2, %v3195_v44, %v3292_v13  ;;  %v3300_v22 = vsel %vm2972_vm2, %v3196_v27, %v3299_v9 }
 0x33a   : > { %v3294_v15 = vsel %vm2974_vm3, %v3201_v55, %v3293_v63  ;;  %v3301_v60 = vsel %vm2974_vm3, %v3202_v61, %v3300_v22 }
 0x33b   : > { %v3295_v43 = vsel %vm2976_vm4, %v3207_v36, %v3294_v15  ;;  %v3302_v24 = vsel %vm2976_vm4, %v3208_v5, %v3301_v60 }
 0x33c   : > { %v3296_v17 = vsel %vm2978_vm5, %v3213_v48, %v3295_v43  ;;  %v3303_v39 = vsel %vm2978_vm5, %v3214_v18, %v3302_v24 }
 0x33d   : > { %v3297_v4 = vsel %vm2980_vm6, %v3219_v53, %v3296_v17  ;;  %v3304_v62 = vsel %vm2980_vm6, %v3220_v12, %v3303_v39 }
 0x33e   : > { %v3310_v33 = vpack.c.b16 %v3304_v62, %v3297_v4 }
 0x340   : > { %3322 = vst [vmem:[#allocation3 + $0x28] sm:$0xff] %v3310_v33 }
 0x341 PF: > { %p6145_p0 = scmp.le.s32.totalorder %s7345_s1, 0 }
 0x343   : > { %3326 = sbr.rel (%p6145_p0) target bundleno = 942 (0x3ae), region = 136 }
 0x348   : > { %v3327_v8 = vld [vmem:[#allocation2] sm:$0xff]  ;;  %v12662_v19 = vld [vmem:[#allocation102_spill] sm:$0xff]  ;;  %v12663_v35 = vld [vmem:[#allocation105_spill] sm:$0xff]  ;;  %vm3537_vm7 = vcmask 1041409   ;;  %vm3539_vm8 = vcmask 1042434   ;;  %vm3541_vm9 = vcmask 1043459  }
 0x349   : > { %v3345_v1 = vunpack.c.l.bf16 %v12662_v19  ;;  %v3351_v49 = vunpack.c.l.bf16 %v12663_v35  ;;  %v3333_v44 = vunpack.c.l.bf16 %v3327_v8  ;;  %v3346_v27 = vunpack.c.h.bf16 %v12662_v19  ;;  %v12664_v0 = vld [vmem:[#allocation108_spill] sm:$0xff]  ;;  %v12665_v36 = vld [vmem:[#allocation111_spill] sm:$0xff]  ;;  %v12666_v54 = vld [vmem:[#allocation114_spill] sm:$0xff] }
 0x34a   : > { %v3352_v14 = vunpack.c.h.bf16 %v12663_v35  ;;  %v3357_v55 = vunpack.c.l.bf16 %v12664_v0  ;;  %v3334_v61 = vunpack.c.h.bf16 %v3327_v8  ;;  %v3358_v41 = vunpack.c.h.bf16 %v12664_v0  ;;  %v12667_v18 = vld [vmem:[#allocation95_spill] sm:$0xff]  ;;  %v10381_v40 = vld [vmem:[#allocation2 + $0x8] sm:$0xff]  ;;  %v12669_v8 = vld [vmem:[#allocation106_spill] sm:$0xff] }
 0x34b   : > { %v3363_v5 = vunpack.c.l.bf16 %v12665_v36  ;;  %v3364_v16 = vunpack.c.h.bf16 %v12665_v36  ;;  %v3369_v37 = vunpack.c.l.bf16 %v12666_v54  ;;  %v3370_v48 = vunpack.c.h.bf16 %v12666_v54  ;;  %v12668_v17 = vld [vmem:[#allocation103_spill] sm:$0xff]  ;;  %v12674_v54 = vld [vmem:[#allocation112_spill] sm:$0xff] }
 0x34c   : > { %v3375_v13 = vunpack.c.l.bf16 %v12667_v18  ;;  %v3538_v9 = vsel %vm3537_vm7, %v3351_v49, %v3345_v1  ;;  %vm3543_vm10 = vcmask 1044484   ;;  %v3376_v53 = vunpack.c.h.bf16 %v12667_v18  ;;  %v12670_v1 = vld [vmem:[#allocation98_spill] sm:$0xff]  ;;  %v12673_v36 = vld [vmem:[#allocation99_spill] sm:$0xff] }
 0x34d   : > { %v3540_v12 = vsel %vm3539_vm8, %v3357_v55, %v3538_v9  ;;  %vm3545_vm11 = vcmask 1045509   ;;  %v3551_v63 = vsel %vm3537_vm7, %v3352_v14, %v3346_v27  ;;  %vm3547_vm12 = vcmask 1046534   ;;  %v12671_v14 = vld [vmem:[#allocation109_spill] sm:$0xff]  ;;  %v12672_v55 = vld [vmem:[#allocation43_spill] sm:$0xff] }
 0x34e   : > { %v3542_v22 = vsel %vm3541_vm9, %v3363_v5, %v3540_v12  ;;  %vm3549_vm13 = vcmask 1047559   ;;  %v3552_v15 = vsel %vm3539_vm8, %v3358_v41, %v3551_v63  ;;  %v3335_v24 = vunpack.c.l.bf16 %v10381_v40 }
 0x34f   : > { %v3544_v60 = vsel %vm3543_vm10, %v3369_v37, %v3542_v22  ;;  %v3553_v43 = vsel %vm3541_vm9, %v3364_v16, %v3552_v15  ;;  %v3347_v39 = vunpack.c.l.bf16 %v12668_v17  ;;  %v3348_v33 = vunpack.c.h.bf16 %v12668_v17  ;;  %v12677_v15 = vld [vmem:[#allocation96_spill] sm:$0xff] }
 0x350   : > { %v3546_v4 = vsel %vm3545_vm11, %v3375_v13, %v3544_v60  ;;  %v3554_v62 = vsel %vm3543_vm10, %v3370_v48, %v3553_v43  ;;  %v3353_v19 = vunpack.c.l.bf16 %v12669_v8  ;;  %v3354_v27 = vunpack.c.h.bf16 %v12669_v8  ;;  %v12675_v48 = vld [vmem:[#allocation40_spill] sm:$0xff] }
 0x351   : > { %v3548_v35 = vsel %vm3547_vm12, %v12670_v1, %v3546_v4  ;;  %v3555_v49 = vsel %vm3545_vm11, %v3376_v53, %v3554_v62  ;;  %v3359_v0 = vunpack.c.l.bf16 %v12671_v14  ;;  %v3360_v16 = vunpack.c.h.bf16 %v12671_v14  ;;  %v12676_v53 = vld [vmem:[#allocation115_spill] sm:$0xff] }
 0x352   : > { %v3550_v41 = vsel %vm3549_vm13, %v12672_v55, %v3548_v35  ;;  %v3556_v5 = vsel %vm3547_vm12, %v12673_v36, %v3555_v49  ;;  %v3365_v37 = vunpack.c.l.bf16 %v12674_v54  ;;  %v3366_v9 = vunpack.c.h.bf16 %v12674_v54 }
 0x353   : > { %v3557_v18 = vsel %vm3549_vm13, %v12675_v48, %v3556_v5  ;;  %v3640_v13 = vmax.f32 %v3333_v44, %v3550_v41  ;;  %v3371_v12 = vunpack.c.l.bf16 %v12676_v53  ;;  %v3372_v22 = vunpack.c.h.bf16 %v12676_v53  ;;  %v12680_v41 = vld [vmem:[#allocation110_spill] sm:$0xff]  ;;  %v12681_v5 = vld [vmem:[#allocation100_spill] sm:$0xff]  ;;  %v12682_v48 = vld [vmem:[#allocation113_spill] sm:$0xff] }
 0x354   : > { %v3641_v63 = vmax.f32 %v3334_v61, %v3557_v18  ;;  %v3377_v60 = vunpack.c.l.bf16 %v12677_v15  ;;  %v3558_v43 = vsel %vm3537_vm7, %v3353_v19, %v3347_v39  ;;  %v3336_v17 = vunpack.c.h.bf16 %v10381_v40  ;;  %v12678_v61 = vld [vmem:[#allocation104_spill] sm:$0xff]  ;;  %v12679_v40 = vld [vmem:[#allocation107_spill] sm:$0xff]  ;;  %v12684_v53 = vld [vmem:[#allocation101_spill] sm:$0xff] }
 0x355   : > { %v3378_v4 = vunpack.c.h.bf16 %v12677_v15  ;;  %v3559_v62 = vsel %vm3539_vm8, %v3359_v0, %v3558_v43  ;;  %v3565_v8 = vsel %vm3537_vm7, %v3354_v27, %v3348_v33  ;;  %v3349_v49 = vunpack.c.l.bf16 %v12678_v61  ;;  %v12685_v15 = vld [vmem:[#allocation94_spill] sm:$0xff]  ;;  %v12686_v43 = vld [vmem:[#allocation41_spill] sm:$0xff] }
 0x356   : > { %v3652_v44 = vpack.c.bf16 %v3641_v63, %v3640_v13  ;;  %v3560_v1 = vsel %vm3541_vm9, %v3365_v37, %v3559_v62  ;;  %v3566_v35 = vsel %vm3539_vm8, %v3360_v16, %v3565_v8  ;;  %v3350_v39 = vunpack.c.h.bf16 %v12678_v61  ;;  %v12683_v13 = vld [vmem:[#allocation44_spill] sm:$0xff]  ;;  %v3329_v63 = vld [vmem:[#allocation2 + $0x10] sm:$0xff] }
 0x357   : > { %v3561_v14 = vsel %vm3543_vm10, %v3371_v12, %v3560_v1  ;;  %v3567_v55 = vsel %vm3541_vm9, %v3366_v9, %v3566_v35  ;;  %v3355_v19 = vunpack.c.l.bf16 %v12679_v40  ;;  %v3356_v27 = vunpack.c.h.bf16 %v12679_v40  ;;  %v10444_v35 = vld [vmem:[#allocation2 + $0x18] sm:$0xff] }
 0x358   : > { %3658 = vst [vmem:[#allocation2] sm:$0xff] %v3652_v44  ;;  %v3562_v0 = vsel %vm3545_vm11, %v3377_v60, %v3561_v14  ;;  %v3568_v33 = vsel %vm3543_vm10, %v3372_v22, %v3567_v55  ;;  %v3361_v36 = vunpack.c.l.bf16 %v12680_v41  ;;  %v3362_v37 = vunpack.c.h.bf16 %v12680_v41  ;;  %v12687_v44 = vld [vmem:[#allocation97_spill] sm:$0xff] }
 0x359   : > { %v3563_v16 = vsel %vm3547_vm12, %v12681_v5, %v3562_v0  ;;  %v3569_v54 = vsel %vm3545_vm11, %v3378_v4, %v3568_v33  ;;  %v3367_v18 = vunpack.c.l.bf16 %v12682_v48  ;;  %v3368_v22 = vunpack.c.h.bf16 %v12682_v48 }
 0x35a   : > { %v3564_v9 = vsel %vm3549_vm13, %v12683_v13, %v3563_v16  ;;  %v3570_v12 = vsel %vm3547_vm12, %v12684_v53, %v3569_v54  ;;  %v3373_v60 = vunpack.c.l.bf16 %v12685_v15  ;;  %v3374_v4 = vunpack.c.h.bf16 %v12685_v15  ;;  %v12690_v53 = vld [vmem:[#allocation39_spill] sm:$0xff] }
 0x35b   : > { %v3571_v62 = vsel %vm3549_vm13, %v12686_v43, %v3570_v12  ;;  %v3642_v8 = vmax.f32 %v3335_v24, %v3564_v9  ;;  %v3379_v1 = vunpack.c.l.bf16 %v12687_v44  ;;  %v3380_v14 = vunpack.c.h.bf16 %v12687_v44  ;;  %v12692_v15 = vld [vmem:[#allocation55_spill] sm:$0xff] }
 0x35c   : > { %v3643_v61 = vmax.f32 %v3336_v17, %v3571_v62  ;;  %v3572_v55 = vsel %vm3537_vm7, %v3355_v19, %v3349_v49  ;;  %v3579_v40 = vsel %vm3537_vm7, %v3356_v27, %v3350_v39  ;;  %v3337_v0 = vunpack.c.l.bf16 %v3329_v63  ;;  %v12688_v49 = vld [vmem:[#allocation49_spill] sm:$0xff] }
 0x35d   : > { %v3338_v33 = vunpack.c.h.bf16 %v3329_v63  ;;  %v3573_v41 = vsel %vm3539_vm8, %v3361_v36, %v3572_v55  ;;  %v3580_v5 = vsel %vm3539_vm8, %v3362_v37, %v3579_v40  ;;  %v3339_v48 = vunpack.c.l.bf16 %v10444_v35  ;;  %v12689_v37 = vld [vmem:[#allocation47_spill] sm:$0xff]  ;;  %v12691_v63 = vld [vmem:[#allocation36_spill] sm:$0xff]  ;;  %v12693_v62 = vld [vmem:[#allocation45_spill] sm:$0xff] }
 0x35e   : > { %v3653_v24 = vpack.c.bf16 %v3643_v61, %v3642_v8  ;;  %v3574_v16 = vsel %vm3541_vm9, %v3367_v18, %v3573_v41  ;;  %v3581_v54 = vsel %vm3541_vm9, %v3368_v22, %v3580_v5  ;;  %v3393_v19 = vunpack.c.l.bf16 %v12688_v49  ;;  %v12696_v41 = vld [vmem:[#allocation61_spill] sm:$0xff] }
 0x35f   : > { %v3575_v17 = vsel %vm3543_vm10, %v3373_v60, %v3574_v16  ;;  %v3582_v13 = vsel %vm3543_vm10, %v3374_v4, %v3581_v54  ;;  %v3394_v39 = vunpack.c.h.bf16 %v12688_v49  ;;  %v3399_v9 = vunpack.c.l.bf16 %v12689_v37  ;;  %v12694_v4 = vld [vmem:[#allocation42_spill] sm:$0xff]  ;;  %v10476_v16 = vld [vmem:[#allocation2 + $0x20] sm:$0xff] }
 0x360   : > { %3659 = vst [vmem:[#allocation2 + $0x8] sm:$0xff] %v3653_v24  ;;  %v3576_v27 = vsel %vm3545_vm11, %v3379_v1, %v3575_v17  ;;  %v3583_v36 = vsel %vm3545_vm11, %v3380_v14, %v3582_v13  ;;  %v3400_v18 = vunpack.c.h.bf16 %v12689_v37  ;;  %v3405_v60 = vunpack.c.l.bf16 %v12692_v15  ;;  %v12695_v1 = vld [vmem:[#allocation53_spill] sm:$0xff]  ;;  %v12697_v54 = vld [vmem:[#allocation59_spill] sm:$0xff] }
 0x361   : > { %v3577_v12 = vsel %vm3547_vm12, %v12690_v53, %v3576_v27  ;;  %v3584_v22 = vsel %vm3547_vm12, %v12691_v63, %v3583_v36  ;;  %v3406_v43 = vunpack.c.h.bf16 %v12692_v15  ;;  %v3411_v61 = vunpack.c.l.bf16 %v12695_v1 }
 0x362   : > { %v3578_v8 = vsel %vm3549_vm13, %v12693_v62, %v3577_v12  ;;  %v3585_v44 = vsel %vm3549_vm13, %v12694_v4, %v3584_v22  ;;  %v3412_v14 = vunpack.c.h.bf16 %v12695_v1  ;;  %v3417_v5 = vunpack.c.l.bf16 %v12696_v41  ;;  %v12700_v4 = vld [vmem:[#allocation85_spill] sm:$0xff]  ;;  %v12701_v1 = vld [vmem:[#allocation82_spill] sm:$0xff] }
 0x363   : > { %v3644_v55 = vmax.f32 %v3337_v0, %v3578_v8  ;;  %v3645_v40 = vmax.f32 %v3338_v33, %v3585_v44  ;;  %v3418_v24 = vunpack.c.h.bf16 %v12696_v41  ;;  %v3423_v17 = vunpack.c.l.bf16 %v12697_v54  ;;  %v12703_v41 = vld [vmem:[#allocation91_spill] sm:$0xff] }
 0x364   : > { %v3424_v13 = vunpack.c.h.bf16 %v12697_v54  ;;  %v3586_v49 = vsel %vm3537_vm7, %v3399_v9, %v3393_v19  ;;  %v3593_v27 = vsel %vm3537_vm7, %v3400_v18, %v3394_v39  ;;  %v3340_v37 = vunpack.c.h.bf16 %v10444_v35  ;;  %v12698_v9 = vld [vmem:[#allocation46_spill] sm:$0xff]  ;;  %v12705_v54 = vld [vmem:[#allocation57_spill] sm:$0xff] }
 0x365   : > { %v3654_v36 = vpack.c.bf16 %v3645_v40, %v3644_v55  ;;  %v3587_v0 = vsel %vm3539_vm8, %v3405_v60, %v3586_v49  ;;  %v3594_v33 = vsel %vm3539_vm8, %v3406_v43, %v3593_v27  ;;  %v3341_v63 = vunpack.c.l.bf16 %v10476_v16  ;;  %v12699_v43 = vld [vmem:[#allocation51_spill] sm:$0xff]  ;;  %v10509_v49 = vld [vmem:[#allocation2 + $0x28] sm:$0xff] }
 0x366   : > { %v3588_v53 = vsel %vm3541_vm9, %v3411_v61, %v3587_v0  ;;  %v3595_v12 = vsel %vm3541_vm9, %v3412_v14, %v3594_v33  ;;  %v3342_v22 = vunpack.c.h.bf16 %v10476_v16  ;;  %v3395_v18 = vunpack.c.l.bf16 %v12698_v9  ;;  %v12702_v14 = vld [vmem:[#allocation52_spill] sm:$0xff]  ;;  %v12706_v0 = vld [vmem:[#allocation58_spill] sm:$0xff] }
 0x367   : > { %3660 = vst [vmem:[#allocation2 + $0x10] sm:$0xff] %v3654_v36  ;;  %v3589_v19 = vsel %vm3543_vm10, %v3417_v5, %v3588_v53  ;;  %v3596_v39 = vsel %vm3543_vm10, %v3418_v24, %v3595_v12  ;;  %v3396_v35 = vunpack.c.h.bf16 %v12698_v9  ;;  %v3401_v62 = vunpack.c.l.bf16 %v12699_v43  ;;  %v12704_v24 = vld [vmem:[#allocation88_spill] sm:$0xff]  ;;  %v12707_v12 = vld [vmem:[#allocation63_spill] sm:$0xff] }
 0x368   : > { %v3590_v15 = vsel %vm3545_vm11, %v3423_v17, %v3589_v19  ;;  %v3597_v60 = vsel %vm3545_vm11, %v3424_v13, %v3596_v39  ;;  %v3402_v8 = vunpack.c.h.bf16 %v12699_v43  ;;  %v3407_v55 = vunpack.c.l.bf16 %v12702_v14 }
 0x369   : > { %v3591_v44 = vsel %vm3547_vm12, %v12700_v4, %v3590_v15  ;;  %v3598_v61 = vsel %vm3547_vm12, %v12701_v1, %v3597_v60  ;;  %v3408_v40 = vunpack.c.h.bf16 %v12702_v14  ;;  %v3413_v17 = vunpack.c.l.bf16 %v12705_v54  ;;  %v12708_v1 = vld [vmem:[#allocation50_spill] sm:$0xff] }
 0x36a   : > { %v3592_v5 = vsel %vm3549_vm13, %v12703_v41, %v3591_v44  ;;  %v3599_v16 = vsel %vm3549_vm13, %v12704_v24, %v3598_v61  ;;  %v3414_v13 = vunpack.c.h.bf16 %v12705_v54  ;;  %v3419_v33 = vunpack.c.l.bf16 %v12706_v0  ;;  %v12711_v54 = vld [vmem:[#allocation86_spill] sm:$0xff] }
 0x36b   : > { %v3646_v27 = vmax.f32 %v3339_v48, %v3592_v5  ;;  %v3647_v36 = vmax.f32 %v3340_v37, %v3599_v16  ;;  %v3420_v53 = vunpack.c.h.bf16 %v12706_v0  ;;  %v3425_v19 = vunpack.c.l.bf16 %v12707_v12  ;;  %v12710_v5 = vld [vmem:[#allocation56_spill] sm:$0xff] }
 0x36c   : > { %v3426_v39 = vunpack.c.h.bf16 %v12707_v12  ;;  %v3600_v9 = vsel %vm3537_vm7, %v3401_v62, %v3395_v18  ;;  %v3607_v15 = vsel %vm3537_vm7, %v3402_v8, %v3396_v35  ;;  %v3343_v48 = vunpack.c.l.bf16 %v10509_v49  ;;  %v12709_v62 = vld [vmem:[#allocation48_spill] sm:$0xff] }
 0x36d   : > { %v3655_v60 = vpack.c.bf16 %v3647_v36, %v3646_v27  ;;  %v3601_v43 = vsel %vm3539_vm8, %v3407_v55, %v3600_v9  ;;  %v3608_v4 = vsel %vm3539_vm8, %v3408_v40, %v3607_v15  ;;  %v3397_v61 = vunpack.c.l.bf16 %v12708_v1  ;;  %v12713_v36 = vld [vmem:[#allocation54_spill] sm:$0xff] }
 0x36e   : > { %v3602_v37 = vsel %vm3541_vm9, %v3413_v17, %v3601_v43  ;;  %v3609_v44 = vsel %vm3541_vm9, %v3414_v13, %v3608_v4  ;;  %v3398_v14 = vunpack.c.h.bf16 %v12708_v1  ;;  %v3403_v8 = vunpack.c.l.bf16 %v12709_v62  ;;  %v12712_v13 = vld [vmem:[#allocation83_spill] sm:$0xff]  ;;  %v12716_v9 = vld [vmem:[#allocation62_spill] sm:$0xff] }
 0x36f   : > { %3661 = vst [vmem:[#allocation2 + $0x18] sm:$0xff] %v3655_v60  ;;  %v3603_v18 = vsel %vm3543_vm10, %v3419_v33, %v3602_v37  ;;  %v3610_v35 = vsel %vm3543_vm10, %v3420_v53, %v3609_v44  ;;  %v3404_v55 = vunpack.c.h.bf16 %v12709_v62  ;;  %v3409_v24 = vunpack.c.l.bf16 %v12710_v5  ;;  %v12714_v53 = vld [vmem:[#allocation92_spill] sm:$0xff] }
 0x370   : > { %v3604_v40 = vsel %vm3545_vm11, %v3425_v19, %v3603_v18  ;;  %v3611_v41 = vsel %vm3545_vm11, %v3426_v39, %v3610_v35  ;;  %v3410_v16 = vunpack.c.h.bf16 %v12710_v5  ;;  %v3415_v0 = vunpack.c.l.bf16 %v12713_v36  ;;  %v12715_v19 = vld [vmem:[#allocation89_spill] sm:$0xff]  ;;  %v12717_v37 = vld [vmem:[#allocation60_spill] sm:$0xff] }
 0x371   : > { %v3605_v17 = vsel %vm3547_vm12, %v12711_v54, %v3604_v40  ;;  %v3612_v27 = vsel %vm3547_vm12, %v12712_v13, %v3611_v41  ;;  %v3416_v33 = vunpack.c.h.bf16 %v12713_v36  ;;  %v3421_v15 = vunpack.c.l.bf16 %v12716_v9 }
 0x372   : > { %v3606_v12 = vsel %vm3549_vm13, %v12714_v53, %v3605_v17  ;;  %v3613_v39 = vsel %vm3549_vm13, %v12715_v19, %v3612_v27  ;;  %v3422_v60 = vunpack.c.h.bf16 %v12716_v9  ;;  %v3427_v44 = vunpack.c.l.bf16 %v12717_v37  ;;  %v12720_v53 = vld [vmem:[#allocation84_spill] sm:$0xff]  ;;  %v3664_v19 = vld [vmem:[#allocation3] sm:$0xff] }
 0x373   : > { %v3648_v43 = vmax.f32 %v3341_v63, %v3606_v12  ;;  %v3649_v4 = vmax.f32 %v3342_v22, %v3613_v39  ;;  %v3614_v1 = vsel %vm3537_vm7, %v3403_v8, %v3397_v61  ;;  %v3344_v18 = vunpack.c.h.bf16 %v10509_v49  ;;  %v12721_v9 = vld [vmem:[#allocation90_spill] sm:$0xff] }
 0x374   : > { %v3428_v35 = vunpack.c.h.bf16 %v12717_v37  ;;  %v3615_v62 = vsel %vm3539_vm8, %v3409_v24, %v3614_v1  ;;  %v3621_v40 = vsel %vm3537_vm7, %v3404_v55, %v3398_v14  ;;  %v3682_v63 = vunpack.c.l.bf16 %v9816_v3 }
 0x375   : > { %v3656_v41 = vpack.c.bf16 %v3649_v4, %v3648_v43  ;;  %v3616_v5 = vsel %vm3541_vm9, %v3415_v0, %v3615_v62  ;;  %v3622_v54 = vsel %vm3539_vm8, %v3410_v16, %v3621_v40  ;;  %v3683_v61 = vunpack.c.h.bf16 %v9816_v3  ;;  %v12718_v16 = vld [vmem:[#allocation87_spill] sm:$0xff]  ;;  %v12719_v0 = vld [vmem:[#allocation93_spill] sm:$0xff] }
 0x376   : > { %v3617_v22 = vsel %vm3543_vm10, %v3421_v15, %v3616_v5  ;;  %v3623_v17 = vsel %vm3541_vm9, %v3416_v33, %v3622_v54  ;;  %v3688_v49 = vunpack.c.l.bf16 %v9828_v10  ;;  %v3689_v55 = vunpack.c.h.bf16 %v9828_v10  ;;  %v10576_v4 = vld [vmem:[#allocation3 + $0x8] sm:$0xff] }
 0x377   : > { %3662 = vst [vmem:[#allocation2 + $0x20] sm:$0xff] %v3656_v41  ;;  %v3618_v8 = vsel %vm3545_vm11, %v3427_v44, %v3617_v22  ;;  %v3624_v14 = vsel %vm3543_vm10, %v3422_v60, %v3623_v17  ;;  %v3694_v24 = vunpack.c.l.bf16 %v9840_v20  ;;  %v3695_v36 = vunpack.c.h.bf16 %v9840_v20 }
 0x378   : > { %v3619_v13 = vsel %vm3547_vm12, %v12718_v16, %v3618_v8  ;;  %v3625_v27 = vsel %vm3545_vm11, %v3428_v35, %v3624_v14  ;;  %v3700_v3 = vunpack.c.l.bf16 %v9852_v34  ;;  %v3701_v10 = vunpack.c.h.bf16 %v9852_v34  ;;  %v12722_v14 = vld [vmem:[#allocation170_spill] sm:$0xff] }
 0x379   : > { %v3620_v33 = vsel %vm3549_vm13, %v12719_v0, %v3619_v13  ;;  %v3626_v12 = vsel %vm3547_vm12, %v12720_v53, %v3625_v27  ;;  %v3706_v39 = vunpack.c.l.bf16 %v9864_v29  ;;  %v3707_v43 = vunpack.c.h.bf16 %v9864_v29 }
 0x37a   : > { %v3627_v15 = vsel %vm3549_vm13, %v12721_v9, %v3626_v12  ;;  %v3650_v60 = vmax.f32 %v3343_v48, %v3620_v33  ;;  %v3712_v20 = vunpack.c.l.bf16 %v9876_v42  ;;  %v3713_v44 = vunpack.c.h.bf16 %v9876_v42 }
 0x37b   : > { %v3651_v37 = vmax.f32 %v3344_v18, %v3627_v15  ;;  %v3874_v1 = vsel %vm3537_vm7, %v3688_v49, %v3682_v63  ;;  %v3881_v35 = vsel %vm3537_vm7, %v3689_v55, %v3683_v61  ;;  %v3670_v34 = vunpack.c.l.bf16 %v3664_v19 }
 0x37c   : > { %v3671_v62 = vunpack.c.h.bf16 %v3664_v19  ;;  %v3875_v40 = vsel %vm3539_vm8, %v3694_v24, %v3874_v1  ;;  %v3882_v41 = vsel %vm3539_vm8, %v3695_v36, %v3881_v35  ;;  %v3672_v54 = vunpack.c.l.bf16 %v10576_v4  ;;  %v12723_v24 = vld [vmem:[#allocation171_spill] sm:$0xff] }
 0x37d   : > { %v3657_v48 = vpack.c.bf16 %v3651_v37, %v3650_v60  ;;  %v3876_v29 = vsel %vm3541_vm9, %v3700_v3, %v3875_v40  ;;  %v3883_v5 = vsel %vm3541_vm9, %v3701_v10, %v3882_v41  ;;  %v3684_v63 = vunpack.c.l.bf16 %v9820_v11  ;;  %v12725_v3 = vld [vmem:[#allocation79_spill] sm:$0xff] }
 0x37e   : > { %v3877_v18 = vsel %vm3543_vm10, %v3706_v39, %v3876_v29  ;;  %v3884_v42 = vsel %vm3543_vm10, %v3707_v43, %v3883_v5  ;;  %v3685_v22 = vunpack.c.h.bf16 %v9820_v11  ;;  %v3690_v49 = vunpack.c.l.bf16 %v9832_v57  ;;  %v12724_v11 = vld [vmem:[#allocation77_spill] sm:$0xff]  ;;  %v10608_v39 = vld [vmem:[#allocation3 + $0x10] sm:$0xff] }
 0x37f   : > { %3663 = vst [vmem:[#allocation2 + $0x28] sm:$0xff] %v3657_v48  ;;  %v3878_v17 = vsel %vm3545_vm11, %v3712_v20, %v3877_v18  ;;  %v3885_v61 = vsel %vm3545_vm11, %v3713_v44, %v3884_v42  ;;  %v3691_v8 = vunpack.c.h.bf16 %v9832_v57  ;;  %v3696_v13 = vunpack.c.l.bf16 %v9844_v56  ;;  %v12726_v5 = vld [vmem:[#allocation172_spill] sm:$0xff]  ;;  %v12727_v42 = vld [vmem:[#allocation173_spill] sm:$0xff] }
 0x380   : > { %v3879_v55 = vsel %vm3547_vm12, %v12722_v14, %v3878_v17  ;;  %v3886_v16 = vsel %vm3547_vm12, %v12723_v24, %v3885_v61  ;;  %v3697_v27 = vunpack.c.h.bf16 %v9844_v56  ;;  %v3702_v33 = vunpack.c.l.bf16 %v9856_v28  ;;  %v12728_v61 = vld [vmem:[#allocation81_spill] sm:$0xff] }
 0x381   : > { %v3880_v36 = vsel %vm3549_vm13, %v12724_v11, %v3879_v55  ;;  %v3887_v0 = vsel %vm3549_vm13, %v12725_v3, %v3886_v16  ;;  %v3703_v57 = vunpack.c.h.bf16 %v9856_v28  ;;  %v3708_v19 = vunpack.c.l.bf16 %v9868_v21  ;;  %v10641_v55 = vld [vmem:[#allocation3 + $0x18] sm:$0xff] }
 0x382   : > { %v3970_v53 = vmax.f32 %v3670_v34, %v3880_v36  ;;  %v3971_v12 = vmax.f32 %v3671_v62, %v3887_v0  ;;  %v3709_v10 = vunpack.c.h.bf16 %v9868_v21  ;;  %v3714_v56 = vunpack.c.l.bf16 %v9880_v26 }
 0x383   : > { %v3715_v9 = vunpack.c.h.bf16 %v9880_v26  ;;  %v3888_v15 = vsel %vm3537_vm7, %v3690_v49, %v3684_v63  ;;  %v3895_v60 = vsel %vm3537_vm7, %v3691_v8, %v3685_v22  ;;  %v3673_v20 = vunpack.c.h.bf16 %v10576_v4  ;;  %v12729_v49 = vld [vmem:[#allocation76_spill] sm:$0xff] }
 0x384   : > { %v3982_v43 = vpack.c.bf16 %v3971_v12, %v3970_v53  ;;  %v3889_v28 = vsel %vm3539_vm8, %v3696_v13, %v3888_v15  ;;  %v3896_v37 = vsel %vm3539_vm8, %v3697_v27, %v3895_v60  ;;  %v3674_v1 = vunpack.c.l.bf16 %v10608_v39 }
 0x385   : > { %v3890_v44 = vsel %vm3541_vm9, %v3702_v33, %v3889_v28  ;;  %v3897_v21 = vsel %vm3541_vm9, %v3703_v57, %v3896_v37  ;;  %v3675_v35 = vunpack.c.h.bf16 %v10608_v39  ;;  %v3686_v62 = vunpack.c.l.bf16 %v9824_v46 }
 0x386   : > { %3988 = vst [vmem:[#allocation3] sm:$0xff] %v3982_v43  ;;  %v3891_v26 = vsel %vm3543_vm10, %v3708_v19, %v3890_v44  ;;  %v3898_v34 = vsel %vm3543_vm10, %v3709_v10, %v3897_v21  ;;  %v3687_v4 = vunpack.c.h.bf16 %v9824_v46  ;;  %v3692_v48 = vunpack.c.l.bf16 %v9836_v58  ;;  %v12730_v43 = vld [vmem:[#allocation72_spill] sm:$0xff]  ;;  %v12732_v21 = vld [vmem:[#allocation78_spill] sm:$0xff] }
 0x387   : > { %v3892_v40 = vsel %vm3545_vm11, %v3714_v56, %v3891_v26  ;;  %v3899_v41 = vsel %vm3545_vm11, %v3715_v9, %v3898_v34  ;;  %v3693_v29 = vunpack.c.h.bf16 %v9836_v58  ;;  %v3698_v22 = vunpack.c.l.bf16 %v9848_v52  ;;  %v12733_v26 = vld [vmem:[#allocation80_spill] sm:$0xff] }
 0x388   : > { %v3893_v18 = vsel %vm3547_vm12, %v12726_v5, %v3892_v40  ;;  %v3900_v63 = vsel %vm3547_vm12, %v12727_v42, %v3899_v41  ;;  %v3699_v17 = vunpack.c.h.bf16 %v9848_v52  ;;  %v3704_v14 = vunpack.c.l.bf16 %v9860_v32 }
 0x389   : > { %v3894_v46 = vsel %vm3549_vm13, %v12728_v61, %v3893_v18  ;;  %v3901_v8 = vsel %vm3549_vm13, %v12729_v49, %v3900_v63  ;;  %v3705_v58 = vunpack.c.h.bf16 %v9860_v32  ;;  %v3710_v13 = vunpack.c.l.bf16 %v9872_v59 }
 0x38a   : > { %v3972_v24 = vmax.f32 %v3672_v54, %v3894_v46  ;;  %v3973_v16 = vmax.f32 %v3673_v20, %v3901_v8  ;;  %v3711_v27 = vunpack.c.h.bf16 %v9872_v59  ;;  %v3716_v52 = vunpack.c.l.bf16 %v9884_v50  ;;  %v12731_v20 = vld [vmem:[#allocation74_spill] sm:$0xff] }
 0x38b   : > { %v3717_v11 = vunpack.c.h.bf16 %v9884_v50  ;;  %v3902_v36 = vsel %vm3537_vm7, %v3692_v48, %v3686_v62  ;;  %v3909_v3 = vsel %vm3537_vm7, %v3693_v29, %v3687_v4  ;;  %v3676_v54 = vunpack.c.l.bf16 %v10641_v55 }
 0x38c   : > { %v3983_v0 = vpack.c.bf16 %v3973_v16, %v3972_v24  ;;  %v3903_v33 = vsel %vm3539_vm8, %v3698_v22, %v3902_v36  ;;  %v3910_v32 = vsel %vm3539_vm8, %v3699_v17, %v3909_v3  ;;  %v3730_v59 = vunpack.c.l.bf16 %v9912_v25  ;;  %v12735_v16 = vld [vmem:[#allocation163_spill] sm:$0xff]  ;;  %v12737_v3 = vld [vmem:[#allocation160_spill] sm:$0xff] }
 0x38d   : > { %v3904_v57 = vsel %vm3541_vm9, %v3704_v14, %v3903_v33  ;;  %v3911_v53 = vsel %vm3541_vm9, %v3705_v58, %v3910_v32  ;;  %v3731_v12 = vunpack.c.h.bf16 %v9912_v25  ;;  %v3736_v10 = vunpack.c.l.bf16 %v9924_v30  ;;  %v12734_v14 = vld [vmem:[#allocation157_spill] sm:$0xff] }
 0x38e   : > { %3989 = vst [vmem:[#allocation3 + $0x8] sm:$0xff] %v3983_v0  ;;  %v3905_v50 = vsel %vm3543_vm10, %v3710_v13, %v3904_v57  ;;  %v3912_v19 = vsel %vm3543_vm10, %v3711_v27, %v3911_v53  ;;  %v3737_v39 = vunpack.c.h.bf16 %v9924_v30  ;;  %v3742_v15 = vunpack.c.l.bf16 %v9936_v7  ;;  %v12736_v27 = vld [vmem:[#allocation154_spill] sm:$0xff] }
 0x38f   : > { %v3906_v56 = vsel %vm3545_vm11, %v3716_v52, %v3905_v50  ;;  %v3913_v9 = vsel %vm3545_vm11, %v3717_v11, %v3912_v19  ;;  %v3743_v60 = vunpack.c.h.bf16 %v9936_v7  ;;  %v3748_v37 = vunpack.c.l.bf16 %v9948_v47  ;;  %v3668_v11 = vld [vmem:[#allocation3 + $0x20] sm:$0xff] }
 0x390   : > { %v3907_v25 = vsel %vm3547_vm12, %v12730_v43, %v3906_v56  ;;  %v3914_v28 = vsel %vm3547_vm12, %v12731_v20, %v3913_v9  ;;  %v3749_v44 = vunpack.c.h.bf16 %v9948_v47  ;;  %v3754_v62 = vunpack.c.l.bf16 %v9960_v45 }
 0x391   : > { %v3908_v30 = vsel %vm3549_vm13, %v12732_v21, %v3907_v25  ;;  %v3915_v34 = vsel %vm3549_vm13, %v12733_v26, %v3914_v28  ;;  %v3755_v7 = vunpack.c.h.bf16 %v9960_v45  ;;  %v3760_v41 = vunpack.c.l.bf16 %v9972_v38 }
 0x392   : > { %v3974_v4 = vmax.f32 %v3674_v1, %v3908_v30  ;;  %v3975_v40 = vmax.f32 %v3675_v35, %v3915_v34  ;;  %v3916_v48 = vsel %vm3537_vm7, %v3736_v10, %v3730_v59  ;;  %v3677_v29 = vunpack.c.h.bf16 %v10641_v55  ;;  %v12741_v30 = vld [vmem:[#allocation158_spill] sm:$0xff]  ;;  %v12742_v34 = vld [vmem:[#allocation155_spill] sm:$0xff] }
 0x393   : > { %v3761_v47 = vunpack.c.h.bf16 %v9972_v38  ;;  %v3917_v5 = vsel %vm3539_vm8, %v3742_v15, %v3916_v48  ;;  %v3923_v18 = vsel %vm3537_vm7, %v3737_v39, %v3731_v12  ;;  %v3732_v45 = vunpack.c.l.bf16 %v9916_v31 }
 0x394   : > { %v3984_v42 = vpack.c.bf16 %v3975_v40, %v3974_v4  ;;  %v3918_v63 = vsel %vm3541_vm9, %v3748_v37, %v3917_v5  ;;  %v3924_v22 = vsel %vm3539_vm8, %v3743_v60, %v3923_v18  ;;  %v3733_v17 = vunpack.c.h.bf16 %v9916_v31  ;;  %v12739_v60 = vld [vmem:[#allocation166_spill] sm:$0xff]  ;;  %v12740_v37 = vld [vmem:[#allocation167_spill] sm:$0xff]  ;;  %v12746_v5 = vld [vmem:[#allocation169_spill] sm:$0xff] }
 0x395   : > { %v3919_v1 = vsel %vm3543_vm10, %v3754_v62, %v3918_v63  ;;  %v3925_v35 = vsel %vm3541_vm9, %v3749_v44, %v3924_v22  ;;  %v3738_v61 = vunpack.c.l.bf16 %v9928_v6  ;;  %v3739_v49 = vunpack.c.h.bf16 %v9928_v6 }
 0x396   : > { %3990 = vst [vmem:[#allocation3 + $0x10] sm:$0xff] %v3984_v42  ;;  %v3920_v38 = vsel %vm3545_vm11, %v3760_v41, %v3919_v1  ;;  %v3926_v46 = vsel %vm3543_vm10, %v3755_v7, %v3925_v35  ;;  %v3744_v8 = vunpack.c.l.bf16 %v9940_v51  ;;  %v3745_v24 = vunpack.c.h.bf16 %v9940_v51  ;;  %v12738_v51 = vld [vmem:[#allocation73_spill] sm:$0xff]  ;;  %v12743_v7 = vld [vmem:[#allocation168_spill] sm:$0xff] }
 0x397   : > { %v3921_v58 = vsel %vm3547_vm12, %v12734_v14, %v3920_v38  ;;  %v3927_v55 = vsel %vm3545_vm11, %v3761_v47, %v3926_v46  ;;  %v3750_v31 = vunpack.c.l.bf16 %v9952_v23  ;;  %v3751_v6 = vunpack.c.h.bf16 %v9952_v23  ;;  %v12744_v41 = vld [vmem:[#allocation164_spill] sm:$0xff] }
 0x398   : > { %v3922_v13 = vsel %vm3549_vm13, %v12735_v16, %v3921_v58  ;;  %v3928_v52 = vsel %vm3547_vm12, %v12736_v27, %v3927_v55  ;;  %v3756_v36 = vunpack.c.l.bf16 %v9964_v2  ;;  %v3757_v32 = vunpack.c.h.bf16 %v9964_v2 }
 0x399   : > { %v3929_v0 = vsel %vm3549_vm13, %v12737_v3, %v3928_v52  ;;  %v3976_v33 = vmax.f32 %v3676_v54, %v3922_v13  ;;  %v3762_v57 = vunpack.c.l.bf16 %v12738_v51  ;;  %v3763_v59 = vunpack.c.h.bf16 %v12738_v51 }
 0x39a   : > { %v3977_v53 = vmax.f32 %v3677_v29, %v3929_v0  ;;  %v3930_v12 = vsel %vm3537_vm7, %v3738_v61, %v3732_v45  ;;  %v3937_v50 = vsel %vm3537_vm7, %v3739_v49, %v3733_v17  ;;  %v3678_v19 = vunpack.c.l.bf16 %v3668_v11  ;;  %v12745_v29 = vld [vmem:[#allocation161_spill] sm:$0xff]  ;;  %v12747_v45 = vld [vmem:[#allocation71_spill] sm:$0xff]  ;;  %v12750_v0 = vld [vmem:[#allocation156_spill] sm:$0xff] }
 0x39b   : > { %v3931_v23 = vsel %vm3539_vm8, %v3744_v8, %v3930_v12  ;;  %v3938_v10 = vsel %vm3539_vm8, %v3745_v24, %v3937_v50  ;;  %v3679_v56 = vunpack.c.h.bf16 %v3668_v11  ;;  %v3734_v43 = vunpack.c.l.bf16 %v12739_v60  ;;  %v3669_v17 = vld [vmem:[#allocation3 + $0x28] sm:$0xff] }
 0x39c   : > { %v3985_v39 = vpack.c.bf16 %v3977_v53, %v3976_v33  ;;  %v3932_v54 = vsel %vm3541_vm9, %v3750_v31, %v3931_v23  ;;  %v3939_v2 = vsel %vm3541_vm9, %v3751_v6, %v3938_v10  ;;  %v3735_v25 = vunpack.c.h.bf16 %v12739_v60  ;;  %v12748_v61 = vld [vmem:[#allocation75_spill] sm:$0xff] }
 0x39d   : > { %v3933_v9 = vsel %vm3543_vm10, %v3756_v36, %v3932_v54  ;;  %v3940_v15 = vsel %vm3543_vm10, %v3757_v32, %v3939_v2  ;;  %v3740_v44 = vunpack.c.l.bf16 %v12740_v37  ;;  %v3741_v21 = vunpack.c.h.bf16 %v12740_v37  ;;  %v12749_v36 = vld [vmem:[#allocation159_spill] sm:$0xff]  ;;  %v12751_v32 = vld [vmem:[#allocation165_spill] sm:$0xff] }
 0x39e   : > { %3991 = vst [vmem:[#allocation3 + $0x18] sm:$0xff] %v3985_v39  ;;  %v3934_v20 = vsel %vm3545_vm11, %v3762_v57, %v3933_v9  ;;  %v3941_v28 = vsel %vm3545_vm11, %v3763_v59, %v3940_v15  ;;  %v3746_v4 = vunpack.c.l.bf16 %v12743_v7  ;;  %v3747_v40 = vunpack.c.h.bf16 %v12743_v7  ;;  %v12752_v57 = vld [vmem:[#allocation162_spill] sm:$0xff] }
 0x39f   : > { %v3935_v26 = vsel %vm3547_vm12, %v12741_v30, %v3934_v20  ;;  %v3942_v62 = vsel %vm3547_vm12, %v12742_v34, %v3941_v28  ;;  %v3752_v18 = vunpack.c.l.bf16 %v12746_v5  ;;  %v3753_v42 = vunpack.c.h.bf16 %v12746_v5 }
 0x3a0   : > { %v3936_v48 = vsel %vm3549_vm13, %v12744_v41, %v3935_v26  ;;  %v3943_v47 = vsel %vm3549_vm13, %v12745_v29, %v3942_v62  ;;  %v3758_v1 = vunpack.c.l.bf16 %v12747_v45  ;;  %v3759_v35 = vunpack.c.h.bf16 %v12747_v45 }
 0x3a1   : > { %v3978_v63 = vmax.f32 %v3678_v19, %v3936_v48  ;;  %v3979_v22 = vmax.f32 %v3679_v56, %v3943_v47  ;;  %v3764_v38 = vunpack.c.l.bf16 %v12748_v61  ;;  %v3765_v46 = vunpack.c.h.bf16 %v12748_v61 }
 0x3a2   : > { %v3944_v49 = vsel %vm3537_vm7, %v3740_v44, %v3734_v43  ;;  %v3951_v8 = vsel %vm3537_vm7, %v3741_v21, %v3735_v25  ;;  %v3680_v16 = vunpack.c.l.bf16 %v3669_v17  ;;  %v3681_v13 = vunpack.c.h.bf16 %v3669_v17 }
 0x3a3   : > { %v3986_v14 = vpack.c.bf16 %v3979_v22, %v3978_v63  ;;  %v3945_v58 = vsel %vm3539_vm8, %v3746_v4, %v3944_v49  ;;  %v3952_v55 = vsel %vm3539_vm8, %v3747_v40, %v3951_v8 }
 0x3a4   : > { %v3946_v24 = vsel %vm3541_vm9, %v3752_v18, %v3945_v58  ;;  %v3953_v31 = vsel %vm3541_vm9, %v3753_v42, %v3952_v55 }
 0x3a5   : > { %3992 = vst [vmem:[#allocation3 + $0x20] sm:$0xff] %v3986_v14  ;;  %v3947_v27 = vsel %vm3543_vm10, %v3758_v1, %v3946_v24  ;;  %v3954_v52 = vsel %vm3543_vm10, %v3759_v35, %v3953_v31 }
 0x3a6   : > { %v3948_v11 = vsel %vm3545_vm11, %v3764_v38, %v3947_v27  ;;  %v3955_v6 = vsel %vm3545_vm11, %v3765_v46, %v3954_v52 }
 0x3a7   : > { %v3949_v3 = vsel %vm3547_vm12, %v12749_v36, %v3948_v11  ;;  %v3956_v33 = vsel %vm3547_vm12, %v12750_v0, %v3955_v6 }
 0x3a8   : > { %v3950_v51 = vsel %vm3549_vm13, %v12751_v32, %v3949_v3  ;;  %v3957_v53 = vsel %vm3549_vm13, %v12752_v57, %v3956_v33 }
 0x3a9   : > { %v3980_v59 = vmax.f32 %v3680_v16, %v3950_v51  ;;  %v3981_v12 = vmax.f32 %v3681_v13, %v3957_v53 }
 0x3ab   : > { %v3987_v50 = vpack.c.bf16 %v3981_v12, %v3980_v59 }
 0x3ad   : > { %3993 = vst [vmem:[#allocation3 + $0x28] sm:$0xff] %v3987_v50 }
 0x3ae PF: > { %p6146_p1 = scmp.ne.s32.totalorder %s7345_s1, 1 }
 0x3af   : > { %s12753_s14 = sld [smem:[#allocation178_spill]] (!%p6146_p1)  ;;  %s7219_s23 = smov (!%p6146_p1), 96  }
 0x3b0   : > { %3997 = sbr.rel (%p6146_p1) target bundleno = 3559 (0xde7), region = 140  ;;  %s12754_s16 = sld [smem:[#allocation179_spill]] (!%p6146_p1) }
 0x3b1   : > { %s7220_s25 = smov (!%p6146_p1), 64   ;;  %s7221_s9 = smov (!%p6146_p1), 32  }
 0x3b2   : > { %s12755_s26 = sld [smem:[#allocation180_spill]] (!%p6146_p1) }
 0x3b3   : > { %s12756_s29 = sld [smem:[#allocation182_spill]] (!%p6146_p1) }
 0x3b4   : > { %s12757_s22 = sld [smem:[#allocation183_spill]] (!%p6146_p1) }
 0x3b5   : > { %v6624_v19 = vld [vmem:[%s11264_s4 + $0x38] sm:$0xff]  ;;  %v6623_v56 = vld [vmem:[%s11264_s4 + $0x30] sm:$0xff]  ;;  %v6622_v15 = vld [vmem:[%s11264_s4 + $0x28] sm:$0xff]  ;;  %vm5042_vm14 = vcmask 523264   ;;  %vm5105_vm15 = vcmask 261120   ;;  %vm5205_vm0 = vcmask 64512  }
 0x3b6   : > { %v6632_v23 = vld [vmem:[%s11264_s4 + $0x78] sm:$0xff]  ;;  %4422 = vmatpush.bf16.msra.mxu0 %v6624_v19  ;;  %v6631_v54 = vld [vmem:[%s11264_s4 + $0x70] sm:$0xff]  ;;  %v6630_v60 = vld [vmem:[%s11264_s4 + $0x68] sm:$0xff]  ;;  %vm5356_vm1 = vcmask 785408   ;;  %vm5621_vm2 = vcmask 130048   ;;  %s12758_s18 = sld [smem:[#allocation184_spill]] }
 0x3b7   : > { %v6640_v10 = vld [vmem:[%s11264_s4 + $0xb8] sm:$0xff]  ;;  %4436 = vmatpush.bf16.msra.mxu1 %v6632_v23  ;;  %v6639_v2 = vld [vmem:[%s11264_s4 + $0xb0] sm:$0xff]  ;;  %v6638_v43 = vld [vmem:[%s11264_s4 + $0xa8] sm:$0xff] }
 0x3b8   : > { %v6648_v39 = vld [vmem:[%s11264_s4 + $0xf8] sm:$0xff]  ;;  %4450 = vmatpush.bf16.msra.mxu2 %v6640_v10  ;;  %v6647_v9 = vld [vmem:[%s11264_s4 + $0xf0] sm:$0xff]  ;;  %v6646_v25 = vld [vmem:[%s11264_s4 + $0xe8] sm:$0xff] }
 0x3b9   : > { %4464 = vmatpush.bf16.msra.mxu3 %v6648_v39  ;;  %v6621_v20 = vld [vmem:[%s11264_s4 + $0x20] sm:$0xff]  ;;  %v6620_v21 = vld [vmem:[%s11264_s4 + $0x18] sm:$0xff]  ;;  %v6619_v62 = vld [vmem:[%s11264_s4 + $0x10] sm:$0xff] }
 0x3ba   : > { %4423 = vmatpush.bf16.msra.mxu0 %v6623_v56  ;;  %v6629_v28 = vld [vmem:[%s11264_s4 + $0x60] sm:$0xff]  ;;  %v6628_v30 = vld [vmem:[%s11264_s4 + $0x58] sm:$0xff]  ;;  %v6627_v7 = vld [vmem:[%s11264_s4 + $0x50] sm:$0xff] }
 0x3bb   : > { %4437 = vmatpush.bf16.msra.mxu1 %v6631_v54  ;;  %v6637_v37 = vld [vmem:[%s11264_s4 + $0xa0] sm:$0xff]  ;;  %v6636_v26 = vld [vmem:[%s11264_s4 + $0x98] sm:$0xff]  ;;  %v6635_v4 = vld [vmem:[%s11264_s4 + $0x90] sm:$0xff] }
 0x3bc   : > { %4451 = vmatpush.bf16.msra.mxu2 %v6639_v2  ;;  %v6645_v44 = vld [vmem:[%s11264_s4 + $0xe0] sm:$0xff]  ;;  %v6644_v34 = vld [vmem:[%s11264_s4 + $0xd8] sm:$0xff]  ;;  %v6643_v40 = vld [vmem:[%s11264_s4 + $0xd0] sm:$0xff] }
 0x3bd   : > { %4465 = vmatpush.bf16.msra.mxu3 %v6647_v9  ;;  %v6618_v41 = vld [vmem:[%s11264_s4 + $0x8] sm:$0xff]  ;;  %v6617_v5 = vld [vmem:[%s11264_s4] sm:$0xff]  ;;  %v6656_v22 = vld [vmem:[%s11264_s4 + $0x138] sm:$0xff] }
 0x3be   : > { %4424 = vmatpush.bf16.msra.mxu0 %v6622_v15  ;;  %v6626_v48 = vld [vmem:[%s11264_s4 + $0x48] sm:$0xff]  ;;  %v6625_v18 = vld [vmem:[%s11264_s4 + $0x40] sm:$0xff]  ;;  %v6664_v45 = vld [vmem:[%s11264_s4 + $0x178] sm:$0xff] }
 0x3bf   : > { %4438 = vmatpush.bf16.msra.mxu1 %v6630_v60  ;;  %v6634_v29 = vld [vmem:[%s11264_s4 + $0x88] sm:$0xff]  ;;  %v6633_v42 = vld [vmem:[%s11264_s4 + $0x80] sm:$0xff]  ;;  %v6614_v35 = vld [vmem:[#allocation2 + $0x14] sm:$0xf0] }
 0x3c0   : > { %4452 = vmatpush.bf16.msra.mxu2 %v6638_v43  ;;  %v6642_v47 = vld [vmem:[%s11264_s4 + $0xc8] sm:$0xff]  ;;  %v6641_v63 = vld [vmem:[%s11264_s4 + $0xc0] sm:$0xff]  ;;  %v6151_v61 = vld [vmem:[#allocation2 + $0x18] sm:$0xf0] }
 0x3c1   : > { %4466 = vmatpush.bf16.msra.mxu3 %v6646_v25  ;;  %v6149_v1 = vld [vmem:[#allocation2] sm:$0xf]  ;;  %v6611_v17 = vld [vmem:[#allocation2 + $0x4] sm:$0xf]  ;;  %v6157_v38 = vld [vmem:[#allocation2 + $0x8] sm:$0xf] }
 0x3c2   : > { %4425 = vmatpush.bf16.msra.mxu0 %v6621_v20  ;;  %v6615_v46 = vld [vmem:[#allocation2 + $0x1c] sm:$0xf0]  ;;  %v6612_v49 = vld [vmem:[#allocation2 + $0xc] sm:$0xf]  ;;  %v6159_v8 = vld [vmem:[#allocation2 + $0x20] sm:$0xf0]  ;;  %v6150_v55 = vor.u32 %v6614_v35, %v6149_v1  ;;  %v6154_v24 = vor.u32 %v6611_v17, %v6151_v61 }
 0x3c3   : > { %4439 = vmatpush.bf16.msra.mxu1 %v6629_v28  ;;  %v6678_v14 = vld [vmem:[%s11266_s6 + $0x38] sm:$0xff]  ;;  %v6158_v31 = vor.u32 %v6615_v46, %v6157_v38  ;;  %v6162_v16 = vor.u32 %v6612_v49, %v6159_v8  ;;  %v6655_v13 = vld [vmem:[%s11264_s4 + $0x130] sm:$0xff]  ;;  %v6654_v6 = vld [vmem:[%s11264_s4 + $0x128] sm:$0xff] }
 0x3c4   : > { %4453 = vmatpush.bf16.msra.mxu2 %v6637_v37  ;;  %v6686_v58 = vld [vmem:[%s11266_s6 + $0x78] sm:$0xff]  ;;  %v6663_v27 = vld [vmem:[%s11264_s4 + $0x170] sm:$0xff]  ;;  %v6662_v36 = vld [vmem:[%s11264_s4 + $0x168] sm:$0xff] }
 0x3c5   : > { %4467 = vmatpush.bf16.msra.mxu3 %v6645_v44  ;;  %v6677_v52 = vld [vmem:[%s11266_s6 + $0x30] sm:$0xff]  ;;  %v6676_v3 = vld [vmem:[%s11266_s6 + $0x28] sm:$0xff]  ;;  %v6653_v33 = vld [vmem:[%s11264_s4 + $0x120] sm:$0xff] }
 0x3c6   : > { %4426 = vmatpush.bf16.msra.mxu0 %v6620_v21  ;;  %v6685_v11 = vld [vmem:[%s11266_s6 + $0x70] sm:$0xff]  ;;  %v6684_v0 = vld [vmem:[%s11266_s6 + $0x68] sm:$0xff]  ;;  %v6661_v32 = vld [vmem:[%s11264_s4 + $0x160] sm:$0xff] }
 0x3c7   : > { %4440 = vmatpush.bf16.msra.mxu1 %v6628_v30  ;;  %v6675_v51 = vld [vmem:[%s11266_s6 + $0x20] sm:$0xff]  ;;  %v6652_v53 = vld [vmem:[%s11264_s4 + $0x118] sm:$0xff]  ;;  %v6651_v19 = vld [vmem:[%s11264_s4 + $0x110] sm:$0xff] }
 0x3c8   : > { %4454 = vmatpush.bf16.msra.mxu2 %v6636_v26  ;;  %v6683_v57 = vld [vmem:[%s11266_s6 + $0x60] sm:$0xff]  ;;  %v6660_v59 = vld [vmem:[%s11264_s4 + $0x158] sm:$0xff]  ;;  %v6659_v23 = vld [vmem:[%s11264_s4 + $0x150] sm:$0xff] }
 0x3c9   : > { %4468 = vmatpush.bf16.msra.mxu3 %v6644_v34  ;;  %v6674_v12 = vld [vmem:[%s11266_s6 + $0x18] sm:$0xff]  ;;  %v6673_v10 = vld [vmem:[%s11266_s6 + $0x10] sm:$0xff]  ;;  %v6650_v56 = vld [vmem:[%s11264_s4 + $0x108] sm:$0xff] }
 0x3ca   : > { %4427 = vmatpush.bf16.msra.mxu0 %v6619_v62  ;;  %v6682_v50 = vld [vmem:[%s11266_s6 + $0x58] sm:$0xff]  ;;  %v6681_v39 = vld [vmem:[%s11266_s6 + $0x50] sm:$0xff]  ;;  %v6658_v54 = vld [vmem:[%s11264_s4 + $0x148] sm:$0xff] }
 0x3cb   : > { %4441 = vmatpush.bf16.msra.mxu1 %v6627_v7  ;;  %v6672_v2 = vld [vmem:[%s11266_s6 + $0x8] sm:$0xff]  ;;  %v6649_v15 = vld [vmem:[%s11264_s4 + $0x100] sm:$0xff]  ;;  %v6694_v20 = vld [vmem:[%s11266_s6 + $0xb8] sm:$0xff] }
 0x3cc   : > { %4455 = vmatpush.bf16.msra.mxu2 %v6635_v4  ;;  %v6680_v9 = vld [vmem:[%s11266_s6 + $0x48] sm:$0xff]  ;;  %v6657_v60 = vld [vmem:[%s11264_s4 + $0x140] sm:$0xff]  ;;  %v6702_v28 = vld [vmem:[%s11266_s6 + $0xf8] sm:$0xff] }
 0x3cd   : > { %4469 = vmatpush.bf16.msra.mxu3 %v6643_v40  ;;  %v6671_v43 = vld [vmem:[%s11266_s6] sm:$0xff]  ;;  %v6165_v37 = vld [vmem:[#allocation2 + $0x10] sm:$0xf]  ;;  %v6616_v44 = vld [vmem:[#allocation2 + $0x24] sm:$0xf0] }
 0x3ce   : > { %4428 = vmatpush.bf16.msra.mxu0 %v6618_v41  ;;  %v6679_v25 = vld [vmem:[%s11266_s6 + $0x40] sm:$0xff]  ;;  %v6613_v21 = vld [vmem:[#allocation2 + $0x14] sm:$0xf]  ;;  %v6167_v30 = vld [vmem:[#allocation2 + $0x28] sm:$0xf0]  ;;  %v6166_v41 = vor.u32 %v6616_v44, %v6165_v37 }
 0x3cf   : > { %4442 = vmatpush.bf16.msra.mxu1 %v6626_v48  ;;  %v6365_v26 = vld [vmem:[#allocation3] sm:$0xf]  ;;  %v6668_v34 = vld [vmem:[#allocation3 + $0x14] sm:$0xf0]  ;;  %v6665_v62 = vld [vmem:[#allocation3 + $0x4] sm:$0xf]  ;;  %v6170_v48 = vor.u32 %v6613_v21, %v6167_v30 }
 0x3d0   : > { %4456 = vmatpush.bf16.msra.mxu2 %v6634_v29  ;;  %v6367_v7 = vld [vmem:[#allocation3 + $0x18] sm:$0xf0]  ;;  %v6710_v4 = vld [vmem:[%s11266_s6 + $0x138] sm:$0xff]  ;;  %v6366_v29 = vor.u32 %v6668_v34, %v6365_v26  ;;  %v6691_v17 = vld [vmem:[%s11266_s6 + $0xa0] sm:$0xff] }
 0x3d1   : > { %4470 = vmatpush.bf16.msra.mxu3 %v6642_v47  ;;  %v6718_v40 = vld [vmem:[%s11266_s6 + $0x178] sm:$0xff]  ;;  %v6370_v47 = vor.u32 %v6665_v62, %v6367_v7  ;;  %v6708_v1 = vld [vmem:[%s11266_s6 + $0x128] sm:$0xff]  ;;  %v6699_v61 = vld [vmem:[%s11266_s6 + $0xe0] sm:$0xff] }
 0x3d2   : > { %4429 = vmatpush.bf16.msra.mxu0 %v6617_v5  ;;  %v6693_v5 = vld [vmem:[%s11266_s6 + $0xb0] sm:$0xff]  ;;  %v6716_v35 = vld [vmem:[%s11266_s6 + $0x168] sm:$0xff]  ;;  %v6707_v38 = vld [vmem:[%s11266_s6 + $0x120] sm:$0xff] }
 0x3d3   : > { %4443 = vmatpush.bf16.msra.mxu1 %v6625_v18  ;;  %v6701_v18 = vld [vmem:[%s11266_s6 + $0xf0] sm:$0xff]  ;;  %v6715_v46 = vld [vmem:[%s11266_s6 + $0x160] sm:$0xff]  ;;  %v6690_v49 = vld [vmem:[%s11266_s6 + $0x98] sm:$0xff] }
 0x3d4   : > { %4457 = vmatpush.bf16.msra.mxu2 %v6633_v42  ;;  %v6709_v42 = vld [vmem:[%s11266_s6 + $0x130] sm:$0xff]  ;;  %v6698_v8 = vld [vmem:[%s11266_s6 + $0xd8] sm:$0xff]  ;;  %v5019_v37 = vld [vmem:[%s11268_s8 + $0x28] sm:$0xff] }
 0x3d5   : > { %4471 = vmatpush.bf16.msra.mxu3 %v6641_v63  ;;  %4430 = vmatmul.bf16.vlgmr.msra.gmra.mxu0 %v6150_v55  ;;  %v6717_v63 = vld [vmem:[%s11266_s6 + $0x170] sm:$0xff]  ;;  %v5018_v44 = vld [vmem:[%s11268_s8 + $0x20] sm:$0xff]  ;;  %v5017_v21 = vld [vmem:[%s11268_s8 + $0x18] sm:$0xff] }
 0x3d6   : > { %4478 = vmatpush.bf16.msrb.mxu0 %v6656_v22  ;;  %4444 = vmatmul.bf16.vlgmr.msra.gmra.mxu1 %v6154_v24  ;;  %v6692_v22 = vld [vmem:[%s11266_s6 + $0xa8] sm:$0xff]  ;;  %v6689_v55 = vld [vmem:[%s11266_s6 + $0x90] sm:$0xff]  ;;  %v5014_v34 = vld [vmem:[%s11268_s8] sm:$0xff] }
 0x3d7   : > { %4492 = vmatpush.bf16.msrb.mxu1 %v6664_v45  ;;  %4458 = vmatmul.bf16.vlgmr.msra.gmra.mxu2 %v6158_v31  ;;  %v6700_v45 = vld [vmem:[%s11266_s6 + $0xe8] sm:$0xff]  ;;  %v6697_v24 = vld [vmem:[%s11266_s6 + $0xd0] sm:$0xff] }
 0x3d8   : > { %4930 = vmatpush.bf16.msrb.mxu2 %v6678_v14  ;;  %4472 = vmatmul.bf16.vlgmr.msra.gmra.mxu3 %v6162_v16  ;;  %v6706_v14 = vld [vmem:[%s11266_s6 + $0x118] sm:$0xff]  ;;  %v6705_v31 = vld [vmem:[%s11266_s6 + $0x110] sm:$0xff]  ;;  %v5015_v26 = vld [vmem:[%s11268_s8 + $0x8] sm:$0xff] }
 0x3d9   : > { %4944 = vmatpush.bf16.msrb.mxu3 %v6686_v58  ;;  %v6714_v58 = vld [vmem:[%s11266_s6 + $0x158] sm:$0xff]  ;;  %v6713_v16 = vld [vmem:[%s11266_s6 + $0x150] sm:$0xff] }
 0x3da   : > { %4479 = vmatpush.bf16.msrb.mxu0 %v6655_v13  ;;  %v6688_v13 = vld [vmem:[%s11266_s6 + $0x88] sm:$0xff]  ;;  %v5016_v30 = vld [vmem:[%s11268_s8 + $0x10] sm:$0xff] }
 0x3db   : > { %4493 = vmatpush.bf16.msrb.mxu1 %v6663_v27  ;;  %v6696_v27 = vld [vmem:[%s11266_s6 + $0xc8] sm:$0xff] }
 0x3dc   : > { %4931 = vmatpush.bf16.msrb.mxu2 %v6677_v52  ;;  %v6704_v52 = vld [vmem:[%s11266_s6 + $0x108] sm:$0xff] }
 0x3dd   : > { %4945 = vmatpush.bf16.msrb.mxu3 %v6685_v11  ;;  %v6712_v11 = vld [vmem:[%s11266_s6 + $0x148] sm:$0xff] }
 0x3de   : > { %4480 = vmatpush.bf16.msrb.mxu0 %v6654_v6  ;;  %v6687_v6 = vld [vmem:[%s11266_s6 + $0x80] sm:$0xff] }
 0x3df   : > { %4494 = vmatpush.bf16.msrb.mxu1 %v6662_v36  ;;  %v6695_v36 = vld [vmem:[%s11266_s6 + $0xc0] sm:$0xff] }
 0x3e0   : > { %4932 = vmatpush.bf16.msrb.mxu2 %v6676_v3  ;;  %v6703_v3 = vld [vmem:[%s11266_s6 + $0x100] sm:$0xff] }
 0x3e1   : > { %4946 = vmatpush.bf16.msrb.mxu3 %v6684_v0  ;;  %v6711_v0 = vld [vmem:[%s11266_s6 + $0x140] sm:$0xff] }
 0x3e2   : > { %4481 = vmatpush.bf16.msrb.mxu0 %v6653_v33  ;;  %v6373_v33 = vld [vmem:[#allocation3 + $0x8] sm:$0xf] }
 0x3e3   : > { %4495 = vmatpush.bf16.msrb.mxu1 %v6661_v32  ;;  %v6669_v32 = vld [vmem:[#allocation3 + $0x1c] sm:$0xf0] }
 0x3e4   : > { %4933 = vmatpush.bf16.msrb.mxu2 %v6675_v51  ;;  %v6666_v51 = vld [vmem:[#allocation3 + $0xc] sm:$0xf] }
 0x3e5   : > { %4947 = vmatpush.bf16.msrb.mxu3 %v6683_v57  ;;  %v6375_v57 = vld [vmem:[#allocation3 + $0x20] sm:$0xf0] }
 0x3e6   : > { %4482 = vmatpush.bf16.msrb.mxu0 %v6652_v53  ;;  %v6381_v53 = vld [vmem:[#allocation3 + $0x10] sm:$0xf] }
 0x3e7   : > { %4496 = vmatpush.bf16.msrb.mxu1 %v6660_v59  ;;  %v6670_v59 = vld [vmem:[#allocation3 + $0x24] sm:$0xf0] }
 0x3e8   : > { %4934 = vmatpush.bf16.msrb.mxu2 %v6674_v12  ;;  %v6667_v12 = vld [vmem:[#allocation3 + $0x14] sm:$0xf] }
 0x3e9   : > { %4948 = vmatpush.bf16.msrb.mxu3 %v6682_v50  ;;  %v6383_v50 = vld [vmem:[#allocation3 + $0x28] sm:$0xf0] }
 0x3ea   : > { %4483 = vmatpush.bf16.msrb.mxu0 %v6651_v19  ;;  %v6374_v19 = vor.u32 %v6669_v32, %v6373_v33 }
 0x3eb   : > { %4497 = vmatpush.bf16.msrb.mxu1 %v6659_v23  ;;  %v6378_v23 = vor.u32 %v6666_v51, %v6375_v57 }
 0x3ec   : > { %4935 = vmatpush.bf16.msrb.mxu2 %v6673_v10  ;;  %v5029_v10 = vld [vmem:[%s11268_s8 + $0x78] sm:$0xff] }
 0x3ed   : > { %4949 = vmatpush.bf16.msrb.mxu3 %v6681_v39  ;;  %v6382_v39 = vor.u32 %v6670_v59, %v6381_v53 }
 0x3ee   : > { %4484 = vmatpush.bf16.msrb.mxu0 %v6650_v56  ;;  %v6386_v56 = vor.u32 %v6667_v12, %v6383_v50 }
 0x3ef   : > { %4498 = vmatpush.bf16.msrb.mxu1 %v6658_v54  ;;  %v5028_v54 = vld [vmem:[%s11268_s8 + $0x70] sm:$0xff] }
 0x3f0   : > { %4936 = vmatpush.bf16.msrb.mxu2 %v6672_v2  ;;  %v5027_v2 = vld [vmem:[%s11268_s8 + $0x68] sm:$0xff] }
 0x3f1   : > { %4950 = vmatpush.bf16.msrb.mxu3 %v6680_v9  ;;  %v5026_v9 = vld [vmem:[%s11268_s8 + $0x60] sm:$0xff] }
 0x3f2   : > { %4485 = vmatpush.bf16.msrb.mxu0 %v6649_v15  ;;  %v5025_v15 = vld [vmem:[%s11268_s8 + $0x58] sm:$0xff] }
 0x3f3   : > { %4499 = vmatpush.bf16.msrb.mxu1 %v6657_v60  ;;  %v5024_v60 = vld [vmem:[%s11268_s8 + $0x50] sm:$0xff] }
 0x3f4   : > { %4937 = vmatpush.bf16.msrb.mxu2 %v6671_v43  ;;  %v5023_v43 = vld [vmem:[%s11268_s8 + $0x48] sm:$0xff] }
 0x3f5   : > { %4951 = vmatpush.bf16.msrb.mxu3 %v6679_v25  ;;  %4486 = vmatmul.bf16.vlgmr.msrb.gmra.mxu0 %v6166_v41  ;;  %v5022_v25 = vld [vmem:[%s11268_s8 + $0x40] sm:$0xff]  ;;  %v5037_v41 = vld [vmem:[%s11268_s8 + $0xb8] sm:$0xff] }
 0x3f6   : > { %4958 = vmatpush.bf16.msra.mxu0 %v6694_v20  ;;  %4500 = vmatmul.bf16.vlgmr.msrb.gmra.mxu1 %v6170_v48  ;;  %v5021_v20 = vld [vmem:[%s11268_s8 + $0x38] sm:$0xff]  ;;  %v5036_v48 = vld [vmem:[%s11268_s8 + $0xb0] sm:$0xff] }
 0x3f7   : > { %4972 = vmatpush.bf16.msra.mxu1 %v6702_v28  ;;  %4938 = vmatmul.bf16.vlgmr.msrb.gmra.mxu2 %v6366_v29  ;;  %v5020_v28 = vld [vmem:[%s11268_s8 + $0x30] sm:$0xff] }
 0x3f8   : > { %4986 = vmatpush.bf16.msra.mxu2 %v6710_v4  ;;  %4952 = vmatmul.bf16.vlgmr.msrb.gmra.mxu3 %v6370_v47  ;;  %v6879_v4 = vld [vmem:[%s11265_s5] ss:$0 sm:$0xff] }
 0x3f9   : > { %5000 = vmatpush.bf16.msra.mxu3 %v6718_v40 }
 0x3fa   : > { %4959 = vmatpush.bf16.msra.mxu0 %v6693_v5 }
 0x3fb   : > { %4973 = vmatpush.bf16.msra.mxu1 %v6701_v18 }
 0x3fc   : > { %4987 = vmatpush.bf16.msra.mxu2 %v6709_v42 }
 0x3fd   : > { %5001 = vmatpush.bf16.msra.mxu3 %v6717_v63 }
 0x3fe   : > { %4960 = vmatpush.bf16.msra.mxu0 %v6692_v22 }
 0x3ff   : > { %4974 = vmatpush.bf16.msra.mxu1 %v6700_v45 }
 0x400   : > { %4988 = vmatpush.bf16.msra.mxu2 %v6708_v1 }
 0x401   : > { %5002 = vmatpush.bf16.msra.mxu3 %v6716_v35  ;;  %v5035_v35 = vld [vmem:[%s11268_s8 + $0xa8] sm:$0xff] }
 0x402   : > { %4961 = vmatpush.bf16.msra.mxu0 %v6691_v17 }
 0x403   : > { %4975 = vmatpush.bf16.msra.mxu1 %v6699_v61  ;;  %v5034_v61 = vld [vmem:[%s11268_s8 + $0xa0] sm:$0xff] }
 0x404   : > { %4989 = vmatpush.bf16.msra.mxu2 %v6707_v38 }
 0x405   : > { %5003 = vmatpush.bf16.msra.mxu3 %v6715_v46 }
 0x406   : > { %4962 = vmatpush.bf16.msra.mxu0 %v6690_v49  ;;  %v5033_v49 = vld [vmem:[%s11268_s8 + $0x98] sm:$0xff] }
 0x407   : > { %4976 = vmatpush.bf16.msra.mxu1 %v6698_v8 }
 0x408   : > { %4990 = vmatpush.bf16.msra.mxu2 %v6706_v14 }
 0x409   : > { %5004 = vmatpush.bf16.msra.mxu3 %v6714_v58 }
 0x40a   : > { %4963 = vmatpush.bf16.msra.mxu0 %v6689_v55 }
 0x40b   : > { %4977 = vmatpush.bf16.msra.mxu1 %v6697_v24  ;;  %v5032_v24 = vld [vmem:[%s11268_s8 + $0x90] sm:$0xff] }
 0x40c   : > { %4991 = vmatpush.bf16.msra.mxu2 %v6705_v31 }
 0x40d   : > { %5005 = vmatpush.bf16.msra.mxu3 %v6713_v16  ;;  %v5031_v16 = vld [vmem:[%s11268_s8 + $0x88] sm:$0xff] }
 0x40e   : > { %4964 = vmatpush.bf16.msra.mxu0 %v6688_v13  ;;  %v5030_v13 = vld [vmem:[%s11268_s8 + $0x80] sm:$0xff] }
 0x40f   : > { %4978 = vmatpush.bf16.msra.mxu1 %v6696_v27 }
 0x410   : > { %4992 = vmatpush.bf16.msra.mxu2 %v6704_v52 }
 0x411   : > { %5006 = vmatpush.bf16.msra.mxu3 %v6712_v11 }
 0x412   : > { %4965 = vmatpush.bf16.msra.mxu0 %v6687_v6 }
 0x413   : > { %4979 = vmatpush.bf16.msra.mxu1 %v6695_v36 }
 0x414   : > { %4993 = vmatpush.bf16.msra.mxu2 %v6703_v3 }
 0x415   : > { %5007 = vmatpush.bf16.msra.mxu3 %v6711_v0  ;;  %4966 = vmatmul.bf16.vlgmr.msra.gmra.mxu0 %v6374_v19  ;;  %v6880_v0 = vld [vmem:[%s12753_s14] ss:$0 sm:$0xff]  ;;  %s12759_s14 = sld [smem:[#allocation185_spill]] }
 0x416   : > { %5049 = vmatpush.msrb.mxu0 %v5029_v10  ;;  %4980 = vmatmul.bf16.vlgmr.msra.gmra.mxu1 %v6378_v23 }
 0x417   : > { %4994 = vmatmul.bf16.vlgmr.msra.gmra.mxu2 %v6382_v39  ;;  %5080 = vmatpush.msrb.mxu1 %v5037_v41 }
 0x418   : > { %5008 = vmatmul.bf16.vlgmr.msra.gmra.mxu3 %v6386_v56  ;;  %5050 = vmatpush.msrb.mxu0 %v5028_v54 }
 0x419   : > { %5081 = vmatpush.msrb.mxu1 %v5036_v48 }
 0x41a   : > { %5051 = vmatpush.msrb.mxu0 %v5027_v2 }
 0x41b   : > { %5082 = vmatpush.msrb.mxu1 %v5035_v35 }
 0x41c   : > { %5052 = vmatpush.msrb.mxu0 %v5026_v9 }
 0x41d   : > { %5083 = vmatpush.msrb.mxu1 %v5034_v61 }
 0x41e   : > { %5053 = vmatpush.msrb.mxu0 %v5025_v15 }
 0x41f   : > { %5084 = vmatpush.msrb.mxu1 %v5033_v49 }
 0x420   : > { %5054 = vmatpush.msrb.mxu0 %v5024_v60 }
 0x421   : > { %5085 = vmatpush.msrb.mxu1 %v5032_v24 }
 0x422   : > { %5055 = vmatpush.msrb.mxu0 %v5023_v43 }
 0x423   : > { %5086 = vmatpush.msrb.mxu1 %v5031_v16 }
 0x424   : > { %5056 = vmatpush.msrb.mxu0 %v5022_v25 }
 0x425   : > { %5087 = vmatpush.msrb.mxu1 %v5030_v13 }
 0x426   : > { %5057 = vmatpush.msrb.mxu0 %v5021_v20 }
 0x428   : > { %5058 = vmatpush.msrb.mxu0 %v5020_v28 }
 0x42a   : > { %5059 = vmatpush.msrb.mxu0 %v5019_v37  ;;  %v6881_v37 = vld [vmem:[%s12754_s16] ss:$0 sm:$0xff] }
 0x42c   : > { %5060 = vmatpush.msrb.mxu0 %v5018_v44 }
 0x42e   : > { %5061 = vmatpush.msrb.mxu0 %v5017_v21 }
 0x430   : > { %5062 = vmatpush.msrb.mxu0 %v5016_v30 }
 0x432   : > { %5063 = vmatpush.msrb.mxu0 %v5015_v26 }
 0x434   : > { %5064 = vmatpush.msrb.mxu0 %v5014_v34 }
 0x452   : > { %v4431_v62 = vpop.f32.mrf.mxu0 }
 0x453   : > { %v4445_v7 = vpop.f32.mrf.mxu1  ;;  %v4432_v40 = vadd.f32 %v6879_v4, %v4431_v62 }
 0x455   : > { %v4446_v47 = vadd.f32 %v4445_v7, %v4432_v40 }
 0x45a   : > { %v4459_v29 = vpop.f32.mrf.mxu2  ;;  %v4433_v5 = vpop.f32.mrf.mxu0 }
 0x45b   : > { %v4447_v18 = vpop.f32.mrf.mxu1  ;;  %v4473_v42 = vpop.f32.mrf.mxu3  ;;  %v4434_v63 = vadd.f32 %v6879_v4, %v4433_v5  ;;  %v4460_v22 = vadd.f32 %v4459_v29, %v4446_v47  ;;  %v5198_v29 = vld [vmem:[#allocation9] sm:$0xff] }
 0x45c   : > { %v5199_v47 = vsub.f32 1.0, %v5198_v29 }
 0x45d   : > { %v4448_v45 = vadd.f32 %v4447_v18, %v4434_v63  ;;  %v4474_v1 = vadd.f32 %v4473_v42, %v4460_v22 }
 0x45e   : > { %v5200_v5 = vmul.f32 1e+30, %v5199_v47 }
 0x462   : > { %v4461_v17 = vpop.f32.mrf.mxu2 }
 0x463   : > { %v4462_v14 = vadd.f32 %v4461_v17, %v4448_v45  ;;  %v4475_v58 = vpop.f32.mrf.mxu3 }
 0x465   : > { %v4476_v31 = vadd.f32 %v4475_v58, %v4462_v14 }
 0x472   : > { %v4487_v38 = vpop.f32.mrf.mxu0 }
 0x473   : > { %v4501_v46 = vpop.f32.mrf.mxu1  ;;  %v4488_v8 = vadd.f32 %v4487_v38, %v4474_v1 }
 0x475   : > { %v4502_v55 = vadd.f32 %v4501_v46, %v4488_v8 }
 0x477   : > { %5065 = vmatmul.f32.vlgmr.msrb.gmra.mxu0 %v4502_v55 }
 0x47a   : > { %v4489_v27 = vpop.f32.mrf.mxu0  ;;  %v4939_v36 = vpop.f32.mrf.mxu2 }
 0x47b   : > { %v4503_v52 = vpop.f32.mrf.mxu1  ;;  %v4490_v11 = vadd.f32 %v4489_v27, %v4476_v31  ;;  %v4953_v3 = vpop.f32.mrf.mxu3  ;;  %v4940_v33 = vadd.f32 %v6880_v0, %v4939_v36 }
 0x47d   : > { %v4504_v6 = vadd.f32 %v4503_v52, %v4490_v11  ;;  %v4954_v57 = vadd.f32 %v4953_v3, %v4940_v33 }
 0x47f   : > { %5068 = vmatmul.f32.gmra.mxu0 %v4504_v6 }
 0x482   : > { %v4941_v32 = vpop.f32.mrf.mxu2 }
 0x483   : > { %v4955_v51 = vpop.f32.mrf.mxu3  ;;  %v4942_v50 = vadd.f32 %v6880_v0, %v4941_v32 }
 0x485   : > { %v4956_v39 = vadd.f32 %v4955_v51, %v4942_v50 }
 0x492   : > { %v4967_v53 = vpop.f32.mrf.mxu0 }
 0x493   : > { %v4968_v59 = vadd.f32 %v4967_v53, %v4954_v57  ;;  %v4981_v12 = vpop.f32.mrf.mxu1 }
 0x495   : > { %v4982_v19 = vadd.f32 %v4981_v12, %v4968_v59 }
 0x49a   : > { %v4995_v23 = vpop.f32.mrf.mxu2  ;;  %v4969_v54 = vpop.f32.mrf.mxu0 }
 0x49b   : > { %v5009_v10 = vpop.f32.mrf.mxu3  ;;  %v4996_v56 = vadd.f32 %v4995_v23, %v4982_v19  ;;  %v4970_v9 = vadd.f32 %v4969_v54, %v4956_v39  ;;  %v4983_v15 = vpop.f32.mrf.mxu1 }
 0x49d   : > { %v5010_v2 = vadd.f32 %v5009_v10, %v4996_v56  ;;  %v4984_v60 = vadd.f32 %v4983_v15, %v4970_v9 }
 0x49f   : > { %6579 = vmatmul.msk.f32.vlgmr.msrb.gmra.mxu1 %vm5042_vm14, %v5010_v2 }
 0x4a2   : > { %v4997_v43 = vpop.f32.mrf.mxu2 }
 0x4a3   : > { %v4998_v25 = vadd.f32 %v4997_v43, %v4984_v60  ;;  %v5011_v20 = vpop.f32.mrf.mxu3 }
 0x4a5   : > { %v5012_v28 = vadd.f32 %v5011_v20, %v4998_v25  ;;  %v5461_v25 = vld [vmem:[#allocation9 + $0x8] sm:$0xff] }
 0x4a7   : > { %6580 = vmatmul.msk.f32.gmra.mxu1 %vm5042_vm14, %v5012_v28 }
 0x4f4   : > { %v5066_v44 = vpop.f32.mrf.mxu0 }
 0x4f5   : > { %v5067_v21 = vadd.f32 %v6881_v37, %v5066_v44 }
 0x4fc   : > { %v5069_v34 = vpop.f32.mrf.mxu0 }
 0x4fd   : > { %v5070_v40 = vadd.f32 %v6881_v37, %v5069_v34  ;;  %v5462_v37 = vsub.f32 1.0, %v5461_v25 }
 0x4ff   : > { %v5463_v44 = vmul.f32 1e+30, %v5462_v37 }
 0x51c   : > { %v5089_v30 = vpop.f32.mrf.mxu1 }
 0x51d   : > { %v11129_v26 = vadd.f32 %v5089_v30, %v5067_v21 }
 0x51f   : > { %5096 = vrot.lane.b32.xlu1 %v11129_v26, %s7219_s23  ;;  %5099 = vrot.lane.b32.xlu0 %v11129_v26, %s7220_s25 }
 0x520   : > { %6581 = vmatpush.xpose.msk.msrb.mxu2 %vm5105_vm15, %v11129_v26 }
 0x523   : > { %6582 = vmatmul.msk.f32.vlgmr.msrb.gmra.mxu2 %vm5105_vm15, %v11129_v26 }
 0x524   : > { %v5092_v62 = vpop.f32.mrf.mxu1 }
 0x525   : > { %v11143_v41 = vadd.f32 %v5092_v62, %v5070_v40 }
 0x527   : > { %5102 = vrot.lane.b32.xlu0 %v11129_v26, %s7221_s9 }
 0x591   : > { %v5097_v7 = vpop.permute.xlu1 %5096  ;;  %v5100_v4 = vpop.permute.xlu0 %5099 }
 0x592   : > { %6583 = vmatpush.xpose.msk.msra.mxu0 %vm5105_vm15, %v5097_v7  ;;  %6585 = vmatpush.xpose.msk.msra.mxu2 %vm5105_vm15, %v5100_v4 }
 0x593   : > { %5314 = vmatpush.msrb.mxu3 %v5100_v4 }
 0x595   : > { %6584 = vmatmul.msk.f32.vlgmr.msra.gmra.mxu0 %vm5105_vm15, %v5097_v7  ;;  %6586 = vmatmul.msk.f32.vlgmr.msra.gmra.mxu2 %vm5105_vm15, %v5100_v4 }
 0x596   : > { %5291 = vmatpush.msrb.mxu2 %v5097_v7 }
 0x598   : > { %6593 = vmatpush.xpose.msk.msra.mxu2 %vm5105_vm15, %v11143_v41 }
 0x599   : > { %v5103_v48 = vpop.permute.xlu0 %5102 }
 0x59a   : > { %6587 = vmatpush.xpose.msk.msra.mxu1 %vm5105_vm15, %v5103_v48 }
 0x59d   : > { %6588 = vmatmul.msk.f32.vlgmr.msra.gmra.mxu1 %vm5105_vm15, %v5103_v48 }
 0x59e   : > { %5268 = vmatpush.msrb.mxu1 %v11129_v26 }
 0x5a0   : > { %5337 = vmatpush.msra.mxu1 %v5103_v48 }
 0x5a6   : > { %v5125_v18 = vpop.f32.mrf.mxu2 }
 0x5a7   : > { %v5194_v42 = vmul.f32 0.17677669, %v5125_v18 }
 0x5a9   : > { %v5201_v63 = vsub.f32 %v5194_v42, %v5200_v5 }
 0x5ab   : > { %v5206_v22 = vsel %vm5205_vm0, %v5201_v63, -inf }
 0x5ac   : > { %5207 = vmax.xlane.f32.xlu2 %v5206_v22 }
 0x612   : > { %v5147_v45 = vpop.f32.mrf.mxu0 }
 0x613   : > { %v5195_v1 = vmul.f32 0.17677669, %v5147_v45 }
 0x615   : > { %v5202_v35 = vsub.f32 %v5195_v1, %v5200_v5 }
 0x617   : > { %v5209_v17 = vsel %vm5205_vm0, %v5202_v35, -inf }
 0x618   : > { %5210 = vmax.xlane.f32.xlu0 %v5209_v17  ;;  %v5169_v61 = vpop.f32.mrf.mxu2 }
 0x619   : > { %v5196_v38 = vmul.f32 0.17677669, %v5169_v61 }
 0x61a   : > { %v5191_v46 = vpop.f32.mrf.mxu1 }
 0x61b   : > { %v5197_v49 = vmul.f32 0.17677669, %v5191_v46  ;;  %v5203_v8 = vsub.f32 %v5196_v38, %v5200_v5 }
 0x61d   : > { %v5212_v14 = vsel %vm5205_vm0, %v5203_v8, -inf  ;;  %v5204_v58 = vsub.f32 %v5197_v49, %v5200_v5 }
 0x61e   : > { %5213 = vmax.xlane.f32.xlu1 %v5212_v14 }
 0x61f   : > { %v5208_v55 = vpop.xlane.xlu2 %5207  ;;  %v5215_v24 = vsel %vm5205_vm0, %v5204_v58, -inf }
 0x620   : > { %v5218_v31 = vsub.f32 %v5201_v63, %v5208_v55  ;;  %5216 = vmax.xlane.f32.xlu2 %v5215_v24 }
 0x622   : > { %v5222_v16 = vmul.f32 1.442695, %v5218_v31 }
 0x624   : > { %6887 = vpow2.f32 %v5222_v16 }
 0x62a   : > { %v6888_v13 = vpop.eup %6887 }
 0x62b   : > { %v5230_v27 = vsel %vm5205_vm0, %v6888_v13, 0.0 }
 0x62c   : > { %5231 = vadd.xlane.f32.xlu2 %v5230_v27  ;;  %5365 = vrot.lane.b32.xlu0 %v11143_v41, %s7221_s9 }
 0x637   : > { %5362 = vrot.lane.b32.xlu1 %v11143_v41, %s7220_s25 }
 0x68b   : > { %v5211_v57 = vpop.xlane.xlu0 %5210 }
 0x68c   : > { %v5219_v10 = vsub.f32 %v5202_v35, %v5211_v57 }
 0x68e   : > { %v5224_v39 = vmul.f32 1.442695, %v5219_v10 }
 0x691   : > { %v5214_v52 = vpop.xlane.xlu1 %5213 }
 0x692   : > { %v5220_v36 = vsub.f32 %v5203_v8, %v5214_v52 }
 0x693   : > { %v5217_v11 = vpop.xlane.xlu2 %5216 }
 0x694   : > { %v5221_v6 = vsub.f32 %v5204_v58, %v5217_v11  ;;  %v5226_v0 = vmul.f32 1.442695, %v5220_v36 }
 0x696   : > { %v5228_v3 = vmul.f32 1.442695, %v5221_v6 }
 0x698   : > { %6889 = vpow2.f32 %v5228_v3 }
 0x699   : > { %6891 = vpow2.f32 %v5226_v0 }
 0x69e   : > { %v6890_v33 = vpop.eup %6889  ;;  %v5366_v19 = vpop.permute.xlu0 %5365 }
 0x69f   : > { %v5232_v32 = vpop.xlane.xlu2 %5231  ;;  %v5239_v51 = vsel %vm5205_vm0, %v6890_v33, 0.0  ;;  %v6892_v53 = vpop.eup %6891 }
 0x6a0   : > { %6893 = vrcp.f32 %v5232_v32  ;;  %5240 = vadd.xlane.f32.xlu2 %v5239_v51  ;;  %v5236_v50 = vsel %vm5205_vm0, %v6892_v53, 0.0 }
 0x6a1   : > { %6895 = vpow2.f32 %v5224_v39 }
 0x6a6   : > { %v6894_v59 = vpop.eup %6893 }
 0x6a7   : > { %v5246_v12 = vmul.f32 %v6894_v59, %v6888_v13  ;;  %v6896_v56 = vpop.eup %6895 }
 0x6a8   : > { %5237 = vadd.xlane.f32.xlu2 %v5236_v50  ;;  %v5233_v54 = vsel %vm5205_vm0, %v6896_v56, 0.0 }
 0x6a9   : > { %6589 = vmatmul.msk.f32.vlgmr.msrb.gmra.mxu1 %vm5205_vm0, %v5246_v12  ;;  %v5363_v23 = vpop.permute.xlu1 %5362 }
 0x6aa   : > { %6599 = vmatpush.xpose.msk.msrb.mxu1 %vm5105_vm15, %v5366_v19  ;;  %6597 = vmatpush.xpose.msk.msrb.mxu0 %vm5105_vm15, %v5363_v23 }
 0x6ad   : > { %6598 = vmatmul.msk.f32.vlgmr.msrb.gmra.mxu0 %vm5105_vm15, %v5363_v23 }
 0x6ae   : > { %5576 = vmatpush.msra.mxu0 %v5363_v23 }
 0x6c0   : > { %5359 = vrot.lane.b32.xlu2 %v11143_v41, %s7219_s23 }
 0x6e9   : > { %5234 = vadd.xlane.f32.xlu2 %v5233_v54 }
 0x713   : > { %v5241_v2 = vpop.xlane.xlu2 %5240 }
 0x714   : > { %6897 = vrcp.f32 %v5241_v2 }
 0x71a   : > { %v6898_v9 = vpop.eup %6897 }
 0x71b   : > { %v5249_v15 = vmul.f32 %v6898_v9, %v6890_v33  ;;  %v5238_v60 = vpop.xlane.xlu2 %5237 }
 0x71c   : > { %6899 = vrcp.f32 %v5238_v60 }
 0x71d   : > { %6592 = vmatmul.msk.f32.vlgmr.msra.gmra.mxu1 %vm5205_vm0, %v5249_v15 }
 0x71e   : > { %5599 = vmatpush.msra.mxu1 %v5366_v19 }
 0x722   : > { %v6900_v43 = vpop.eup %6899 }
 0x723   : > { %v5248_v20 = vmul.f32 %v6900_v43, %v6892_v53  ;;  %v5360_v28 = vpop.permute.xlu2 %5359 }
 0x724   : > { %6595 = vmatpush.xpose.msk.msra.mxu3 %vm5105_vm15, %v5360_v28 }
 0x725   : > { %6591 = vmatmul.msk.f32.vlgmr.msrb.gmra.mxu3 %vm5205_vm0, %v5248_v20  ;;  %6600 = vmatmul.msk.f32.vlgmr.msrb.gmra.mxu1 %vm5105_vm15, %v5366_v19 }
 0x726   : > { %v11180_v48 = vpop.f32.mrf.mxu1 }
 0x728   : > { %5553 = vmatpush.msrb.mxu3 %v5360_v28 }
 0x72a   : > { %v5431_v21 = vpop.f32.mrf.mxu0 }
 0x72b   : > { %v5458_v30 = vmul.f32 0.17677669, %v5431_v21  ;;  %v5665_v21 = vld [vmem:[#allocation12 + $0x70] sm:$0xff] }
 0x72d   : > { %6596 = vmatmul.msk.f32.vlgmr.msra.gmra.mxu3 %vm5105_vm15, %v5360_v28  ;;  %v5466_v34 = vsub.f32 %v5458_v30, %v5463_v44  ;;  %v5664_v30 = vld [vmem:[#allocation12 + $0x68] sm:$0xff] }
 0x72f   : > { %v5474_v62 = vsel %vm5205_vm0, %v5466_v34, -inf }
 0x730   : > { %5475 = vmax.xlane.f32.xlu0 %v5474_v62  ;;  %v5662_v62 = vld [vmem:[#allocation12 + $0x58] sm:$0xff] }
 0x75c   : > { %v5235_v7 = vpop.xlane.xlu2 %5234 }
 0x75d   : > { %6901 = vrcp.f32 %v5235_v7  ;;  %v5661_v7 = vld [vmem:[#allocation12 + $0x50] sm:$0xff] }
 0x763   : > { %v6902_v4 = vpop.eup %6901 }
 0x764   : > { %v5247_v40 = vmul.f32 %v6902_v4, %v6896_v56  ;;  %v5660_v4 = vld [vmem:[#allocation12 + $0x48] sm:$0xff] }
 0x766   : > { %6590 = vmatmul.msk.f32.vlgmr.msrb.gmra.mxu2 %vm5205_vm0, %v5247_v40  ;;  %v5659_v40 = vld [vmem:[#allocation12 + $0x40] sm:$0xff] }
 0x767   : > { %5530 = vmatpush.msrb.mxu2 %v11143_v41 }
 0x76e   : > { %6594 = vmatmul.msk.f32.vlgmr.msra.gmra.mxu2 %vm5105_vm15, %v11143_v41 }
 0x79a   : > { %v11182_v29 = vpop.f32.mrf.mxu1 }
 0x7a2   : > { %v5453_v47 = vpop.f32.mrf.mxu1 }
 0x7a3   : > { %v5459_v5 = vmul.f32 0.17677669, %v5453_v47  ;;  %v5476_v18 = vpop.xlane.xlu0 %5475  ;;  %v5658_v47 = vld [vmem:[#allocation12 + $0x38] sm:$0xff] }
 0x7a4   : > { %v5482_v42 = vsub.f32 %v5466_v34, %v5476_v18  ;;  %v5663_v34 = vld [vmem:[#allocation12 + $0x60] sm:$0xff] }
 0x7a5   : > { %v5467_v63 = vsub.f32 %v5459_v5, %v5463_v44 }
 0x7a6   : > { %v5488_v22 = vmul.f32 1.442695, %v5482_v42 }
 0x7a7   : > { %v5477_v45 = vsel %vm5205_vm0, %v5467_v63, -inf }
 0x7a8   : > { %6903 = vpow2.f32 %v5488_v22  ;;  %5478 = vmax.xlane.f32.xlu2 %v5477_v45  ;;  %v5316_v1 = vpop.f32.mrf.mxu3  ;;  %v5657_v22 = vld [vmem:[#allocation12 + $0x30] sm:$0xff] }
 0x7ae   : > { %v6904_v35 = vpop.eup %6903 }
 0x7af   : > { %v5498_v17 = vsel %vm5205_vm0, %v6904_v35, 0.0 }
 0x7b0   : > { %v5409_v61 = vpop.f32.mrf.mxu3  ;;  %5499 = vadd.xlane.f32.xlu0 %v5498_v17 }
 0x7b1   : > { %v5457_v38 = vmul.f32 0.17677669, %v5409_v61 }
 0x7b3   : > { %v5465_v46 = vsub.f32 %v5457_v38, %v5463_v44 }
 0x7b5   : > { %v5471_v49 = vsel %vm5205_vm0, %v5465_v46, -inf }
 0x7b6   : > { %5472 = vmax.xlane.f32.xlu1 %v5471_v49 }
 0x7e9   : > { %v5293_v8 = vpop.f32.mrf.mxu2 }
 0x7f1   : > { %v5387_v14 = vpop.f32.mrf.mxu2 }
 0x7f2   : > { %v5456_v58 = vmul.f32 0.17677669, %v5387_v14 }
 0x7f4   : > { %v5464_v55 = vsub.f32 %v5456_v58, %v5463_v44  ;;  %v5666_v44 = vld [vmem:[#allocation12 + $0x78] sm:$0xff] }
 0x7f5   : > { %5667 = vmatpush.msra.mxu3 %v5666_v44  ;;  %v5774_v44 = vld [vmem:[#allocation15 + $0xb8] sm:$0xff] }
 0x7f6   : > { %v5468_v24 = vsel %vm5205_vm0, %v5464_v55, -inf }
 0x7f7   : > { %5469 = vmax.xlane.f32.xlu2 %v5468_v24  ;;  %5668 = vmatpush.msra.mxu3 %v5665_v21  ;;  %v5619_v24 = vld [vmem:[#allocation10] sm:$0xff]  ;;  %v5771_v21 = vld [vmem:[#allocation15 + $0xa0] sm:$0xff] }
 0x7f9   : > { %5669 = vmatpush.msra.mxu3 %v5664_v30  ;;  %v5772_v30 = vld [vmem:[#allocation15 + $0xa8] sm:$0xff] }
 0x7fb   : > { %5670 = vmatpush.msra.mxu3 %v5663_v34  ;;  %v5769_v34 = vld [vmem:[#allocation15 + $0x90] sm:$0xff] }
 0x7fd   : > { %5671 = vmatpush.msra.mxu3 %v5662_v62  ;;  %v5770_v62 = vld [vmem:[#allocation15 + $0x98] sm:$0xff] }
 0x7ff   : > { %5672 = vmatpush.msra.mxu3 %v5661_v7  ;;  %v5767_v7 = vld [vmem:[#allocation15 + $0x80] sm:$0xff] }
 0x801   : > { %5673 = vmatpush.msra.mxu3 %v5660_v4  ;;  %v5768_v4 = vld [vmem:[#allocation15 + $0x88] sm:$0xff] }
 0x803   : > { %5674 = vmatpush.msra.mxu3 %v5659_v40  ;;  %v5765_v40 = vld [vmem:[#allocation15 + $0x70] sm:$0xff] }
 0x805   : > { %5675 = vmatpush.msra.mxu3 %v5658_v47  ;;  %v5763_v47 = vld [vmem:[#allocation15 + $0x60] sm:$0xff] }
 0x807   : > { %5676 = vmatpush.msra.mxu3 %v5657_v22  ;;  %v5760_v22 = vld [vmem:[#allocation15 + $0x48] sm:$0xff] }
 0x81b   : > { %v5479_v31 = vpop.xlane.xlu2 %5478 }
 0x81c   : > { %v5483_v16 = vsub.f32 %v5467_v63, %v5479_v31 }
 0x81e   : > { %v5490_v13 = vmul.f32 1.442695, %v5483_v16  ;;  %v5654_v16 = vld [vmem:[#allocation12 + $0x18] sm:$0xff] }
 0x820   : > { %6905 = vpow2.f32 %v5490_v13  ;;  %v5652_v13 = vld [vmem:[#allocation12 + $0x8] sm:$0xff] }
 0x823   : > { %v5500_v27 = vpop.xlane.xlu0 %5499 }
 0x824   : > { %6907 = vrcp.f32 %v5500_v27  ;;  %v5620_v27 = vld [vmem:[#allocation10 + $0x8] sm:$0xff] }
 0x826   : > { %v6906_v52 = vpop.eup %6905 }
 0x827   : > { %v5501_v11 = vsel %vm5205_vm0, %v6906_v52, 0.0 }
 0x828   : > { %5502 = vadd.xlane.f32.xlu2 %v5501_v11 }
 0x829   : > { %v5473_v6 = vpop.xlane.xlu1 %5472 }
 0x82a   : > { %v6908_v36 = vpop.eup %6907  ;;  %v5481_v3 = vsub.f32 %v5465_v46, %v5473_v6  ;;  %v5656_v46 = vld [vmem:[#allocation12 + $0x28] sm:$0xff] }
 0x82b   : > { %v5510_v0 = vmul.f32 %v6908_v36, %v6904_v35  ;;  %5677 = vmatpush.msra.mxu3 %v5656_v46  ;;  %v5751_v46 = vld [vmem:[#allocation15] sm:$0xff] }
 0x82c   : > { %v5486_v33 = vmul.f32 1.442695, %v5481_v3 }
 0x82d   : > { %6603 = vmatmul.msk.f32.vlgmr.msra.gmra.mxu0 %vm5205_vm0, %v5510_v0 }
 0x82e   : > { %6909 = vpow2.f32 %v5486_v33 }
 0x834   : > { %v6910_v32 = vpop.eup %6909 }
 0x835   : > { %v5495_v51 = vsel %vm5205_vm0, %v6910_v32, 0.0 }
 0x836   : > { %5496 = vadd.xlane.f32.xlu1 %v5495_v51 }
 0x86a   : > { %v5470_v57 = vpop.xlane.xlu2 %5469 }
 0x86b   : > { %v5480_v53 = vsub.f32 %v5464_v55, %v5470_v57  ;;  %v5655_v55 = vld [vmem:[#allocation12 + $0x20] sm:$0xff] }
 0x86c   : > { %5678 = vmatpush.msra.mxu3 %v5655_v55  ;;  %v5854_v55 = vld [vmem:[#allocation16 + $0x78] sm:$0xff] }
 0x86d   : > { %v5484_v59 = vmul.f32 1.442695, %v5480_v53  ;;  %v5781_v53 = vld [vmem:[#allocation15 + $0xf0] sm:$0xff] }
 0x86e   : > { %5679 = vmatpush.msra.mxu3 %v5654_v16  ;;  %5789 = vmatpush.msrb.mxu0 %v5781_v53  ;;  %v5869_v16 = vld [vmem:[#allocation16 + $0xf0] sm:$0xff] }
 0x86f   : > { %6911 = vpow2.f32 %v5484_v59  ;;  %v5782_v59 = vld [vmem:[#allocation15 + $0xf8] sm:$0xff] }
 0x870   : > { %5812 = vmatpush.msrb.mxu1 %v5782_v59  ;;  %v5848_v59 = vld [vmem:[#allocation16 + $0x48] sm:$0xff] }
 0x875   : > { %v6912_v12 = vpop.eup %6911 }
 0x876   : > { %v5492_v50 = vsel %vm5205_vm0, %v6912_v12, 0.0 }
 0x877   : > { %5493 = vadd.xlane.f32.xlu1 %v5492_v50  ;;  %v5780_v50 = vld [vmem:[#allocation15 + $0xe8] sm:$0xff] }
 0x878   : > { %5813 = vmatpush.msrb.mxu1 %v5780_v50 }
 0x89b   : > { %v5503_v19 = vpop.xlane.xlu2 %5502 }
 0x89c   : > { %6913 = vrcp.f32 %v5503_v19 }
 0x8a2   : > { %v6914_v23 = vpop.eup %6913 }
 0x8a3   : > { %v5511_v10 = vmul.f32 %v6914_v23, %v6906_v52  ;;  %v5651_v52 = vld [vmem:[#allocation12] sm:$0xff] }
 0x8a5   : > { %6604 = vmatmul.msk.f32.vlgmr.msra.gmra.mxu1 %vm5205_vm0, %v5511_v10 }
 0x8a9   : > { %v5497_v39 = vpop.xlane.xlu1 %5496 }
 0x8aa   : > { %6915 = vrcp.f32 %v5497_v39  ;;  %v5578_v56 = vpop.f32.mrf.mxu0 }
 0x8ab   : > { %v6869_v54 = vpack.i.bf16 %v5316_v1, %v5578_v56 }
 0x8ad   : > { %6870 = vrot.lane.b32.xlu2 %v6869_v54, %s7220_s25 }
 0x8b0   : > { %v6916_v2 = vpop.eup %6915 }
 0x8b1   : > { %v5509_v9 = vmul.f32 %v6916_v2, %v6910_v32  ;;  %v7222_v32 = vmov 128.0  }
 0x8b3   : > { %6602 = vmatmul.msk.f32.vlgmr.msrb.gmra.mxu3 %vm5205_vm0, %v5509_v9 }
 0x8ea   : > { %v5494_v15 = vpop.xlane.xlu1 %5493 }
 0x8eb   : > { %6917 = vrcp.f32 %v5494_v15 }
 0x8ec   : > { %6919 = vrcp.f32 %v7222_v32 }
 0x8f1   : > { %v6918_v60 = vpop.eup %6917 }
 0x8f2   : > { %v5508_v43 = vmul.f32 %v6918_v60, %v6912_v12  ;;  %v6920_v51 = vpop.eup %6919  ;;  %v5779_v12 = vld [vmem:[#allocation15 + $0xe0] sm:$0xff] }
 0x8f3   : > { %v5699_v57 = vmul.f32 128.0, %v6920_v51  ;;  %5790 = vmatpush.msrb.mxu0 %v5779_v12  ;;  %vm5703_vm3 = vweird.f32 %v6920_v51  ;;  %v5864_v12 = vld [vmem:[#allocation16 + $0xc8] sm:$0xff] }
 0x8f4   : > { %6601 = vmatmul.msk.f32.vlgmr.msrb.gmra.mxu2 %vm5205_vm0, %v5508_v43  ;;  %v5777_v43 = vld [vmem:[#allocation15 + $0xd0] sm:$0xff] }
 0x8f5   : > { %v5700_v19 = vsub.f32 1.0, %v5699_v57  ;;  %5791 = vmatpush.msrb.mxu0 %v5777_v43  ;;  %v5865_v57 = vld [vmem:[#allocation16 + $0xd0] sm:$0xff] }
 0x8f6   : > { %v5845_v43 = vld [vmem:[#allocation16 + $0x30] sm:$0xff] }
 0x8f7   : > { %v5701_v23 = vmul.f32 %v6920_v51, %v5700_v19  ;;  %v5847_v19 = vld [vmem:[#allocation16 + $0x40] sm:$0xff] }
 0x922   : > { %v5601_v25 = vpop.f32.mrf.mxu1 }
 0x923   : > { %v6874_v20 = vpack.i.bf16 %v11182_v29, %v5601_v25  ;;  %v6871_v29 = vpop.permute.xlu2 %6870  ;;  %v5778_v25 = vld [vmem:[#allocation15 + $0xd8] sm:$0xff] }
 0x924   : > { %v6873_v45 = vunpack.i.h.bf16 %v6871_v29  ;;  %v6872_v1 = vunpack.i.l.bf16 %v6871_v29  ;;  %5814 = vmatpush.msrb.mxu1 %v5778_v25  ;;  %v5766_v29 = vld [vmem:[#allocation15 + $0x78] sm:$0xff]  ;;  %v5861_v25 = vld [vmem:[#allocation16 + $0xb0] sm:$0xff] }
 0x925   : > { %6875 = vrot.lane.b32.xlu1 %v6874_v20, %s7219_s23  ;;  %v5775_v20 = vld [vmem:[#allocation15 + $0xc0] sm:$0xff] }
 0x926   : > { %5792 = vmatpush.msrb.mxu0 %v5775_v20 }
 0x936   : > { %v5555_v28 = vpop.f32.mrf.mxu3 }
 0x937   : > { %v6864_v37 = vpack.i.bf16 %v5293_v8, %v5555_v28  ;;  %v5776_v28 = vld [vmem:[#allocation15 + $0xc8] sm:$0xff] }
 0x938   : > { %5815 = vmatpush.msrb.mxu1 %v5776_v28 }
 0x939   : > { %6865 = vrot.lane.b32.xlu0 %v6864_v37, %s7221_s9  ;;  %v5773_v37 = vld [vmem:[#allocation15 + $0xb0] sm:$0xff] }
 0x93a   : > { %5793 = vmatpush.msrb.mxu0 %v5773_v37  ;;  %5816 = vmatpush.msrb.mxu1 %v5774_v44  ;;  %v6883_v44 = vld [vmem:[#allocation13] ss:$0 sm:$0xff] }
 0x93c   : > { %5794 = vmatpush.msrb.mxu0 %v5771_v21  ;;  %5817 = vmatpush.msrb.mxu1 %v5772_v30  ;;  %v5844_v21 = vld [vmem:[#allocation16 + $0x28] sm:$0xff] }
 0x93d   : > { %v5860_v30 = vld [vmem:[#allocation16 + $0xa8] sm:$0xff] }
 0x93e   : > { %5795 = vmatpush.msrb.mxu0 %v5769_v34  ;;  %5818 = vmatpush.msrb.mxu1 %v5770_v62 }
 0x940   : > { %5796 = vmatpush.msrb.mxu0 %v5767_v7  ;;  %5819 = vmatpush.msrb.mxu1 %v5768_v4  ;;  %v5843_v7 = vld [vmem:[#allocation16 + $0x20] sm:$0xff] }
 0x941   : > { %v5859_v4 = vld [vmem:[#allocation16 + $0xa0] sm:$0xff] }
 0x942   : > { %5797 = vmatpush.msrb.mxu0 %v5765_v40  ;;  %5820 = vmatpush.msrb.mxu1 %v5766_v29 }
 0x944   : > { %5798 = vmatpush.msrb.mxu0 %v5763_v47  ;;  %v5842_v47 = vld [vmem:[#allocation16 + $0x18] sm:$0xff] }
 0x977   : > { %v5532_v35 = vpop.f32.mrf.mxu2 }
 0x997   : > { %v6876_v5 = vpop.permute.xlu1 %6875 }
 0x998   : > { %v6877_v17 = vunpack.i.l.bf16 %v6876_v5  ;;  %v6878_v14 = vunpack.i.h.bf16 %v6876_v5  ;;  %v5764_v5 = vld [vmem:[#allocation15 + $0x68] sm:$0xff] }
 0x999   : > { %5821 = vmatpush.msrb.mxu1 %v5764_v5  ;;  %v5858_v5 = vld [vmem:[#allocation16 + $0x98] sm:$0xff] }
 0x9ab   : > { %v6866_v18 = vpop.permute.xlu0 %6865 }
 0x9ac   : > { %v6868_v42 = vunpack.i.h.bf16 %v6866_v18  ;;  %v6867_v63 = vunpack.i.l.bf16 %v6866_v18  ;;  %v5761_v18 = vld [vmem:[#allocation15 + $0x50] sm:$0xff] }
 0x9ad   : > { %5799 = vmatpush.msrb.mxu0 %v5761_v18 }
 0x9ae   : > { %v5616_v61 = vsel %vm5105_vm15, %v5532_v35, %v6867_v63  ;;  %v5354_v38 = vsel %vm5105_vm15, %v11180_v48, %v6868_v42  ;;  %v5653_v48 = vld [vmem:[#allocation12 + $0x10] sm:$0xff]  ;;  %v5762_v42 = vld [vmem:[#allocation15 + $0x58] sm:$0xff]  ;;  %v5759_v63 = vld [vmem:[#allocation15 + $0x40] sm:$0xff] }
 0x9af   : > { %v5617_v49 = vsel %vm5042_vm14, %v5616_v61, %v6872_v1  ;;  %v5355_v8 = vsel %vm5042_vm14, %v5354_v38, %v6873_v45  ;;  %5680 = vmatpush.msra.mxu3 %v5653_v48  ;;  %5822 = vmatpush.msrb.mxu1 %v5762_v42  ;;  %v5757_v45 = vld [vmem:[#allocation15 + $0x30] sm:$0xff]  ;;  %v5758_v1 = vld [vmem:[#allocation15 + $0x38] sm:$0xff]  ;;  %v5755_v35 = vld [vmem:[#allocation15 + $0x20] sm:$0xff] }
 0x9b0   : > { %v5618_v58 = vsel %vm5356_vm1, %v5617_v49, %v6877_v17  ;;  %v5357_v31 = vsel %vm5356_vm1, %v5355_v8, %v6878_v14  ;;  %5800 = vmatpush.msrb.mxu0 %v5759_v63  ;;  %v5756_v17 = vld [vmem:[#allocation15 + $0x28] sm:$0xff]  ;;  %v5753_v61 = vld [vmem:[#allocation15 + $0x10] sm:$0xff]  ;;  %v5754_v38 = vld [vmem:[#allocation15 + $0x18] sm:$0xff] }
 0x9b1   : > { %5642 = vmatpush.msra.mxu2 %v5618_v58  ;;  %5681 = vmatpush.msra.mxu3 %v5652_v13  ;;  %v5752_v49 = vld [vmem:[#allocation15 + $0x8] sm:$0xff] }
 0x9b2   : > { %5823 = vmatpush.msrb.mxu1 %v5760_v22  ;;  %5801 = vmatpush.msrb.mxu0 %v5757_v45  ;;  %v5852_v48 = vld [vmem:[#allocation16 + $0x68] sm:$0xff]  ;;  %v5841_v45 = vld [vmem:[#allocation16 + $0x10] sm:$0xff] }
 0x9b3   : > { %5643 = vmatpush.msra.mxu2 %v5357_v31  ;;  %5682 = vmatpush.msra.mxu3 %v5651_v52  ;;  %v5853_v31 = vld [vmem:[#allocation16 + $0x70] sm:$0xff]  ;;  %v5868_v13 = vld [vmem:[#allocation16 + $0xe8] sm:$0xff] }
 0x9b4   : > { %6605 = vmatmul.msk.f32.vlgmr.msra.gmra.mxu2 %vm5621_vm2, %v5619_v24  ;;  %5824 = vmatpush.msrb.mxu1 %v5758_v1  ;;  %v5870_v24 = vld [vmem:[#allocation16 + $0xf8] sm:$0xff]  ;;  %v5857_v1 = vld [vmem:[#allocation16 + $0x90] sm:$0xff] }
 0x9b5   : > { %5802 = vmatpush.msrb.mxu0 %v5755_v35  ;;  %5875 = vmatpush.msrb.mxu2 %v5854_v55  ;;  %v5840_v35 = vld [vmem:[#allocation16 + $0x8] sm:$0xff] }
 0x9b6   : > { %5825 = vmatpush.msrb.mxu1 %v5756_v17  ;;  %5898 = vmatpush.msrb.mxu3 %v5870_v24  ;;  %v5856_v17 = vld [vmem:[#allocation16 + $0x88] sm:$0xff] }
 0x9b7   : > { %5803 = vmatpush.msrb.mxu0 %v5753_v61  ;;  %5876 = vmatpush.msrb.mxu2 %v5853_v31  ;;  %v5839_v61 = vld [vmem:[#allocation16] sm:$0xff] }
 0x9b8   : > { %5826 = vmatpush.msrb.mxu1 %v5754_v38  ;;  %5899 = vmatpush.msrb.mxu3 %v5869_v16  ;;  %v5855_v38 = vld [vmem:[#allocation16 + $0x80] sm:$0xff] }
 0x9b9   : > { %5804 = vmatpush.msrb.mxu0 %v5751_v46  ;;  %5877 = vmatpush.msrb.mxu2 %v5852_v48 }
 0x9ba   : > { %5827 = vmatpush.msrb.mxu1 %v5752_v49  ;;  %5900 = vmatpush.msrb.mxu3 %v5868_v13 }
 0x9bc   : > { %6606 = vmatmul.msk.f32.gmra.mxu2 %vm5621_vm2, %v5620_v27 }
 0xa37   : > { %v5645_v11 = vpop.f32.mrf.mxu2 }
 0xa38   : > { %5683 = vmatmul.f32.vlgmr.msra.gmra.mxu3 %v5645_v11  ;;  %v5851_v11 = vld [vmem:[#allocation16 + $0x60] sm:$0xff] }
 0xa39   : > { %5878 = vmatpush.msrb.mxu2 %v5851_v11 }
 0xa3f   : > { %v5648_v6 = vpop.f32.mrf.mxu2 }
 0xa40   : > { %5686 = vmatmul.f32.gmra.mxu3 %v5648_v6  ;;  %v5867_v6 = vld [vmem:[#allocation16 + $0xe0] sm:$0xff] }
 0xa41   : > { %5901 = vmatpush.msrb.mxu3 %v5867_v6  ;;  %v6884_v6 = vld [vmem:[%s12757_s22] ss:$0 sm:$0xff] }
 0xabb   : > { %v5684_v36 = vpop.f32.mrf.mxu3 }
 0xabc   : > { %v5690_v3 = vadd.f32 %v5684_v36, %v11129_v26  ;;  %v5702_v26 = vadd.f32 %v6920_v51, %v5701_v23  ;;  %v5863_v23 = vld [vmem:[#allocation16 + $0xc0] sm:$0xff] }
 0xabe   : > { %5694 = vadd.xlane.f32.xlu0 %v5690_v3  ;;  %v11208_v10 = vsel %vm5703_vm3, %v6920_v51, %v5702_v26  ;;  %v5849_v51 = vld [vmem:[#allocation16 + $0x50] sm:$0xff] }
 0xac3   : > { %v5687_v0 = vpop.f32.mrf.mxu3 }
 0xac4   : > { %v5691_v33 = vadd.f32 %v5687_v0, %v11143_v41  ;;  %v5850_v0 = vld [vmem:[#allocation16 + $0x58] sm:$0xff] }
 0xac5   : > { %5879 = vmatpush.msrb.mxu2 %v5850_v0 }
 0xac6   : > { %5696 = vadd.xlane.f32.xlu2 %v5691_v33 }
 0xac7   : > { %5880 = vmatpush.msrb.mxu2 %v5849_v51 }
 0xac9   : > { %5881 = vmatpush.msrb.mxu2 %v5848_v59 }
 0xacb   : > { %5882 = vmatpush.msrb.mxu2 %v5847_v19 }
 0xb31   : > { %v5695_v41 = vpop.xlane.xlu0 %5694 }
 0xb32   : > { %v5705_v39 = vmul.f32 %v11208_v10, %v5695_v41 }
 0xb34   : > { %v11211_v56 = vsub.f32 %v5690_v3, %v5705_v39  ;;  %v5846_v39 = vld [vmem:[#allocation16 + $0x38] sm:$0xff] }
 0xb35   : > { %5883 = vmatpush.msrb.mxu2 %v5846_v39 }
 0xb36   : > { %v5709_v54 = vmul.f32 %v11211_v56, %v11211_v56 }
 0xb37   : > { %5884 = vmatpush.msrb.mxu2 %v5845_v43 }
 0xb38   : > { %5711 = vadd.xlane.f32.xlu1 %v5709_v54  ;;  %v5862_v54 = vld [vmem:[#allocation16 + $0xb8] sm:$0xff] }
 0xb39   : > { %v5697_v2 = vpop.xlane.xlu2 %5696  ;;  %5885 = vmatpush.msrb.mxu2 %v5844_v21 }
 0xb3a   : > { %v5706_v9 = vmul.f32 %v11208_v10, %v5697_v2 }
 0xb3b   : > { %5886 = vmatpush.msrb.mxu2 %v5843_v7 }
 0xb3c   : > { %v11216_v15 = vsub.f32 %v5691_v33, %v5706_v9  ;;  %v5866_v33 = vld [vmem:[#allocation16 + $0xd8] sm:$0xff] }
 0xb3d   : > { %5902 = vmatpush.msrb.mxu3 %v5866_v33  ;;  %5887 = vmatpush.msrb.mxu2 %v5842_v47 }
 0xb3e   : > { %v5710_v60 = vmul.f32 %v11216_v15, %v11216_v15 }
 0xb3f   : > { %5903 = vmatpush.msrb.mxu3 %v5865_v57  ;;  %5888 = vmatpush.msrb.mxu2 %v5841_v45 }
 0xb40   : > { %5713 = vadd.xlane.f32.xlu0 %v5710_v60  ;;  %v6882_v60 = vld [vmem:[%s12755_s26] ss:$0 sm:$0xff] }
 0xb41   : > { %5904 = vmatpush.msrb.mxu3 %v5864_v12  ;;  %5889 = vmatpush.msrb.mxu2 %v5840_v35 }
 0xb43   : > { %5905 = vmatpush.msrb.mxu3 %v5863_v23  ;;  %5890 = vmatpush.msrb.mxu2 %v5839_v61 }
 0xb45   : > { %5906 = vmatpush.msrb.mxu3 %v5862_v54 }
 0xb47   : > { %5907 = vmatpush.msrb.mxu3 %v5861_v25 }
 0xb49   : > { %5908 = vmatpush.msrb.mxu3 %v5860_v30 }
 0xb4b   : > { %5909 = vmatpush.msrb.mxu3 %v5859_v4 }
 0xb4d   : > { %5910 = vmatpush.msrb.mxu3 %v5858_v5 }
 0xb4f   : > { %5911 = vmatpush.msrb.mxu3 %v5857_v1 }
 0xb51   : > { %5912 = vmatpush.msrb.mxu3 %v5856_v17 }
 0xb53   : > { %5913 = vmatpush.msrb.mxu3 %v5855_v38 }
 0xbab   : > { %v5712_v8 = vpop.xlane.xlu1 %5711 }
 0xbac   : > { %v5715_v14 = vmul.f32 %v5712_v8, %v11208_v10 }
 0xbae   : > { %v5717_v58 = vadd.f32 1e-05, %v5715_v14 }
 0xbb0   : > { %6921 = vrsqrt.f32 %v5717_v58  ;;  %vm5725_vm5 = vweird.f32 %v5717_v58 }
 0xbb3   : > { %v5714_v27 = vpop.xlane.xlu0 %5713 }
 0xbb4   : > { %v5716_v52 = vmul.f32 %v5714_v27, %v11208_v10 }
 0xbb6   : > { %v6922_v36 = vpop.eup %6921  ;;  %v5718_v3 = vadd.f32 1e-05, %v5716_v52 }
 0xbb7   : > { %v5720_v32 = vmul.f32 %v6922_v36, %v5717_v58  ;;  %vm5726_vm4 = vweird.f32 %v6922_v36 }
 0xbb8   : > { %6923 = vrsqrt.f32 %v5718_v3  ;;  %vm5727_vm6 = vmor %vm5725_vm5, %vm5726_vm4  ;;  %vm5735_vm8 = vweird.f32 %v5718_v3 }
 0xbb9   : > { %v5721_v53 = vmul.f32 %v6922_v36, %v5720_v32 }
 0xbbb   : > { %v5722_v50 = vmul.f32 0.5, %v5721_v53 }
 0xbbd   : > { %v5723_v26 = vsub.f32 1.5, %v5722_v50 }
 0xbbe   : > { %v6924_v41 = vpop.eup %6923 }
 0xbbf   : > { %v5724_v2 = vmul.f32 %v6922_v36, %v5723_v26  ;;  %v5730_v9 = vmul.f32 %v6924_v41, %v5718_v3  ;;  %vm5736_vm7 = vweird.f32 %v6924_v41 }
 0xbc0   : > { %vm5737_vm9 = vmor %vm5735_vm8, %vm5736_vm7 }
 0xbc1   : > { %v5728_v20 = vsel %vm5727_vm6, %v6922_v36, %v5724_v2  ;;  %v5731_v28 = vmul.f32 %v6924_v41, %v5730_v9 }
 0xbc2   : > { %v5739_v37 = vmul.f32 %v5728_v20, %v11211_v56 }
 0xbc3   : > { %v5732_v34 = vmul.f32 0.5, %v5731_v28 }
 0xbc4   : > { %v5744_v62 = vmul.f32 %v6882_v60, %v5739_v37 }
 0xbc5   : > { %v5733_v40 = vsub.f32 1.5, %v5732_v34 }
 0xbc6   : > { %v5749_v29 = vadd.f32 %v6883_v44, %v5744_v62 }
 0xbc7   : > { %v5734_v18 = vmul.f32 %v6924_v41, %v5733_v40  ;;  %v6885_v40 = vld [vmem:[%s12758_s18] ss:$0 sm:$0xff] }
 0xbc8   : > { %5805 = vmatmul.f32.vlgmr.msrb.gmra.mxu0 %v5749_v29  ;;  %5828 = vmatmul.f32.vlgmr.msrb.gmra.mxu1 %v5749_v29 }
 0xbc9   : > { %v5738_v56 = vsel %vm5737_vm9, %v6924_v41, %v5734_v18 }
 0xbca   : > { %v5740_v42 = vmul.f32 %v5738_v56, %v11216_v15  ;;  %v5783_v15 = vld [vmem:[%s12756_s29] sm:$0x3] }
 0xbcb   : > { %v5785_v46 = vperm.slane %v5783_v15, 0  ;;  %v5786_v49 = vperm.slane %v5783_v15, 1 }
 0xbcc   : > { %v5745_v63 = vmul.f32 %v6882_v60, %v5740_v42 }
 0xbce   : > { %v5750_v22 = vadd.f32 %v6883_v44, %v5745_v63 }
 0xbd0   : > { %5808 = vmatmul.f32.gmra.mxu0 %v5750_v22  ;;  %5831 = vmatmul.f32.gmra.mxu1 %v5750_v22 }
 0xc45   : > { %v5806_v8 = vpop.f32.mrf.mxu0  ;;  %v5829_v14 = vpop.f32.mrf.mxu1 }
 0xc46   : > { %v5807_v58 = vadd.f32 %v5806_v8, %v5785_v46  ;;  %v5830_v55 = vadd.f32 %v5829_v14, %v5786_v49 }
 0xc48   : > { %v5835_v24 = vmax.f32 %v5807_v58, 0.0  ;;  %v5836_v31 = vmax.f32 %v5830_v55, 0.0 }
 0xc4a   : > { %5891 = vmatmul.f32.vlgmr.msrb.gmra.mxu2 %v5835_v24  ;;  %5914 = vmatmul.f32.vlgmr.msrb.gmra.mxu3 %v5836_v31 }
 0xc4d   : > { %v5809_v16 = vpop.f32.mrf.mxu0  ;;  %v5832_v48 = vpop.f32.mrf.mxu1 }
 0xc4e   : > { %v5810_v13 = vadd.f32 %v5809_v16, %v5785_v46  ;;  %v5833_v27 = vadd.f32 %v5832_v48, %v5786_v49 }
 0xc50   : > { %v5837_v52 = vmax.f32 %v5810_v13, 0.0  ;;  %v5838_v11 = vmax.f32 %v5833_v27, 0.0 }
 0xc52   : > { %5894 = vmatmul.f32.gmra.mxu2 %v5837_v52  ;;  %5917 = vmatmul.f32.gmra.mxu3 %v5838_v11 }
 0xccd   : > { %v5892_v36 = vpop.f32.mrf.mxu2  ;;  %v5915_v3 = vpop.f32.mrf.mxu3 }
 0xcce   : > { %v5893_v0 = vadd.f32 %v6884_v6, %v5892_v36 }
 0xcd0   : > { %v5916_v33 = vadd.f32 %v5915_v3, %v5893_v0 }
 0xcd2   : > { %v5921_v32 = vadd.f32 %v5916_v33, %v5749_v29 }
 0xcd4   : > { %5925 = vadd.xlane.f32.xlu2 %v5921_v32 }
 0xcd5   : > { %v5895_v51 = vpop.f32.mrf.mxu2  ;;  %v5918_v53 = vpop.f32.mrf.mxu3 }
 0xcd6   : > { %v5896_v57 = vadd.f32 %v6884_v6, %v5895_v51 }
 0xcd8   : > { %v5919_v59 = vadd.f32 %v5918_v53, %v5896_v57 }
 0xcda   : > { %v5922_v12 = vadd.f32 %v5919_v59, %v5750_v22 }
 0xcdc   : > { %5927 = vadd.xlane.f32.xlu0 %v5922_v12 }
 0xd47   : > { %v5926_v50 = vpop.xlane.xlu2 %5925 }
 0xd48   : > { %v5929_v19 = vmul.f32 %v5926_v50, %v11208_v10 }
 0xd4a   : > { %v5931_v23 = vsub.f32 %v5921_v32, %v5929_v19 }
 0xd4c   : > { %v5933_v26 = vmul.f32 %v5931_v23, %v5931_v23 }
 0xd4e   : > { %5935 = vadd.xlane.f32.xlu1 %v5933_v26 }
 0xd4f   : > { %v5928_v41 = vpop.xlane.xlu0 %5927 }
 0xd50   : > { %v5930_v39 = vmul.f32 %v5928_v41, %v11208_v10 }
 0xd52   : > { %v5932_v54 = vsub.f32 %v5922_v12, %v5930_v39 }
 0xd54   : > { %v5934_v2 = vmul.f32 %v5932_v54, %v5932_v54 }
 0xd56   : > { %5937 = vadd.xlane.f32.xlu2 %v5934_v2 }
 0xdc1   : > { %v5936_v9 = vpop.xlane.xlu1 %5935 }
 0xdc2   : > { %v5939_v60 = vmul.f32 %v5936_v9, %v11208_v10 }
 0xdc4   : > { %v5941_v43 = vadd.f32 1e-05, %v5939_v60 }
 0xdc6   : > { %6925 = vrsqrt.f32 %v5941_v43  ;;  %vm5949_vm11 = vweird.f32 %v5941_v43 }
 0xdc9   : > { %v5938_v25 = vpop.xlane.xlu2 %5937 }
 0xdca   : > { %v5940_v20 = vmul.f32 %v5938_v25, %v11208_v10  ;;  %v6886_v10 = vld [vmem:[%s12759_s14] ss:$0 sm:$0xff] }
 0xdcc   : > { %v6926_v28 = vpop.eup %6925  ;;  %v5942_v37 = vadd.f32 1e-05, %v5940_v20 }
 0xdcd   : > { %v5944_v44 = vmul.f32 %v6926_v28, %v5941_v43  ;;  %vm5950_vm10 = vweird.f32 %v6926_v28 }
 0xdce   : > { %6927 = vrsqrt.f32 %v5942_v37  ;;  %vm5951_vm12 = vmor %vm5949_vm11, %vm5950_vm10  ;;  %vm5959_vm14 = vweird.f32 %v5942_v37 }
 0xdcf   : > { %v5945_v21 = vmul.f32 %v6926_v28, %v5944_v44 }
 0xdd1   : > { %v5946_v30 = vmul.f32 0.5, %v5945_v21 }
 0xdd3   : > { %v5947_v34 = vsub.f32 1.5, %v5946_v30 }
 0xdd4   : > { %v6928_v62 = vpop.eup %6927 }
 0xdd5   : > { %v5948_v7 = vmul.f32 %v6926_v28, %v5947_v34  ;;  %v5954_v4 = vmul.f32 %v6928_v62, %v5942_v37  ;;  %vm5960_vm13 = vweird.f32 %v6928_v62 }
 0xdd6   : > { %vm5961_vm15 = vmor %vm5959_vm14, %vm5960_vm13 }
 0xdd7   : > { %v5952_v29 = vsel %vm5951_vm12, %v6926_v28, %v5948_v7  ;;  %v5955_v47 = vmul.f32 %v6928_v62, %v5954_v4 }
 0xdd8   : > { %v5963_v5 = vmul.f32 %v5952_v29, %v5931_v23 }
 0xdd9   : > { %v5956_v18 = vmul.f32 0.5, %v5955_v47 }
 0xdda   : > { %v5968_v56 = vmul.f32 %v6885_v40, %v5963_v5 }
 0xddb   : > { %v5957_v42 = vsub.f32 1.5, %v5956_v18 }
 0xddc   : > { %v5973_v63 = vadd.f32 %v6886_v10, %v5968_v56 }
 0xddd   : > { %v5958_v22 = vmul.f32 %v6928_v62, %v5957_v42 }
 0xdde   : > { %5975 = vst [vmem:[#allocation18] sm:$0xff] %v5973_v63 }
 0xddf   : > { %v5962_v45 = vsel %vm5961_vm15, %v6928_v62, %v5958_v22 }
 0xde0   : > { %v5964_v1 = vmul.f32 %v5962_v45, %v5932_v54 }
 0xde2   : > { %v5969_v35 = vmul.f32 %v6885_v40, %v5964_v1 }
 0xde4   : > { %v5974_v17 = vadd.f32 %v6886_v10, %v5969_v35 }
 0xde6   : > { %5976 = vst [vmem:[#allocation18 + $0x8] sm:$0xff] %v5974_v17 }
 0xde7 PF: > { %p6801_p2 = scmp.eq.s32.totalorder %s7345_s1, 1  ;;  %s7223_s7 = smov [#allocation18]  }
 0xde8   : > { %s5982_s2 = sshll.u32 %s7223_s7, 4  ;;  %s12760_s25 = sld [smem:[#allocation186_spill]]  ;;  %s5983_s2 = int_to_ptr.vmem [resolvable:$true] %s5982_s2 }
 0xde9   : > { %s7224_s11 = smov 128   ;;  %s7225_s3 = smov 8  }
 0xdee   : > { %s5984_s9 = sshll.u32 %s12760_s25, 4  ;;  %s5985_s9 = int_to_ptr.hbm [resolvable:$true] %s5984_s9 }
 0xdef   : > { %6767 = dma.vmem_to_hbm [thread:$0]  (%p6801_p2), %s5983_s2, 256, %s5985_s9, [#allocation6], %s7224_s11, %s7224_s11, %s7225_s3  }
 0xdf0   : > { %7178 = dma.done.wait (%p6801_p2), [#allocation6], 256  }
 0xdf1   : > { %7180 = vsyncadd (%p6801_p2), [#allocation6], 4294967040 }
 0xdf2 PF: > { %s12761_s21 = sld [smem:[#allocation32_spill]]  ;;  %s12763_s0 = smov %s7187_s30 }
 0xdf3   : > { %s12762_s26 = sld [smem:[#allocation33_spill]]  ;;  %s12764_s30 = smov %s7191_s20 }
 0xdf8   : > { %p36_p3 = scmp.ge.s32.totalorder %s12761_s21, 4  }
 0xdf9   : > { %s12765_s20 = smov %s12762_s26 }
 0xdfa   :  { %38 = sbr.rel (!%p36_p3) target bundleno = 23 (0x17), region = 193 }
 0xdff   :  { %6001 = vsyncpa [#allocation5], 1 }
 0xe00   :  { %6003 = vsyncpa [#allocation5 + $0x1], 1 }
 0xe01   :  { %6004 = vsyncpa [#allocation8], 1 }
 0xe02   :  { %6006 = vsyncpa [#allocation8 + $0x1], 1 }
 0xe03   :  { %6007 = vsyncpa [#allocation11], 1 }
 0xe04   :  { %6008 = vsyncpa [#allocation14], 1 }
 0xe05   :  { %6009 = vsyncpa [#allocation17], 1 }
 0xe06   :  { %6010 = vsyncpa [#allocation6], 1 }
 0xe07   :  { %6012 = vsyncpa [#allocation6 + $0x1], 1 }

</bundles_post_ra>
